<compile_context>
chip_gen: v7x
topology: tpu7x:2x2x1
jax: 0.10.0
libtpu: 0.0.40
codegen_flags: <defaults>
</compile_context>

<pallas_src>
import functools
import math

import jax
import jax.numpy as jnp
import numpy as np
from jax.experimental import pallas as pl
from jax.experimental.pallas import tpu as pltpu

NEG_INF = -1e9


def _layernorm_fused(x, g, b, eps=1e-5):
    """LayerNorm with a single pair of independent reductions (E[x], E[x^2])."""
    mu = jnp.mean(x, axis=-1, keepdims=True)
    ms = jnp.mean(x * x, axis=-1, keepdims=True)
    var = ms - mu * mu
    return (x - mu) * jax.lax.rsqrt(var + eps) * g + b


def _layernorm_ref(x, g, b, eps=1e-5):
    mu = jnp.mean(x, axis=-1, keepdims=True)
    var = jnp.mean((x - mu) ** 2, axis=-1, keepdims=True)
    return (x - mu) * jax.lax.rsqrt(var + eps) * g + b


# ---------------------------------------------------------------------------
# Fused Pallas kernel: full encoder stack + final LayerNorm in one invocation
# ---------------------------------------------------------------------------

def fused_encoder_kernel(x_ref, posmod_ref, mask_ref,
                         ln1_g_ref, ln1_b_ref,
                         wq_ref, bq_ref, wk_ref, bk_ref, wv_ref, bv_ref,
                         wo_ref, bo_ref,
                         ln2_g_ref, ln2_b_ref, w1_ref, b1_ref, w2_ref, b2_ref,
                         fin_g_ref, fin_b_ref,
                         o_ref, *, nhead, num_layers, batch, seq, approx_softmax):
    B, Lp = batch, seq
    D = x_ref.shape[-1]
    dh = D // nhead
    cdt = wq_ref.dtype          # matmul operand dtype (bf16 default; acc stays f32)

    xf = x_ref[...].reshape(B * Lp, D)       # flatten batch into matmul M dimension
    # hoisted, batch-independent broadcasts (done once, reused every layer/head)
    pm_flat = jnp.broadcast_to(posmod_ref[...][None], (B, Lp, D)).reshape(B * Lp, D)
    mask_b = jnp.broadcast_to(mask_ref[...][None], (B, Lp, Lp))

    for l in range(num_layers):              # static, fully fused layer loop
        # ---- self-attention block (pre-norm) ----
        x2 = _layernorm_fused(xf, ln1_g_ref[l], ln1_b_ref[l])
        qkv_in = (x2 + pm_flat).astype(cdt)  # q = k = v (PyTorch in-place `+=`)

        attn_acc = None
        for h in range(nhead):               # static head loop; batch stays batched
            lh = l * nhead + h
            # per-head Q/K/V: lane-aligned (D, dh) weights, scale pre-folded into Q
            qh = (jnp.dot(qkv_in, wq_ref[lh], preferred_element_type=jnp.float32)
                  + bq_ref[lh]).reshape(B, Lp, dh)
            kh = (jnp.dot(qkv_in, wk_ref[lh], preferred_element_type=jnp.float32)
                  + bk_ref[lh]).reshape(B, Lp, dh)
            vh = (jnp.dot(qkv_in, wv_ref[lh], preferred_element_type=jnp.float32)
                  + bv_ref[lh]).reshape(B, Lp, dh)
            # batched (over B) attention scores and PV product, no transposes
            s = jnp.einsum('bld,bmd->blm', qh.astype(cdt), kh.astype(cdt),
                           preferred_element_type=jnp.float32)       # (B, Lp, Lp)
            s = s + mask_b
            s = s - jnp.max(s, axis=-1, keepdims=True)
            p = jnp.exp(s)
            den = jnp.sum(p, axis=-1, keepdims=True)
            if approx_softmax:
                p = p * pl.reciprocal(den, approx=True)              # EUP slot
            else:
                p = p / den
            oh = jnp.einsum('blm,bmd->bld', p.astype(cdt), vh.astype(cdt),
                            preferred_element_type=jnp.float32)      # (B, Lp, dh)
            # per-head slice of the output projection -> no concat over heads needed
            part = jnp.dot(oh.reshape(B * Lp, dh).astype(cdt), wo_ref[lh],
                           preferred_element_type=jnp.float32)       # (B*Lp, D)
            attn_acc = part if attn_acc is None else attn_acc + part
        xf = xf + attn_acc + bo_ref[l]       # residual (dropout1 = identity in eval)

        # ---- feed-forward block (pre-norm) ----
        x2 = _layernorm_fused(xf, ln2_g_ref[l], ln2_b_ref[l])
        h1 = jnp.maximum(jnp.dot(x2.astype(cdt), w1_ref[l],
                                 preferred_element_type=jnp.float32) + b1_ref[l], 0.0)
        ffn = jnp.dot(h1.astype(cdt), w2_ref[l],
                      preferred_element_type=jnp.float32) + b2_ref[l]
        xf = xf + ffn                        # residual (dropout2 = identity)

    # final encoder LayerNorm only on the 3 class-token rows the host consumes
    cls = xf.reshape(B, Lp, D)[:, 0:3, :]                 # (B, 3, D)
    o_ref[...] = _layernorm_fused(cls, fin_g_ref[...], fin_b_ref[...])


# ---------------------------------------------------------------------------
# Host-side glue
# ---------------------------------------------------------------------------

def _full_spec(shape):
    n = len(shape)
    return pl.BlockSpec(shape, lambda *_: (0,) * n)


def sinusoid_pe(T, D):
    position = np.arange(T, dtype=np.float32)[:, None]
    div = np.exp(np.arange(0, D, 2, dtype=np.float32) * -(math.log(10000.0) / D))
    pe = np.zeros((T, D), np.float32)
    pe[:, 0::2] = np.sin(position * div)
    pe[:, 1::2] = np.cos(position * div)
    return jnp.asarray(pe)


def build_inputs(x_in, params, T, D, pad_to=None):
    """Token assembly, positional/modality encodings and additive attention mask."""
    B = x_in.shape[0]
    L = 2 * T + 3
    Lp = L if pad_to is None else pad_to
    assert Lp >= L
    # (B, T, 2*D) -> (B, 2T, D): interleaved pose/video per micro-action
    seq = x_in.reshape(B, T, 2, D).reshape(B, 2 * T, D)
    verb = jnp.broadcast_to(params['verb_token'][None, None, :], (B, 1, D))
    noun = jnp.broadcast_to(params['noun_token'][None, None, :], (B, 1, D))
    action = jnp.broadcast_to(params['action_token'][None, None, :], (B, 1, D))
    tokens = jnp.concatenate([verb, noun, action, seq], axis=1)   # (B, L, D)
    if Lp > L:
        tokens = jnp.concatenate(
            [tokens, jnp.zeros((B, Lp - L, D), jnp.float32)], axis=1)

    pe = sinusoid_pe(T, D)                         # (T, D)
    pe_rep = jnp.repeat(pe, 2, axis=0)             # (2T, D)
    posmod = jnp.zeros((Lp, D), jnp.float32).at[3:L].set(pe_rep)
    mod = jnp.zeros((Lp, D), jnp.float32)
    mod = mod.at[3:L:2].set(params['pose_mod'])
    mod = mod.at[4:L:2].set(params['video_mod'])
    posmod = posmod + mod                          # pos + modality, batch-independent

    # attn_mask (bool True -> disallowed) as additive mask; pad keys fully masked
    m = np.zeros((Lp, Lp), np.float32)
    m[0, 4:L:2] = NEG_INF    # verb token cannot attend to video tokens
    m[1, 3:L:2] = NEG_INF    # noun token cannot attend to pose tokens
    if Lp > L:
        m[:, L:] = NEG_INF   # nothing attends to padding keys
    mask = jnp.asarray(m)
    # key_padding_mask: modality='both', rgb_frames_to_use=-1 -> all False (no-op)
    return tokens, posmod, mask


def stack_layer_params(params, nhead, cdt):
    """Stack per-layer weights, split Q/K/V/out-proj per head, pre-transpose to
    (in, out), fold the 1/sqrt(dh) scale into Q, and cast matmul operands to `cdt`."""
    Ls = params['layers']
    NL = len(Ls)
    D = Ls[0]['wo'].shape[0]
    dh = D // nhead
    scale = 1.0 / math.sqrt(dh)

    stk = lambda f: jnp.stack([f(lp) for lp in Ls])

    def qkv_heads(w, s=1.0):
        # (NL, D_out, D_in) rows = output features -> per-head (NL*H, D_in, dh)
        w = (w * s).reshape(NL, nhead, dh, D)
        w = jnp.transpose(w, (0, 1, 3, 2))
        return w.reshape(NL * nhead, D, dh).astype(cdt)

    def bias_heads(b, s=1.0):
        return (b * s).reshape(NL * nhead, 1, dh)

    wq = stk(lambda lp: lp['wqkv'][:D]);       bq = stk(lambda lp: lp['bqkv'][:D])
    wk = stk(lambda lp: lp['wqkv'][D:2 * D]);  bk = stk(lambda lp: lp['bqkv'][D:2 * D])
    wv = stk(lambda lp: lp['wqkv'][2 * D:]);   bv = stk(lambda lp: lp['bqkv'][2 * D:])
    wo = stk(lambda lp: lp['wo'])              # (NL, D_out, D_in)
    wo_heads = jnp.transpose(wo, (0, 2, 1)).reshape(NL, nhead, dh, D)
    wo_heads = wo_heads.reshape(NL * nhead, dh, D).astype(cdt)

    return dict(
        ln1_g=stk(lambda lp: lp['ln1_g'])[:, None, :],
        ln1_b=stk(lambda lp: lp['ln1_b'])[:, None, :],
        wq=qkv_heads(wq, scale), bq=bias_heads(bq, scale),   # scale folded into Q
        wk=qkv_heads(wk), bk=bias_heads(bk),
        wv=qkv_heads(wv), bv=bias_heads(bv),
        wo=wo_heads, bo=stk(lambda lp: lp['bo'])[:, None, :],
        ln2_g=stk(lambda lp: lp['ln2_g'])[:, None, :],
        ln2_b=stk(lambda lp: lp['ln2_b'])[:, None, :],
        w1=stk(lambda lp: lp['w1'].T).astype(cdt),
        b1=stk(lambda lp: lp['b1'])[:, None, :],
        w2=stk(lambda lp: lp['w2'].T).astype(cdt),
        b2=stk(lambda lp: lp['b2'])[:, None, :],
        final_g=params['final_g'][None, :], final_b=params['final_b'][None, :],
    )


def bimodal_tf_forward(x_in, params, T, D, nhead,
                       compute_dtype=jnp.bfloat16, approx_softmax=True):
    num_layers = len(params['layers'])
    B = x_in.shape[0]
    L = 2 * T + 3
    Lp = ((L + 7) // 8) * 8                  # pad seq length to 8-sublane boundary

    tokens, posmod, mask = build_inputs(x_in, params, T, D, pad_to=Lp)
    sp = stack_layer_params(params, nhead, compute_dtype)

    args = (tokens, posmod, mask,
            sp['ln1_g'], sp['ln1_b'],
            sp['wq'], sp['bq'], sp['wk'], sp['bk'], sp['wv'], sp['bv'],
            sp['wo'], sp['bo'],
            sp['ln2_g'], sp['ln2_b'], sp['w1'], sp['b1'], sp['w2'], sp['b2'],
            sp['final_g'], sp['final_b'])

    out = pl.pallas_call(
        functools.partial(fused_encoder_kernel, nhead=nhead, num_layers=num_layers,
                          batch=B, seq=Lp, approx_softmax=approx_softmax),
        grid=(1,),                            # single invocation: everything fits VMEM
        in_specs=[_full_spec(a.shape) for a in args],
        out_specs=_full_spec((B, 3, D)),
        out_shape=jax.ShapeDtypeStruct((B, 3, D), jnp.float32),
        compiler_params=pltpu.CompilerParams(dimension_semantics=("arbitrary",)),
    )(*args)

    verb_f = out[:, 0]
    noun_f = out[:, 1]
    action_f = out[:, 2]
    return action_f, verb_f, noun_f


# ---------------------------------------------------------------------------
# Pure-JAX f32 reference (unpadded, two-pass LayerNorm, exact softmax)
# ---------------------------------------------------------------------------

def bimodal_tf_reference(x_in, params, T, D, nhead):
    tokens, posmod, mask = build_inputs(x_in, params, T, D, pad_to=None)
    x = tokens
    dh = D // nhead
    for lp in params['layers']:
        x2 = _layernorm_ref(x, lp['ln1_g'], lp['ln1_b'])
        qkv_in = x2 + posmod[None]
        q = qkv_in @ lp['wqkv'][:D].T + lp['bqkv'][:D]
        k = qkv_in @ lp['wqkv'][D:2 * D].T + lp['bqkv'][D:2 * D]
        v = qkv_in @ lp['wqkv'][2 * D:].T + lp['bqkv'][2 * D:]
        B, L, _ = q.shape
        qh = q.reshape(B, L, nhead, dh).transpose(0, 2, 1, 3) / math.sqrt(dh)
        kh = k.reshape(B, L, nhead, dh).transpose(0, 2, 1, 3)
        vh = v.reshape(B, L, nhead, dh).transpose(0, 2, 1, 3)
        s = qh @ kh.transpose(0, 1, 3, 2) + mask[None, None]
        p = jax.nn.softmax(s, axis=-1)
        o = (p @ vh).transpose(0, 2, 1, 3).reshape(B, L, D)
        x = x + (o @ lp['wo'].T + lp['bo'])
        x2 = _layernorm_ref(x, lp['ln2_g'], lp['ln2_b'])
        h1 = jnp.maximum(x2 @ lp['w1'].T + lp['b1'], 0.0)
        x = x + (h1 @ lp['w2'].T + lp['b2'])
    x = _layernorm_ref(x, params['final_g'], params['final_b'])
    return x[:, 2], x[:, 0], x[:, 1]


# ---------------------------------------------------------------------------
# Deterministic parameter initialization (shapes from Bimodal_TF.__init__)
# ---------------------------------------------------------------------------

def init_params(key, D, num_layers):
    keys = iter(jax.random.split(key, 16 + 12 * num_layers))
    nrm = lambda shape, s=0.02: s * jax.random.normal(next(keys), shape, dtype=jnp.float32)
    F = 4 * D
    params = dict(
        verb_token=nrm((D,), 1.0),
        noun_token=nrm((D,), 1.0),
        action_token=nrm((D,), 1.0),
        pose_mod=nrm((D,), 1.0),
        video_mod=nrm((D,), 1.0),
        final_g=1.0 + nrm((D,), 0.1),
        final_b=nrm((D,), 0.02),
        layers=[],
    )
    for _ in range(num_layers):
        params['layers'].append(dict(
            ln1_g=1.0 + nrm((D,), 0.1), ln1_b=nrm((D,), 0.02),
            wqkv=nrm((3 * D, D)), bqkv=nrm((3 * D,)),
            wo=nrm((D, D)), bo=nrm((D,)),
            ln2_g=1.0 + nrm((D,), 0.1), ln2_b=nrm((D,), 0.02),
            w1=nrm((F, D)), b1=nrm((F,)),
            w2=nrm((D, F)), b2=nrm((D,)),
        ))
    return params


# ---------------------------------------------------------------------------
if __name__ == "__main__":
    B, T = 2, 8
    D = 64          # transformer_d_model
    nhead = 4
    num_layers = 2

    key = jax.random.PRNGKey(0)
    kp, kx = jax.random.split(key)
    params = init_params(kp, D, num_layers)
    # input: (B, T, 2*D) -- concatenated pose + video features per micro-action
    x_in = jax.random.normal(kx, (B, T, 2 * D), dtype=jnp.float32)

    fwd = jax.jit(functools.partial(bimodal_tf_forward, T=T, D=D, nhead=nhead))
    action_f, verb_f, noun_f = fwd(x_in, params)
    jax.block_until_ready((action_f, verb_f, noun_f))

    # sanity check against a pure-JAX f32 reference of the same math
    ra, rv, rn = bimodal_tf_reference(x_in, params, T, D, nhead)
    np.testing.assert_allclose(np.asarray(action_f), np.asarray(ra), rtol=5e-2, atol=5e-2)
    np.testing.assert_allclose(np.asarray(verb_f), np.asarray(rv), rtol=5e-2, atol=5e-2)
    np.testing.assert_allclose(np.asarray(noun_f), np.asarray(rn), rtol=5e-2, atol=5e-2)
    assert action_f.shape == (B, D) and verb_f.shape == (B, D) and noun_f.shape == (B, D)

    print("KERNEL_OK")
</pallas_src>

<mosaic_0001>
module attributes {stable_mosaic.version = 11 : i64} {
  func.func @fused_encoder_kernel(%arg0: i32, %arg1: memref<2x24x64xf32, #tpu.memory_space<vmem>>, %arg2: memref<24x64xf32, #tpu.memory_space<vmem>>, %arg3: memref<24x24xf32, #tpu.memory_space<vmem>>, %arg4: memref<2x1x64xf32, #tpu.memory_space<vmem>>, %arg5: memref<2x1x64xf32, #tpu.memory_space<vmem>>, %arg6: memref<8x64x16xbf16, #tpu.memory_space<vmem>>, %arg7: memref<8x1x16xf32, #tpu.memory_space<vmem>>, %arg8: memref<8x64x16xbf16, #tpu.memory_space<vmem>>, %arg9: memref<8x1x16xf32, #tpu.memory_space<vmem>>, %arg10: memref<8x64x16xbf16, #tpu.memory_space<vmem>>, %arg11: memref<8x1x16xf32, #tpu.memory_space<vmem>>, %arg12: memref<8x16x64xbf16, #tpu.memory_space<vmem>>, %arg13: memref<2x1x64xf32, #tpu.memory_space<vmem>>, %arg14: memref<2x1x64xf32, #tpu.memory_space<vmem>>, %arg15: memref<2x1x64xf32, #tpu.memory_space<vmem>>, %arg16: memref<2x64x256xbf16, #tpu.memory_space<vmem>>, %arg17: memref<2x1x256xf32, #tpu.memory_space<vmem>>, %arg18: memref<2x256x64xbf16, #tpu.memory_space<vmem>>, %arg19: memref<2x1x64xf32, #tpu.memory_space<vmem>>, %arg20: memref<1x64xf32, #tpu.memory_space<vmem>>, %arg21: memref<1x64xf32, #tpu.memory_space<vmem>>, %arg22: memref<2x3x64xf32, #tpu.memory_space<vmem>>) attributes {dimension_semantics = [#tpu.dimension_semantics<arbitrary>], iteration_bounds = array<i64: 1>, scalar_prefetch = 0 : i64, scratch_operands = 0 : i64, tpu.core_type = #tpu.core_type<tc>, window_params = [{pipeline_mode = #tpu.pipeline_mode<synchronous>, transform_indices = @transform_0, window_bounds = array<i64: 2, 24, 64>}, {pipeline_mode = #tpu.pipeline_mode<synchronous>, transform_indices = @transform_1, window_bounds = array<i64: 24, 64>}, {pipeline_mode = #tpu.pipeline_mode<synchronous>, transform_indices = @transform_2, window_bounds = array<i64: 24, 24>}, {pipeline_mode = #tpu.pipeline_mode<synchronous>, transform_indices = @transform_3, window_bounds = array<i64: 2, 1, 64>}, {pipeline_mode = #tpu.pipeline_mode<synchronous>, transform_indices = @transform_4, window_bounds = array<i64: 2, 1, 64>}, {pipeline_mode = #tpu.pipeline_mode<synchronous>, transform_indices = @transform_5, window_bounds = array<i64: 8, 64, 16>}, {pipeline_mode = #tpu.pipeline_mode<synchronous>, transform_indices = @transform_6, window_bounds = array<i64: 8, 1, 16>}, {pipeline_mode = #tpu.pipeline_mode<synchronous>, transform_indices = @transform_7, window_bounds = array<i64: 8, 64, 16>}, {pipeline_mode = #tpu.pipeline_mode<synchronous>, transform_indices = @transform_8, window_bounds = array<i64: 8, 1, 16>}, {pipeline_mode = #tpu.pipeline_mode<synchronous>, transform_indices = @transform_9, window_bounds = array<i64: 8, 64, 16>}, {pipeline_mode = #tpu.pipeline_mode<synchronous>, transform_indices = @transform_10, window_bounds = array<i64: 8, 1, 16>}, {pipeline_mode = #tpu.pipeline_mode<synchronous>, transform_indices = @transform_11, window_bounds = array<i64: 8, 16, 64>}, {pipeline_mode = #tpu.pipeline_mode<synchronous>, transform_indices = @transform_12, window_bounds = array<i64: 2, 1, 64>}, {pipeline_mode = #tpu.pipeline_mode<synchronous>, transform_indices = @transform_13, window_bounds = array<i64: 2, 1, 64>}, {pipeline_mode = #tpu.pipeline_mode<synchronous>, transform_indices = @transform_14, window_bounds = array<i64: 2, 1, 64>}, {pipeline_mode = #tpu.pipeline_mode<synchronous>, transform_indices = @transform_15, window_bounds = array<i64: 2, 64, 256>}, {pipeline_mode = #tpu.pipeline_mode<synchronous>, transform_indices = @transform_16, window_bounds = array<i64: 2, 1, 256>}, {pipeline_mode = #tpu.pipeline_mode<synchronous>, transform_indices = @transform_17, window_bounds = array<i64: 2, 256, 64>}, {pipeline_mode = #tpu.pipeline_mode<synchronous>, transform_indices = @transform_18, window_bounds = array<i64: 2, 1, 64>}, {pipeline_mode = #tpu.pipeline_mode<synchronous>, transform_indices = @transform_19, window_bounds = array<i64: 1, 64>}, {pipeline_mode = #tpu.pipeline_mode<synchronous>, transform_indices = @transform_20, window_bounds = array<i64: 1, 64>}, {pipeline_mode = #tpu.pipeline_mode<synchronous>, transform_indices = @transform_21, window_bounds = array<i64: 2, 3, 64>}]} {
    %c0 = arith.constant 0 : index
    %c0_0 = arith.constant 0 : index
    %c0_1 = arith.constant 0 : index
    %0 = vector.load %arg1[%c0, %c0_0, %c0_1] : memref<2x24x64xf32, #tpu.memory_space<vmem>>, vector<2x24x64xf32>
    %1 = vector.shape_cast %0 : vector<2x24x64xf32> to vector<48x64xf32>
    %c0_2 = arith.constant 0 : index
    %c0_3 = arith.constant 0 : index
    %2 = vector.load %arg2[%c0_2, %c0_3] : memref<24x64xf32, #tpu.memory_space<vmem>>, vector<24x64xf32>
    %3 = vector.shape_cast %2 : vector<24x64xf32> to vector<1x24x64xf32>
    %4 = vector.shape_cast %3 : vector<1x24x64xf32> to vector<1x24x64xf32>
    %5 = vector.broadcast %4 : vector<1x24x64xf32> to vector<2x24x64xf32>
    %6 = vector.shape_cast %5 : vector<2x24x64xf32> to vector<48x64xf32>
    %c0_4 = arith.constant 0 : index
    %c0_5 = arith.constant 0 : index
    %7 = vector.load %arg3[%c0_4, %c0_5] : memref<24x24xf32, #tpu.memory_space<vmem>>, vector<24x24xf32>
    %8 = vector.shape_cast %7 : vector<24x24xf32> to vector<1x24x24xf32>
    %9 = vector.shape_cast %8 : vector<1x24x24xf32> to vector<1x24x24xf32>
    %10 = vector.broadcast %9 : vector<1x24x24xf32> to vector<2x24x24xf32>
    %c0_6 = arith.constant 0 : index
    %c0_7 = arith.constant 0 : index
    %c0_8 = arith.constant 0 : index
    %11 = vector.load %arg4[%c0_6, %c0_7, %c0_8] : memref<2x1x64xf32, #tpu.memory_space<vmem>>, vector<1x1x64xf32>
    %12 = vector.shape_cast %11 : vector<1x1x64xf32> to vector<1x64xf32>
    %c0_9 = arith.constant 0 : index
    %c0_10 = arith.constant 0 : index
    %c0_11 = arith.constant 0 : index
    %13 = vector.load %arg5[%c0_9, %c0_10, %c0_11] : memref<2x1x64xf32, #tpu.memory_space<vmem>>, vector<1x1x64xf32>
    %14 = vector.shape_cast %13 : vector<1x1x64xf32> to vector<1x64xf32>
    %cst = arith.constant dense<0.000000e+00> : vector<48xf32>
    %15 = vector.multi_reduction <add>, %1, %cst [1] : vector<48x64xf32> to vector<48xf32>
    %16 = vector.shape_cast %15 : vector<48xf32> to vector<48x1xf32>
    %cst_12 = arith.constant 6.400000e+01 : f32
    %17 = vector.broadcast %cst_12 : f32 to vector<48x1xf32>
    %18 = arith.divf %16, %17 : vector<48x1xf32>
    %19 = arith.mulf %1, %1 : vector<48x64xf32>
    %cst_13 = arith.constant dense<0.000000e+00> : vector<48xf32>
    %20 = vector.multi_reduction <add>, %19, %cst_13 [1] : vector<48x64xf32> to vector<48xf32>
    %21 = vector.shape_cast %20 : vector<48xf32> to vector<48x1xf32>
    %cst_14 = arith.constant 6.400000e+01 : f32
    %22 = vector.broadcast %cst_14 : f32 to vector<48x1xf32>
    %23 = arith.divf %21, %22 : vector<48x1xf32>
    %24 = arith.mulf %18, %18 : vector<48x1xf32>
    %25 = arith.subf %23, %24 : vector<48x1xf32>
    %26 = vector.broadcast %18 : vector<48x1xf32> to vector<48x64xf32>
    %27 = arith.subf %1, %26 : vector<48x64xf32>
    %cst_15 = arith.constant 9.99999974E-6 : f32
    %28 = vector.broadcast %cst_15 : f32 to vector<48x1xf32>
    %29 = arith.addf %25, %28 : vector<48x1xf32>
    %30 = math.rsqrt %29 : vector<48x1xf32>
    %31 = vector.broadcast %30 : vector<48x1xf32> to vector<48x64xf32>
    %32 = arith.mulf %27, %31 : vector<48x64xf32>
    %33 = vector.broadcast %12 : vector<1x64xf32> to vector<48x64xf32>
    %34 = arith.mulf %32, %33 : vector<48x64xf32>
    %35 = vector.broadcast %14 : vector<1x64xf32> to vector<48x64xf32>
    %36 = arith.addf %34, %35 : vector<48x64xf32>
    %37 = arith.addf %36, %6 : vector<48x64xf32>
    %38 = arith.truncf %37 : vector<48x64xf32> to vector<48x64xbf16>
    %c0_16 = arith.constant 0 : index
    %c0_17 = arith.constant 0 : index
    %c0_18 = arith.constant 0 : index
    %39 = vector.load %arg6[%c0_16, %c0_17, %c0_18] : memref<8x64x16xbf16, #tpu.memory_space<vmem>>, vector<1x64x16xbf16>
    %40 = vector.shape_cast %39 : vector<1x64x16xbf16> to vector<64x16xbf16>
    %cst_19 = arith.constant dense<0.000000e+00> : vector<48x16xf32>
    %41 = tpu.matmul %38, %40, %cst_19 {dimension_numbers = #tpu.dot_dimension_numbers<[1], [0], [0], [1], [0, 0, 1, 1], [], []>} : vector<48x64xbf16>, vector<64x16xbf16>, vector<48x16xf32> -> vector<48x16xf32>
    %c0_20 = arith.constant 0 : index
    %c0_21 = arith.constant 0 : index
    %c0_22 = arith.constant 0 : index
    %42 = vector.load %arg7[%c0_20, %c0_21, %c0_22] : memref<8x1x16xf32, #tpu.memory_space<vmem>>, vector<1x1x16xf32>
    %43 = vector.shape_cast %42 : vector<1x1x16xf32> to vector<1x16xf32>
    %44 = vector.broadcast %43 : vector<1x16xf32> to vector<48x16xf32>
    %45 = arith.addf %41, %44 : vector<48x16xf32>
    %46 = vector.shape_cast %45 : vector<48x16xf32> to vector<2x24x16xf32>
    %c0_23 = arith.constant 0 : index
    %c0_24 = arith.constant 0 : index
    %c0_25 = arith.constant 0 : index
    %47 = vector.load %arg8[%c0_23, %c0_24, %c0_25] : memref<8x64x16xbf16, #tpu.memory_space<vmem>>, vector<1x64x16xbf16>
    %48 = vector.shape_cast %47 : vector<1x64x16xbf16> to vector<64x16xbf16>
    %cst_26 = arith.constant dense<0.000000e+00> : vector<48x16xf32>
    %49 = tpu.matmul %38, %48, %cst_26 {dimension_numbers = #tpu.dot_dimension_numbers<[1], [0], [0], [1], [0, 0, 1, 1], [], []>} : vector<48x64xbf16>, vector<64x16xbf16>, vector<48x16xf32> -> vector<48x16xf32>
    %c0_27 = arith.constant 0 : index
    %c0_28 = arith.constant 0 : index
    %c0_29 = arith.constant 0 : index
    %50 = vector.load %arg9[%c0_27, %c0_28, %c0_29] : memref<8x1x16xf32, #tpu.memory_space<vmem>>, vector<1x1x16xf32>
    %51 = vector.shape_cast %50 : vector<1x1x16xf32> to vector<1x16xf32>
    %52 = vector.broadcast %51 : vector<1x16xf32> to vector<48x16xf32>
    %53 = arith.addf %49, %52 : vector<48x16xf32>
    %54 = vector.shape_cast %53 : vector<48x16xf32> to vector<2x24x16xf32>
    %c0_30 = arith.constant 0 : index
    %c0_31 = arith.constant 0 : index
    %c0_32 = arith.constant 0 : index
    %55 = vector.load %arg10[%c0_30, %c0_31, %c0_32] : memref<8x64x16xbf16, #tpu.memory_space<vmem>>, vector<1x64x16xbf16>
    %56 = vector.shape_cast %55 : vector<1x64x16xbf16> to vector<64x16xbf16>
    %cst_33 = arith.constant dense<0.000000e+00> : vector<48x16xf32>
    %57 = tpu.matmul %38, %56, %cst_33 {dimension_numbers = #tpu.dot_dimension_numbers<[1], [0], [0], [1], [0, 0, 1, 1], [], []>} : vector<48x64xbf16>, vector<64x16xbf16>, vector<48x16xf32> -> vector<48x16xf32>
    %c0_34 = arith.constant 0 : index
    %c0_35 = arith.constant 0 : index
    %c0_36 = arith.constant 0 : index
    %58 = vector.load %arg11[%c0_34, %c0_35, %c0_36] : memref<8x1x16xf32, #tpu.memory_space<vmem>>, vector<1x1x16xf32>
    %59 = vector.shape_cast %58 : vector<1x1x16xf32> to vector<1x16xf32>
    %60 = vector.broadcast %59 : vector<1x16xf32> to vector<48x16xf32>
    %61 = arith.addf %57, %60 : vector<48x16xf32>
    %62 = vector.shape_cast %61 : vector<48x16xf32> to vector<2x24x16xf32>
    %63 = arith.truncf %46 : vector<2x24x16xf32> to vector<2x24x16xbf16>
    %64 = arith.truncf %54 : vector<2x24x16xf32> to vector<2x24x16xbf16>
    "tpu.trace_start"() <{level = 10 : i32, message = "bld,bmd->blm"}> : () -> ()
    %cst_37 = arith.constant dense<0.000000e+00> : vector<2x24x24xf32>
    %65 = tpu.matmul %63, %64, %cst_37 {dimension_numbers = #tpu.dot_dimension_numbers<[2], [2], [1], [1], [0, 0, 0, 1, 1, 1], [0], [0]>} : vector<2x24x16xbf16>, vector<2x24x16xbf16>, vector<2x24x24xf32> -> vector<2x24x24xf32>
    "tpu.trace_stop"() : () -> ()
    %66 = arith.addf %65, %10 : vector<2x24x24xf32>
    %cst_38 = arith.constant dense<0xFF800000> : vector<2x24xf32>
    %67 = vector.multi_reduction <maximumf>, %66, %cst_38 [2] : vector<2x24x24xf32> to vector<2x24xf32>
    %68 = vector.shape_cast %67 : vector<2x24xf32> to vector<2x24x1xf32>
    %69 = vector.broadcast %68 : vector<2x24x1xf32> to vector<2x24x24xf32>
    %70 = arith.subf %66, %69 : vector<2x24x24xf32>
    %71 = math.exp %70 : vector<2x24x24xf32>
    %cst_39 = arith.constant dense<0.000000e+00> : vector<2x24xf32>
    %72 = vector.multi_reduction <add>, %71, %cst_39 [2] : vector<2x24x24xf32> to vector<2x24xf32>
    %73 = vector.shape_cast %72 : vector<2x24xf32> to vector<2x24x1xf32>
    %74 = tpu.reciprocal %73 {approx = true} : vector<2x24x1xf32> -> vector<2x24x1xf32>
    %75 = vector.broadcast %74 : vector<2x24x1xf32> to vector<2x24x24xf32>
    %76 = arith.mulf %71, %75 : vector<2x24x24xf32>
    %77 = arith.truncf %76 : vector<2x24x24xf32> to vector<2x24x24xbf16>
    %78 = arith.truncf %62 : vector<2x24x16xf32> to vector<2x24x16xbf16>
    "tpu.trace_start"() <{level = 10 : i32, message = "blm,bmd->bld"}> : () -> ()
    %cst_40 = arith.constant dense<0.000000e+00> : vector<2x24x16xf32>
    %79 = tpu.matmul %77, %78, %cst_40 {dimension_numbers = #tpu.dot_dimension_numbers<[2], [1], [1], [2], [0, 0, 0, 1, 1, 2], [0], [0]>} : vector<2x24x24xbf16>, vector<2x24x16xbf16>, vector<2x24x16xf32> -> vector<2x24x16xf32>
    "tpu.trace_stop"() : () -> ()
    %80 = vector.shape_cast %79 : vector<2x24x16xf32> to vector<48x16xf32>
    %81 = arith.truncf %80 : vector<48x16xf32> to vector<48x16xbf16>
    %c0_41 = arith.constant 0 : index
    %c0_42 = arith.constant 0 : index
    %c0_43 = arith.constant 0 : index
    %82 = vector.load %arg12[%c0_41, %c0_42, %c0_43] : memref<8x16x64xbf16, #tpu.memory_space<vmem>>, vector<1x16x64xbf16>
    %83 = vector.shape_cast %82 : vector<1x16x64xbf16> to vector<16x64xbf16>
    %cst_44 = arith.constant dense<0.000000e+00> : vector<48x64xf32>
    %84 = tpu.matmul %81, %83, %cst_44 {dimension_numbers = #tpu.dot_dimension_numbers<[1], [0], [0], [1], [0, 0, 1, 1], [], []>} : vector<48x16xbf16>, vector<16x64xbf16>, vector<48x64xf32> -> vector<48x64xf32>
    %c1 = arith.constant 1 : index
    %c0_45 = arith.constant 0 : index
    %c0_46 = arith.constant 0 : index
    %85 = vector.load %arg6[%c1, %c0_45, %c0_46] : memref<8x64x16xbf16, #tpu.memory_space<vmem>>, vector<1x64x16xbf16>
    %86 = vector.shape_cast %85 : vector<1x64x16xbf16> to vector<64x16xbf16>
    %cst_47 = arith.constant dense<0.000000e+00> : vector<48x16xf32>
    %87 = tpu.matmul %38, %86, %cst_47 {dimension_numbers = #tpu.dot_dimension_numbers<[1], [0], [0], [1], [0, 0, 1, 1], [], []>} : vector<48x64xbf16>, vector<64x16xbf16>, vector<48x16xf32> -> vector<48x16xf32>
    %c1_48 = arith.constant 1 : index
    %c0_49 = arith.constant 0 : index
    %c0_50 = arith.constant 0 : index
    %88 = vector.load %arg7[%c1_48, %c0_49, %c0_50] : memref<8x1x16xf32, #tpu.memory_space<vmem>>, vector<1x1x16xf32>
    %89 = vector.shape_cast %88 : vector<1x1x16xf32> to vector<1x16xf32>
    %90 = vector.broadcast %89 : vector<1x16xf32> to vector<48x16xf32>
    %91 = arith.addf %87, %90 : vector<48x16xf32>
    %92 = vector.shape_cast %91 : vector<48x16xf32> to vector<2x24x16xf32>
    %c1_51 = arith.constant 1 : index
    %c0_52 = arith.constant 0 : index
    %c0_53 = arith.constant 0 : index
    %93 = vector.load %arg8[%c1_51, %c0_52, %c0_53] : memref<8x64x16xbf16, #tpu.memory_space<vmem>>, vector<1x64x16xbf16>
    %94 = vector.shape_cast %93 : vector<1x64x16xbf16> to vector<64x16xbf16>
    %cst_54 = arith.constant dense<0.000000e+00> : vector<48x16xf32>
    %95 = tpu.matmul %38, %94, %cst_54 {dimension_numbers = #tpu.dot_dimension_numbers<[1], [0], [0], [1], [0, 0, 1, 1], [], []>} : vector<48x64xbf16>, vector<64x16xbf16>, vector<48x16xf32> -> vector<48x16xf32>
    %c1_55 = arith.constant 1 : index
    %c0_56 = arith.constant 0 : index
    %c0_57 = arith.constant 0 : index
    %96 = vector.load %arg9[%c1_55, %c0_56, %c0_57] : memref<8x1x16xf32, #tpu.memory_space<vmem>>, vector<1x1x16xf32>
    %97 = vector.shape_cast %96 : vector<1x1x16xf32> to vector<1x16xf32>
    %98 = vector.broadcast %97 : vector<1x16xf32> to vector<48x16xf32>
    %99 = arith.addf %95, %98 : vector<48x16xf32>
    %100 = vector.shape_cast %99 : vector<48x16xf32> to vector<2x24x16xf32>
    %c1_58 = arith.constant 1 : index
    %c0_59 = arith.constant 0 : index
    %c0_60 = arith.constant 0 : index
    %101 = vector.load %arg10[%c1_58, %c0_59, %c0_60] : memref<8x64x16xbf16, #tpu.memory_space<vmem>>, vector<1x64x16xbf16>
    %102 = vector.shape_cast %101 : vector<1x64x16xbf16> to vector<64x16xbf16>
    %cst_61 = arith.constant dense<0.000000e+00> : vector<48x16xf32>
    %103 = tpu.matmul %38, %102, %cst_61 {dimension_numbers = #tpu.dot_dimension_numbers<[1], [0], [0], [1], [0, 0, 1, 1], [], []>} : vector<48x64xbf16>, vector<64x16xbf16>, vector<48x16xf32> -> vector<48x16xf32>
    %c1_62 = arith.constant 1 : index
    %c0_63 = arith.constant 0 : index
    %c0_64 = arith.constant 0 : index
    %104 = vector.load %arg11[%c1_62, %c0_63, %c0_64] : memref<8x1x16xf32, #tpu.memory_space<vmem>>, vector<1x1x16xf32>
    %105 = vector.shape_cast %104 : vector<1x1x16xf32> to vector<1x16xf32>
    %106 = vector.broadcast %105 : vector<1x16xf32> to vector<48x16xf32>
    %107 = arith.addf %103, %106 : vector<48x16xf32>
    %108 = vector.shape_cast %107 : vector<48x16xf32> to vector<2x24x16xf32>
    %109 = arith.truncf %92 : vector<2x24x16xf32> to vector<2x24x16xbf16>
    %110 = arith.truncf %100 : vector<2x24x16xf32> to vector<2x24x16xbf16>
    "tpu.trace_start"() <{level = 10 : i32, message = "bld,bmd->blm"}> : () -> ()
    %cst_65 = arith.constant dense<0.000000e+00> : vector<2x24x24xf32>
    %111 = tpu.matmul %109, %110, %cst_65 {dimension_numbers = #tpu.dot_dimension_numbers<[2], [2], [1], [1], [0, 0, 0, 1, 1, 1], [0], [0]>} : vector<2x24x16xbf16>, vector<2x24x16xbf16>, vector<2x24x24xf32> -> vector<2x24x24xf32>
    "tpu.trace_stop"() : () -> ()
    %112 = arith.addf %111, %10 : vector<2x24x24xf32>
    %cst_66 = arith.constant dense<0xFF800000> : vector<2x24xf32>
    %113 = vector.multi_reduction <maximumf>, %112, %cst_66 [2] : vector<2x24x24xf32> to vector<2x24xf32>
    %114 = vector.shape_cast %113 : vector<2x24xf32> to vector<2x24x1xf32>
    %115 = vector.broadcast %114 : vector<2x24x1xf32> to vector<2x24x24xf32>
    %116 = arith.subf %112, %115 : vector<2x24x24xf32>
    %117 = math.exp %116 : vector<2x24x24xf32>
    %cst_67 = arith.constant dense<0.000000e+00> : vector<2x24xf32>
    %118 = vector.multi_reduction <add>, %117, %cst_67 [2] : vector<2x24x24xf32> to vector<2x24xf32>
    %119 = vector.shape_cast %118 : vector<2x24xf32> to vector<2x24x1xf32>
    %120 = tpu.reciprocal %119 {approx = true} : vector<2x24x1xf32> -> vector<2x24x1xf32>
    %121 = vector.broadcast %120 : vector<2x24x1xf32> to vector<2x24x24xf32>
    %122 = arith.mulf %117, %121 : vector<2x24x24xf32>
    %123 = arith.truncf %122 : vector<2x24x24xf32> to vector<2x24x24xbf16>
    %124 = arith.truncf %108 : vector<2x24x16xf32> to vector<2x24x16xbf16>
    "tpu.trace_start"() <{level = 10 : i32, message = "blm,bmd->bld"}> : () -> ()
    %cst_68 = arith.constant dense<0.000000e+00> : vector<2x24x16xf32>
    %125 = tpu.matmul %123, %124, %cst_68 {dimension_numbers = #tpu.dot_dimension_numbers<[2], [1], [1], [2], [0, 0, 0, 1, 1, 2], [0], [0]>} : vector<2x24x24xbf16>, vector<2x24x16xbf16>, vector<2x24x16xf32> -> vector<2x24x16xf32>
    "tpu.trace_stop"() : () -> ()
    %126 = vector.shape_cast %125 : vector<2x24x16xf32> to vector<48x16xf32>
    %127 = arith.truncf %126 : vector<48x16xf32> to vector<48x16xbf16>
    %c1_69 = arith.constant 1 : index
    %c0_70 = arith.constant 0 : index
    %c0_71 = arith.constant 0 : index
    %128 = vector.load %arg12[%c1_69, %c0_70, %c0_71] : memref<8x16x64xbf16, #tpu.memory_space<vmem>>, vector<1x16x64xbf16>
    %129 = vector.shape_cast %128 : vector<1x16x64xbf16> to vector<16x64xbf16>
    %cst_72 = arith.constant dense<0.000000e+00> : vector<48x64xf32>
    %130 = tpu.matmul %127, %129, %cst_72 {dimension_numbers = #tpu.dot_dimension_numbers<[1], [0], [0], [1], [0, 0, 1, 1], [], []>} : vector<48x16xbf16>, vector<16x64xbf16>, vector<48x64xf32> -> vector<48x64xf32>
    %131 = arith.addf %84, %130 : vector<48x64xf32>
    %c2 = arith.constant 2 : index
    %c0_73 = arith.constant 0 : index
    %c0_74 = arith.constant 0 : index
    %132 = vector.load %arg6[%c2, %c0_73, %c0_74] : memref<8x64x16xbf16, #tpu.memory_space<vmem>>, vector<1x64x16xbf16>
    %133 = vector.shape_cast %132 : vector<1x64x16xbf16> to vector<64x16xbf16>
    %cst_75 = arith.constant dense<0.000000e+00> : vector<48x16xf32>
    %134 = tpu.matmul %38, %133, %cst_75 {dimension_numbers = #tpu.dot_dimension_numbers<[1], [0], [0], [1], [0, 0, 1, 1], [], []>} : vector<48x64xbf16>, vector<64x16xbf16>, vector<48x16xf32> -> vector<48x16xf32>
    %c2_76 = arith.constant 2 : index
    %c0_77 = arith.constant 0 : index
    %c0_78 = arith.constant 0 : index
    %135 = vector.load %arg7[%c2_76, %c0_77, %c0_78] : memref<8x1x16xf32, #tpu.memory_space<vmem>>, vector<1x1x16xf32>
    %136 = vector.shape_cast %135 : vector<1x1x16xf32> to vector<1x16xf32>
    %137 = vector.broadcast %136 : vector<1x16xf32> to vector<48x16xf32>
    %138 = arith.addf %134, %137 : vector<48x16xf32>
    %139 = vector.shape_cast %138 : vector<48x16xf32> to vector<2x24x16xf32>
    %c2_79 = arith.constant 2 : index
    %c0_80 = arith.constant 0 : index
    %c0_81 = arith.constant 0 : index
    %140 = vector.load %arg8[%c2_79, %c0_80, %c0_81] : memref<8x64x16xbf16, #tpu.memory_space<vmem>>, vector<1x64x16xbf16>
    %141 = vector.shape_cast %140 : vector<1x64x16xbf16> to vector<64x16xbf16>
    %cst_82 = arith.constant dense<0.000000e+00> : vector<48x16xf32>
    %142 = tpu.matmul %38, %141, %cst_82 {dimension_numbers = #tpu.dot_dimension_numbers<[1], [0], [0], [1], [0, 0, 1, 1], [], []>} : vector<48x64xbf16>, vector<64x16xbf16>, vector<48x16xf32> -> vector<48x16xf32>
    %c2_83 = arith.constant 2 : index
    %c0_84 = arith.constant 0 : index
    %c0_85 = arith.constant 0 : index
    %143 = vector.load %arg9[%c2_83, %c0_84, %c0_85] : memref<8x1x16xf32, #tpu.memory_space<vmem>>, vector<1x1x16xf32>
    %144 = vector.shape_cast %143 : vector<1x1x16xf32> to vector<1x16xf32>
    %145 = vector.broadcast %144 : vector<1x16xf32> to vector<48x16xf32>
    %146 = arith.addf %142, %145 : vector<48x16xf32>
    %147 = vector.shape_cast %146 : vector<48x16xf32> to vector<2x24x16xf32>
    %c2_86 = arith.constant 2 : index
    %c0_87 = arith.constant 0 : index
    %c0_88 = arith.constant 0 : index
    %148 = vector.load %arg10[%c2_86, %c0_87, %c0_88] : memref<8x64x16xbf16, #tpu.memory_space<vmem>>, vector<1x64x16xbf16>
    %149 = vector.shape_cast %148 : vector<1x64x16xbf16> to vector<64x16xbf16>
    %cst_89 = arith.constant dense<0.000000e+00> : vector<48x16xf32>
    %150 = tpu.matmul %38, %149, %cst_89 {dimension_numbers = #tpu.dot_dimension_numbers<[1], [0], [0], [1], [0, 0, 1, 1], [], []>} : vector<48x64xbf16>, vector<64x16xbf16>, vector<48x16xf32> -> vector<48x16xf32>
    %c2_90 = arith.constant 2 : index
    %c0_91 = arith.constant 0 : index
    %c0_92 = arith.constant 0 : index
    %151 = vector.load %arg11[%c2_90, %c0_91, %c0_92] : memref<8x1x16xf32, #tpu.memory_space<vmem>>, vector<1x1x16xf32>
    %152 = vector.shape_cast %151 : vector<1x1x16xf32> to vector<1x16xf32>
    %153 = vector.broadcast %152 : vector<1x16xf32> to vector<48x16xf32>
    %154 = arith.addf %150, %153 : vector<48x16xf32>
    %155 = vector.shape_cast %154 : vector<48x16xf32> to vector<2x24x16xf32>
    %156 = arith.truncf %139 : vector<2x24x16xf32> to vector<2x24x16xbf16>
    %157 = arith.truncf %147 : vector<2x24x16xf32> to vector<2x24x16xbf16>
    "tpu.trace_start"() <{level = 10 : i32, message = "bld,bmd->blm"}> : () -> ()
    %cst_93 = arith.constant dense<0.000000e+00> : vector<2x24x24xf32>
    %158 = tpu.matmul %156, %157, %cst_93 {dimension_numbers = #tpu.dot_dimension_numbers<[2], [2], [1], [1], [0, 0, 0, 1, 1, 1], [0], [0]>} : vector<2x24x16xbf16>, vector<2x24x16xbf16>, vector<2x24x24xf32> -> vector<2x24x24xf32>
    "tpu.trace_stop"() : () -> ()
    %159 = arith.addf %158, %10 : vector<2x24x24xf32>
    %cst_94 = arith.constant dense<0xFF800000> : vector<2x24xf32>
    %160 = vector.multi_reduction <maximumf>, %159, %cst_94 [2] : vector<2x24x24xf32> to vector<2x24xf32>
    %161 = vector.shape_cast %160 : vector<2x24xf32> to vector<2x24x1xf32>
    %162 = vector.broadcast %161 : vector<2x24x1xf32> to vector<2x24x24xf32>
    %163 = arith.subf %159, %162 : vector<2x24x24xf32>
    %164 = math.exp %163 : vector<2x24x24xf32>
    %cst_95 = arith.constant dense<0.000000e+00> : vector<2x24xf32>
    %165 = vector.multi_reduction <add>, %164, %cst_95 [2] : vector<2x24x24xf32> to vector<2x24xf32>
    %166 = vector.shape_cast %165 : vector<2x24xf32> to vector<2x24x1xf32>
    %167 = tpu.reciprocal %166 {approx = true} : vector<2x24x1xf32> -> vector<2x24x1xf32>
    %168 = vector.broadcast %167 : vector<2x24x1xf32> to vector<2x24x24xf32>
    %169 = arith.mulf %164, %168 : vector<2x24x24xf32>
    %170 = arith.truncf %169 : vector<2x24x24xf32> to vector<2x24x24xbf16>
    %171 = arith.truncf %155 : vector<2x24x16xf32> to vector<2x24x16xbf16>
    "tpu.trace_start"() <{level = 10 : i32, message = "blm,bmd->bld"}> : () -> ()
    %cst_96 = arith.constant dense<0.000000e+00> : vector<2x24x16xf32>
    %172 = tpu.matmul %170, %171, %cst_96 {dimension_numbers = #tpu.dot_dimension_numbers<[2], [1], [1], [2], [0, 0, 0, 1, 1, 2], [0], [0]>} : vector<2x24x24xbf16>, vector<2x24x16xbf16>, vector<2x24x16xf32> -> vector<2x24x16xf32>
    "tpu.trace_stop"() : () -> ()
    %173 = vector.shape_cast %172 : vector<2x24x16xf32> to vector<48x16xf32>
    %174 = arith.truncf %173 : vector<48x16xf32> to vector<48x16xbf16>
    %c2_97 = arith.constant 2 : index
    %c0_98 = arith.constant 0 : index
    %c0_99 = arith.constant 0 : index
    %175 = vector.load %arg12[%c2_97, %c0_98, %c0_99] : memref<8x16x64xbf16, #tpu.memory_space<vmem>>, vector<1x16x64xbf16>
    %176 = vector.shape_cast %175 : vector<1x16x64xbf16> to vector<16x64xbf16>
    %cst_100 = arith.constant dense<0.000000e+00> : vector<48x64xf32>
    %177 = tpu.matmul %174, %176, %cst_100 {dimension_numbers = #tpu.dot_dimension_numbers<[1], [0], [0], [1], [0, 0, 1, 1], [], []>} : vector<48x16xbf16>, vector<16x64xbf16>, vector<48x64xf32> -> vector<48x64xf32>
    %178 = arith.addf %131, %177 : vector<48x64xf32>
    %c3 = arith.constant 3 : index
    %c0_101 = arith.constant 0 : index
    %c0_102 = arith.constant 0 : index
    %179 = vector.load %arg6[%c3, %c0_101, %c0_102] : memref<8x64x16xbf16, #tpu.memory_space<vmem>>, vector<1x64x16xbf16>
    %180 = vector.shape_cast %179 : vector<1x64x16xbf16> to vector<64x16xbf16>
    %cst_103 = arith.constant dense<0.000000e+00> : vector<48x16xf32>
    %181 = tpu.matmul %38, %180, %cst_103 {dimension_numbers = #tpu.dot_dimension_numbers<[1], [0], [0], [1], [0, 0, 1, 1], [], []>} : vector<48x64xbf16>, vector<64x16xbf16>, vector<48x16xf32> -> vector<48x16xf32>
    %c3_104 = arith.constant 3 : index
    %c0_105 = arith.constant 0 : index
    %c0_106 = arith.constant 0 : index
    %182 = vector.load %arg7[%c3_104, %c0_105, %c0_106] : memref<8x1x16xf32, #tpu.memory_space<vmem>>, vector<1x1x16xf32>
    %183 = vector.shape_cast %182 : vector<1x1x16xf32> to vector<1x16xf32>
    %184 = vector.broadcast %183 : vector<1x16xf32> to vector<48x16xf32>
    %185 = arith.addf %181, %184 : vector<48x16xf32>
    %186 = vector.shape_cast %185 : vector<48x16xf32> to vector<2x24x16xf32>
    %c3_107 = arith.constant 3 : index
    %c0_108 = arith.constant 0 : index
    %c0_109 = arith.constant 0 : index
    %187 = vector.load %arg8[%c3_107, %c0_108, %c0_109] : memref<8x64x16xbf16, #tpu.memory_space<vmem>>, vector<1x64x16xbf16>
    %188 = vector.shape_cast %187 : vector<1x64x16xbf16> to vector<64x16xbf16>
    %cst_110 = arith.constant dense<0.000000e+00> : vector<48x16xf32>
    %189 = tpu.matmul %38, %188, %cst_110 {dimension_numbers = #tpu.dot_dimension_numbers<[1], [0], [0], [1], [0, 0, 1, 1], [], []>} : vector<48x64xbf16>, vector<64x16xbf16>, vector<48x16xf32> -> vector<48x16xf32>
    %c3_111 = arith.constant 3 : index
    %c0_112 = arith.constant 0 : index
    %c0_113 = arith.constant 0 : index
    %190 = vector.load %arg9[%c3_111, %c0_112, %c0_113] : memref<8x1x16xf32, #tpu.memory_space<vmem>>, vector<1x1x16xf32>
    %191 = vector.shape_cast %190 : vector<1x1x16xf32> to vector<1x16xf32>
    %192 = vector.broadcast %191 : vector<1x16xf32> to vector<48x16xf32>
    %193 = arith.addf %189, %192 : vector<48x16xf32>
    %194 = vector.shape_cast %193 : vector<48x16xf32> to vector<2x24x16xf32>
    %c3_114 = arith.constant 3 : index
    %c0_115 = arith.constant 0 : index
    %c0_116 = arith.constant 0 : index
    %195 = vector.load %arg10[%c3_114, %c0_115, %c0_116] : memref<8x64x16xbf16, #tpu.memory_space<vmem>>, vector<1x64x16xbf16>
    %196 = vector.shape_cast %195 : vector<1x64x16xbf16> to vector<64x16xbf16>
    %cst_117 = arith.constant dense<0.000000e+00> : vector<48x16xf32>
    %197 = tpu.matmul %38, %196, %cst_117 {dimension_numbers = #tpu.dot_dimension_numbers<[1], [0], [0], [1], [0, 0, 1, 1], [], []>} : vector<48x64xbf16>, vector<64x16xbf16>, vector<48x16xf32> -> vector<48x16xf32>
    %c3_118 = arith.constant 3 : index
    %c0_119 = arith.constant 0 : index
    %c0_120 = arith.constant 0 : index
    %198 = vector.load %arg11[%c3_118, %c0_119, %c0_120] : memref<8x1x16xf32, #tpu.memory_space<vmem>>, vector<1x1x16xf32>
    %199 = vector.shape_cast %198 : vector<1x1x16xf32> to vector<1x16xf32>
    %200 = vector.broadcast %199 : vector<1x16xf32> to vector<48x16xf32>
    %201 = arith.addf %197, %200 : vector<48x16xf32>
    %202 = vector.shape_cast %201 : vector<48x16xf32> to vector<2x24x16xf32>
    %203 = arith.truncf %186 : vector<2x24x16xf32> to vector<2x24x16xbf16>
    %204 = arith.truncf %194 : vector<2x24x16xf32> to vector<2x24x16xbf16>
    "tpu.trace_start"() <{level = 10 : i32, message = "bld,bmd->blm"}> : () -> ()
    %cst_121 = arith.constant dense<0.000000e+00> : vector<2x24x24xf32>
    %205 = tpu.matmul %203, %204, %cst_121 {dimension_numbers = #tpu.dot_dimension_numbers<[2], [2], [1], [1], [0, 0, 0, 1, 1, 1], [0], [0]>} : vector<2x24x16xbf16>, vector<2x24x16xbf16>, vector<2x24x24xf32> -> vector<2x24x24xf32>
    "tpu.trace_stop"() : () -> ()
    %206 = arith.addf %205, %10 : vector<2x24x24xf32>
    %cst_122 = arith.constant dense<0xFF800000> : vector<2x24xf32>
    %207 = vector.multi_reduction <maximumf>, %206, %cst_122 [2] : vector<2x24x24xf32> to vector<2x24xf32>
    %208 = vector.shape_cast %207 : vector<2x24xf32> to vector<2x24x1xf32>
    %209 = vector.broadcast %208 : vector<2x24x1xf32> to vector<2x24x24xf32>
    %210 = arith.subf %206, %209 : vector<2x24x24xf32>
    %211 = math.exp %210 : vector<2x24x24xf32>
    %cst_123 = arith.constant dense<0.000000e+00> : vector<2x24xf32>
    %212 = vector.multi_reduction <add>, %211, %cst_123 [2] : vector<2x24x24xf32> to vector<2x24xf32>
    %213 = vector.shape_cast %212 : vector<2x24xf32> to vector<2x24x1xf32>
    %214 = tpu.reciprocal %213 {approx = true} : vector<2x24x1xf32> -> vector<2x24x1xf32>
    %215 = vector.broadcast %214 : vector<2x24x1xf32> to vector<2x24x24xf32>
    %216 = arith.mulf %211, %215 : vector<2x24x24xf32>
    %217 = arith.truncf %216 : vector<2x24x24xf32> to vector<2x24x24xbf16>
    %218 = arith.truncf %202 : vector<2x24x16xf32> to vector<2x24x16xbf16>
    "tpu.trace_start"() <{level = 10 : i32, message = "blm,bmd->bld"}> : () -> ()
    %cst_124 = arith.constant dense<0.000000e+00> : vector<2x24x16xf32>
    %219 = tpu.matmul %217, %218, %cst_124 {dimension_numbers = #tpu.dot_dimension_numbers<[2], [1], [1], [2], [0, 0, 0, 1, 1, 2], [0], [0]>} : vector<2x24x24xbf16>, vector<2x24x16xbf16>, vector<2x24x16xf32> -> vector<2x24x16xf32>
    "tpu.trace_stop"() : () -> ()
    %220 = vector.shape_cast %219 : vector<2x24x16xf32> to vector<48x16xf32>
    %221 = arith.truncf %220 : vector<48x16xf32> to vector<48x16xbf16>
    %c3_125 = arith.constant 3 : index
    %c0_126 = arith.constant 0 : index
    %c0_127 = arith.constant 0 : index
    %222 = vector.load %arg12[%c3_125, %c0_126, %c0_127] : memref<8x16x64xbf16, #tpu.memory_space<vmem>>, vector<1x16x64xbf16>
    %223 = vector.shape_cast %222 : vector<1x16x64xbf16> to vector<16x64xbf16>
    %cst_128 = arith.constant dense<0.000000e+00> : vector<48x64xf32>
    %224 = tpu.matmul %221, %223, %cst_128 {dimension_numbers = #tpu.dot_dimension_numbers<[1], [0], [0], [1], [0, 0, 1, 1], [], []>} : vector<48x16xbf16>, vector<16x64xbf16>, vector<48x64xf32> -> vector<48x64xf32>
    %225 = arith.addf %178, %224 : vector<48x64xf32>
    %226 = arith.addf %1, %225 : vector<48x64xf32>
    %c0_129 = arith.constant 0 : index
    %c0_130 = arith.constant 0 : index
    %c0_131 = arith.constant 0 : index
    %227 = vector.load %arg13[%c0_129, %c0_130, %c0_131] : memref<2x1x64xf32, #tpu.memory_space<vmem>>, vector<1x1x64xf32>
    %228 = vector.shape_cast %227 : vector<1x1x64xf32> to vector<1x64xf32>
    %229 = vector.broadcast %228 : vector<1x64xf32> to vector<48x64xf32>
    %230 = arith.addf %226, %229 : vector<48x64xf32>
    %c0_132 = arith.constant 0 : index
    %c0_133 = arith.constant 0 : index
    %c0_134 = arith.constant 0 : index
    %231 = vector.load %arg14[%c0_132, %c0_133, %c0_134] : memref<2x1x64xf32, #tpu.memory_space<vmem>>, vector<1x1x64xf32>
    %232 = vector.shape_cast %231 : vector<1x1x64xf32> to vector<1x64xf32>
    %c0_135 = arith.constant 0 : index
    %c0_136 = arith.constant 0 : index
    %c0_137 = arith.constant 0 : index
    %233 = vector.load %arg15[%c0_135, %c0_136, %c0_137] : memref<2x1x64xf32, #tpu.memory_space<vmem>>, vector<1x1x64xf32>
    %234 = vector.shape_cast %233 : vector<1x1x64xf32> to vector<1x64xf32>
    %cst_138 = arith.constant dense<0.000000e+00> : vector<48xf32>
    %235 = vector.multi_reduction <add>, %230, %cst_138 [1] : vector<48x64xf32> to vector<48xf32>
    %236 = vector.shape_cast %235 : vector<48xf32> to vector<48x1xf32>
    %cst_139 = arith.constant 6.400000e+01 : f32
    %237 = vector.broadcast %cst_139 : f32 to vector<48x1xf32>
    %238 = arith.divf %236, %237 : vector<48x1xf32>
    %239 = arith.mulf %230, %230 : vector<48x64xf32>
    %cst_140 = arith.constant dense<0.000000e+00> : vector<48xf32>
    %240 = vector.multi_reduction <add>, %239, %cst_140 [1] : vector<48x64xf32> to vector<48xf32>
    %241 = vector.shape_cast %240 : vector<48xf32> to vector<48x1xf32>
    %cst_141 = arith.constant 6.400000e+01 : f32
    %242 = vector.broadcast %cst_141 : f32 to vector<48x1xf32>
    %243 = arith.divf %241, %242 : vector<48x1xf32>
    %244 = arith.mulf %238, %238 : vector<48x1xf32>
    %245 = arith.subf %243, %244 : vector<48x1xf32>
    %246 = vector.broadcast %238 : vector<48x1xf32> to vector<48x64xf32>
    %247 = arith.subf %230, %246 : vector<48x64xf32>
    %cst_142 = arith.constant 9.99999974E-6 : f32
    %248 = vector.broadcast %cst_142 : f32 to vector<48x1xf32>
    %249 = arith.addf %245, %248 : vector<48x1xf32>
    %250 = math.rsqrt %249 : vector<48x1xf32>
    %251 = vector.broadcast %250 : vector<48x1xf32> to vector<48x64xf32>
    %252 = arith.mulf %247, %251 : vector<48x64xf32>
    %253 = vector.broadcast %232 : vector<1x64xf32> to vector<48x64xf32>
    %254 = arith.mulf %252, %253 : vector<48x64xf32>
    %255 = vector.broadcast %234 : vector<1x64xf32> to vector<48x64xf32>
    %256 = arith.addf %254, %255 : vector<48x64xf32>
    %257 = arith.truncf %256 : vector<48x64xf32> to vector<48x64xbf16>
    %c0_143 = arith.constant 0 : index
    %c0_144 = arith.constant 0 : index
    %c0_145 = arith.constant 0 : index
    %258 = vector.load %arg16[%c0_143, %c0_144, %c0_145] : memref<2x64x256xbf16, #tpu.memory_space<vmem>>, vector<1x64x256xbf16>
    %259 = vector.shape_cast %258 : vector<1x64x256xbf16> to vector<64x256xbf16>
    %cst_146 = arith.constant dense<0.000000e+00> : vector<48x256xf32>
    %260 = tpu.matmul %257, %259, %cst_146 {dimension_numbers = #tpu.dot_dimension_numbers<[1], [0], [0], [1], [0, 0, 1, 1], [], []>} : vector<48x64xbf16>, vector<64x256xbf16>, vector<48x256xf32> -> vector<48x256xf32>
    %c0_147 = arith.constant 0 : index
    %c0_148 = arith.constant 0 : index
    %c0_149 = arith.constant 0 : index
    %261 = vector.load %arg17[%c0_147, %c0_148, %c0_149] : memref<2x1x256xf32, #tpu.memory_space<vmem>>, vector<1x1x256xf32>
    %262 = vector.shape_cast %261 : vector<1x1x256xf32> to vector<1x256xf32>
    %263 = vector.broadcast %262 : vector<1x256xf32> to vector<48x256xf32>
    %264 = arith.addf %260, %263 : vector<48x256xf32>
    %cst_150 = arith.constant 0.000000e+00 : f32
    %265 = vector.broadcast %cst_150 : f32 to vector<48x256xf32>
    %266 = arith.maximumf %264, %265 : vector<48x256xf32>
    %267 = arith.truncf %266 : vector<48x256xf32> to vector<48x256xbf16>
    %c0_151 = arith.constant 0 : index
    %c0_152 = arith.constant 0 : index
    %c0_153 = arith.constant 0 : index
    %268 = vector.load %arg18[%c0_151, %c0_152, %c0_153] : memref<2x256x64xbf16, #tpu.memory_space<vmem>>, vector<1x256x64xbf16>
    %269 = vector.shape_cast %268 : vector<1x256x64xbf16> to vector<256x64xbf16>
    %cst_154 = arith.constant dense<0.000000e+00> : vector<48x64xf32>
    %270 = tpu.matmul %267, %269, %cst_154 {dimension_numbers = #tpu.dot_dimension_numbers<[1], [0], [0], [1], [0, 0, 1, 1], [], []>} : vector<48x256xbf16>, vector<256x64xbf16>, vector<48x64xf32> -> vector<48x64xf32>
    %c0_155 = arith.constant 0 : index
    %c0_156 = arith.constant 0 : index
    %c0_157 = arith.constant 0 : index
    %271 = vector.load %arg19[%c0_155, %c0_156, %c0_157] : memref<2x1x64xf32, #tpu.memory_space<vmem>>, vector<1x1x64xf32>
    %272 = vector.shape_cast %271 : vector<1x1x64xf32> to vector<1x64xf32>
    %273 = vector.broadcast %272 : vector<1x64xf32> to vector<48x64xf32>
    %274 = arith.addf %270, %273 : vector<48x64xf32>
    %275 = arith.addf %230, %274 : vector<48x64xf32>
    %c1_158 = arith.constant 1 : index
    %c0_159 = arith.constant 0 : index
    %c0_160 = arith.constant 0 : index
    %276 = vector.load %arg4[%c1_158, %c0_159, %c0_160] : memref<2x1x64xf32, #tpu.memory_space<vmem>>, vector<1x1x64xf32>
    %277 = vector.shape_cast %276 : vector<1x1x64xf32> to vector<1x64xf32>
    %c1_161 = arith.constant 1 : index
    %c0_162 = arith.constant 0 : index
    %c0_163 = arith.constant 0 : index
    %278 = vector.load %arg5[%c1_161, %c0_162, %c0_163] : memref<2x1x64xf32, #tpu.memory_space<vmem>>, vector<1x1x64xf32>
    %279 = vector.shape_cast %278 : vector<1x1x64xf32> to vector<1x64xf32>
    %cst_164 = arith.constant dense<0.000000e+00> : vector<48xf32>
    %280 = vector.multi_reduction <add>, %275, %cst_164 [1] : vector<48x64xf32> to vector<48xf32>
    %281 = vector.shape_cast %280 : vector<48xf32> to vector<48x1xf32>
    %cst_165 = arith.constant 6.400000e+01 : f32
    %282 = vector.broadcast %cst_165 : f32 to vector<48x1xf32>
    %283 = arith.divf %281, %282 : vector<48x1xf32>
    %284 = arith.mulf %275, %275 : vector<48x64xf32>
    %cst_166 = arith.constant dense<0.000000e+00> : vector<48xf32>
    %285 = vector.multi_reduction <add>, %284, %cst_166 [1] : vector<48x64xf32> to vector<48xf32>
    %286 = vector.shape_cast %285 : vector<48xf32> to vector<48x1xf32>
    %cst_167 = arith.constant 6.400000e+01 : f32
    %287 = vector.broadcast %cst_167 : f32 to vector<48x1xf32>
    %288 = arith.divf %286, %287 : vector<48x1xf32>
    %289 = arith.mulf %283, %283 : vector<48x1xf32>
    %290 = arith.subf %288, %289 : vector<48x1xf32>
    %291 = vector.broadcast %283 : vector<48x1xf32> to vector<48x64xf32>
    %292 = arith.subf %275, %291 : vector<48x64xf32>
    %cst_168 = arith.constant 9.99999974E-6 : f32
    %293 = vector.broadcast %cst_168 : f32 to vector<48x1xf32>
    %294 = arith.addf %290, %293 : vector<48x1xf32>
    %295 = math.rsqrt %294 : vector<48x1xf32>
    %296 = vector.broadcast %295 : vector<48x1xf32> to vector<48x64xf32>
    %297 = arith.mulf %292, %296 : vector<48x64xf32>
    %298 = vector.broadcast %277 : vector<1x64xf32> to vector<48x64xf32>
    %299 = arith.mulf %297, %298 : vector<48x64xf32>
    %300 = vector.broadcast %279 : vector<1x64xf32> to vector<48x64xf32>
    %301 = arith.addf %299, %300 : vector<48x64xf32>
    %302 = arith.addf %301, %6 : vector<48x64xf32>
    %303 = arith.truncf %302 : vector<48x64xf32> to vector<48x64xbf16>
    %c4 = arith.constant 4 : index
    %c0_169 = arith.constant 0 : index
    %c0_170 = arith.constant 0 : index
    %304 = vector.load %arg6[%c4, %c0_169, %c0_170] : memref<8x64x16xbf16, #tpu.memory_space<vmem>>, vector<1x64x16xbf16>
    %305 = vector.shape_cast %304 : vector<1x64x16xbf16> to vector<64x16xbf16>
    %cst_171 = arith.constant dense<0.000000e+00> : vector<48x16xf32>
    %306 = tpu.matmul %303, %305, %cst_171 {dimension_numbers = #tpu.dot_dimension_numbers<[1], [0], [0], [1], [0, 0, 1, 1], [], []>} : vector<48x64xbf16>, vector<64x16xbf16>, vector<48x16xf32> -> vector<48x16xf32>
    %c4_172 = arith.constant 4 : index
    %c0_173 = arith.constant 0 : index
    %c0_174 = arith.constant 0 : index
    %307 = vector.load %arg7[%c4_172, %c0_173, %c0_174] : memref<8x1x16xf32, #tpu.memory_space<vmem>>, vector<1x1x16xf32>
    %308 = vector.shape_cast %307 : vector<1x1x16xf32> to vector<1x16xf32>
    %309 = vector.broadcast %308 : vector<1x16xf32> to vector<48x16xf32>
    %310 = arith.addf %306, %309 : vector<48x16xf32>
    %311 = vector.shape_cast %310 : vector<48x16xf32> to vector<2x24x16xf32>
    %c4_175 = arith.constant 4 : index
    %c0_176 = arith.constant 0 : index
    %c0_177 = arith.constant 0 : index
    %312 = vector.load %arg8[%c4_175, %c0_176, %c0_177] : memref<8x64x16xbf16, #tpu.memory_space<vmem>>, vector<1x64x16xbf16>
    %313 = vector.shape_cast %312 : vector<1x64x16xbf16> to vector<64x16xbf16>
    %cst_178 = arith.constant dense<0.000000e+00> : vector<48x16xf32>
    %314 = tpu.matmul %303, %313, %cst_178 {dimension_numbers = #tpu.dot_dimension_numbers<[1], [0], [0], [1], [0, 0, 1, 1], [], []>} : vector<48x64xbf16>, vector<64x16xbf16>, vector<48x16xf32> -> vector<48x16xf32>
    %c4_179 = arith.constant 4 : index
    %c0_180 = arith.constant 0 : index
    %c0_181 = arith.constant 0 : index
    %315 = vector.load %arg9[%c4_179, %c0_180, %c0_181] : memref<8x1x16xf32, #tpu.memory_space<vmem>>, vector<1x1x16xf32>
    %316 = vector.shape_cast %315 : vector<1x1x16xf32> to vector<1x16xf32>
    %317 = vector.broadcast %316 : vector<1x16xf32> to vector<48x16xf32>
    %318 = arith.addf %314, %317 : vector<48x16xf32>
    %319 = vector.shape_cast %318 : vector<48x16xf32> to vector<2x24x16xf32>
    %c4_182 = arith.constant 4 : index
    %c0_183 = arith.constant 0 : index
    %c0_184 = arith.constant 0 : index
    %320 = vector.load %arg10[%c4_182, %c0_183, %c0_184] : memref<8x64x16xbf16, #tpu.memory_space<vmem>>, vector<1x64x16xbf16>
    %321 = vector.shape_cast %320 : vector<1x64x16xbf16> to vector<64x16xbf16>
    %cst_185 = arith.constant dense<0.000000e+00> : vector<48x16xf32>
    %322 = tpu.matmul %303, %321, %cst_185 {dimension_numbers = #tpu.dot_dimension_numbers<[1], [0], [0], [1], [0, 0, 1, 1], [], []>} : vector<48x64xbf16>, vector<64x16xbf16>, vector<48x16xf32> -> vector<48x16xf32>
    %c4_186 = arith.constant 4 : index
    %c0_187 = arith.constant 0 : index
    %c0_188 = arith.constant 0 : index
    %323 = vector.load %arg11[%c4_186, %c0_187, %c0_188] : memref<8x1x16xf32, #tpu.memory_space<vmem>>, vector<1x1x16xf32>
    %324 = vector.shape_cast %323 : vector<1x1x16xf32> to vector<1x16xf32>
    %325 = vector.broadcast %324 : vector<1x16xf32> to vector<48x16xf32>
    %326 = arith.addf %322, %325 : vector<48x16xf32>
    %327 = vector.shape_cast %326 : vector<48x16xf32> to vector<2x24x16xf32>
    %328 = arith.truncf %311 : vector<2x24x16xf32> to vector<2x24x16xbf16>
    %329 = arith.truncf %319 : vector<2x24x16xf32> to vector<2x24x16xbf16>
    "tpu.trace_start"() <{level = 10 : i32, message = "bld,bmd->blm"}> : () -> ()
    %cst_189 = arith.constant dense<0.000000e+00> : vector<2x24x24xf32>
    %330 = tpu.matmul %328, %329, %cst_189 {dimension_numbers = #tpu.dot_dimension_numbers<[2], [2], [1], [1], [0, 0, 0, 1, 1, 1], [0], [0]>} : vector<2x24x16xbf16>, vector<2x24x16xbf16>, vector<2x24x24xf32> -> vector<2x24x24xf32>
    "tpu.trace_stop"() : () -> ()
    %331 = arith.addf %330, %10 : vector<2x24x24xf32>
    %cst_190 = arith.constant dense<0xFF800000> : vector<2x24xf32>
    %332 = vector.multi_reduction <maximumf>, %331, %cst_190 [2] : vector<2x24x24xf32> to vector<2x24xf32>
    %333 = vector.shape_cast %332 : vector<2x24xf32> to vector<2x24x1xf32>
    %334 = vector.broadcast %333 : vector<2x24x1xf32> to vector<2x24x24xf32>
    %335 = arith.subf %331, %334 : vector<2x24x24xf32>
    %336 = math.exp %335 : vector<2x24x24xf32>
    %cst_191 = arith.constant dense<0.000000e+00> : vector<2x24xf32>
    %337 = vector.multi_reduction <add>, %336, %cst_191 [2] : vector<2x24x24xf32> to vector<2x24xf32>
    %338 = vector.shape_cast %337 : vector<2x24xf32> to vector<2x24x1xf32>
    %339 = tpu.reciprocal %338 {approx = true} : vector<2x24x1xf32> -> vector<2x24x1xf32>
    %340 = vector.broadcast %339 : vector<2x24x1xf32> to vector<2x24x24xf32>
    %341 = arith.mulf %336, %340 : vector<2x24x24xf32>
    %342 = arith.truncf %341 : vector<2x24x24xf32> to vector<2x24x24xbf16>
    %343 = arith.truncf %327 : vector<2x24x16xf32> to vector<2x24x16xbf16>
    "tpu.trace_start"() <{level = 10 : i32, message = "blm,bmd->bld"}> : () -> ()
    %cst_192 = arith.constant dense<0.000000e+00> : vector<2x24x16xf32>
    %344 = tpu.matmul %342, %343, %cst_192 {dimension_numbers = #tpu.dot_dimension_numbers<[2], [1], [1], [2], [0, 0, 0, 1, 1, 2], [0], [0]>} : vector<2x24x24xbf16>, vector<2x24x16xbf16>, vector<2x24x16xf32> -> vector<2x24x16xf32>
    "tpu.trace_stop"() : () -> ()
    %345 = vector.shape_cast %344 : vector<2x24x16xf32> to vector<48x16xf32>
    %346 = arith.truncf %345 : vector<48x16xf32> to vector<48x16xbf16>
    %c4_193 = arith.constant 4 : index
    %c0_194 = arith.constant 0 : index
    %c0_195 = arith.constant 0 : index
    %347 = vector.load %arg12[%c4_193, %c0_194, %c0_195] : memref<8x16x64xbf16, #tpu.memory_space<vmem>>, vector<1x16x64xbf16>
    %348 = vector.shape_cast %347 : vector<1x16x64xbf16> to vector<16x64xbf16>
    %cst_196 = arith.constant dense<0.000000e+00> : vector<48x64xf32>
    %349 = tpu.matmul %346, %348, %cst_196 {dimension_numbers = #tpu.dot_dimension_numbers<[1], [0], [0], [1], [0, 0, 1, 1], [], []>} : vector<48x16xbf16>, vector<16x64xbf16>, vector<48x64xf32> -> vector<48x64xf32>
    %c5 = arith.constant 5 : index
    %c0_197 = arith.constant 0 : index
    %c0_198 = arith.constant 0 : index
    %350 = vector.load %arg6[%c5, %c0_197, %c0_198] : memref<8x64x16xbf16, #tpu.memory_space<vmem>>, vector<1x64x16xbf16>
    %351 = vector.shape_cast %350 : vector<1x64x16xbf16> to vector<64x16xbf16>
    %cst_199 = arith.constant dense<0.000000e+00> : vector<48x16xf32>
    %352 = tpu.matmul %303, %351, %cst_199 {dimension_numbers = #tpu.dot_dimension_numbers<[1], [0], [0], [1], [0, 0, 1, 1], [], []>} : vector<48x64xbf16>, vector<64x16xbf16>, vector<48x16xf32> -> vector<48x16xf32>
    %c5_200 = arith.constant 5 : index
    %c0_201 = arith.constant 0 : index
    %c0_202 = arith.constant 0 : index
    %353 = vector.load %arg7[%c5_200, %c0_201, %c0_202] : memref<8x1x16xf32, #tpu.memory_space<vmem>>, vector<1x1x16xf32>
    %354 = vector.shape_cast %353 : vector<1x1x16xf32> to vector<1x16xf32>
    %355 = vector.broadcast %354 : vector<1x16xf32> to vector<48x16xf32>
    %356 = arith.addf %352, %355 : vector<48x16xf32>
    %357 = vector.shape_cast %356 : vector<48x16xf32> to vector<2x24x16xf32>
    %c5_203 = arith.constant 5 : index
    %c0_204 = arith.constant 0 : index
    %c0_205 = arith.constant 0 : index
    %358 = vector.load %arg8[%c5_203, %c0_204, %c0_205] : memref<8x64x16xbf16, #tpu.memory_space<vmem>>, vector<1x64x16xbf16>
    %359 = vector.shape_cast %358 : vector<1x64x16xbf16> to vector<64x16xbf16>
    %cst_206 = arith.constant dense<0.000000e+00> : vector<48x16xf32>
    %360 = tpu.matmul %303, %359, %cst_206 {dimension_numbers = #tpu.dot_dimension_numbers<[1], [0], [0], [1], [0, 0, 1, 1], [], []>} : vector<48x64xbf16>, vector<64x16xbf16>, vector<48x16xf32> -> vector<48x16xf32>
    %c5_207 = arith.constant 5 : index
    %c0_208 = arith.constant 0 : index
    %c0_209 = arith.constant 0 : index
    %361 = vector.load %arg9[%c5_207, %c0_208, %c0_209] : memref<8x1x16xf32, #tpu.memory_space<vmem>>, vector<1x1x16xf32>
    %362 = vector.shape_cast %361 : vector<1x1x16xf32> to vector<1x16xf32>
    %363 = vector.broadcast %362 : vector<1x16xf32> to vector<48x16xf32>
    %364 = arith.addf %360, %363 : vector<48x16xf32>
    %365 = vector.shape_cast %364 : vector<48x16xf32> to vector<2x24x16xf32>
    %c5_210 = arith.constant 5 : index
    %c0_211 = arith.constant 0 : index
    %c0_212 = arith.constant 0 : index
    %366 = vector.load %arg10[%c5_210, %c0_211, %c0_212] : memref<8x64x16xbf16, #tpu.memory_space<vmem>>, vector<1x64x16xbf16>
    %367 = vector.shape_cast %366 : vector<1x64x16xbf16> to vector<64x16xbf16>
    %cst_213 = arith.constant dense<0.000000e+00> : vector<48x16xf32>
    %368 = tpu.matmul %303, %367, %cst_213 {dimension_numbers = #tpu.dot_dimension_numbers<[1], [0], [0], [1], [0, 0, 1, 1], [], []>} : vector<48x64xbf16>, vector<64x16xbf16>, vector<48x16xf32> -> vector<48x16xf32>
    %c5_214 = arith.constant 5 : index
    %c0_215 = arith.constant 0 : index
    %c0_216 = arith.constant 0 : index
    %369 = vector.load %arg11[%c5_214, %c0_215, %c0_216] : memref<8x1x16xf32, #tpu.memory_space<vmem>>, vector<1x1x16xf32>
    %370 = vector.shape_cast %369 : vector<1x1x16xf32> to vector<1x16xf32>
    %371 = vector.broadcast %370 : vector<1x16xf32> to vector<48x16xf32>
    %372 = arith.addf %368, %371 : vector<48x16xf32>
    %373 = vector.shape_cast %372 : vector<48x16xf32> to vector<2x24x16xf32>
    %374 = arith.truncf %357 : vector<2x24x16xf32> to vector<2x24x16xbf16>
    %375 = arith.truncf %365 : vector<2x24x16xf32> to vector<2x24x16xbf16>
    "tpu.trace_start"() <{level = 10 : i32, message = "bld,bmd->blm"}> : () -> ()
    %cst_217 = arith.constant dense<0.000000e+00> : vector<2x24x24xf32>
    %376 = tpu.matmul %374, %375, %cst_217 {dimension_numbers = #tpu.dot_dimension_numbers<[2], [2], [1], [1], [0, 0, 0, 1, 1, 1], [0], [0]>} : vector<2x24x16xbf16>, vector<2x24x16xbf16>, vector<2x24x24xf32> -> vector<2x24x24xf32>
    "tpu.trace_stop"() : () -> ()
    %377 = arith.addf %376, %10 : vector<2x24x24xf32>
    %cst_218 = arith.constant dense<0xFF800000> : vector<2x24xf32>
    %378 = vector.multi_reduction <maximumf>, %377, %cst_218 [2] : vector<2x24x24xf32> to vector<2x24xf32>
    %379 = vector.shape_cast %378 : vector<2x24xf32> to vector<2x24x1xf32>
    %380 = vector.broadcast %379 : vector<2x24x1xf32> to vector<2x24x24xf32>
    %381 = arith.subf %377, %380 : vector<2x24x24xf32>
    %382 = math.exp %381 : vector<2x24x24xf32>
    %cst_219 = arith.constant dense<0.000000e+00> : vector<2x24xf32>
    %383 = vector.multi_reduction <add>, %382, %cst_219 [2] : vector<2x24x24xf32> to vector<2x24xf32>
    %384 = vector.shape_cast %383 : vector<2x24xf32> to vector<2x24x1xf32>
    %385 = tpu.reciprocal %384 {approx = true} : vector<2x24x1xf32> -> vector<2x24x1xf32>
    %386 = vector.broadcast %385 : vector<2x24x1xf32> to vector<2x24x24xf32>
    %387 = arith.mulf %382, %386 : vector<2x24x24xf32>
    %388 = arith.truncf %387 : vector<2x24x24xf32> to vector<2x24x24xbf16>
    %389 = arith.truncf %373 : vector<2x24x16xf32> to vector<2x24x16xbf16>
    "tpu.trace_start"() <{level = 10 : i32, message = "blm,bmd->bld"}> : () -> ()
    %cst_220 = arith.constant dense<0.000000e+00> : vector<2x24x16xf32>
    %390 = tpu.matmul %388, %389, %cst_220 {dimension_numbers = #tpu.dot_dimension_numbers<[2], [1], [1], [2], [0, 0, 0, 1, 1, 2], [0], [0]>} : vector<2x24x24xbf16>, vector<2x24x16xbf16>, vector<2x24x16xf32> -> vector<2x24x16xf32>
    "tpu.trace_stop"() : () -> ()
    %391 = vector.shape_cast %390 : vector<2x24x16xf32> to vector<48x16xf32>
    %392 = arith.truncf %391 : vector<48x16xf32> to vector<48x16xbf16>
    %c5_221 = arith.constant 5 : index
    %c0_222 = arith.constant 0 : index
    %c0_223 = arith.constant 0 : index
    %393 = vector.load %arg12[%c5_221, %c0_222, %c0_223] : memref<8x16x64xbf16, #tpu.memory_space<vmem>>, vector<1x16x64xbf16>
    %394 = vector.shape_cast %393 : vector<1x16x64xbf16> to vector<16x64xbf16>
    %cst_224 = arith.constant dense<0.000000e+00> : vector<48x64xf32>
    %395 = tpu.matmul %392, %394, %cst_224 {dimension_numbers = #tpu.dot_dimension_numbers<[1], [0], [0], [1], [0, 0, 1, 1], [], []>} : vector<48x16xbf16>, vector<16x64xbf16>, vector<48x64xf32> -> vector<48x64xf32>
    %396 = arith.addf %349, %395 : vector<48x64xf32>
    %c6 = arith.constant 6 : index
    %c0_225 = arith.constant 0 : index
    %c0_226 = arith.constant 0 : index
    %397 = vector.load %arg6[%c6, %c0_225, %c0_226] : memref<8x64x16xbf16, #tpu.memory_space<vmem>>, vector<1x64x16xbf16>
    %398 = vector.shape_cast %397 : vector<1x64x16xbf16> to vector<64x16xbf16>
    %cst_227 = arith.constant dense<0.000000e+00> : vector<48x16xf32>
    %399 = tpu.matmul %303, %398, %cst_227 {dimension_numbers = #tpu.dot_dimension_numbers<[1], [0], [0], [1], [0, 0, 1, 1], [], []>} : vector<48x64xbf16>, vector<64x16xbf16>, vector<48x16xf32> -> vector<48x16xf32>
    %c6_228 = arith.constant 6 : index
    %c0_229 = arith.constant 0 : index
    %c0_230 = arith.constant 0 : index
    %400 = vector.load %arg7[%c6_228, %c0_229, %c0_230] : memref<8x1x16xf32, #tpu.memory_space<vmem>>, vector<1x1x16xf32>
    %401 = vector.shape_cast %400 : vector<1x1x16xf32> to vector<1x16xf32>
    %402 = vector.broadcast %401 : vector<1x16xf32> to vector<48x16xf32>
    %403 = arith.addf %399, %402 : vector<48x16xf32>
    %404 = vector.shape_cast %403 : vector<48x16xf32> to vector<2x24x16xf32>
    %c6_231 = arith.constant 6 : index
    %c0_232 = arith.constant 0 : index
    %c0_233 = arith.constant 0 : index
    %405 = vector.load %arg8[%c6_231, %c0_232, %c0_233] : memref<8x64x16xbf16, #tpu.memory_space<vmem>>, vector<1x64x16xbf16>
    %406 = vector.shape_cast %405 : vector<1x64x16xbf16> to vector<64x16xbf16>
    %cst_234 = arith.constant dense<0.000000e+00> : vector<48x16xf32>
    %407 = tpu.matmul %303, %406, %cst_234 {dimension_numbers = #tpu.dot_dimension_numbers<[1], [0], [0], [1], [0, 0, 1, 1], [], []>} : vector<48x64xbf16>, vector<64x16xbf16>, vector<48x16xf32> -> vector<48x16xf32>
    %c6_235 = arith.constant 6 : index
    %c0_236 = arith.constant 0 : index
    %c0_237 = arith.constant 0 : index
    %408 = vector.load %arg9[%c6_235, %c0_236, %c0_237] : memref<8x1x16xf32, #tpu.memory_space<vmem>>, vector<1x1x16xf32>
    %409 = vector.shape_cast %408 : vector<1x1x16xf32> to vector<1x16xf32>
    %410 = vector.broadcast %409 : vector<1x16xf32> to vector<48x16xf32>
    %411 = arith.addf %407, %410 : vector<48x16xf32>
    %412 = vector.shape_cast %411 : vector<48x16xf32> to vector<2x24x16xf32>
    %c6_238 = arith.constant 6 : index
    %c0_239 = arith.constant 0 : index
    %c0_240 = arith.constant 0 : index
    %413 = vector.load %arg10[%c6_238, %c0_239, %c0_240] : memref<8x64x16xbf16, #tpu.memory_space<vmem>>, vector<1x64x16xbf16>
    %414 = vector.shape_cast %413 : vector<1x64x16xbf16> to vector<64x16xbf16>
    %cst_241 = arith.constant dense<0.000000e+00> : vector<48x16xf32>
    %415 = tpu.matmul %303, %414, %cst_241 {dimension_numbers = #tpu.dot_dimension_numbers<[1], [0], [0], [1], [0, 0, 1, 1], [], []>} : vector<48x64xbf16>, vector<64x16xbf16>, vector<48x16xf32> -> vector<48x16xf32>
    %c6_242 = arith.constant 6 : index
    %c0_243 = arith.constant 0 : index
    %c0_244 = arith.constant 0 : index
    %416 = vector.load %arg11[%c6_242, %c0_243, %c0_244] : memref<8x1x16xf32, #tpu.memory_space<vmem>>, vector<1x1x16xf32>
    %417 = vector.shape_cast %416 : vector<1x1x16xf32> to vector<1x16xf32>
    %418 = vector.broadcast %417 : vector<1x16xf32> to vector<48x16xf32>
    %419 = arith.addf %415, %418 : vector<48x16xf32>
    %420 = vector.shape_cast %419 : vector<48x16xf32> to vector<2x24x16xf32>
    %421 = arith.truncf %404 : vector<2x24x16xf32> to vector<2x24x16xbf16>
    %422 = arith.truncf %412 : vector<2x24x16xf32> to vector<2x24x16xbf16>
    "tpu.trace_start"() <{level = 10 : i32, message = "bld,bmd->blm"}> : () -> ()
    %cst_245 = arith.constant dense<0.000000e+00> : vector<2x24x24xf32>
    %423 = tpu.matmul %421, %422, %cst_245 {dimension_numbers = #tpu.dot_dimension_numbers<[2], [2], [1], [1], [0, 0, 0, 1, 1, 1], [0], [0]>} : vector<2x24x16xbf16>, vector<2x24x16xbf16>, vector<2x24x24xf32> -> vector<2x24x24xf32>
    "tpu.trace_stop"() : () -> ()
    %424 = arith.addf %423, %10 : vector<2x24x24xf32>
    %cst_246 = arith.constant dense<0xFF800000> : vector<2x24xf32>
    %425 = vector.multi_reduction <maximumf>, %424, %cst_246 [2] : vector<2x24x24xf32> to vector<2x24xf32>
    %426 = vector.shape_cast %425 : vector<2x24xf32> to vector<2x24x1xf32>
    %427 = vector.broadcast %426 : vector<2x24x1xf32> to vector<2x24x24xf32>
    %428 = arith.subf %424, %427 : vector<2x24x24xf32>
    %429 = math.exp %428 : vector<2x24x24xf32>
    %cst_247 = arith.constant dense<0.000000e+00> : vector<2x24xf32>
    %430 = vector.multi_reduction <add>, %429, %cst_247 [2] : vector<2x24x24xf32> to vector<2x24xf32>
    %431 = vector.shape_cast %430 : vector<2x24xf32> to vector<2x24x1xf32>
    %432 = tpu.reciprocal %431 {approx = true} : vector<2x24x1xf32> -> vector<2x24x1xf32>
    %433 = vector.broadcast %432 : vector<2x24x1xf32> to vector<2x24x24xf32>
    %434 = arith.mulf %429, %433 : vector<2x24x24xf32>
    %435 = arith.truncf %434 : vector<2x24x24xf32> to vector<2x24x24xbf16>
    %436 = arith.truncf %420 : vector<2x24x16xf32> to vector<2x24x16xbf16>
    "tpu.trace_start"() <{level = 10 : i32, message = "blm,bmd->bld"}> : () -> ()
    %cst_248 = arith.constant dense<0.000000e+00> : vector<2x24x16xf32>
    %437 = tpu.matmul %435, %436, %cst_248 {dimension_numbers = #tpu.dot_dimension_numbers<[2], [1], [1], [2], [0, 0, 0, 1, 1, 2], [0], [0]>} : vector<2x24x24xbf16>, vector<2x24x16xbf16>, vector<2x24x16xf32> -> vector<2x24x16xf32>
    "tpu.trace_stop"() : () -> ()
    %438 = vector.shape_cast %437 : vector<2x24x16xf32> to vector<48x16xf32>
    %439 = arith.truncf %438 : vector<48x16xf32> to vector<48x16xbf16>
    %c6_249 = arith.constant 6 : index
    %c0_250 = arith.constant 0 : index
    %c0_251 = arith.constant 0 : index
    %440 = vector.load %arg12[%c6_249, %c0_250, %c0_251] : memref<8x16x64xbf16, #tpu.memory_space<vmem>>, vector<1x16x64xbf16>
    %441 = vector.shape_cast %440 : vector<1x16x64xbf16> to vector<16x64xbf16>
    %cst_252 = arith.constant dense<0.000000e+00> : vector<48x64xf32>
    %442 = tpu.matmul %439, %441, %cst_252 {dimension_numbers = #tpu.dot_dimension_numbers<[1], [0], [0], [1], [0, 0, 1, 1], [], []>} : vector<48x16xbf16>, vector<16x64xbf16>, vector<48x64xf32> -> vector<48x64xf32>
    %443 = arith.addf %396, %442 : vector<48x64xf32>
    %c7 = arith.constant 7 : index
    %c0_253 = arith.constant 0 : index
    %c0_254 = arith.constant 0 : index
    %444 = vector.load %arg6[%c7, %c0_253, %c0_254] : memref<8x64x16xbf16, #tpu.memory_space<vmem>>, vector<1x64x16xbf16>
    %445 = vector.shape_cast %444 : vector<1x64x16xbf16> to vector<64x16xbf16>
    %cst_255 = arith.constant dense<0.000000e+00> : vector<48x16xf32>
    %446 = tpu.matmul %303, %445, %cst_255 {dimension_numbers = #tpu.dot_dimension_numbers<[1], [0], [0], [1], [0, 0, 1, 1], [], []>} : vector<48x64xbf16>, vector<64x16xbf16>, vector<48x16xf32> -> vector<48x16xf32>
    %c7_256 = arith.constant 7 : index
    %c0_257 = arith.constant 0 : index
    %c0_258 = arith.constant 0 : index
    %447 = vector.load %arg7[%c7_256, %c0_257, %c0_258] : memref<8x1x16xf32, #tpu.memory_space<vmem>>, vector<1x1x16xf32>
    %448 = vector.shape_cast %447 : vector<1x1x16xf32> to vector<1x16xf32>
    %449 = vector.broadcast %448 : vector<1x16xf32> to vector<48x16xf32>
    %450 = arith.addf %446, %449 : vector<48x16xf32>
    %451 = vector.shape_cast %450 : vector<48x16xf32> to vector<2x24x16xf32>
    %c7_259 = arith.constant 7 : index
    %c0_260 = arith.constant 0 : index
    %c0_261 = arith.constant 0 : index
    %452 = vector.load %arg8[%c7_259, %c0_260, %c0_261] : memref<8x64x16xbf16, #tpu.memory_space<vmem>>, vector<1x64x16xbf16>
    %453 = vector.shape_cast %452 : vector<1x64x16xbf16> to vector<64x16xbf16>
    %cst_262 = arith.constant dense<0.000000e+00> : vector<48x16xf32>
    %454 = tpu.matmul %303, %453, %cst_262 {dimension_numbers = #tpu.dot_dimension_numbers<[1], [0], [0], [1], [0, 0, 1, 1], [], []>} : vector<48x64xbf16>, vector<64x16xbf16>, vector<48x16xf32> -> vector<48x16xf32>
    %c7_263 = arith.constant 7 : index
    %c0_264 = arith.constant 0 : index
    %c0_265 = arith.constant 0 : index
    %455 = vector.load %arg9[%c7_263, %c0_264, %c0_265] : memref<8x1x16xf32, #tpu.memory_space<vmem>>, vector<1x1x16xf32>
    %456 = vector.shape_cast %455 : vector<1x1x16xf32> to vector<1x16xf32>
    %457 = vector.broadcast %456 : vector<1x16xf32> to vector<48x16xf32>
    %458 = arith.addf %454, %457 : vector<48x16xf32>
    %459 = vector.shape_cast %458 : vector<48x16xf32> to vector<2x24x16xf32>
    %c7_266 = arith.constant 7 : index
    %c0_267 = arith.constant 0 : index
    %c0_268 = arith.constant 0 : index
    %460 = vector.load %arg10[%c7_266, %c0_267, %c0_268] : memref<8x64x16xbf16, #tpu.memory_space<vmem>>, vector<1x64x16xbf16>
    %461 = vector.shape_cast %460 : vector<1x64x16xbf16> to vector<64x16xbf16>
    %cst_269 = arith.constant dense<0.000000e+00> : vector<48x16xf32>
    %462 = tpu.matmul %303, %461, %cst_269 {dimension_numbers = #tpu.dot_dimension_numbers<[1], [0], [0], [1], [0, 0, 1, 1], [], []>} : vector<48x64xbf16>, vector<64x16xbf16>, vector<48x16xf32> -> vector<48x16xf32>
    %c7_270 = arith.constant 7 : index
    %c0_271 = arith.constant 0 : index
    %c0_272 = arith.constant 0 : index
    %463 = vector.load %arg11[%c7_270, %c0_271, %c0_272] : memref<8x1x16xf32, #tpu.memory_space<vmem>>, vector<1x1x16xf32>
    %464 = vector.shape_cast %463 : vector<1x1x16xf32> to vector<1x16xf32>
    %465 = vector.broadcast %464 : vector<1x16xf32> to vector<48x16xf32>
    %466 = arith.addf %462, %465 : vector<48x16xf32>
    %467 = vector.shape_cast %466 : vector<48x16xf32> to vector<2x24x16xf32>
    %468 = arith.truncf %451 : vector<2x24x16xf32> to vector<2x24x16xbf16>
    %469 = arith.truncf %459 : vector<2x24x16xf32> to vector<2x24x16xbf16>
    "tpu.trace_start"() <{level = 10 : i32, message = "bld,bmd->blm"}> : () -> ()
    %cst_273 = arith.constant dense<0.000000e+00> : vector<2x24x24xf32>
    %470 = tpu.matmul %468, %469, %cst_273 {dimension_numbers = #tpu.dot_dimension_numbers<[2], [2], [1], [1], [0, 0, 0, 1, 1, 1], [0], [0]>} : vector<2x24x16xbf16>, vector<2x24x16xbf16>, vector<2x24x24xf32> -> vector<2x24x24xf32>
    "tpu.trace_stop"() : () -> ()
    %471 = arith.addf %470, %10 : vector<2x24x24xf32>
    %cst_274 = arith.constant dense<0xFF800000> : vector<2x24xf32>
    %472 = vector.multi_reduction <maximumf>, %471, %cst_274 [2] : vector<2x24x24xf32> to vector<2x24xf32>
    %473 = vector.shape_cast %472 : vector<2x24xf32> to vector<2x24x1xf32>
    %474 = vector.broadcast %473 : vector<2x24x1xf32> to vector<2x24x24xf32>
    %475 = arith.subf %471, %474 : vector<2x24x24xf32>
    %476 = math.exp %475 : vector<2x24x24xf32>
    %cst_275 = arith.constant dense<0.000000e+00> : vector<2x24xf32>
    %477 = vector.multi_reduction <add>, %476, %cst_275 [2] : vector<2x24x24xf32> to vector<2x24xf32>
    %478 = vector.shape_cast %477 : vector<2x24xf32> to vector<2x24x1xf32>
    %479 = tpu.reciprocal %478 {approx = true} : vector<2x24x1xf32> -> vector<2x24x1xf32>
    %480 = vector.broadcast %479 : vector<2x24x1xf32> to vector<2x24x24xf32>
    %481 = arith.mulf %476, %480 : vector<2x24x24xf32>
    %482 = arith.truncf %481 : vector<2x24x24xf32> to vector<2x24x24xbf16>
    %483 = arith.truncf %467 : vector<2x24x16xf32> to vector<2x24x16xbf16>
    "tpu.trace_start"() <{level = 10 : i32, message = "blm,bmd->bld"}> : () -> ()
    %cst_276 = arith.constant dense<0.000000e+00> : vector<2x24x16xf32>
    %484 = tpu.matmul %482, %483, %cst_276 {dimension_numbers = #tpu.dot_dimension_numbers<[2], [1], [1], [2], [0, 0, 0, 1, 1, 2], [0], [0]>} : vector<2x24x24xbf16>, vector<2x24x16xbf16>, vector<2x24x16xf32> -> vector<2x24x16xf32>
    "tpu.trace_stop"() : () -> ()
    %485 = vector.shape_cast %484 : vector<2x24x16xf32> to vector<48x16xf32>
    %486 = arith.truncf %485 : vector<48x16xf32> to vector<48x16xbf16>
    %c7_277 = arith.constant 7 : index
    %c0_278 = arith.constant 0 : index
    %c0_279 = arith.constant 0 : index
    %487 = vector.load %arg12[%c7_277, %c0_278, %c0_279] : memref<8x16x64xbf16, #tpu.memory_space<vmem>>, vector<1x16x64xbf16>
    %488 = vector.shape_cast %487 : vector<1x16x64xbf16> to vector<16x64xbf16>
    %cst_280 = arith.constant dense<0.000000e+00> : vector<48x64xf32>
    %489 = tpu.matmul %486, %488, %cst_280 {dimension_numbers = #tpu.dot_dimension_numbers<[1], [0], [0], [1], [0, 0, 1, 1], [], []>} : vector<48x16xbf16>, vector<16x64xbf16>, vector<48x64xf32> -> vector<48x64xf32>
    %490 = arith.addf %443, %489 : vector<48x64xf32>
    %491 = arith.addf %275, %490 : vector<48x64xf32>
    %c1_281 = arith.constant 1 : index
    %c0_282 = arith.constant 0 : index
    %c0_283 = arith.constant 0 : index
    %492 = vector.load %arg13[%c1_281, %c0_282, %c0_283] : memref<2x1x64xf32, #tpu.memory_space<vmem>>, vector<1x1x64xf32>
    %493 = vector.shape_cast %492 : vector<1x1x64xf32> to vector<1x64xf32>
    %494 = vector.broadcast %493 : vector<1x64xf32> to vector<48x64xf32>
    %495 = arith.addf %491, %494 : vector<48x64xf32>
    %c1_284 = arith.constant 1 : index
    %c0_285 = arith.constant 0 : index
    %c0_286 = arith.constant 0 : index
    %496 = vector.load %arg14[%c1_284, %c0_285, %c0_286] : memref<2x1x64xf32, #tpu.memory_space<vmem>>, vector<1x1x64xf32>
    %497 = vector.shape_cast %496 : vector<1x1x64xf32> to vector<1x64xf32>
    %c1_287 = arith.constant 1 : index
    %c0_288 = arith.constant 0 : index
    %c0_289 = arith.constant 0 : index
    %498 = vector.load %arg15[%c1_287, %c0_288, %c0_289] : memref<2x1x64xf32, #tpu.memory_space<vmem>>, vector<1x1x64xf32>
    %499 = vector.shape_cast %498 : vector<1x1x64xf32> to vector<1x64xf32>
    %cst_290 = arith.constant dense<0.000000e+00> : vector<48xf32>
    %500 = vector.multi_reduction <add>, %495, %cst_290 [1] : vector<48x64xf32> to vector<48xf32>
    %501 = vector.shape_cast %500 : vector<48xf32> to vector<48x1xf32>
    %cst_291 = arith.constant 6.400000e+01 : f32
    %502 = vector.broadcast %cst_291 : f32 to vector<48x1xf32>
    %503 = arith.divf %501, %502 : vector<48x1xf32>
    %504 = arith.mulf %495, %495 : vector<48x64xf32>
    %cst_292 = arith.constant dense<0.000000e+00> : vector<48xf32>
    %505 = vector.multi_reduction <add>, %504, %cst_292 [1] : vector<48x64xf32> to vector<48xf32>
    %506 = vector.shape_cast %505 : vector<48xf32> to vector<48x1xf32>
    %cst_293 = arith.constant 6.400000e+01 : f32
    %507 = vector.broadcast %cst_293 : f32 to vector<48x1xf32>
    %508 = arith.divf %506, %507 : vector<48x1xf32>
    %509 = arith.mulf %503, %503 : vector<48x1xf32>
    %510 = arith.subf %508, %509 : vector<48x1xf32>
    %511 = vector.broadcast %503 : vector<48x1xf32> to vector<48x64xf32>
    %512 = arith.subf %495, %511 : vector<48x64xf32>
    %cst_294 = arith.constant 9.99999974E-6 : f32
    %513 = vector.broadcast %cst_294 : f32 to vector<48x1xf32>
    %514 = arith.addf %510, %513 : vector<48x1xf32>
    %515 = math.rsqrt %514 : vector<48x1xf32>
    %516 = vector.broadcast %515 : vector<48x1xf32> to vector<48x64xf32>
    %517 = arith.mulf %512, %516 : vector<48x64xf32>
    %518 = vector.broadcast %497 : vector<1x64xf32> to vector<48x64xf32>
    %519 = arith.mulf %517, %518 : vector<48x64xf32>
    %520 = vector.broadcast %499 : vector<1x64xf32> to vector<48x64xf32>
    %521 = arith.addf %519, %520 : vector<48x64xf32>
    %522 = arith.truncf %521 : vector<48x64xf32> to vector<48x64xbf16>
    %c1_295 = arith.constant 1 : index
    %c0_296 = arith.constant 0 : index
    %c0_297 = arith.constant 0 : index
    %523 = vector.load %arg16[%c1_295, %c0_296, %c0_297] : memref<2x64x256xbf16, #tpu.memory_space<vmem>>, vector<1x64x256xbf16>
    %524 = vector.shape_cast %523 : vector<1x64x256xbf16> to vector<64x256xbf16>
    %cst_298 = arith.constant dense<0.000000e+00> : vector<48x256xf32>
    %525 = tpu.matmul %522, %524, %cst_298 {dimension_numbers = #tpu.dot_dimension_numbers<[1], [0], [0], [1], [0, 0, 1, 1], [], []>} : vector<48x64xbf16>, vector<64x256xbf16>, vector<48x256xf32> -> vector<48x256xf32>
    %c1_299 = arith.constant 1 : index
    %c0_300 = arith.constant 0 : index
    %c0_301 = arith.constant 0 : index
    %526 = vector.load %arg17[%c1_299, %c0_300, %c0_301] : memref<2x1x256xf32, #tpu.memory_space<vmem>>, vector<1x1x256xf32>
    %527 = vector.shape_cast %526 : vector<1x1x256xf32> to vector<1x256xf32>
    %528 = vector.broadcast %527 : vector<1x256xf32> to vector<48x256xf32>
    %529 = arith.addf %525, %528 : vector<48x256xf32>
    %cst_302 = arith.constant 0.000000e+00 : f32
    %530 = vector.broadcast %cst_302 : f32 to vector<48x256xf32>
    %531 = arith.maximumf %529, %530 : vector<48x256xf32>
    %532 = arith.truncf %531 : vector<48x256xf32> to vector<48x256xbf16>
    %c1_303 = arith.constant 1 : index
    %c0_304 = arith.constant 0 : index
    %c0_305 = arith.constant 0 : index
    %533 = vector.load %arg18[%c1_303, %c0_304, %c0_305] : memref<2x256x64xbf16, #tpu.memory_space<vmem>>, vector<1x256x64xbf16>
    %534 = vector.shape_cast %533 : vector<1x256x64xbf16> to vector<256x64xbf16>
    %cst_306 = arith.constant dense<0.000000e+00> : vector<48x64xf32>
    %535 = tpu.matmul %532, %534, %cst_306 {dimension_numbers = #tpu.dot_dimension_numbers<[1], [0], [0], [1], [0, 0, 1, 1], [], []>} : vector<48x256xbf16>, vector<256x64xbf16>, vector<48x64xf32> -> vector<48x64xf32>
    %c1_307 = arith.constant 1 : index
    %c0_308 = arith.constant 0 : index
    %c0_309 = arith.constant 0 : index
    %536 = vector.load %arg19[%c1_307, %c0_308, %c0_309] : memref<2x1x64xf32, #tpu.memory_space<vmem>>, vector<1x1x64xf32>
    %537 = vector.shape_cast %536 : vector<1x1x64xf32> to vector<1x64xf32>
    %538 = vector.broadcast %537 : vector<1x64xf32> to vector<48x64xf32>
    %539 = arith.addf %535, %538 : vector<48x64xf32>
    %540 = arith.addf %495, %539 : vector<48x64xf32>
    %541 = vector.shape_cast %540 : vector<48x64xf32> to vector<2x24x64xf32>
    %542 = vector.extract_strided_slice %541 {offsets = [0, 0, 0], sizes = [2, 3, 64], strides = [1, 1, 1]} : vector<2x24x64xf32> to vector<2x3x64xf32>
    %c0_310 = arith.constant 0 : index
    %c0_311 = arith.constant 0 : index
    %543 = vector.load %arg20[%c0_310, %c0_311] : memref<1x64xf32, #tpu.memory_space<vmem>>, vector<1x64xf32>
    %c0_312 = arith.constant 0 : index
    %c0_313 = arith.constant 0 : index
    %544 = vector.load %arg21[%c0_312, %c0_313] : memref<1x64xf32, #tpu.memory_space<vmem>>, vector<1x64xf32>
    %cst_314 = arith.constant dense<0.000000e+00> : vector<2x3xf32>
    %545 = vector.multi_reduction <add>, %542, %cst_314 [2] : vector<2x3x64xf32> to vector<2x3xf32>
    %546 = vector.shape_cast %545 : vector<2x3xf32> to vector<2x3x1xf32>
    %cst_315 = arith.constant 6.400000e+01 : f32
    %547 = vector.broadcast %cst_315 : f32 to vector<2x3x1xf32>
    %548 = arith.divf %546, %547 : vector<2x3x1xf32>
    %549 = arith.mulf %542, %542 : vector<2x3x64xf32>
    %cst_316 = arith.constant dense<0.000000e+00> : vector<2x3xf32>
    %550 = vector.multi_reduction <add>, %549, %cst_316 [2] : vector<2x3x64xf32> to vector<2x3xf32>
    %551 = vector.shape_cast %550 : vector<2x3xf32> to vector<2x3x1xf32>
    %cst_317 = arith.constant 6.400000e+01 : f32
    %552 = vector.broadcast %cst_317 : f32 to vector<2x3x1xf32>
    %553 = arith.divf %551, %552 : vector<2x3x1xf32>
    %554 = arith.mulf %548, %548 : vector<2x3x1xf32>
    %555 = arith.subf %553, %554 : vector<2x3x1xf32>
    %556 = vector.broadcast %548 : vector<2x3x1xf32> to vector<2x3x64xf32>
    %557 = arith.subf %542, %556 : vector<2x3x64xf32>
    %cst_318 = arith.constant 9.99999974E-6 : f32
    %558 = vector.broadcast %cst_318 : f32 to vector<2x3x1xf32>
    %559 = arith.addf %555, %558 : vector<2x3x1xf32>
    %560 = math.rsqrt %559 : vector<2x3x1xf32>
    %561 = vector.broadcast %560 : vector<2x3x1xf32> to vector<2x3x64xf32>
    %562 = arith.mulf %557, %561 : vector<2x3x64xf32>
    %563 = vector.shape_cast %543 : vector<1x64xf32> to vector<1x1x64xf32>
    %564 = vector.broadcast %563 : vector<1x1x64xf32> to vector<2x3x64xf32>
    %565 = arith.mulf %562, %564 : vector<2x3x64xf32>
    %566 = vector.shape_cast %544 : vector<1x64xf32> to vector<1x1x64xf32>
    %567 = vector.broadcast %566 : vector<1x1x64xf32> to vector<2x3x64xf32>
    %568 = arith.addf %565, %567 : vector<2x3x64xf32>
    %c0_319 = arith.constant 0 : index
    %c0_320 = arith.constant 0 : index
    %c0_321 = arith.constant 0 : index
    %569 = vector.load %arg22[%c0_319, %c0_320, %c0_321] : memref<2x3x64xf32, #tpu.memory_space<vmem>>, vector<2x3x64xf32>
    tpu.vector_store %arg22[%c0_319, %c0_320, %c0_321], %568 {strides = array<i32>} : memref<2x3x64xf32, #tpu.memory_space<vmem>>, vector<2x3x64xf32>,
    return
  }
  func.func @transform_0(%arg0: i32) -> (i32, i32, i32) {
    %c0_i32 = arith.constant 0 : i32
    %c0_i32_0 = arith.constant 0 : i32
    %c0_i32_1 = arith.constant 0 : i32
    %c0_i32_2 = arith.constant 0 : i32
    return %c0_i32, %c0_i32_0, %c0_i32_1 : i32, i32, i32
  }
  func.func @transform_1(%arg0: i32) -> (i32, i32) {
    %c0_i32 = arith.constant 0 : i32
    %c0_i32_0 = arith.constant 0 : i32
    %c0_i32_1 = arith.constant 0 : i32
    return %c0_i32, %c0_i32_0 : i32, i32
  }
  func.func @transform_2(%arg0: i32) -> (i32, i32) {
    %c0_i32 = arith.constant 0 : i32
    %c0_i32_0 = arith.constant 0 : i32
    %c0_i32_1 = arith.constant 0 : i32
    return %c0_i32, %c0_i32_0 : i32, i32
  }
  func.func @transform_3(%arg0: i32) -> (i32, i32, i32) {
    %c0_i32 = arith.constant 0 : i32
    %c0_i32_0 = arith.constant 0 : i32
    %c0_i32_1 = arith.constant 0 : i32
    %c0_i32_2 = arith.constant 0 : i32
    return %c0_i32, %c0_i32_0, %c0_i32_1 : i32, i32, i32
  }
  func.func @transform_4(%arg0: i32) -> (i32, i32, i32) {
    %c0_i32 = arith.constant 0 : i32
    %c0_i32_0 = arith.constant 0 : i32
    %c0_i32_1 = arith.constant 0 : i32
    %c0_i32_2 = arith.constant 0 : i32
    return %c0_i32, %c0_i32_0, %c0_i32_1 : i32, i32, i32
  }
  func.func @transform_5(%arg0: i32) -> (i32, i32, i32) {
    %c0_i32 = arith.constant 0 : i32
    %c0_i32_0 = arith.constant 0 : i32
    %c0_i32_1 = arith.constant 0 : i32
    %c0_i32_2 = arith.constant 0 : i32
    return %c0_i32, %c0_i32_0, %c0_i32_1 : i32, i32, i32
  }
  func.func @transform_6(%arg0: i32) -> (i32, i32, i32) {
    %c0_i32 = arith.constant 0 : i32
    %c0_i32_0 = arith.constant 0 : i32
    %c0_i32_1 = arith.constant 0 : i32
    %c0_i32_2 = arith.constant 0 : i32
    return %c0_i32, %c0_i32_0, %c0_i32_1 : i32, i32, i32
  }
  func.func @transform_7(%arg0: i32) -> (i32, i32, i32) {
    %c0_i32 = arith.constant 0 : i32
    %c0_i32_0 = arith.constant 0 : i32
    %c0_i32_1 = arith.constant 0 : i32
    %c0_i32_2 = arith.constant 0 : i32
    return %c0_i32, %c0_i32_0, %c0_i32_1 : i32, i32, i32
  }
  func.func @transform_8(%arg0: i32) -> (i32, i32, i32) {
    %c0_i32 = arith.constant 0 : i32
    %c0_i32_0 = arith.constant 0 : i32
    %c0_i32_1 = arith.constant 0 : i32
    %c0_i32_2 = arith.constant 0 : i32
    return %c0_i32, %c0_i32_0, %c0_i32_1 : i32, i32, i32
  }
  func.func @transform_9(%arg0: i32) -> (i32, i32, i32) {
    %c0_i32 = arith.constant 0 : i32
    %c0_i32_0 = arith.constant 0 : i32
    %c0_i32_1 = arith.constant 0 : i32
    %c0_i32_2 = arith.constant 0 : i32
    return %c0_i32, %c0_i32_0, %c0_i32_1 : i32, i32, i32
  }
  func.func @transform_10(%arg0: i32) -> (i32, i32, i32) {
    %c0_i32 = arith.constant 0 : i32
    %c0_i32_0 = arith.constant 0 : i32
    %c0_i32_1 = arith.constant 0 : i32
    %c0_i32_2 = arith.constant 0 : i32
    return %c0_i32, %c0_i32_0, %c0_i32_1 : i32, i32, i32
  }
  func.func @transform_11(%arg0: i32) -> (i32, i32, i32) {
    %c0_i32 = arith.constant 0 : i32
    %c0_i32_0 = arith.constant 0 : i32
    %c0_i32_1 = arith.constant 0 : i32
    %c0_i32_2 = arith.constant 0 : i32
    return %c0_i32, %c0_i32_0, %c0_i32_1 : i32, i32, i32
  }
  func.func @transform_12(%arg0: i32) -> (i32, i32, i32) {
    %c0_i32 = arith.constant 0 : i32
    %c0_i32_0 = arith.constant 0 : i32
    %c0_i32_1 = arith.constant 0 : i32
    %c0_i32_2 = arith.constant 0 : i32
    return %c0_i32, %c0_i32_0, %c0_i32_1 : i32, i32, i32
  }
  func.func @transform_13(%arg0: i32) -> (i32, i32, i32) {
    %c0_i32 = arith.constant 0 : i32
    %c0_i32_0 = arith.constant 0 : i32
    %c0_i32_1 = arith.constant 0 : i32
    %c0_i32_2 = arith.constant 0 : i32
    return %c0_i32, %c0_i32_0, %c0_i32_1 : i32, i32, i32
  }
  func.func @transform_14(%arg0: i32) -> (i32, i32, i32) {
    %c0_i32 = arith.constant 0 : i32
    %c0_i32_0 = arith.constant 0 : i32
    %c0_i32_1 = arith.constant 0 : i32
    %c0_i32_2 = arith.constant 0 : i32
    return %c0_i32, %c0_i32_0, %c0_i32_1 : i32, i32, i32
  }
  func.func @transform_15(%arg0: i32) -> (i32, i32, i32) {
    %c0_i32 = arith.constant 0 : i32
    %c0_i32_0 = arith.constant 0 : i32
    %c0_i32_1 = arith.constant 0 : i32
    %c0_i32_2 = arith.constant 0 : i32
    return %c0_i32, %c0_i32_0, %c0_i32_1 : i32, i32, i32
  }
  func.func @transform_16(%arg0: i32) -> (i32, i32, i32) {
    %c0_i32 = arith.constant 0 : i32
    %c0_i32_0 = arith.constant 0 : i32
    %c0_i32_1 = arith.constant 0 : i32
    %c0_i32_2 = arith.constant 0 : i32
    return %c0_i32, %c0_i32_0, %c0_i32_1 : i32, i32, i32
  }
  func.func @transform_17(%arg0: i32) -> (i32, i32, i32) {
    %c0_i32 = arith.constant 0 : i32
    %c0_i32_0 = arith.constant 0 : i32
    %c0_i32_1 = arith.constant 0 : i32
    %c0_i32_2 = arith.constant 0 : i32
    return %c0_i32, %c0_i32_0, %c0_i32_1 : i32, i32, i32
  }
  func.func @transform_18(%arg0: i32) -> (i32, i32, i32) {
    %c0_i32 = arith.constant 0 : i32
    %c0_i32_0 = arith.constant 0 : i32
    %c0_i32_1 = arith.constant 0 : i32
    %c0_i32_2 = arith.constant 0 : i32
    return %c0_i32, %c0_i32_0, %c0_i32_1 : i32, i32, i32
  }
  func.func @transform_19(%arg0: i32) -> (i32, i32) {
    %c0_i32 = arith.constant 0 : i32
    %c0_i32_0 = arith.constant 0 : i32
    %c0_i32_1 = arith.constant 0 : i32
    return %c0_i32, %c0_i32_0 : i32, i32
  }
  func.func @transform_20(%arg0: i32) -> (i32, i32) {
    %c0_i32 = arith.constant 0 : i32
    %c0_i32_0 = arith.constant 0 : i32
    %c0_i32_1 = arith.constant 0 : i32
    return %c0_i32, %c0_i32_0 : i32, i32
  }
  func.func @transform_21(%arg0: i32) -> (i32, i32, i32) {
    %c0_i32 = arith.constant 0 : i32
    %c0_i32_0 = arith.constant 0 : i32
    %c0_i32_1 = arith.constant 0 : i32
    %c0_i32_2 = arith.constant 0 : i32
    return %c0_i32, %c0_i32_0, %c0_i32_1 : i32, i32, i32
  }
}

</mosaic_0001>

<bundles_post_ra>
// kernel: bimodal_tf_forward.1
= control target key start
LH: loop header
LB: loop body
LE: loop exit
PB: predicated region body
PF: predicated region fallthrough
CT: control target
= control target key end

     0   :  { %vm83_vm0 = vcmask 523264   ;;  %v9226_v25 = vmov 0.0   ;;  %vm9227_vm1 = vmmov 0   ;;  %vm513_vm2 = vcmask 130048   ;;  %s11339_s0 = inlined_call_operand.vmem [shape: f32[2,24,64], index: 0, kind: input, shape index: {}]   ;;  %s11340_s5 = inlined_call_operand.vmem [shape: bf16[8,64,16], index: 5, kind: input, shape index: {}]   ;;  %s11341_s7 = inlined_call_operand.vmem [shape: bf16[8,64,16], index: 7, kind: input, shape index: {}]   ;;  %s11342_s9 = inlined_call_operand.vmem [shape: bf16[8,64,16], index: 9, kind: input, shape index: {}]   ;;  %s11343_s3 = inlined_call_operand.vmem [shape: f32[2,1,64], index: 3, kind: input, shape index: {}]   ;;  %s11344_s4 = inlined_call_operand.vmem [shape: f32[2,1,64], index: 4, kind: input, shape index: {}]   ;;  %s11345_s1 = inlined_call_operand.vmem [shape: f32[24,64], index: 1, kind: input, shape index: {}]   ;;  %s11346_s6 = inlined_call_operand.vmem [shape: f32[8,1,16], index: 6, kind: input, shape index: {}]   ;;  %s11347_s8 = inlined_call_operand.vmem [shape: f32[8,1,16], index: 8, kind: input, shape index: {}]   ;;  %s11348_s10 = inlined_call_operand.vmem [shape: f32[8,1,16], index: 10, kind: input, shape index: {}]   ;;  %s11349_s2 = inlined_call_operand.vmem [shape: f32[24,24], index: 2, kind: input, shape index: {}]   ;;  %s11350_s11 = inlined_call_operand.vmem [shape: bf16[8,16,64], index: 11, kind: input, shape index: {}]   ;;  %s11351_s12 = inlined_call_operand.vmem [shape: f32[2,1,64], index: 12, kind: input, shape index: {}]   ;;  %s11352_s15 = inlined_call_operand.vmem [shape: bf16[2,64,256], index: 15, kind: input, shape index: {}]   ;;  %s11353_s17 = inlined_call_operand.vmem [shape: bf16[2,256,64], index: 17, kind: input, shape index: {}]   ;;  %s11354_s13 = inlined_call_operand.vmem [shape: f32[2,1,64], index: 13, kind: input, shape index: {}]   ;;  %s11355_s14 = inlined_call_operand.vmem [shape: f32[2,1,64], index: 14, kind: input, shape index: {}]   ;;  %s11356_s16 = inlined_call_operand.vmem [shape: f32[2,1,256], index: 16, kind: input, shape index: {}]   ;;  %s11357_s18 = inlined_call_operand.vmem [shape: f32[2,1,64], index: 18, kind: input, shape index: {}]   ;;  %s11358_s19 = inlined_call_operand.vmem [shape: f32[1,64], index: 19, kind: input, shape index: {}]   ;;  %s11359_s20 = inlined_call_operand.vmem [shape: f32[1,64], index: 20, kind: input, shape index: {}]   ;;  %s11360_s21 = inlined_call_operand.vmem [shape: f32[2,3,64], index: 21, kind: output, shape index: {}]  }
   0x1   :  { %11367 = sst [smem:[#allocation2_spill]] %s11339_s0  ;;  %7905 = vmatprep.subr.bf16.mxu0 %v9226_v25  ;;  %7925 = vmatprep.subr.bf16.mxu1 %v9226_v25  ;;  %vm715_vm3 = vcmask 1043456   ;;  %vm634_vm4 = vcmask 195584   ;;  %vm6850_vm5 = vcmask 518144  }
   0x2   :  { %11368 = sst [smem:[#allocation3_spill]] %s11340_s5  ;;  %s11373_s26 = sld [smem:[#allocation2_spill]]  ;;  %7913 = vmatprep.mubr.msk.bf16.mxu0 %vm9227_vm1, %v9226_v25  ;;  %7933 = vmatprep.mubr.msk.bf16.mxu1 %vm9227_vm1, %v9226_v25 }
   0x3   :  { %11369 = sst [smem:[#allocation4_spill]] %s11341_s7  ;;  %s11374_s7 = sld [smem:[#allocation3_spill]] }
   0x4   :  { %11370 = sst [smem:[#allocation5_spill]] %s11342_s9  ;;  %s11375_s9 = sld [smem:[#allocation4_spill]] }
   0x5   :  { %11371 = sst [smem:[#allocation6_spill]] %s11343_s3  ;;  %s11378_s28 = sld [smem:[#allocation5_spill]] }
   0x6   :  { %11372 = sst [smem:[#allocation7_spill]] %s11344_s4  ;;  %s11376_s0 = sld [smem:[#allocation6_spill]] }
   0x7   :  { %s11377_s4 = sld [smem:[#allocation7_spill]] }
   0x8   :  { %v9342_v0 = vld [vmem:[%s11373_s26] sm:$0xff]  ;;  %v9347_v1 = vld [vmem:[%s11373_s26 + $0x8] sm:$0xff]  ;;  %v9361_v7 = vld [vmem:[%s11373_s26 + $0x10] sm:$0xff] }
   0x9   :  { %v84_v2 = vsel %vm83_vm0, %v9342_v0, 0.0  ;;  %v109_v3 = vmul.f32 %v9342_v0, %v9342_v0  ;;  %v110_v4 = vmul.f32 %v9347_v1, %v9347_v1  ;;  %v87_v6 = vsel %vm83_vm0, %v9347_v1, 0.0  ;;  %v9367_v9 = vld [vmem:[%s11373_s26 + $0x18] sm:$0xff]  ;;  %v9381_v15 = vld [vmem:[%s11373_s26 + $0x20] sm:$0xff]  ;;  %v9387_v17 = vld [vmem:[%s11373_s26 + $0x28] sm:$0xff] }
   0xa   :  { %85 = vadd.xlane.f32.xlu0 %v84_v2  ;;  %v90_v10 = vsel %vm83_vm0, %v9361_v7, 0.0  ;;  %v111_v11 = vmul.f32 %v9361_v7, %v9361_v7  ;;  %v93_v12 = vsel %vm83_vm0, %v9367_v9, 0.0  ;;  %v112_v13 = vmul.f32 %v9367_v9, %v9367_v9  ;;  %v8804_v24 = vld [vmem:[%s11374_s7] sm:$0xff]   ;;  %v8806_v27 = vld [vmem:[%s11374_s7 + $0x8] sm:$0xff]   ;;  %v8808_v29 = vld [vmem:[%s11374_s7 + $0x10] sm:$0xff]  }
   0xb   :  { %v115_v5 = vsel %vm83_vm0, %v109_v3, 0.0  ;;  %v118_v8 = vsel %vm83_vm0, %v110_v4, 0.0  ;;  %v96_v18 = vsel %vm83_vm0, %v9381_v15, 0.0  ;;  %v113_v19 = vmul.f32 %v9381_v15, %v9381_v15  ;;  %v8805_v26 = vld [vmem:[%s11375_s9] sm:$0xff]   ;;  %7906 = vmatpush3.bf16.msra.mxu0 %v8804_v24  ;;  %v8807_v28 = vld [vmem:[%s11375_s9 + $0x8] sm:$0xff]   ;;  %v8809_v30 = vld [vmem:[%s11375_s9 + $0x10] sm:$0xff]  }
   0xc   :  { %116 = vadd.xlane.f32.xlu1 %v115_v5  ;;  %v121_v14 = vsel %vm83_vm0, %v111_v11, 0.0  ;;  %v124_v16 = vsel %vm83_vm0, %v112_v13, 0.0  ;;  %v99_v20 = vsel %vm83_vm0, %v9387_v17, 0.0  ;;  %v114_v21 = vmul.f32 %v9387_v17, %v9387_v17  ;;  %7926 = vmatpush3.bf16.msra.mxu1 %v8805_v26  ;;  %v8810_v31 = vld [vmem:[%s11374_s7 + $0x18] sm:$0xff]   ;;  %v9440_v3 = vld [vmem:[%s11376_s0] ss:$0 sm:$0xff] }
   0xd   :  { %v127_v22 = vsel %vm83_vm0, %v113_v19, 0.0  ;;  %7907 = vmatprep.subr.bf16.mxu0 %v9226_v25  ;;  %7927 = vmatprep.subr.bf16.mxu1 %v9226_v25  ;;  %v8811_v32 = vld [vmem:[%s11375_s9 + $0x18] sm:$0xff]  }
   0xe   :  { %88 = vadd.xlane.f32.xlu0 %v87_v6  ;;  %v130_v23 = vsel %vm83_vm0, %v114_v21, 0.0 }
   0xf   :  { %7908 = vmatpush3.bf16.msra.mxu0 %v8806_v27  ;;  %v75_v27 = vld [vmem:[%s11345_s1] sm:$0xff] }
  0x10   :  { %119 = vadd.xlane.f32.xlu1 %v118_v8  ;;  %7928 = vmatpush3.bf16.msra.mxu1 %v8807_v28 }
  0x11   :  { %7909 = vmatprep.subr.bf16.mxu0 %v9226_v25  ;;  %7929 = vmatprep.subr.bf16.mxu1 %v9226_v25 }
  0x12   :  { %91 = vadd.xlane.f32.xlu0 %v90_v10 }
  0x13   :  { %7910 = vmatpush3.bf16.msra.mxu0 %v8808_v29 }
  0x14   :  { %94 = vadd.xlane.f32.xlu1 %v93_v12  ;;  %7930 = vmatpush3.bf16.msra.mxu1 %v8809_v30 }
  0x15   :  { %7911 = vmatprep.subr.bf16.mxu0 %v9226_v25  ;;  %7931 = vmatprep.subr.bf16.mxu1 %v9226_v25 }
  0x16   :  { %122 = vadd.xlane.f32.xlu0 %v121_v14 }
  0x17   :  { %7912 = vmatpush3.bf16.msra.mxu0 %v8810_v31 }
  0x18   :  { %125 = vadd.xlane.f32.xlu1 %v124_v16  ;;  %7932 = vmatpush3.bf16.msra.mxu1 %v8811_v32 }
  0x19   :  { %7945 = vmatprep.subr.bf16.mxu0 %v9226_v25 }
  0x1a   :  { %97 = vadd.xlane.f32.xlu0 %v96_v18  ;;  %v6904_v18 = vld [vmem:[%s11377_s4] ss:$0 sm:$0xff] }
  0x1c   :  { %100 = vadd.xlane.f32.xlu1 %v99_v20 }
  0x1e   :  { %128 = vadd.xlane.f32.xlu0 %v127_v22 }
  0x20   :  { %131 = vadd.xlane.f32.xlu1 %v130_v23 }
  0x97   :  { %v86_v33 = vpop.xlane.xlu0 %85 }
  0x98   :  { %v103_v34 = vmul.f32 0.015625, %v86_v33 }
  0x99   :  { %v117_v35 = vpop.xlane.xlu1 %116 }
  0x9a   :  { %v139_v36 = vmul.f32 %v103_v34, %v103_v34  ;;  %v133_v37 = vmul.f32 0.015625, %v117_v35  ;;  %v151_v62 = vsub.f32 %v9342_v0, %v103_v34 }
  0x9b   :  { %v89_v38 = vpop.xlane.xlu0 %88 }
  0x9c   :  { %v145_v39 = vsub.f32 %v133_v37, %v139_v36  ;;  %v104_v40 = vmul.f32 0.015625, %v89_v38 }
  0x9d   :  { %v120_v41 = vpop.xlane.xlu1 %119 }
  0x9e   :  { %v157_v42 = vadd.f32 1e-05, %v145_v39  ;;  %v140_v43 = vmul.f32 %v104_v40, %v104_v40  ;;  %v134_v44 = vmul.f32 0.015625, %v120_v41  ;;  %v152_v13 = vsub.f32 %v9347_v1, %v104_v40  ;;  %v76_v1 = vld [vmem:[%s11345_s1 + $0x8] sm:$0xff]  ;;  %v8812_v40 = vld [vmem:[%s11378_s28] sm:$0xff]  }
  0x9f   :  { %v92_v45 = vpop.xlane.xlu0 %91 }
  0xa0   :  { %8964 = vrsqrt.f32 %v157_v42  ;;  %v146_v46 = vsub.f32 %v134_v44, %v140_v43  ;;  %v105_v47 = vmul.f32 0.015625, %v92_v45  ;;  %v8813_v44 = vld [vmem:[%s11378_s28 + $0x8] sm:$0xff]  }
  0xa1   :  { %v95_v48 = vpop.xlane.xlu1 %94 }
  0xa2   :  { %v158_v49 = vadd.f32 1e-05, %v146_v46  ;;  %v141_v50 = vmul.f32 %v105_v47, %v105_v47  ;;  %v106_v51 = vmul.f32 0.015625, %v95_v48  ;;  %v153_v30 = vsub.f32 %v9361_v7, %v105_v47 }
  0xa3   :  { %v123_v52 = vpop.xlane.xlu0 %122 }
  0xa4   :  { %8966 = vrsqrt.f32 %v158_v49  ;;  %v142_v53 = vmul.f32 %v106_v51, %v106_v51  ;;  %v135_v54 = vmul.f32 0.015625, %v123_v52  ;;  %v154_v34 = vsub.f32 %v9367_v9, %v106_v51  ;;  %v77_v9 = vld [vmem:[%s11345_s1 + $0x10] sm:$0xff] }
  0xa5   :  { %v126_v55 = vpop.xlane.xlu1 %125 }
  0xa6   :  { %v147_v56 = vsub.f32 %v135_v54, %v141_v50  ;;  %v136_v57 = vmul.f32 0.015625, %v126_v55 }
  0xa7   :  { %v98_v58 = vpop.xlane.xlu0 %97 }
  0xa8   :  { %v159_v59 = vadd.f32 1e-05, %v147_v56  ;;  %v148_v60 = vsub.f32 %v136_v57, %v142_v53  ;;  %v107_v61 = vmul.f32 0.015625, %v98_v58  ;;  %v8815_v56 = vld [vmem:[%s11378_s28 + $0x18] sm:$0xff]  }
  0xa9   :  { %v101_v63 = vpop.xlane.xlu1 %100 }
  0xaa   :  { %v8965_v2 = vpop.eup %8964  ;;  %8968 = vrsqrt.f32 %v159_v59  ;;  %v160_v4 = vadd.f32 1e-05, %v148_v60  ;;  %v143_v5 = vmul.f32 %v107_v61, %v107_v61  ;;  %v108_v8 = vmul.f32 0.015625, %v101_v63  ;;  %v8816_v60 = vld [vmem:[%s11374_s7 + $0x20] sm:$0xff]   ;;  %v8819_v63 = vld [vmem:[%s11374_s7 + $0x38] sm:$0xff]  }
  0xab   :  { %v169_v6 = vmul.f32 %v8965_v2, %v151_v62  ;;  %v129_v10 = vpop.xlane.xlu0 %128  ;;  %v155_v43 = vsub.f32 %v9381_v15, %v107_v61  ;;  %v8814_v15 = vld [vmem:[%s11378_s28 + $0x10] sm:$0xff]   ;;  %v8817_v61 = vld [vmem:[%s11374_s7 + $0x28] sm:$0xff]   ;;  %v8820_v2 = vld [vmem:[%s11378_s28 + $0x20] sm:$0xff]  }
  0xac   :  { %8970 = vrsqrt.f32 %v160_v4  ;;  %v137_v11 = vmul.f32 0.015625, %v129_v10  ;;  %v144_v0 = vmul.f32 %v108_v8, %v108_v8  ;;  %v156_v48 = vsub.f32 %v9387_v17, %v108_v8  ;;  %v8818_v62 = vld [vmem:[%s11374_s7 + $0x30] sm:$0xff]   ;;  %v6913_v10 = vld [vmem:[%s11347_s8] ss:$0 sm:$0xff] }
  0xad   :  { %v181_v12 = vmul.f32 %v9440_v3, %v169_v6  ;;  %v132_v14 = vpop.xlane.xlu1 %131  ;;  %v8822_v4 = vld [vmem:[%s11378_s28 + $0x30] sm:$0xff]   ;;  %v9577_v6 = vld [vmem:[%s11346_s6] ss:$0 sm:$0xff] }
  0xae   :  { %v8967_v16 = vpop.eup %8966  ;;  %v149_v19 = vsub.f32 %v137_v11, %v143_v5  ;;  %v138_v20 = vmul.f32 0.015625, %v132_v14  ;;  %v8823_v5 = vld [vmem:[%s11378_s28 + $0x38] sm:$0xff]  }
  0xaf   :  { %v170_v21 = vmul.f32 %v8967_v16, %v152_v13  ;;  %v193_v24 = vadd.f32 %v6904_v18, %v181_v12 }
  0xb0   :  { %v161_v22 = vadd.f32 1e-05, %v149_v19  ;;  %v150_v23 = vsub.f32 %v138_v20, %v144_v0 }
  0xb1   :  { %v182_v26 = vmul.f32 %v9440_v3, %v170_v21  ;;  %v199_v32 = vadd.f32 %v193_v24, %v75_v27 }
  0xb2   :  { %8972 = vrsqrt.f32 %v161_v22  ;;  %v162_v28 = vadd.f32 1e-05, %v150_v23 }
  0xb3   :  { %v194_v29 = vadd.f32 %v6904_v18, %v182_v26 }
  0xb4   :  { %v8969_v31 = vpop.eup %8968  ;;  %8974 = vrsqrt.f32 %v162_v28 }
  0xb5   :  { %v200_v33 = vadd.f32 %v194_v29, %v76_v1  ;;  %v171_v35 = vmul.f32 %v8969_v31, %v153_v30 }
  0xb6   :  { %v8971_v36 = vpop.eup %8970 }
  0xb7   :  { %v9456_v37 = vpack.c.bf16 %v200_v33, %v199_v32  ;;  %v183_v38 = vmul.f32 %v9440_v3, %v171_v35  ;;  %v172_v39 = vmul.f32 %v8971_v36, %v154_v34 }
  0xb9   :  { %v195_v41 = vadd.f32 %v6904_v18, %v183_v38  ;;  %v184_v7 = vmul.f32 %v9440_v3, %v172_v39  ;;  %7914 = vmatmul.mubr.msk.bf16.vlgmr.msra.gmra.mrb[0].mxu0 %vm83_vm0, %v9456_v37  ;;  %7934 = vmatmul.mubr.msk.bf16.vlgmr.msra.gmra.mrb[0].mxu1 %vm83_vm0, %v9456_v37 }
  0xba   :  { %7917 = vmatprep.mubr.msk.bf16.mxu0 %vm9227_vm1, %v9226_v25  ;;  %7937 = vmatprep.mubr.msk.bf16.mxu1 %vm9227_vm1, %v9226_v25 }
  0xbb   :  { %v196_v42 = vadd.f32 %v6904_v18, %v184_v7  ;;  %7946 = vmatpush3.bf16.msra.mxu0 %v8812_v40  ;;  %v201_v46 = vadd.f32 %v195_v41, %v77_v9 }
  0xbc   :  { %v8973_v45 = vpop.eup %8972  ;;  %7947 = vmatprep.subr.bf16.mxu0 %v9226_v25 }
  0xbd   :  { %v202_v47 = vadd.f32 %v196_v42, %v75_v27  ;;  %v173_v49 = vmul.f32 %v8973_v45, %v155_v43 }
  0xbe   :  { %v8975_v50 = vpop.eup %8974 }
  0xbf   :  { %v9480_v51 = vpack.c.bf16 %v202_v47, %v201_v46  ;;  %v185_v52 = vmul.f32 %v9440_v3, %v173_v49  ;;  %v174_v53 = vmul.f32 %v8975_v50, %v156_v48  ;;  %7948 = vmatpush3.bf16.msra.mxu0 %v8813_v44 }
  0xc0   :  { %7949 = vmatprep.subr.bf16.mxu0 %v9226_v25 }
  0xc1   :  { %v197_v54 = vadd.f32 %v6904_v18, %v185_v52  ;;  %v186_v55 = vmul.f32 %v9440_v3, %v174_v53  ;;  %7918 = vmatmul.mubr.msk.bf16.gmra.mrb[4].mxu0 %vm83_vm0, %v9480_v51  ;;  %7938 = vmatmul.mubr.msk.bf16.gmra.mrb[4].mxu1 %vm83_vm0, %v9480_v51  ;;  %v8821_v3 = vld [vmem:[%s11378_s28 + $0x28] sm:$0xff]  }
  0xc2   :  { %7921 = vmatprep.mubr.msk.bf16.mxu0 %vm9227_vm1, %v9226_v25  ;;  %7941 = vmatprep.mubr.msk.bf16.mxu1 %vm9227_vm1, %v9226_v25 }
  0xc3   :  { %v198_v17 = vadd.f32 %v6904_v18, %v186_v55  ;;  %7950 = vmatpush3.bf16.msra.mxu0 %v8814_v15  ;;  %v203_v57 = vadd.f32 %v197_v54, %v76_v1  ;;  %v6921_v55 = vld [vmem:[%s11348_s10] ss:$0 sm:$0xff] }
  0xc4   :  { %7951 = vmatprep.subr.bf16.mxu0 %v9226_v25 }
  0xc5   :  { %v204_v58 = vadd.f32 %v198_v17, %v77_v9 }
  0xc7   :  { %v9500_v59 = vpack.c.bf16 %v204_v58, %v203_v57  ;;  %7952 = vmatpush3.bf16.msra.mxu0 %v8815_v56 }
  0xc8   :  { %7997 = vmatprep.subr.bf16.mxu0 %v9226_v25 }
  0xc9   :  { %7922 = vmatmul.mubr.msk.bf16.gmra.mrb[8].mxu0 %vm83_vm0, %v9500_v59  ;;  %7942 = vmatmul.mubr.msk.bf16.gmra.mrb[8].mxu1 %vm83_vm0, %v9500_v59 }
  0xca   :  { %7953 = vmatprep.mubr.msk.bf16.mxu0 %vm9227_vm1, %v9226_v25 }
  0xd1   :  { %7954 = vmatmul.mubr.msk.bf16.vlgmr.msra.gmra.mrb[12].mxu0 %vm83_vm0, %v9456_v37 }
  0xd2   :  { %7957 = vmatprep.mubr.msk.bf16.mxu0 %vm9227_vm1, %v9226_v25  ;;  %7998 = vmatpush3.bf16.msra.mxu0 %v8816_v60 }
  0xd3   :  { %7999 = vmatprep.subr.bf16.mxu0 %v9226_v25 }
  0xd6   :  { %8000 = vmatpush3.bf16.msra.mxu0 %v8817_v61 }
  0xd7   :  { %8001 = vmatprep.subr.bf16.mxu0 %v9226_v25 }
  0xd9   :  { %7958 = vmatmul.mubr.msk.bf16.gmra.mrb[16].mxu0 %vm83_vm0, %v9480_v51 }
  0xda   :  { %7961 = vmatprep.mubr.msk.bf16.mxu0 %vm9227_vm1, %v9226_v25  ;;  %8002 = vmatpush3.bf16.msra.mxu0 %v8818_v62 }
  0xdb   :  { %8003 = vmatprep.subr.bf16.mxu0 %v9226_v25 }
  0xde   :  { %8004 = vmatpush3.bf16.msra.mxu0 %v8819_v63 }
  0xdf   :  { %8037 = vmatprep.subr.bf16.mxu0 %v9226_v25 }
  0xe1   :  { %7962 = vmatmul.mubr.msk.bf16.gmra.mrb[20].mxu0 %vm83_vm0, %v9500_v59 }
  0xe2   :  { %8005 = vmatprep.mubr.msk.bf16.mxu0 %vm9227_vm1, %v9226_v25 }
  0xe9   :  { %8006 = vmatmul.mubr.msk.bf16.vlgmr.msra.gmra.mrb[24].mxu0 %vm83_vm0, %v9456_v37 }
  0xea   :  { %8009 = vmatprep.mubr.msk.bf16.mxu0 %vm9227_vm1, %v9226_v25  ;;  %8038 = vmatpush3.bf16.msra.mxu0 %v8820_v2 }
  0xeb   :  { %8039 = vmatprep.subr.bf16.mxu0 %v9226_v25 }
  0xee   :  { %8040 = vmatpush3.bf16.msra.mxu0 %v8821_v3 }
  0xef   :  { %8041 = vmatprep.subr.bf16.mxu0 %v9226_v25 }
  0xf1   :  { %8010 = vmatmul.mubr.msk.bf16.gmra.mrb[28].mxu0 %vm83_vm0, %v9480_v51 }
  0xf2   :  { %8013 = vmatprep.mubr.msk.bf16.mxu0 %vm9227_vm1, %v9226_v25  ;;  %8042 = vmatpush3.bf16.msra.mxu0 %v8822_v4 }
  0xf3   :  { %8043 = vmatprep.subr.bf16.mxu0 %v9226_v25 }
  0xf6   :  { %8044 = vmatpush3.bf16.msra.mxu0 %v8823_v5 }
  0xf9   :  { %8014 = vmatmul.mubr.msk.bf16.gmra.mrb[32].mxu0 %vm83_vm0, %v9500_v59 }
  0xfa   :  { %8045 = vmatprep.mubr.msk.bf16.mxu0 %vm9227_vm1, %v9226_v25 }
 0x101   :  { %8046 = vmatmul.mubr.msk.bf16.vlgmr.msra.gmra.mrb[36].mxu0 %vm83_vm0, %v9456_v37 }
 0x102   :  { %8049 = vmatprep.mubr.msk.bf16.mxu0 %vm9227_vm1, %v9226_v25 }
 0x109   :  { %8050 = vmatmul.mubr.msk.bf16.gmra.mrb[40].mxu0 %vm83_vm0, %v9480_v51 }
 0x10a   :  { %8053 = vmatprep.mubr.msk.bf16.mxu0 %vm9227_vm1, %v9226_v25 }
 0x111   :  { %8054 = vmatmul.mubr.msk.bf16.gmra.mrb[44].mxu0 %vm83_vm0, %v9500_v59 }
 0x18c   :  { %v290_v8 = vpop.f32.mrb[0].mxu0  ;;  %v386_v11 = vpop.f32.mrb[0].mxu1 }
 0x18d   :  { %v7915_v12 = vpop.f32.mrb[1].mxu0  ;;  %v7935_v13 = vpop.f32.mrb[1].mxu1  ;;  %v291_v16 = vadd.f32 %v9577_v6, %v290_v8  ;;  %v387_v18 = vadd.f32 %v6913_v10, %v386_v11 }
 0x18e   :  { %v293_v0 = vpop.f32.mrb[2].mxu0  ;;  %v389_v14 = vpop.f32.mrb[2].mxu1 }
 0x18f   :  { %v294_v19 = vadd.f32 %v9577_v6, %v293_v0  ;;  %v390_v20 = vadd.f32 %v6913_v10, %v389_v14  ;;  %v7916_v21 = vpop.f32.mrb[3].mxu0  ;;  %v7936_v22 = vpop.f32.mrb[3].mxu1 }
 0x190   :  { %v6946_v22 = vld [vmem:[%s11346_s6 + $0x1] ss:$0 sm:$0xff] }
 0x191   :  { %v505_v23 = vpack.c.bf16 %v294_v19, %v291_v16  ;;  %v509_v24 = vpack.c.bf16 %v390_v20, %v387_v18 }
 0x193   :  { %8753 = vmatprep.subr.msk.bf16.mxu1 %vm513_vm2, %v509_v24  ;;  %7969 = vmatprep.mubr.msk.bf16.mxu1 %vm513_vm2, %v505_v23  ;;  %v521_v26 = vsel %vm513_vm2, %v509_v24, 0 }
 0x194   :  { %v298_v27 = vpop.f32.mrb[4].mxu0  ;;  %v394_v1 = vpop.f32.mrb[4].mxu1  ;;  %7966 = vmatpush3.bf16.xpose.msra.mxu1 %v521_v26 }
 0x195   :  { %v395_v28 = vadd.f32 %v6913_v10, %v394_v1  ;;  %v7919_v29 = vpop.f32.mrb[5].mxu0  ;;  %v7939_v30 = vpop.f32.mrb[5].mxu1  ;;  %v299_v38 = vadd.f32 %v9577_v6, %v298_v27 }
 0x196   :  { %v301_v31 = vpop.f32.mrb[6].mxu0  ;;  %v397_v32 = vpop.f32.mrb[6].mxu1 }
 0x197   :  { %v510_v33 = vpack.c.bf16 %v395_v28, %v395_v28  ;;  %v7920_v34 = vpop.f32.mrb[7].mxu0  ;;  %v7940_v35 = vpop.f32.mrb[7].mxu1  ;;  %v302_v41 = vadd.f32 %v9577_v6, %v301_v31  ;;  %v398_v7 = vadd.f32 %v6913_v10, %v397_v32  ;;  %v506_v53 = vpack.c.bf16 %v299_v38, %v299_v38 }
 0x199   :  { %8754 = vmatprep.subr.msk.bf16.mxu1 %vm513_vm2, %v510_v33  ;;  %v524_v36 = vsel %vm513_vm2, %v510_v33, 0 }
 0x19c   :  { %v306_v39 = vpop.f32.mrb[8].mxu0  ;;  %v402_v40 = vpop.f32.mrb[8].mxu1  ;;  %7968 = vmatpush3.bf16.xpose.msra.mxu1 %v524_v36 }
 0x19d   :  { %v307_v9 = vadd.f32 %v9577_v6, %v306_v39  ;;  %v403_v42 = vadd.f32 %v6913_v10, %v402_v40  ;;  %v7923_v43 = vpop.f32.mrb[9].mxu0  ;;  %v7943_v44 = vpop.f32.mrb[9].mxu1 }
 0x19e   :  { %v309_v45 = vpop.f32.mrb[10].mxu0  ;;  %v405_v46 = vpop.f32.mrb[10].mxu1 }
 0x19f   :  { %v507_v47 = vpack.c.bf16 %v307_v9, %v302_v41  ;;  %v511_v48 = vpack.c.bf16 %v403_v42, %v398_v7  ;;  %v406_v49 = vadd.f32 %v6913_v10, %v405_v46  ;;  %v7924_v50 = vpop.f32.mrb[11].mxu0  ;;  %v7944_v52 = vpop.f32.mrb[11].mxu1  ;;  %v310_v3 = vadd.f32 %v9577_v6, %v309_v45  ;;  %v6980_v42 = vld [vmem:[%s11348_s10 + $0x1] ss:$0 sm:$0xff] }
 0x1a1   :  { %8755 = vmatprep.subr.msk.bf16.mxu1 %vm513_vm2, %v511_v48  ;;  %v512_v15 = vpack.c.bf16 %v406_v49, %v406_v49  ;;  %v581_v54 = vsel %vm513_vm2, %v511_v48, 0  ;;  %v508_v11 = vpack.c.bf16 %v310_v3, %v310_v3  ;;  %v9642_v3 = vld [vmem:[%s11349_s2] sm:$0xff] }
 0x1a3   :  { %7970 = vmatmul.mubr.msk.bf16.vlgmr.msra.gmra.mrb[12].mxu1 %vm513_vm2, %v506_v53  ;;  %v584_v63 = vsel %vm513_vm2, %v512_v15, 0 }
 0x1a4   :  { %v482_v17 = vpop.f32.mrb[12].mxu0  ;;  %7974 = vmatpush3.bf16.xpose.msra.mxu1 %v581_v54  ;;  %7977 = vmatprep.mubr.msk.bf16.mxu1 %vm513_vm2, %v507_v47 }
 0x1a5   :  { %v7955_v56 = vpop.f32.mrb[13].mxu0  ;;  %8756 = vmatprep.subr.msk.bf16.mxu1 %vm513_vm2, %v512_v15  ;;  %v483_v58 = vadd.f32 %v6921_v55, %v482_v17 }
 0x1a6   :  { %v485_v57 = vpop.f32.mrb[14].mxu0 }
 0x1a7   :  { %v486_v60 = vadd.f32 %v6921_v55, %v485_v57  ;;  %v7956_v61 = vpop.f32.mrb[15].mxu0 }
 0x1a9   :  { %v705_v62 = vpack.c.bf16 %v486_v60, %v483_v58 }
 0x1ac   :  { %v490_v2 = vpop.f32.mrb[16].mxu0  ;;  %7976 = vmatpush3.bf16.xpose.msra.mxu1 %v584_v63 }
 0x1ad   :  { %v7959_v4 = vpop.f32.mrb[17].mxu0  ;;  %7981 = vmatprep.subr.bf16.mxu1 %v705_v62  ;;  %v491_v8 = vadd.f32 %v6921_v55, %v490_v2 }
 0x1ae   :  { %v493_v5 = vpop.f32.mrb[18].mxu0 }
 0x1af   :  { %v7960_v10 = vpop.f32.mrb[19].mxu0  ;;  %v706_v12 = vpack.c.bf16 %v491_v8, %v491_v8  ;;  %v494_v0 = vadd.f32 %v6921_v55, %v493_v5  ;;  %v9647_v8 = vld [vmem:[%s11349_s2 + $0x8] sm:$0xff] }
 0x1b0   :  { %v9652_v10 = vld [vmem:[%s11349_s2 + $0x10] sm:$0xff] }
 0x1b1   :  { %v717_v20 = vsel %vm715_vm3, %v706_v12, 0 }
 0x1b3   :  { %7978 = vmatmul.mubr.msk.bf16.vlgmr.msra.gmra.mrb[16].mxu1 %vm513_vm2, %v508_v11 }
 0x1b4   :  { %v498_v13 = vpop.f32.mrb[20].mxu0  ;;  %7982 = vmatpush3.bf16.msra.mxu1 %v705_v62 }
 0x1b5   :  { %v499_v14 = vadd.f32 %v6921_v55, %v498_v13  ;;  %v7963_v16 = vpop.f32.mrb[21].mxu0  ;;  %8757 = vmatprep.subr.msk.bf16.mxu1 %vm715_vm3, %v706_v12 }
 0x1b6   :  { %v501_v18 = vpop.f32.mrb[22].mxu0 }
 0x1b7   :  { %v9604_v19 = vadd.f32 %v6921_v55, %v501_v18  ;;  %v7964_v6 = vpop.f32.mrb[23].mxu0  ;;  %v9607_v21 = vpack.c.bf16 %v499_v14, %v494_v0 }
 0x1b8   :  { %7984 = vmatpush3.bf16.msra.mxu1 %v717_v20 }
 0x1b9   :  { %7989 = vmatprep.subr.bf16.mxu1 %v9607_v21 }
 0x1bc   :  { %v904_v23 = vpop.f32.mrb[24].mxu0 }
 0x1bd   :  { %v8007_v24 = vpop.f32.mrb[25].mxu0  ;;  %v9613_v27 = vadd.f32 %v6946_v22, %v904_v23 }
 0x1be   :  { %v907_v26 = vpop.f32.mrb[26].mxu0 }
 0x1bf   :  { %v9615_v1 = vadd.f32 %v6946_v22, %v907_v26  ;;  %v8008_v28 = vpop.f32.mrb[27].mxu0 }
 0x1c1   :  { %v1123_v29 = vpack.c.bf16 %v9615_v1, %v9613_v27 }
 0x1c4   :  { %v912_v30 = vpop.f32.mrb[28].mxu0 }
 0x1c5   :  { %v9619_v31 = vadd.f32 %v6946_v22, %v912_v30  ;;  %v8011_v32 = vpop.f32.mrb[29].mxu0 }
 0x1c6   :  { %v915_v33 = vpop.f32.mrb[30].mxu0 }
 0x1c7   :  { %v9621_v34 = vadd.f32 %v6946_v22, %v915_v33  ;;  %v8012_v35 = vpop.f32.mrb[31].mxu0 }
 0x1cc   :  { %v920_v36 = vpop.f32.mrb[32].mxu0 }
 0x1cd   :  { %v9623_v38 = vadd.f32 %v6946_v22, %v920_v36  ;;  %v8015_v39 = vpop.f32.mrb[33].mxu0 }
 0x1ce   :  { %v923_v40 = vpop.f32.mrb[34].mxu0 }
 0x1cf   :  { %v1125_v41 = vpack.c.bf16 %v9623_v38, %v9621_v34  ;;  %v9627_v7 = vadd.f32 %v6946_v22, %v923_v40  ;;  %v8016_v9 = vpop.f32.mrb[35].mxu0 }
 0x1d4   :  { %v1100_v43 = vpop.f32.mrb[36].mxu0 }
 0x1d5   :  { %v8047_v44 = vpop.f32.mrb[37].mxu0  ;;  %v1101_v46 = vadd.f32 %v6980_v42, %v1100_v43 }
 0x1d6   :  { %v1103_v45 = vpop.f32.mrb[38].mxu0 }
 0x1d7   :  { %v1104_v47 = vadd.f32 %v6980_v42, %v1103_v45  ;;  %v8048_v48 = vpop.f32.mrb[39].mxu0 }
 0x1d9   :  { %v1321_v49 = vpack.c.bf16 %v1104_v47, %v1101_v46 }
 0x1db   :  { %8073 = vmatprep.subr.bf16.mxu0 %v1321_v49 }
 0x1dc   :  { %v1108_v50 = vpop.f32.mrb[40].mxu0  ;;  %8074 = vmatpush3.bf16.msra.mxu0 %v1321_v49 }
 0x1dd   :  { %v1109_v52 = vadd.f32 %v6980_v42, %v1108_v50  ;;  %v8051_v53 = vpop.f32.mrb[41].mxu0 }
 0x1de   :  { %v1111_v15 = vpop.f32.mrb[42].mxu0 }
 0x1df   :  { %v1322_v54 = vpack.c.bf16 %v1109_v52, %v1109_v52  ;;  %v1112_v55 = vadd.f32 %v6980_v42, %v1111_v15  ;;  %v8052_v17 = vpop.f32.mrb[43].mxu0 }
 0x1e1   :  { %v1332_v56 = vsel %vm715_vm3, %v1322_v54, 0  ;;  %8763 = vmatprep.subr.msk.bf16.mxu0 %vm715_vm3, %v1322_v54 }
 0x1e2   :  { %8076 = vmatpush3.bf16.msra.mxu0 %v1332_v56 }
 0x1e3   :  { %8089 = vmatprep.subr.bf16.mxu0 %v9226_v25 }
 0x1e4   :  { %v1116_v57 = vpop.f32.mrb[44].mxu0 }
 0x1e5   :  { %v1117_v58 = vadd.f32 %v6980_v42, %v1116_v57  ;;  %v8055_v60 = vpop.f32.mrb[45].mxu0 }
 0x1e6   :  { %v1119_v61 = vpop.f32.mrb[46].mxu0 }
 0x1e7   :  { %v9635_v62 = vpack.c.bf16 %v1117_v58, %v1112_v55  ;;  %v9637_v63 = vadd.f32 %v6980_v42, %v1119_v61  ;;  %v8056_v2 = vpop.f32.mrb[47].mxu0 }
 0x276   :  { %v7971_v4 = vpop.f32.mrb[12].mxu1 }
 0x277   :  { %v560_v5 = vpop.f32.mrb[13].mxu1  ;;  %v569_v16 = vadd.f32 %v7971_v4, %v9652_v10 }
 0x278   :  { %v7972_v11 = vpop.f32.mrb[14].mxu1  ;;  %v561_v12 = vadd.f32 %v560_v5, %v9642_v3 }
 0x279   :  { %v563_v13 = vpop.f32.mrb[15].mxu1  ;;  %v641_v6 = vsel %vm634_vm4, %v569_v16, -inf }
 0x27a   :  { %v635_v0 = vsel %vm634_vm4, %v561_v12, -inf  ;;  %v564_v14 = vadd.f32 %v563_v13, %v9647_v8 }
 0x27b   :  { %636 = vmax.xlane.f32.xlu0 %v635_v0 }
 0x27c   :  { %v638_v18 = vsel %vm634_vm4, %v564_v14, -inf }
 0x27d   :  { %639 = vmax.xlane.f32.xlu1 %v638_v18 }
 0x27f   :  { %642 = vmax.xlane.f32.xlu0 %v641_v6 }
 0x286   :  { %v7979_v20 = vpop.f32.mrb[16].mxu1 }
 0x287   :  { %v620_v22 = vpop.f32.mrb[17].mxu1  ;;  %v629_v32 = vadd.f32 %v7979_v20, %v9652_v10 }
 0x288   :  { %v7980_v23 = vpop.f32.mrb[18].mxu1  ;;  %v621_v24 = vadd.f32 %v620_v22, %v9642_v3 }
 0x289   :  { %v623_v26 = vpop.f32.mrb[19].mxu1  ;;  %v650_v35 = vsel %vm634_vm4, %v629_v32, -inf }
 0x28a   :  { %v644_v28 = vsel %vm634_vm4, %v621_v24, -inf  ;;  %v624_v30 = vadd.f32 %v623_v26, %v9647_v8 }
 0x28b   :  { %645 = vmax.xlane.f32.xlu1 %v644_v28 }
 0x28c   :  { %v647_v33 = vsel %vm634_vm4, %v624_v30, -inf }
 0x28d   :  { %648 = vmax.xlane.f32.xlu0 %v647_v33  ;;  %v708_v33 = vpack.c.bf16 %v9604_v19, %v9604_v19 }
 0x28f   :  { %651 = vmax.xlane.f32.xlu1 %v650_v35 }
 0x308   :  { %v637_v36 = vpop.xlane.xlu0 %636 }
 0x309   :  { %v653_v39 = vsub.f32 %v561_v12, %v637_v36  ;;  %v774_v36 = vsel %vm715_vm3, %v708_v33, 0 }
 0x30a   :  { %v640_v40 = vpop.xlane.xlu1 %639 }
 0x30b   :  { %v659_v9 = vmul.f32 1.442695, %v653_v39  ;;  %v654_v42 = vsub.f32 %v564_v14, %v640_v40 }
 0x30c   :  { %v643_v43 = vpop.xlane.xlu0 %642 }
 0x30d   :  { %8976 = vpow2.f32 %v659_v9  ;;  %v661_v44 = vmul.f32 1.442695, %v654_v42  ;;  %v655_v45 = vsub.f32 %v569_v16, %v643_v43 }
 0x30f   :  { %8978 = vpow2.f32 %v661_v44  ;;  %v663_v46 = vmul.f32 1.442695, %v655_v45  ;;  %v8824_v45 = vld [vmem:[%s11375_s9 + $0x20] sm:$0xff]  }
 0x311   :  { %8980 = vpow2.f32 %v663_v46  ;;  %v8825_v46 = vld [vmem:[%s11375_s9 + $0x28] sm:$0xff]  }
 0x317   :  { %v8977_v47 = vpop.eup %8976 }
 0x318   :  { %v646_v48 = vpop.xlane.xlu1 %645  ;;  %v671_v49 = vsel %vm634_vm4, %v8977_v47, 0.0 }
 0x319   :  { %v8979_v50 = vpop.eup %8978  ;;  %v656_v52 = vsub.f32 %v621_v24, %v646_v48  ;;  %672 = vadd.xlane.f32.xlu0 %v671_v49  ;;  %v8827_v48 = vld [vmem:[%s11375_s9 + $0x38] sm:$0xff]  }
 0x31a   :  { %v649_v53 = vpop.xlane.xlu0 %648  ;;  %v674_v15 = vsel %vm634_vm4, %v8979_v50, 0.0 }
 0x31b   :  { %v8981_v54 = vpop.eup %8980  ;;  %v665_v55 = vmul.f32 1.442695, %v656_v52  ;;  %v657_v17 = vsub.f32 %v624_v30, %v649_v53  ;;  %675 = vadd.xlane.f32.xlu1 %v674_v15 }
 0x31c   :  { %v652_v56 = vpop.xlane.xlu1 %651  ;;  %v677_v57 = vsel %vm634_vm4, %v8981_v54, 0.0 }
 0x31d   :  { %8982 = vpow2.f32 %v665_v55  ;;  %v667_v58 = vmul.f32 1.442695, %v657_v17  ;;  %v658_v60 = vsub.f32 %v629_v32, %v652_v56  ;;  %678 = vadd.xlane.f32.xlu0 %v677_v57  ;;  %v6963_v56 = vld [vmem:[%s11347_s8 + $0x1] ss:$0 sm:$0xff] }
 0x31f   :  { %8984 = vpow2.f32 %v667_v58  ;;  %v669_v61 = vmul.f32 1.442695, %v658_v60 }
 0x321   :  { %8986 = vpow2.f32 %v669_v61 }
 0x327   :  { %v8983_v2 = vpop.eup %8982 }
 0x328   :  { %v680_v4 = vsel %vm634_vm4, %v8983_v2, 0.0 }
 0x329   :  { %v8985_v5 = vpop.eup %8984  ;;  %681 = vadd.xlane.f32.xlu1 %v680_v4 }
 0x32a   :  { %v683_v11 = vsel %vm634_vm4, %v8985_v5, 0.0 }
 0x32b   :  { %v8987_v12 = vpop.eup %8986  ;;  %684 = vadd.xlane.f32.xlu0 %v683_v11 }
 0x32c   :  { %v686_v13 = vsel %vm634_vm4, %v8987_v12, 0.0 }
 0x32d   :  { %687 = vadd.xlane.f32.xlu1 %v686_v13 }
 0x3a6   :  { %v673_v0 = vpop.xlane.xlu0 %672 }
 0x3a7   :  { %8988 = vrcp.f32 %v673_v0 }
 0x3a8   :  { %v676_v14 = vpop.xlane.xlu1 %675 }
 0x3a9   :  { %8990 = vrcp.f32 %v676_v14 }
 0x3aa   :  { %v679_v16 = vpop.xlane.xlu0 %678 }
 0x3ab   :  { %8992 = vrcp.f32 %v679_v16 }
 0x3b1   :  { %v8989_v18 = vpop.eup %8988 }
 0x3b2   :  { %v695_v20 = vmul.f32 %v8989_v18, %v8977_v47  ;;  %v8826_v47 = vld [vmem:[%s11375_s9 + $0x30] sm:$0xff]  }
 0x3b3   :  { %v8991_v6 = vpop.eup %8990 }
 0x3b4   :  { %v696_v22 = vmul.f32 %v8991_v6, %v8979_v50 }
 0x3b5   :  { %v8993_v23 = vpop.eup %8992 }
 0x3b6   :  { %v682_v24 = vpop.xlane.xlu1 %681  ;;  %v701_v26 = vpack.c.bf16 %v696_v22, %v695_v20  ;;  %v697_v28 = vmul.f32 %v8993_v23, %v8981_v54 }
 0x3b7   :  { %8994 = vrcp.f32 %v682_v24 }
 0x3b8   :  { %v685_v30 = vpop.xlane.xlu0 %684  ;;  %7985 = vmatprep.mubr.msk.bf16.mxu1 %vm634_vm4, %v701_v26  ;;  %v702_v32 = vpack.c.bf16 %v697_v28, %v697_v28 }
 0x3b9   :  { %8996 = vrcp.f32 %v685_v30 }
 0x3ba   :  { %v688_v35 = vpop.xlane.xlu1 %687  ;;  %7986 = vmatmul.mubr.msk.bf16.vlgmr.msra.gmra.mrb[20].mxu1 %vm634_vm4, %v702_v32 }
 0x3bb   :  { %8998 = vrcp.f32 %v688_v35  ;;  %7990 = vmatpush3.bf16.msra.mxu1 %v9607_v21 }
 0x3bc   :  { %8758 = vmatprep.subr.msk.bf16.mxu1 %vm715_vm3, %v708_v33  ;;  %v1124_v33 = vpack.c.bf16 %v9619_v31, %v9619_v31  ;;  %v1126_v31 = vpack.c.bf16 %v9627_v7, %v9627_v7 }
 0x3bf   :  { %7992 = vmatpush3.bf16.msra.mxu1 %v774_v36 }
 0x3c0   :  { %8017 = vmatprep.subr.bf16.mxu1 %v9226_v25 }
 0x3c1   :  { %v8995_v39 = vpop.eup %8994 }
 0x3c2   :  { %v698_v9 = vmul.f32 %v8995_v39, %v8983_v2 }
 0x3c3   :  { %v8997_v40 = vpop.eup %8996 }
 0x3c4   :  { %v699_v42 = vmul.f32 %v8997_v40, %v8985_v5  ;;  %v1324_v40 = vpack.c.bf16 %v9637_v63, %v9637_v63 }
 0x3c5   :  { %v8999_v43 = vpop.eup %8998 }
 0x3c6   :  { %v703_v44 = vpack.c.bf16 %v699_v42, %v698_v9  ;;  %v700_v19 = vmul.f32 %v8999_v43, %v8987_v12  ;;  %v1389_v34 = vsel %vm715_vm3, %v1324_v40, 0 }
 0x3c8   :  { %7993 = vmatprep.mubr.msk.bf16.mxu1 %vm634_vm4, %v703_v44  ;;  %v704_v21 = vpack.c.bf16 %v700_v19, %v700_v19 }
 0x3ca   :  { %7994 = vmatmul.mubr.msk.bf16.vlgmr.msra.gmra.mrb[24].mxu1 %vm634_vm4, %v704_v21 }
 0x3cb   :  { %8018 = vmatpush3.bf16.msra.mxu1 %v8824_v45  ;;  %8025 = vmatprep.mubr.msk.bf16.mxu1 %vm9227_vm1, %v9226_v25 }
 0x3cc   :  { %8019 = vmatprep.subr.bf16.mxu1 %v9226_v25 }
 0x3cf   :  { %8020 = vmatpush3.bf16.msra.mxu1 %v8825_v46 }
 0x3d0   :  { %8021 = vmatprep.subr.bf16.mxu1 %v9226_v25 }
 0x3d3   :  { %8022 = vmatpush3.bf16.msra.mxu1 %v8826_v47 }
 0x3d4   :  { %8023 = vmatprep.subr.bf16.mxu1 %v9226_v25 }
 0x3d7   :  { %8024 = vmatpush3.bf16.msra.mxu1 %v8827_v48 }
 0x3da   :  { %8026 = vmatmul.mubr.msk.bf16.vlgmr.msra.gmra.mrb[28].mxu1 %vm83_vm0, %v9456_v37 }
 0x3db   :  { %8029 = vmatprep.mubr.msk.bf16.mxu1 %vm9227_vm1, %v9226_v25 }
 0x3e2   :  { %8030 = vmatmul.mubr.msk.bf16.gmra.mrb[32].mxu1 %vm83_vm0, %v9480_v51 }
 0x3e3   :  { %8033 = vmatprep.mubr.msk.bf16.mxu1 %vm9227_vm1, %v9226_v25 }
 0x3ea   :  { %8034 = vmatmul.mubr.msk.bf16.gmra.mrb[36].mxu1 %vm83_vm0, %v9500_v59 }
 0x3eb   :  { %8061 = vmatprep.mubr.msk.bf16.mxu1 %vm513_vm2, %v1123_v29 }
 0x48d   :  { %v9713_v49 = vpop.f32.mrb[20].mxu1 }
 0x48e   :  { %v9715_v50 = vpop.f32.mrb[21].mxu1 }
 0x48f   :  { %v7988_v52 = vpop.f32.mrb[22].mxu1 }
 0x490   :  { %v9717_v53 = vpop.f32.mrb[23].mxu1 }
 0x491   :  { %v824_v15 = vpack.c.bf16 %v9717_v53, %v9715_v50  ;;  %v8832_v50 = vld [vmem:[%s11375_s9 + $0x58] sm:$0xff]  }
 0x49d   :  { %v9721_v54 = vpop.f32.mrb[24].mxu1 }
 0x49e   :  { %v9723_v55 = vpop.f32.mrb[25].mxu1 }
 0x49f   :  { %v825_v17 = vpack.c.bf16 %v9723_v55, %v9713_v49  ;;  %v7996_v27 = vpop.f32.mrb[26].mxu1  ;;  %v8833_v49 = vld [vmem:[%s11350_s11 + $0x8] sm:$0xff]  }
 0x4a0   :  { %v9727_v1 = vpop.f32.mrb[27].mxu1 }
 0x4a1   :  { %v826_v29 = vpack.c.bf16 %v9721_v54, %v9727_v1 }
 0x4ad   :  { %v1002_v57 = vpop.f32.mrb[28].mxu1 }
 0x4ae   :  { %v8027_v58 = vpop.f32.mrb[29].mxu1  ;;  %v1003_v61 = vadd.f32 %v6963_v56, %v1002_v57 }
 0x4af   :  { %v1005_v60 = vpop.f32.mrb[30].mxu1 }
 0x4b0   :  { %v1006_v2 = vadd.f32 %v6963_v56, %v1005_v60  ;;  %v8028_v4 = vpop.f32.mrb[31].mxu1 }
 0x4b2   :  { %v1127_v5 = vpack.c.bf16 %v1006_v2, %v1003_v61 }
 0x4b4   :  { %8759 = vmatprep.subr.msk.bf16.mxu1 %vm513_vm2, %v1127_v5  ;;  %v1138_v11 = vsel %vm513_vm2, %v1127_v5, 0 }
 0x4b5   :  { %v1010_v12 = vpop.f32.mrb[32].mxu1  ;;  %8058 = vmatpush3.bf16.xpose.msra.mxu1 %v1138_v11 }
 0x4b6   :  { %v1011_v13 = vadd.f32 %v6963_v56, %v1010_v12  ;;  %v8031_v0 = vpop.f32.mrb[33].mxu1 }
 0x4b7   :  { %v1013_v14 = vpop.f32.mrb[34].mxu1 }
 0x4b8   :  { %v1128_v16 = vpack.c.bf16 %v1011_v13, %v1011_v13  ;;  %v8032_v18 = vpop.f32.mrb[35].mxu1  ;;  %v1014_v22 = vadd.f32 %v6963_v56, %v1013_v14 }
 0x4ba   :  { %8760 = vmatprep.subr.msk.bf16.mxu1 %vm513_vm2, %v1128_v16  ;;  %v1141_v6 = vsel %vm513_vm2, %v1128_v16, 0 }
 0x4bd   :  { %v1018_v20 = vpop.f32.mrb[36].mxu1  ;;  %8060 = vmatpush3.bf16.xpose.msra.mxu1 %v1141_v6 }
 0x4be   :  { %v1019_v23 = vadd.f32 %v6963_v56, %v1018_v20  ;;  %v8035_v24 = vpop.f32.mrb[37].mxu1 }
 0x4bf   :  { %v1021_v26 = vpop.f32.mrb[38].mxu1 }
 0x4c0   :  { %v1129_v28 = vpack.c.bf16 %v1019_v23, %v1014_v22  ;;  %v1022_v30 = vadd.f32 %v6963_v56, %v1021_v26  ;;  %v8036_v32 = vpop.f32.mrb[39].mxu1 }
 0x4c2   :  { %8761 = vmatprep.subr.msk.bf16.mxu1 %vm513_vm2, %v1129_v28  ;;  %v1130_v35 = vpack.c.bf16 %v1022_v30, %v1022_v30  ;;  %v1198_v36 = vsel %vm513_vm2, %v1129_v28, 0 }
 0x4c4   :  { %8062 = vmatmul.mubr.msk.bf16.vlgmr.msra.gmra.mrb[40].mxu1 %vm513_vm2, %v1124_v33  ;;  %v1201_v39 = vsel %vm513_vm2, %v1130_v35, 0 }
 0x4c5   :  { %8066 = vmatpush3.bf16.xpose.msra.mxu1 %v1198_v36  ;;  %8069 = vmatprep.mubr.msk.bf16.mxu1 %vm513_vm2, %v1125_v41 }
 0x4c6   :  { %8762 = vmatprep.subr.msk.bf16.mxu1 %vm513_vm2, %v1130_v35 }
 0x4cd   :  { %8068 = vmatpush3.bf16.xpose.msra.mxu1 %v1201_v39 }
 0x4ce   :  { %8081 = vmatprep.subr.bf16.mxu1 %v9635_v62 }
 0x4d4   :  { %8070 = vmatmul.mubr.msk.bf16.vlgmr.msra.gmra.mrb[44].mxu1 %vm513_vm2, %v1126_v31 }
 0x4d5   :  { %8082 = vmatpush3.bf16.msra.mxu1 %v9635_v62 }
 0x4d6   :  { %8764 = vmatprep.subr.msk.bf16.mxu1 %vm715_vm3, %v1324_v40 }
 0x4d9   :  { %8084 = vmatpush3.bf16.msra.mxu1 %v1389_v34 }
 0x4da   :  { %8103 = vmatprep.subr.bf16.mxu1 %v9226_v25 }
 0x597   :  { %v8063_v38 = vpop.f32.mrb[40].mxu1 }
 0x598   :  { %v1177_v41 = vpop.f32.mrb[41].mxu1  ;;  %v1186_v43 = vadd.f32 %v8063_v38, %v9652_v10 }
 0x599   :  { %v1178_v9 = vadd.f32 %v1177_v41, %v9642_v3  ;;  %v8064_v42 = vpop.f32.mrb[42].mxu1 }
 0x59a   :  { %v1180_v7 = vpop.f32.mrb[43].mxu1  ;;  %v1257_v19 = vsel %vm634_vm4, %v1186_v43, -inf }
 0x59b   :  { %v1181_v63 = vadd.f32 %v1180_v7, %v9647_v8  ;;  %v1251_v44 = vsel %vm634_vm4, %v1178_v9, -inf }
 0x59c   :  { %1252 = vmax.xlane.f32.xlu0 %v1251_v44 }
 0x59d   :  { %v1254_v62 = vsel %vm634_vm4, %v1181_v63, -inf }
 0x59e   :  { %1255 = vmax.xlane.f32.xlu1 %v1254_v62 }
 0x5a0   :  { %1258 = vmax.xlane.f32.xlu0 %v1257_v19 }
 0x5a7   :  { %v8071_v45 = vpop.f32.mrb[44].mxu1 }
 0x5a8   :  { %v1237_v21 = vpop.f32.mrb[45].mxu1  ;;  %v1246_v52 = vadd.f32 %v8071_v45, %v9652_v10 }
 0x5a9   :  { %v1238_v46 = vadd.f32 %v1237_v21, %v9642_v3  ;;  %v8072_v47 = vpop.f32.mrb[46].mxu1 }
 0x5aa   :  { %v1240_v48 = vpop.f32.mrb[47].mxu1  ;;  %v1266_v58 = vsel %vm634_vm4, %v1246_v52, -inf }
 0x5ab   :  { %v1241_v27 = vadd.f32 %v1240_v48, %v9647_v8  ;;  %v1260_v56 = vsel %vm634_vm4, %v1238_v46, -inf }
 0x5ac   :  { %1261 = vmax.xlane.f32.xlu1 %v1260_v56 }
 0x5ad   :  { %v1263_v57 = vsel %vm634_vm4, %v1241_v27, -inf }
 0x5ae   :  { %1264 = vmax.xlane.f32.xlu0 %v1263_v57 }
 0x5b0   :  { %1267 = vmax.xlane.f32.xlu1 %v1266_v58 }
 0x629   :  { %v1253_v60 = vpop.xlane.xlu0 %1252 }
 0x62a   :  { %v1269_v61 = vsub.f32 %v1178_v9, %v1253_v60 }
 0x62b   :  { %v1256_v2 = vpop.xlane.xlu1 %1255 }
 0x62c   :  { %v1275_v4 = vmul.f32 1.442695, %v1269_v61  ;;  %v1270_v3 = vsub.f32 %v1181_v63, %v1256_v2  ;;  %v8828_v61 = vld [vmem:[%s11350_s11] sm:$0xff]  }
 0x62d   :  { %v1259_v5 = vpop.xlane.xlu0 %1258 }
 0x62e   :  { %9000 = vpow2.f32 %v1275_v4  ;;  %v1277_v11 = vmul.f32 1.442695, %v1270_v3  ;;  %v1271_v12 = vsub.f32 %v1186_v43, %v1259_v5  ;;  %v8829_v4 = vld [vmem:[%s11375_s9 + $0x40] sm:$0xff]   ;;  %v8830_v3 = vld [vmem:[%s11375_s9 + $0x48] sm:$0xff]   ;;  %v8831_v5 = vld [vmem:[%s11375_s9 + $0x50] sm:$0xff]  }
 0x630   :  { %9002 = vpow2.f32 %v1277_v11  ;;  %v1279_v8 = vmul.f32 1.442695, %v1271_v12  ;;  %v8836_v11 = vld [vmem:[%s11374_s7 + $0x50] sm:$0xff]   ;;  %v8837_v12 = vld [vmem:[%s11374_s7 + $0x58] sm:$0xff]  }
 0x632   :  { %9004 = vpow2.f32 %v1279_v8 }
 0x638   :  { %v9001_v13 = vpop.eup %9000 }
 0x639   :  { %v1262_v0 = vpop.xlane.xlu1 %1261  ;;  %v1287_v14 = vsel %vm634_vm4, %v9001_v13, 0.0 }
 0x63a   :  { %v9003_v16 = vpop.eup %9002  ;;  %v1272_v18 = vsub.f32 %v1238_v46, %v1262_v0  ;;  %1288 = vadd.xlane.f32.xlu0 %v1287_v14 }
 0x63b   :  { %v1265_v6 = vpop.xlane.xlu0 %1264  ;;  %v1290_v20 = vsel %vm634_vm4, %v9003_v16, 0.0 }
 0x63c   :  { %v9005_v22 = vpop.eup %9004  ;;  %v1281_v23 = vmul.f32 1.442695, %v1272_v18  ;;  %v1273_v24 = vsub.f32 %v1241_v27, %v1265_v6  ;;  %1291 = vadd.xlane.f32.xlu1 %v1290_v20 }
 0x63d   :  { %v1268_v26 = vpop.xlane.xlu1 %1267  ;;  %v1293_v28 = vsel %vm634_vm4, %v9005_v22, 0.0 }
 0x63e   :  { %9006 = vpow2.f32 %v1281_v23  ;;  %v1283_v30 = vmul.f32 1.442695, %v1273_v24  ;;  %v1274_v32 = vsub.f32 %v1246_v52, %v1268_v26  ;;  %1294 = vadd.xlane.f32.xlu0 %v1293_v28  ;;  %v8838_v28 = vld [vmem:[%s11378_s28 + $0x40] sm:$0xff]  }
 0x640   :  { %9008 = vpow2.f32 %v1283_v30  ;;  %v1285_v33 = vmul.f32 1.442695, %v1274_v32 }
 0x642   :  { %9010 = vpow2.f32 %v1285_v33  ;;  %v8839_v33 = vld [vmem:[%s11378_s28 + $0x48] sm:$0xff]  }
 0x648   :  { %v9007_v35 = vpop.eup %9006 }
 0x649   :  { %v1296_v36 = vsel %vm634_vm4, %v9007_v35, 0.0 }
 0x64a   :  { %v9009_v39 = vpop.eup %9008  ;;  %1297 = vadd.xlane.f32.xlu1 %v1296_v36 }
 0x64b   :  { %v1299_v31 = vsel %vm634_vm4, %v9009_v39, 0.0 }
 0x64c   :  { %v9011_v40 = vpop.eup %9010  ;;  %1300 = vadd.xlane.f32.xlu0 %v1299_v31 }
 0x64d   :  { %v1302_v34 = vsel %vm634_vm4, %v9011_v40, 0.0 }
 0x64e   :  { %1303 = vadd.xlane.f32.xlu1 %v1302_v34  ;;  %v8841_v34 = vld [vmem:[%s11378_s28 + $0x58] sm:$0xff]  }
 0x6c7   :  { %v1289_v38 = vpop.xlane.xlu0 %1288 }
 0x6c8   :  { %9012 = vrcp.f32 %v1289_v38  ;;  %v7032_v38 = vld [vmem:[%s11347_s8 + $0x2] ss:$0 sm:$0xff] }
 0x6c9   :  { %v1292_v41 = vpop.xlane.xlu1 %1291 }
 0x6ca   :  { %9014 = vrcp.f32 %v1292_v41 }
 0x6cb   :  { %v1295_v9 = vpop.xlane.xlu0 %1294 }
 0x6cc   :  { %9016 = vrcp.f32 %v1295_v9 }
 0x6d2   :  { %v9013_v42 = vpop.eup %9012 }
 0x6d3   :  { %v1311_v43 = vmul.f32 %v9013_v42, %v9001_v13 }
 0x6d4   :  { %v9015_v7 = vpop.eup %9014 }
 0x6d5   :  { %v1312_v63 = vmul.f32 %v9015_v7, %v9003_v16 }
 0x6d6   :  { %v9017_v44 = vpop.eup %9016 }
 0x6d7   :  { %v1313_v62 = vmul.f32 %v9017_v44, %v9005_v22  ;;  %v1298_v19 = vpop.xlane.xlu1 %1297  ;;  %v1317_v45 = vpack.c.bf16 %v1312_v63, %v1311_v43 }
 0x6d8   :  { %9018 = vrcp.f32 %v1298_v19 }
 0x6d9   :  { %v1318_v21 = vpack.c.bf16 %v1313_v62, %v1313_v62  ;;  %v1301_v46 = vpop.xlane.xlu0 %1300  ;;  %8077 = vmatprep.mubr.msk.bf16.mxu0 %vm634_vm4, %v1317_v45 }
 0x6da   :  { %9020 = vrcp.f32 %v1301_v46 }
 0x6db   :  { %v1304_v47 = vpop.xlane.xlu1 %1303  ;;  %8078 = vmatmul.mubr.msk.bf16.vlgmr.msra.gmra.mrb[48].mxu0 %vm634_vm4, %v1318_v21 }
 0x6dc   :  { %9022 = vrcp.f32 %v1304_v47  ;;  %8091 = vmatprep.mubr.msk.bf16.mxu0 %vm9227_vm1, %v9226_v25  ;;  %8090 = vmatpush3.bf16.msra.mxu0 %v8833_v49 }
 0x6dd   :  { %8117 = vmatprep.subr.bf16.mxu0 %v9226_v25 }
 0x6e2   :  { %v9019_v48 = vpop.eup %9018 }
 0x6e3   :  { %v1314_v27 = vmul.f32 %v9019_v48, %v9007_v35 }
 0x6e4   :  { %v9021_v52 = vpop.eup %9020 }
 0x6e5   :  { %v1315_v56 = vmul.f32 %v9021_v52, %v9009_v39  ;;  %v8840_v39 = vld [vmem:[%s11378_s28 + $0x50] sm:$0xff]  }
 0x6e6   :  { %v9023_v57 = vpop.eup %9022 }
 0x6e7   :  { %v1319_v58 = vpack.c.bf16 %v1315_v56, %v1314_v27  ;;  %v1316_v60 = vmul.f32 %v9023_v57, %v9011_v40 }
 0x6e9   :  { %8085 = vmatprep.mubr.msk.bf16.mxu1 %vm634_vm4, %v1319_v58  ;;  %v1320_v2 = vpack.c.bf16 %v1316_v60, %v1316_v60 }
 0x6eb   :  { %8086 = vmatmul.mubr.msk.bf16.vlgmr.msra.gmra.mrb[48].mxu1 %vm634_vm4, %v1320_v2 }
 0x6ec   :  { %8104 = vmatpush3.bf16.msra.mxu1 %v8828_v61  ;;  %8105 = vmatprep.mubr.msk.bf16.mxu1 %vm9227_vm1, %v9226_v25 }
 0x6ed   :  { %8137 = vmatprep.subr.bf16.mxu1 %v9226_v25 }
 0x6f3   :  { %8106 = vmatmul.mubr.msk.bf16.vlgmr.msra.gmra.mrb[52].mxu1 %vm513_vm2, %v824_v15 }
 0x6f4   :  { %8109 = vmatprep.mubr.msk.bf16.mxu1 %vm9227_vm1, %v9226_v25  ;;  %8138 = vmatpush3.bf16.msra.mxu1 %v8829_v4 }
 0x6f5   :  { %8139 = vmatprep.subr.bf16.mxu1 %v9226_v25 }
 0x6f8   :  { %8140 = vmatpush3.bf16.msra.mxu1 %v8830_v3 }
 0x6f9   :  { %8141 = vmatprep.subr.bf16.mxu1 %v9226_v25 }
 0x6fb   :  { %8110 = vmatmul.mubr.msk.bf16.gmra.mrb[56].mxu1 %vm513_vm2, %v825_v17  ;;  %v8834_v17 = vld [vmem:[%s11374_s7 + $0x40] sm:$0xff]  }
 0x6fc   :  { %8113 = vmatprep.mubr.msk.bf16.mxu1 %vm9227_vm1, %v9226_v25  ;;  %8142 = vmatpush3.bf16.msra.mxu1 %v8831_v5 }
 0x6fd   :  { %8143 = vmatprep.subr.bf16.mxu1 %v9226_v25 }
 0x700   :  { %8144 = vmatpush3.bf16.msra.mxu1 %v8832_v50 }
 0x703   :  { %8114 = vmatmul.mubr.msk.bf16.gmra.mrb[60].mxu1 %vm513_vm2, %v826_v29  ;;  %v8835_v29 = vld [vmem:[%s11374_s7 + $0x48] sm:$0xff]  }
 0x704   :  { %8145 = vmatprep.mubr.msk.bf16.mxu1 %vm9227_vm1, %v9226_v25 }
 0x70b   :  { %8146 = vmatmul.mubr.msk.bf16.vlgmr.msra.gmra.mrb[64].mxu1 %vm83_vm0, %v9456_v37 }
 0x70c   :  { %8149 = vmatprep.mubr.msk.bf16.mxu1 %vm9227_vm1, %v9226_v25 }
 0x713   :  { %8150 = vmatmul.mubr.msk.bf16.gmra.mrb[68].mxu1 %vm83_vm0, %v9480_v51 }
 0x714   :  { %8153 = vmatprep.mubr.msk.bf16.mxu1 %vm9227_vm1, %v9226_v25 }
 0x71b   :  { %8154 = vmatmul.mubr.msk.bf16.gmra.mrb[72].mxu1 %vm83_vm0, %v9500_v59 }
 0x7ae   :  { %v8079_v53 = vpop.f32.mrb[48].mxu0 }
 0x7af   :  { %v1368_v15 = vpop.f32.mrb[49].mxu0 }
 0x7b0   :  { %v8080_v54 = vpop.f32.mrb[50].mxu0 }
 0x7b1   :  { %v1371_v55 = vpop.f32.mrb[51].mxu0 }
 0x7b2   :  { %v1439_v1 = vpack.c.bf16 %v1371_v55, %v1368_v15 }
 0x7b4   :  { %8092 = vmatmul.mubr.msk.bf16.vlgmr.msra.gmra.mrb[52].mxu0 %vm513_vm2, %v1439_v1 }
 0x7b5   :  { %8095 = vmatprep.mubr.msk.bf16.mxu0 %vm9227_vm1, %v9226_v25  ;;  %8118 = vmatpush3.bf16.msra.mxu0 %v8834_v17 }
 0x7b6   :  { %8119 = vmatprep.subr.bf16.mxu0 %v9226_v25 }
 0x7b9   :  { %8120 = vmatpush3.bf16.msra.mxu0 %v8835_v29 }
 0x7ba   :  { %8121 = vmatprep.subr.bf16.mxu0 %v9226_v25 }
 0x7bd   :  { %8122 = vmatpush3.bf16.msra.mxu0 %v8836_v11 }
 0x7be   :  { %v8087_v8 = vpop.f32.mrb[48].mxu1  ;;  %8123 = vmatprep.subr.bf16.mxu0 %v9226_v25 }
 0x7bf   :  { %v1425_v13 = vpop.f32.mrb[49].mxu1 }
 0x7c0   :  { %v1440_v0 = vpack.c.bf16 %v1425_v13, %v8079_v53  ;;  %v8088_v14 = vpop.f32.mrb[50].mxu1 }
 0x7c1   :  { %v1428_v16 = vpop.f32.mrb[51].mxu1  ;;  %8124 = vmatpush3.bf16.msra.mxu0 %v8837_v12 }
 0x7c2   :  { %v1441_v18 = vpack.c.bf16 %v8087_v8, %v1428_v16  ;;  %8096 = vmatmul.mubr.msk.bf16.gmra.mrb[56].mxu0 %vm513_vm2, %v1440_v0  ;;  %8157 = vmatprep.subr.bf16.mxu0 %v9226_v25 }
 0x7c3   :  { %8099 = vmatprep.mubr.msk.bf16.mxu0 %vm9227_vm1, %v9226_v25 }
 0x7c6   :  { %v9858_v6 = vpop.f32.mrb[52].mxu1 }
 0x7c7   :  { %v8107_v20 = vpop.f32.mrb[53].mxu1 }
 0x7c8   :  { %v9860_v22 = vpop.f32.mrb[54].mxu1 }
 0x7c9   :  { %v8108_v23 = vpop.f32.mrb[55].mxu1 }
 0x7ca   :  { %8100 = vmatmul.mubr.msk.bf16.gmra.mrb[60].mxu0 %vm513_vm2, %v1441_v18  ;;  %v7015_v18 = vld [vmem:[%s11346_s6 + $0x2] ss:$0 sm:$0xff] }
 0x7cb   :  { %8125 = vmatprep.mubr.msk.bf16.mxu0 %vm9227_vm1, %v9226_v25 }
 0x7ce   :  { %v9865_v24 = vpop.f32.mrb[56].mxu1 }
 0x7cf   :  { %v8111_v26 = vpop.f32.mrb[57].mxu1 }
 0x7d0   :  { %v9870_v30 = vpop.f32.mrb[58].mxu1 }
 0x7d1   :  { %v8112_v32 = vpop.f32.mrb[59].mxu1 }
 0x7d2   :  { %8126 = vmatmul.mubr.msk.bf16.vlgmr.msra.gmra.mrb[64].mxu0 %vm83_vm0, %v9456_v37 }
 0x7d3   :  { %8129 = vmatprep.mubr.msk.bf16.mxu0 %vm9227_vm1, %v9226_v25  ;;  %8158 = vmatpush3.bf16.msra.mxu0 %v8838_v28 }
 0x7d4   :  { %8159 = vmatprep.subr.bf16.mxu0 %v9226_v25 }
 0x7d6   :  { %v1582_v35 = vpop.f32.mrb[60].mxu1 }
 0x7d7   :  { %v8115_v36 = vpop.f32.mrb[61].mxu1  ;;  %8160 = vmatpush3.bf16.msra.mxu0 %v8839_v33 }
 0x7d8   :  { %v1585_v31 = vpop.f32.mrb[62].mxu1  ;;  %8161 = vmatprep.subr.bf16.mxu0 %v9226_v25 }
 0x7d9   :  { %v8116_v40 = vpop.f32.mrb[63].mxu1 }
 0x7da   :  { %8130 = vmatmul.mubr.msk.bf16.gmra.mrb[68].mxu0 %vm83_vm0, %v9480_v51 }
 0x7db   :  { %8133 = vmatprep.mubr.msk.bf16.mxu0 %vm9227_vm1, %v9226_v25  ;;  %8162 = vmatpush3.bf16.msra.mxu0 %v8840_v39 }
 0x7dc   :  { %8163 = vmatprep.subr.bf16.mxu0 %v9226_v25 }
 0x7de   :  { %v1762_v41 = vpop.f32.mrb[64].mxu1 }
 0x7df   :  { %v8147_v9 = vpop.f32.mrb[65].mxu1  ;;  %8164 = vmatpush3.bf16.msra.mxu0 %v8841_v34  ;;  %v1763_v7 = vadd.f32 %v7032_v38, %v1762_v41 }
 0x7e0   :  { %v1765_v42 = vpop.f32.mrb[66].mxu1 }
 0x7e1   :  { %v1766_v43 = vadd.f32 %v7032_v38, %v1765_v42  ;;  %v8148_v63 = vpop.f32.mrb[67].mxu1 }
 0x7e2   :  { %8134 = vmatmul.mubr.msk.bf16.gmra.mrb[72].mxu0 %vm83_vm0, %v9500_v59 }
 0x7e3   :  { %v1887_v44 = vpack.c.bf16 %v1766_v43, %v1763_v7  ;;  %8165 = vmatprep.mubr.msk.bf16.mxu0 %vm9227_vm1, %v9226_v25 }
 0x7e5   :  { %8765 = vmatprep.subr.msk.bf16.mxu1 %vm513_vm2, %v1887_v44  ;;  %v1898_v62 = vsel %vm513_vm2, %v1887_v44, 0 }
 0x7e6   :  { %v1770_v19 = vpop.f32.mrb[68].mxu1  ;;  %8178 = vmatpush3.bf16.xpose.msra.mxu1 %v1898_v62  ;;  %v7049_v62 = vld [vmem:[%s11348_s10 + $0x2] ss:$0 sm:$0xff] }
 0x7e7   :  { %v1771_v45 = vadd.f32 %v7032_v38, %v1770_v19  ;;  %v8151_v21 = vpop.f32.mrb[69].mxu1 }
 0x7e8   :  { %v1773_v46 = vpop.f32.mrb[70].mxu1 }
 0x7e9   :  { %v1888_v47 = vpack.c.bf16 %v1771_v45, %v1771_v45  ;;  %v8152_v48 = vpop.f32.mrb[71].mxu1  ;;  %v1774_v56 = vadd.f32 %v7032_v38, %v1773_v46 }
 0x7ea   :  { %8166 = vmatmul.mubr.msk.bf16.vlgmr.msra.gmra.mrb[76].mxu0 %vm83_vm0, %v9456_v37 }
 0x7eb   :  { %8766 = vmatprep.subr.msk.bf16.mxu1 %vm513_vm2, %v1888_v47  ;;  %8169 = vmatprep.mubr.msk.bf16.mxu0 %vm9227_vm1, %v9226_v25  ;;  %v1901_v52 = vsel %vm513_vm2, %v1888_v47, 0 }
 0x7ee   :  { %v1778_v27 = vpop.f32.mrb[72].mxu1  ;;  %8180 = vmatpush3.bf16.xpose.msra.mxu1 %v1901_v52 }
 0x7ef   :  { %v1779_v57 = vadd.f32 %v7032_v38, %v1778_v27  ;;  %v8155_v58 = vpop.f32.mrb[73].mxu1 }
 0x7f0   :  { %v1781_v60 = vpop.f32.mrb[74].mxu1 }
 0x7f1   :  { %v1889_v61 = vpack.c.bf16 %v1779_v57, %v1774_v56  ;;  %v1782_v2 = vadd.f32 %v7032_v38, %v1781_v60  ;;  %v8156_v4 = vpop.f32.mrb[75].mxu1 }
 0x7f2   :  { %8170 = vmatmul.mubr.msk.bf16.gmra.mrb[80].mxu0 %vm83_vm0, %v9480_v51 }
 0x7f3   :  { %8767 = vmatprep.subr.msk.bf16.mxu1 %vm513_vm2, %v1889_v61  ;;  %8173 = vmatprep.mubr.msk.bf16.mxu0 %vm9227_vm1, %v9226_v25  ;;  %v1958_v40 = vsel %vm513_vm2, %v1889_v61, 0 }
 0x7fa   :  { %8174 = vmatmul.mubr.msk.bf16.gmra.mrb[84].mxu0 %vm83_vm0, %v9500_v59 }
 0x887   :  { %v1494_v3 = vpop.f32.mrb[52].mxu0 }
 0x888   :  { %v9915_v5 = vadd.f32 %v9858_v6, %v1494_v3  ;;  %v8093_v50 = vpop.f32.mrb[53].mxu0 }
 0x889   :  { %v1497_v49 = vpop.f32.mrb[54].mxu0 }
 0x88a   :  { %v9918_v53 = vadd.f32 %v9860_v22, %v1497_v49  ;;  %v8094_v15 = vpop.f32.mrb[55].mxu0 }
 0x895   :  { %v1502_v54 = vpop.f32.mrb[56].mxu0 }
 0x896   :  { %v9921_v55 = vadd.f32 %v9865_v24, %v1502_v54  ;;  %v8097_v17 = vpop.f32.mrb[57].mxu0 }
 0x897   :  { %v1505_v1 = vpop.f32.mrb[58].mxu0 }
 0x898   :  { %v9924_v29 = vadd.f32 %v9870_v30, %v1505_v1  ;;  %v8098_v11 = vpop.f32.mrb[59].mxu0 }
 0x89d   :  { %v1510_v12 = vpop.f32.mrb[60].mxu0 }
 0x89e   :  { %v9926_v8 = vadd.f32 %v1582_v35, %v1510_v12  ;;  %v8101_v13 = vpop.f32.mrb[61].mxu0 }
 0x89f   :  { %v1513_v0 = vpop.f32.mrb[62].mxu0 }
 0x8a0   :  { %v9928_v14 = vadd.f32 %v1585_v31, %v1513_v0  ;;  %v8102_v16 = vpop.f32.mrb[63].mxu0  ;;  %v1890_v31 = vpack.c.bf16 %v1782_v2, %v1782_v2 }
 0x8a2   :  { %v1961_v63 = vsel %vm513_vm2, %v1890_v31, 0 }
 0x8a5   :  { %v1664_v6 = vpop.f32.mrb[64].mxu0 }
 0x8a6   :  { %v8127_v20 = vpop.f32.mrb[65].mxu0  ;;  %v1665_v23 = vadd.f32 %v7015_v18, %v1664_v6 }
 0x8a7   :  { %v1667_v22 = vpop.f32.mrb[66].mxu0 }
 0x8a8   :  { %v1668_v24 = vadd.f32 %v7015_v18, %v1667_v22  ;;  %v8128_v26 = vpop.f32.mrb[67].mxu0 }
 0x8aa   :  { %v1883_v28 = vpack.c.bf16 %v1668_v24, %v1665_v23  ;;  %v9959_v24 = vld [vmem:[%s11349_s2 + $0x8] sm:$0xff] }
 0x8ac   :  { %8181 = vmatprep.mubr.msk.bf16.mxu1 %vm513_vm2, %v1883_v28 }
 0x8ad   :  { %v1672_v30 = vpop.f32.mrb[68].mxu0 }
 0x8ae   :  { %v1673_v32 = vadd.f32 %v7015_v18, %v1672_v30  ;;  %v8131_v33 = vpop.f32.mrb[69].mxu0 }
 0x8af   :  { %v1675_v35 = vpop.f32.mrb[70].mxu0 }
 0x8b0   :  { %v1884_v36 = vpack.c.bf16 %v1673_v32, %v1673_v32  ;;  %v8132_v39 = vpop.f32.mrb[71].mxu0  ;;  %v1676_v38 = vadd.f32 %v7015_v18, %v1675_v35 }
 0x8b2   :  { %8182 = vmatmul.mubr.msk.bf16.vlgmr.msra.gmra.mrb[76].mxu1 %vm513_vm2, %v1884_v36 }
 0x8b3   :  { %8186 = vmatpush3.bf16.xpose.msra.mxu1 %v1958_v40 }
 0x8b4   :  { %8768 = vmatprep.subr.msk.bf16.mxu1 %vm513_vm2, %v1890_v31  ;;  %v9969_v31 = vld [vmem:[%s11349_s2 + $0x10] sm:$0xff] }
 0x8b5   :  { %v1680_v34 = vpop.f32.mrb[72].mxu0 }
 0x8b6   :  { %v1681_v41 = vadd.f32 %v7015_v18, %v1680_v34  ;;  %v8135_v9 = vpop.f32.mrb[73].mxu0 }
 0x8b7   :  { %v1683_v42 = vpop.f32.mrb[74].mxu0 }
 0x8b8   :  { %v1885_v7 = vpack.c.bf16 %v1681_v41, %v1676_v38  ;;  %v8136_v43 = vpop.f32.mrb[75].mxu0  ;;  %v1684_v44 = vadd.f32 %v7015_v18, %v1683_v42  ;;  %v9952_v18 = vld [vmem:[%s11349_s2] sm:$0xff] }
 0x8ba   :  { %8189 = vmatprep.mubr.msk.bf16.mxu1 %vm513_vm2, %v1885_v7  ;;  %v1886_v46 = vpack.c.bf16 %v1684_v44, %v1684_v44 }
 0x8bb   :  { %8188 = vmatpush3.bf16.xpose.msra.mxu1 %v1961_v63 }
 0x8bd   :  { %v1860_v19 = vpop.f32.mrb[76].mxu0 }
 0x8be   :  { %v8167_v45 = vpop.f32.mrb[77].mxu0  ;;  %v1861_v47 = vadd.f32 %v7049_v62, %v1860_v19 }
 0x8bf   :  { %v1863_v21 = vpop.f32.mrb[78].mxu0 }
 0x8c0   :  { %v1864_v48 = vadd.f32 %v7049_v62, %v1863_v21  ;;  %v8168_v52 = vpop.f32.mrb[79].mxu0 }
 0x8c2   :  { %v2081_v27 = vpack.c.bf16 %v1864_v48, %v1861_v47  ;;  %8190 = vmatmul.mubr.msk.bf16.vlgmr.msra.gmra.mrb[80].mxu1 %vm513_vm2, %v1886_v46 }
 0x8c4   :  { %8193 = vmatprep.subr.bf16.mxu0 %v2081_v27 }
 0x8c5   :  { %v1868_v56 = vpop.f32.mrb[80].mxu0  ;;  %8194 = vmatpush3.bf16.msra.mxu0 %v2081_v27 }
 0x8c6   :  { %v1869_v57 = vadd.f32 %v7049_v62, %v1868_v56  ;;  %v8171_v58 = vpop.f32.mrb[81].mxu0 }
 0x8c7   :  { %v1871_v60 = vpop.f32.mrb[82].mxu0 }
 0x8c8   :  { %v2082_v61 = vpack.c.bf16 %v1869_v57, %v1869_v57  ;;  %v8172_v2 = vpop.f32.mrb[83].mxu0  ;;  %v1872_v50 = vadd.f32 %v7049_v62, %v1871_v60 }
 0x8ca   :  { %v2092_v4 = vsel %vm715_vm3, %v2082_v61, 0  ;;  %8769 = vmatprep.subr.msk.bf16.mxu0 %vm715_vm3, %v2082_v61 }
 0x8cb   :  { %8196 = vmatpush3.bf16.msra.mxu0 %v2092_v4 }
 0x8cc   :  { %8209 = vmatprep.subr.bf16.mxu0 %v9226_v25 }
 0x8cd   :  { %v1876_v3 = vpop.f32.mrb[84].mxu0 }
 0x8ce   :  { %v1877_v49 = vadd.f32 %v7049_v62, %v1876_v3  ;;  %v8175_v15 = vpop.f32.mrb[85].mxu0 }
 0x8cf   :  { %v1879_v54 = vpop.f32.mrb[86].mxu0 }
 0x8d0   :  { %v2083_v17 = vpack.c.bf16 %v1877_v49, %v1872_v50  ;;  %v1880_v1 = vadd.f32 %v7049_v62, %v1879_v54  ;;  %v8176_v11 = vpop.f32.mrb[87].mxu0 }
 0x8d2   :  { %v2084_v12 = vpack.c.bf16 %v1880_v1, %v1880_v1  ;;  %8201 = vmatprep.subr.bf16.mxu1 %v2083_v17 }
 0x8d3   :  { %8202 = vmatpush3.bf16.msra.mxu1 %v2083_v17 }
 0x8d4   :  { %8770 = vmatprep.subr.msk.bf16.mxu1 %vm715_vm3, %v2084_v12  ;;  %v2149_v13 = vsel %vm715_vm3, %v2084_v12, 0 }
 0x8d7   :  { %8204 = vmatpush3.bf16.msra.mxu1 %v2149_v13 }
 0x8d8   :  { %8223 = vmatprep.subr.bf16.mxu1 %v9226_v25 }
 0x985   :  { %v8183_v0 = vpop.f32.mrb[76].mxu1 }
 0x986   :  { %v1937_v16 = vpop.f32.mrb[77].mxu1  ;;  %v1946_v23 = vadd.f32 %v8183_v0, %v9652_v10 }
 0x987   :  { %v1938_v6 = vadd.f32 %v9952_v18, %v1937_v16  ;;  %v8184_v20 = vpop.f32.mrb[78].mxu1 }
 0x988   :  { %v1940_v22 = vpop.f32.mrb[79].mxu1  ;;  %v2017_v32 = vsel %vm634_vm4, %v1946_v23, -inf }
 0x989   :  { %v1941_v26 = vadd.f32 %v9959_v24, %v1940_v22  ;;  %v2011_v28 = vsel %vm634_vm4, %v1938_v6, -inf }
 0x98a   :  { %2012 = vmax.xlane.f32.xlu0 %v2011_v28 }
 0x98b   :  { %v2014_v30 = vsel %vm634_vm4, %v1941_v26, -inf }
 0x98c   :  { %2015 = vmax.xlane.f32.xlu1 %v2014_v30 }
 0x98e   :  { %2018 = vmax.xlane.f32.xlu0 %v2017_v32 }
 0x995   :  { %v8191_v33 = vpop.f32.mrb[80].mxu1 }
 0x996   :  { %v1997_v35 = vpop.f32.mrb[81].mxu1  ;;  %v2006_v40 = vadd.f32 %v9969_v31, %v8191_v33 }
 0x997   :  { %v1998_v10 = vadd.f32 %v9952_v18, %v1997_v35  ;;  %v8192_v36 = vpop.f32.mrb[82].mxu1 }
 0x998   :  { %v2000_v39 = vpop.f32.mrb[83].mxu1  ;;  %v2026_v9 = vsel %vm634_vm4, %v2006_v40, -inf }
 0x999   :  { %v2001_v34 = vadd.f32 %v9959_v24, %v2000_v39  ;;  %v2020_v38 = vsel %vm634_vm4, %v1998_v10, -inf }
 0x99a   :  { %2021 = vmax.xlane.f32.xlu1 %v2020_v38 }
 0x99b   :  { %v2023_v41 = vsel %vm634_vm4, %v2001_v34, -inf }
 0x99c   :  { %2024 = vmax.xlane.f32.xlu0 %v2023_v41 }
 0x99e   :  { %2027 = vmax.xlane.f32.xlu1 %v2026_v9 }
 0xa17   :  { %v2013_v42 = vpop.xlane.xlu0 %2012 }
 0xa18   :  { %v2029_v7 = vsub.f32 %v1938_v6, %v2013_v42  ;;  %v8842_v42 = vld [vmem:[%s11374_s7 + $0x60] sm:$0xff]  }
 0xa19   :  { %v2016_v43 = vpop.xlane.xlu1 %2015 }
 0xa1a   :  { %v2035_v63 = vmul.f32 1.442695, %v2029_v7  ;;  %v2030_v44 = vsub.f32 %v1941_v26, %v2016_v43  ;;  %v8843_v43 = vld [vmem:[%s11374_s7 + $0x68] sm:$0xff]  }
 0xa1b   :  { %v2019_v62 = vpop.xlane.xlu0 %2018 }
 0xa1c   :  { %9024 = vpow2.f32 %v2035_v63  ;;  %v2037_v19 = vmul.f32 1.442695, %v2030_v44  ;;  %v2031_v45 = vsub.f32 %v1946_v23, %v2019_v62  ;;  %v8844_v63 = vld [vmem:[%s11374_s7 + $0x70] sm:$0xff]   ;;  %v8845_v44 = vld [vmem:[%s11374_s7 + $0x78] sm:$0xff]   ;;  %v8846_v62 = vld [vmem:[%s11378_s28 + $0x60] sm:$0xff]  }
 0xa1e   :  { %9026 = vpow2.f32 %v2037_v19  ;;  %v2039_v21 = vmul.f32 1.442695, %v2031_v45  ;;  %v8847_v19 = vld [vmem:[%s11378_s28 + $0x68] sm:$0xff]   ;;  %v8848_v45 = vld [vmem:[%s11378_s28 + $0x70] sm:$0xff]  }
 0xa20   :  { %9028 = vpow2.f32 %v2039_v21  ;;  %v8849_v21 = vld [vmem:[%s11378_s28 + $0x78] sm:$0xff]  }
 0xa26   :  { %v9025_v46 = vpop.eup %9024 }
 0xa27   :  { %v2022_v47 = vpop.xlane.xlu1 %2021  ;;  %v2047_v48 = vsel %vm634_vm4, %v9025_v46, 0.0 }
 0xa28   :  { %v9027_v52 = vpop.eup %9026  ;;  %v2032_v27 = vsub.f32 %v1998_v10, %v2022_v47  ;;  %2048 = vadd.xlane.f32.xlu0 %v2047_v48 }
 0xa29   :  { %v2025_v56 = vpop.xlane.xlu0 %2024  ;;  %v2050_v57 = vsel %vm634_vm4, %v9027_v52, 0.0 }
 0xa2a   :  { %v9029_v58 = vpop.eup %9028  ;;  %v2041_v60 = vmul.f32 1.442695, %v2032_v27  ;;  %v2033_v61 = vsub.f32 %v2001_v34, %v2025_v56  ;;  %2051 = vadd.xlane.f32.xlu1 %v2050_v57  ;;  %v8851_v56 = vld [vmem:[%s11375_s9 + $0x60] sm:$0xff]  }
 0xa2b   :  { %v2028_v2 = vpop.xlane.xlu1 %2027  ;;  %v2053_v4 = vsel %vm634_vm4, %v9029_v58, 0.0 }
 0xa2c   :  { %9030 = vpow2.f32 %v2041_v60  ;;  %v2043_v3 = vmul.f32 1.442695, %v2033_v61  ;;  %v2034_v50 = vsub.f32 %v2006_v40, %v2028_v2  ;;  %2054 = vadd.xlane.f32.xlu0 %v2053_v4  ;;  %v8853_v60 = vld [vmem:[%s11375_s9 + $0x70] sm:$0xff]   ;;  %v8854_v61 = vld [vmem:[%s11375_s9 + $0x78] sm:$0xff]  }
 0xa2e   :  { %9032 = vpow2.f32 %v2043_v3  ;;  %v2045_v49 = vmul.f32 1.442695, %v2034_v50 }
 0xa30   :  { %9034 = vpow2.f32 %v2045_v49 }
 0xa36   :  { %v9031_v15 = vpop.eup %9030 }
 0xa37   :  { %v2056_v54 = vsel %vm634_vm4, %v9031_v15, 0.0 }
 0xa38   :  { %v9033_v17 = vpop.eup %9032  ;;  %2057 = vadd.xlane.f32.xlu1 %v2056_v54  ;;  %v7080_v54 = vld [vmem:[%s11346_s6 + $0x3] ss:$0 sm:$0xff] }
 0xa39   :  { %v2059_v1 = vsel %vm634_vm4, %v9033_v17, 0.0 }
 0xa3a   :  { %v9035_v11 = vpop.eup %9034  ;;  %2060 = vadd.xlane.f32.xlu0 %v2059_v1 }
 0xa3b   :  { %v2062_v12 = vsel %vm634_vm4, %v9035_v11, 0.0 }
 0xa3c   :  { %2063 = vadd.xlane.f32.xlu1 %v2062_v12 }
 0xab5   :  { %v2049_v13 = vpop.xlane.xlu0 %2048 }
 0xab6   :  { %9036 = vrcp.f32 %v2049_v13 }
 0xab7   :  { %v2052_v0 = vpop.xlane.xlu1 %2051 }
 0xab8   :  { %9038 = vrcp.f32 %v2052_v0 }
 0xab9   :  { %v2055_v16 = vpop.xlane.xlu0 %2054 }
 0xaba   :  { %9040 = vrcp.f32 %v2055_v16 }
 0xac0   :  { %v9037_v6 = vpop.eup %9036 }
 0xac1   :  { %v2071_v22 = vmul.f32 %v9037_v6, %v9025_v46  ;;  %v8850_v46 = vld [vmem:[%s11350_s11 + $0x10] sm:$0xff]  }
 0xac2   :  { %v9039_v20 = vpop.eup %9038 }
 0xac3   :  { %v2072_v23 = vmul.f32 %v9039_v20, %v9027_v52 }
 0xac4   :  { %v9041_v26 = vpop.eup %9040 }
 0xac5   :  { %v2073_v28 = vmul.f32 %v9041_v26, %v9029_v58  ;;  %v2058_v30 = vpop.xlane.xlu1 %2057  ;;  %v2077_v32 = vpack.c.bf16 %v2072_v23, %v2071_v22  ;;  %v8852_v58 = vld [vmem:[%s11375_s9 + $0x68] sm:$0xff]  }
 0xac6   :  { %9042 = vrcp.f32 %v2058_v30 }
 0xac7   :  { %v2078_v33 = vpack.c.bf16 %v2073_v28, %v2073_v28  ;;  %v2061_v35 = vpop.xlane.xlu0 %2060  ;;  %8197 = vmatprep.mubr.msk.bf16.mxu0 %vm634_vm4, %v2077_v32 }
 0xac8   :  { %9044 = vrcp.f32 %v2061_v35 }
 0xac9   :  { %v2064_v10 = vpop.xlane.xlu1 %2063  ;;  %8198 = vmatmul.mubr.msk.bf16.vlgmr.msra.gmra.mrb[88].mxu0 %vm634_vm4, %v2078_v33 }
 0xaca   :  { %9046 = vrcp.f32 %v2064_v10  ;;  %8211 = vmatprep.mubr.msk.bf16.mxu0 %vm9227_vm1, %v9226_v25  ;;  %8210 = vmatpush3.bf16.msra.mxu0 %v8850_v46 }
 0xacb   :  { %8243 = vmatprep.subr.bf16.mxu0 %v9226_v25 }
 0xad0   :  { %v9043_v36 = vpop.eup %9042 }
 0xad1   :  { %v2074_v40 = vmul.f32 %v9043_v36, %v9031_v15 }
 0xad2   :  { %v9045_v39 = vpop.eup %9044 }
 0xad3   :  { %v2075_v34 = vmul.f32 %v9045_v39, %v9033_v17 }
 0xad4   :  { %v9047_v38 = vpop.eup %9046 }
 0xad5   :  { %v2079_v41 = vpack.c.bf16 %v2075_v34, %v2074_v40  ;;  %v2076_v9 = vmul.f32 %v9047_v38, %v9035_v11 }
 0xad7   :  { %8205 = vmatprep.mubr.msk.bf16.mxu1 %vm634_vm4, %v2079_v41  ;;  %v2080_v7 = vpack.c.bf16 %v2076_v9, %v2076_v9 }
 0xad9   :  { %8206 = vmatmul.mubr.msk.bf16.vlgmr.msra.gmra.mrb[84].mxu1 %vm634_vm4, %v2080_v7 }
 0xada   :  { %8224 = vmatpush3.bf16.msra.mxu1 %v8842_v42  ;;  %8231 = vmatprep.mubr.msk.bf16.mxu1 %vm9227_vm1, %v9226_v25 }
 0xadb   :  { %8225 = vmatprep.subr.bf16.mxu1 %v9226_v25 }
 0xade   :  { %8226 = vmatpush3.bf16.msra.mxu1 %v8843_v43 }
 0xadf   :  { %8227 = vmatprep.subr.bf16.mxu1 %v9226_v25 }
 0xae2   :  { %8228 = vmatpush3.bf16.msra.mxu1 %v8844_v63 }
 0xae3   :  { %8229 = vmatprep.subr.bf16.mxu1 %v9226_v25 }
 0xae6   :  { %8230 = vmatpush3.bf16.msra.mxu1 %v8845_v44 }
 0xae7   :  { %8263 = vmatprep.subr.bf16.mxu1 %v9226_v25 }
 0xae9   :  { %8232 = vmatmul.mubr.msk.bf16.vlgmr.msra.gmra.mrb[88].mxu1 %vm83_vm0, %v9456_v37 }
 0xaea   :  { %8235 = vmatprep.mubr.msk.bf16.mxu1 %vm9227_vm1, %v9226_v25  ;;  %8264 = vmatpush3.bf16.msra.mxu1 %v8846_v62 }
 0xaeb   :  { %8265 = vmatprep.subr.bf16.mxu1 %v9226_v25 }
 0xaee   :  { %8266 = vmatpush3.bf16.msra.mxu1 %v8847_v19 }
 0xaef   :  { %8267 = vmatprep.subr.bf16.mxu1 %v9226_v25 }
 0xaf1   :  { %8236 = vmatmul.mubr.msk.bf16.gmra.mrb[92].mxu1 %vm83_vm0, %v9480_v51 }
 0xaf2   :  { %8239 = vmatprep.mubr.msk.bf16.mxu1 %vm9227_vm1, %v9226_v25  ;;  %8268 = vmatpush3.bf16.msra.mxu1 %v8848_v45 }
 0xaf3   :  { %8269 = vmatprep.subr.bf16.mxu1 %v9226_v25 }
 0xaf6   :  { %8270 = vmatpush3.bf16.msra.mxu1 %v8849_v21 }
 0xaf9   :  { %8240 = vmatmul.mubr.msk.bf16.gmra.mrb[96].mxu1 %vm83_vm0, %v9500_v59 }
 0xafa   :  { %8271 = vmatprep.mubr.msk.bf16.mxu1 %vm9227_vm1, %v9226_v25 }
 0xb01   :  { %8272 = vmatmul.mubr.msk.bf16.vlgmr.msra.gmra.mrb[100].mxu1 %vm83_vm0, %v9456_v37 }
 0xb02   :  { %8275 = vmatprep.mubr.msk.bf16.mxu1 %vm9227_vm1, %v9226_v25 }
 0xb09   :  { %8276 = vmatmul.mubr.msk.bf16.gmra.mrb[104].mxu1 %vm83_vm0, %v9480_v51 }
 0xb0a   :  { %8279 = vmatprep.mubr.msk.bf16.mxu1 %vm9227_vm1, %v9226_v25 }
 0xb11   :  { %8280 = vmatmul.mubr.msk.bf16.gmra.mrb[108].mxu1 %vm83_vm0, %v9500_v59 }
 0xb9c   :  { %v8199_v47 = vpop.f32.mrb[88].mxu0 }
 0xb9d   :  { %v2128_v48 = vpop.f32.mrb[89].mxu0 }
 0xb9e   :  { %v8200_v52 = vpop.f32.mrb[90].mxu0 }
 0xb9f   :  { %v2131_v27 = vpop.f32.mrb[91].mxu0 }
 0xba0   :  { %v2199_v57 = vpack.c.bf16 %v2131_v27, %v2128_v48 }
 0xba2   :  { %8212 = vmatmul.mubr.msk.bf16.vlgmr.msra.gmra.mrb[92].mxu0 %vm513_vm2, %v2199_v57 }
 0xba3   :  { %8215 = vmatprep.mubr.msk.bf16.mxu0 %vm9227_vm1, %v9226_v25  ;;  %8244 = vmatpush3.bf16.msra.mxu0 %v8851_v56 }
 0xba4   :  { %8245 = vmatprep.subr.bf16.mxu0 %v9226_v25 }
 0xba7   :  { %8246 = vmatpush3.bf16.msra.mxu0 %v8852_v58 }
 0xba8   :  { %8247 = vmatprep.subr.bf16.mxu0 %v9226_v25 }
 0xbab   :  { %8248 = vmatpush3.bf16.msra.mxu0 %v8853_v60 }
 0xbac   :  { %v8207_v2 = vpop.f32.mrb[84].mxu1  ;;  %8249 = vmatprep.subr.bf16.mxu0 %v9226_v25 }
 0xbad   :  { %v2185_v4 = vpop.f32.mrb[85].mxu1 }
 0xbae   :  { %v2200_v3 = vpack.c.bf16 %v2185_v4, %v8199_v47  ;;  %v8208_v50 = vpop.f32.mrb[86].mxu1 }
 0xbaf   :  { %v2188_v49 = vpop.f32.mrb[87].mxu1  ;;  %8250 = vmatpush3.bf16.msra.mxu0 %v8854_v61 }
 0xbb0   :  { %v2201_v15 = vpack.c.bf16 %v8207_v2, %v2188_v49  ;;  %8216 = vmatmul.mubr.msk.bf16.gmra.mrb[96].mxu0 %vm513_vm2, %v2200_v3 }
 0xbb1   :  { %8219 = vmatprep.mubr.msk.bf16.mxu0 %vm9227_vm1, %v9226_v25 }
 0xbb8   :  { %8220 = vmatmul.mubr.msk.bf16.gmra.mrb[100].mxu0 %vm513_vm2, %v2201_v15 }
 0xbb9   :  { %8251 = vmatprep.mubr.msk.bf16.mxu0 %vm9227_vm1, %v9226_v25 }
 0xbbc   :  { %v2358_v17 = vpop.f32.mrb[88].mxu1 }
 0xbbd   :  { %v8233_v1 = vpop.f32.mrb[89].mxu1  ;;  %v2359_v12 = vadd.f32 %v7080_v54, %v2358_v17 }
 0xbbe   :  { %v2361_v11 = vpop.f32.mrb[90].mxu1 }
 0xbbf   :  { %v2362_v13 = vadd.f32 %v7080_v54, %v2361_v11  ;;  %v8234_v0 = vpop.f32.mrb[91].mxu1 }
 0xbc0   :  { %8252 = vmatmul.mubr.msk.bf16.vlgmr.msra.gmra.mrb[104].mxu0 %vm83_vm0, %v9456_v37 }
 0xbc1   :  { %v2577_v16 = vpack.c.bf16 %v2362_v13, %v2359_v12  ;;  %8255 = vmatprep.mubr.msk.bf16.mxu0 %vm9227_vm1, %v9226_v25 }
 0xbc4   :  { %v2366_v6 = vpop.f32.mrb[92].mxu1 }
 0xbc5   :  { %v10078_v20 = vadd.f32 %v7080_v54, %v2366_v6  ;;  %v8237_v22 = vpop.f32.mrb[93].mxu1 }
 0xbc6   :  { %v2369_v23 = vpop.f32.mrb[94].mxu1 }
 0xbc7   :  { %v8238_v26 = vpop.f32.mrb[95].mxu1  ;;  %v2370_v30 = vadd.f32 %v7080_v54, %v2369_v23 }
 0xbc8   :  { %8256 = vmatmul.mubr.msk.bf16.gmra.mrb[108].mxu0 %vm83_vm0, %v9480_v51  ;;  %v10093_v51 = vld [vmem:[%s11348_s10 + $0x3] ss:$0 sm:$0xff] }
 0xbc9   :  { %8259 = vmatprep.mubr.msk.bf16.mxu0 %vm9227_vm1, %v9226_v25 }
 0xbcc   :  { %v2374_v28 = vpop.f32.mrb[96].mxu1 }
 0xbcd   :  { %v2375_v32 = vadd.f32 %v7080_v54, %v2374_v28  ;;  %v8241_v37 = vpop.f32.mrb[97].mxu1 }
 0xbce   :  { %v2377_v33 = vpop.f32.mrb[98].mxu1 }
 0xbcf   :  { %v2579_v35 = vpack.c.bf16 %v2375_v32, %v2370_v30  ;;  %v10084_v10 = vadd.f32 %v7080_v54, %v2377_v33  ;;  %v8242_v36 = vpop.f32.mrb[99].mxu1 }
 0xbd0   :  { %8260 = vmatmul.mubr.msk.bf16.gmra.mrb[112].mxu0 %vm83_vm0, %v9500_v59 }
 0xbd1   :  { %8295 = vmatprep.mubr.msk.bf16.mxu1 %vm513_vm2, %v2579_v35  ;;  %8287 = vmatprep.mubr.msk.bf16.mxu0 %vm513_vm2, %v2577_v16 }
 0xbd4   :  { %v2554_v39 = vpop.f32.mrb[100].mxu1 }
 0xbd5   :  { %v8273_v40 = vpop.f32.mrb[101].mxu1  ;;  %v2555_v38 = vadd.f32 %v10093_v51, %v2554_v39 }
 0xbd6   :  { %v2557_v34 = vpop.f32.mrb[102].mxu1 }
 0xbd7   :  { %v2558_v41 = vadd.f32 %v10093_v51, %v2557_v34  ;;  %v8274_v9 = vpop.f32.mrb[103].mxu1 }
 0xbd8   :  { %v2578_v9 = vpack.c.bf16 %v10078_v20, %v10078_v20 }
 0xbd9   :  { %v10097_v42 = vpack.c.bf16 %v2558_v41, %v2555_v38 }
 0xbdc   :  { %v2562_v59 = vpop.f32.mrb[104].mxu1 }
 0xbdd   :  { %v8277_v7 = vpop.f32.mrb[105].mxu1  ;;  %v2563_v40 = vadd.f32 %v10093_v51, %v2562_v59  ;;  %v2580_v59 = vpack.c.bf16 %v10084_v10, %v10084_v10 }
 0xbde   :  { %v2565_v43 = vpop.f32.mrb[106].mxu1 }
 0xbdf   :  { %v8278_v63 = vpop.f32.mrb[107].mxu1  ;;  %v2566_v62 = vadd.f32 %v10093_v51, %v2565_v43 }
 0xbe0   :  { %v2776_v63 = vpack.c.bf16 %v2563_v40, %v2563_v40 }
 0xbe4   :  { %v2570_v44 = vpop.f32.mrb[108].mxu1 }
 0xbe5   :  { %v2571_v19 = vadd.f32 %v10093_v51, %v2570_v44  ;;  %v8281_v45 = vpop.f32.mrb[109].mxu1 }
 0xbe6   :  { %v2573_v21 = vpop.f32.mrb[110].mxu1 }
 0xbe7   :  { %v10101_v46 = vpack.c.bf16 %v2571_v19, %v2566_v62  ;;  %v10104_v47 = vadd.f32 %v10093_v51, %v2573_v21  ;;  %v8282_v48 = vpop.f32.mrb[111].mxu1  ;;  %v2786_v51 = vsel %vm715_vm3, %v2776_v63, 0 }
 0xc75   :  { %v2254_v52 = vpop.f32.mrb[92].mxu0 }
 0xc76   :  { %v10107_v27 = vadd.f32 %v2254_v52, %v9915_v5  ;;  %v8213_v56 = vpop.f32.mrb[93].mxu0 }
 0xc77   :  { %v2257_v57 = vpop.f32.mrb[94].mxu0 }
 0xc78   :  { %v10110_v58 = vadd.f32 %v2257_v57, %v9918_v53  ;;  %v8214_v60 = vpop.f32.mrb[95].mxu0 }
 0xc83   :  { %v2262_v61 = vpop.f32.mrb[96].mxu0 }
 0xc84   :  { %v10113_v2 = vadd.f32 %v2262_v61, %v9921_v55  ;;  %v8217_v4 = vpop.f32.mrb[97].mxu0  ;;  %v7097_v55 = vld [vmem:[%s11347_s8 + $0x3] ss:$0 sm:$0xff] }
 0xc85   :  { %v2265_v3 = vpop.f32.mrb[98].mxu0 }
 0xc86   :  { %v10116_v50 = vadd.f32 %v2265_v3, %v9924_v29  ;;  %v8218_v49 = vpop.f32.mrb[99].mxu0 }
 0xc8b   :  { %v2270_v15 = vpop.f32.mrb[100].mxu0 }
 0xc8c   :  { %v10119_v5 = vadd.f32 %v2270_v15, %v9926_v8  ;;  %v8221_v54 = vpop.f32.mrb[101].mxu0 }
 0xc8d   :  { %v2273_v17 = vpop.f32.mrb[102].mxu0 }
 0xc8e   :  { %v10122_v53 = vadd.f32 %v2273_v17, %v9928_v14  ;;  %v8222_v1 = vpop.f32.mrb[103].mxu0 }
 0xc93   :  { %v2456_v11 = vpop.f32.mrb[104].mxu0 }
 0xc94   :  { %v8253_v12 = vpop.f32.mrb[105].mxu0  ;;  %v2457_v29 = vadd.f32 %v7097_v55, %v2456_v11 }
 0xc95   :  { %v2459_v13 = vpop.f32.mrb[106].mxu0 }
 0xc96   :  { %v2460_v0 = vadd.f32 %v7097_v55, %v2459_v13  ;;  %v8254_v16 = vpop.f32.mrb[107].mxu0 }
 0xc98   :  { %v2581_v6 = vpack.c.bf16 %v2460_v0, %v2457_v29 }
 0xc9a   :  { %8771 = vmatprep.subr.msk.bf16.mxu0 %vm513_vm2, %v2581_v6  ;;  %v2592_v8 = vsel %vm513_vm2, %v2581_v6, 0 }
 0xc9b   :  { %v2464_v22 = vpop.f32.mrb[108].mxu0  ;;  %8284 = vmatpush3.bf16.xpose.msra.mxu0 %v2592_v8 }
 0xc9c   :  { %v2465_v14 = vadd.f32 %v7097_v55, %v2464_v22  ;;  %v8257_v23 = vpop.f32.mrb[109].mxu0 }
 0xc9d   :  { %v2467_v26 = vpop.f32.mrb[110].mxu0 }
 0xc9e   :  { %v2582_v28 = vpack.c.bf16 %v2465_v14, %v2465_v14  ;;  %v8258_v30 = vpop.f32.mrb[111].mxu0  ;;  %v2468_v33 = vadd.f32 %v7097_v55, %v2467_v26 }
 0xca0   :  { %8772 = vmatprep.subr.msk.bf16.mxu0 %vm513_vm2, %v2582_v28  ;;  %v2595_v32 = vsel %vm513_vm2, %v2582_v28, 0 }
 0xca3   :  { %v2472_v37 = vpop.f32.mrb[112].mxu0  ;;  %8286 = vmatpush3.bf16.xpose.msra.mxu0 %v2595_v32 }
 0xca4   :  { %v2473_v35 = vadd.f32 %v7097_v55, %v2472_v37  ;;  %v8261_v36 = vpop.f32.mrb[113].mxu0  ;;  %8299 = vmatprep.subr.bf16.mxu0 %v10097_v42 }
 0xca5   :  { %v2475_v39 = vpop.f32.mrb[114].mxu0 }
 0xca6   :  { %v2583_v34 = vpack.c.bf16 %v2473_v35, %v2468_v33  ;;  %v2476_v38 = vadd.f32 %v7097_v55, %v2475_v39  ;;  %v8262_v41 = vpop.f32.mrb[115].mxu0 }
 0xca8   :  { %v2584_v7 = vpack.c.bf16 %v2476_v38, %v2476_v38  ;;  %8773 = vmatprep.subr.msk.bf16.mxu1 %vm513_vm2, %v2583_v34  ;;  %v2652_v43 = vsel %vm513_vm2, %v2583_v34, 0 }
 0xca9   :  { %8292 = vmatpush3.bf16.xpose.msra.mxu1 %v2652_v43 }
 0xcaa   :  { %8288 = vmatmul.mubr.msk.bf16.vlgmr.msra.gmra.mrb[116].mxu0 %vm513_vm2, %v2578_v9  ;;  %8774 = vmatprep.subr.msk.bf16.mxu1 %vm513_vm2, %v2584_v7  ;;  %v2655_v20 = vsel %vm513_vm2, %v2584_v7, 0 }
 0xcab   :  { %8300 = vmatpush3.bf16.msra.mxu0 %v10097_v42 }
 0xcac   :  { %8775 = vmatprep.subr.msk.bf16.mxu0 %vm715_vm3, %v2776_v63 }
 0xcaf   :  { %8302 = vmatpush3.bf16.msra.mxu0 %v2786_v51 }
 0xcb0   :  { %8307 = vmatprep.subr.bf16.mxu0 %v10101_v46 }
 0xcb1   :  { %8294 = vmatpush3.bf16.xpose.msra.mxu1 %v2655_v20 }
 0xcb2   :  { %8315 = vmatprep.subr.bf16.mxu1 %v9226_v25 }
 0xcb8   :  { %8296 = vmatmul.mubr.msk.bf16.vlgmr.msra.gmra.mrb[112].mxu1 %vm513_vm2, %v2580_v59 }
 0xcb9   :  { %8317 = vmatprep.mubr.msk.bf16.mxu1 %vm9227_vm1, %v9226_v25 }
 0xd7d   :  { %v8289_v42 = vpop.f32.mrb[116].mxu0 }
 0xd7e   :  { %v2631_v44 = vpop.f32.mrb[117].mxu0  ;;  %v2640_v21 = vadd.f32 %v9969_v31, %v8289_v42 }
 0xd7f   :  { %v2632_v62 = vadd.f32 %v9952_v18, %v2631_v44  ;;  %v8290_v19 = vpop.f32.mrb[118].mxu0 }
 0xd80   :  { %v2634_v45 = vpop.f32.mrb[119].mxu0  ;;  %v2711_v56 = vsel %vm634_vm4, %v2640_v21, -inf }
 0xd81   :  { %v2635_v48 = vadd.f32 %v9959_v24, %v2634_v45  ;;  %v2705_v52 = vsel %vm634_vm4, %v2632_v62, -inf }
 0xd82   :  { %2706 = vmax.xlane.f32.xlu0 %v2705_v52 }
 0xd83   :  { %v2708_v10 = vsel %vm634_vm4, %v2635_v48, -inf }
 0xd84   :  { %2709 = vmax.xlane.f32.xlu1 %v2708_v10 }
 0xd86   :  { %2712 = vmax.xlane.f32.xlu0 %v2711_v56  ;;  %v2778_v56 = vpack.c.bf16 %v10104_v47, %v10104_v47 }
 0xd8b   :  { %v8297_v57 = vpop.f32.mrb[112].mxu1 }
 0xd8c   :  { %v2691_v60 = vpop.f32.mrb[113].mxu1  ;;  %v2700_v49 = vadd.f32 %v9969_v31, %v8297_v57  ;;  %v2843_v57 = vsel %vm715_vm3, %v2778_v56, 0 }
 0xd8d   :  { %v2692_v61 = vadd.f32 %v9952_v18, %v2691_v60  ;;  %v8298_v4 = vpop.f32.mrb[114].mxu1 }
 0xd8e   :  { %v2694_v3 = vpop.f32.mrb[115].mxu1  ;;  %v2720_v1 = vsel %vm634_vm4, %v2700_v49, -inf }
 0xd8f   :  { %v2695_v15 = vadd.f32 %v9959_v24, %v2694_v3  ;;  %v2714_v54 = vsel %vm634_vm4, %v2692_v61, -inf }
 0xd90   :  { %2715 = vmax.xlane.f32.xlu1 %v2714_v54 }
 0xd91   :  { %v2717_v17 = vsel %vm634_vm4, %v2695_v15, -inf }
 0xd92   :  { %2718 = vmax.xlane.f32.xlu0 %v2717_v17 }
 0xd94   :  { %2721 = vmax.xlane.f32.xlu1 %v2720_v1 }
 0xe0f   :  { %v2707_v55 = vpop.xlane.xlu0 %2706 }
 0xe10   :  { %v2723_v11 = vsub.f32 %v2632_v62, %v2707_v55 }
 0xe11   :  { %v2710_v12 = vpop.xlane.xlu1 %2709 }
 0xe12   :  { %v2729_v13 = vmul.f32 1.442695, %v2723_v11  ;;  %v2724_v18 = vsub.f32 %v2635_v48, %v2710_v12 }
 0xe13   :  { %v2713_v29 = vpop.xlane.xlu0 %2712 }
 0xe14   :  { %9048 = vpow2.f32 %v2729_v13  ;;  %v2731_v0 = vmul.f32 1.442695, %v2724_v18  ;;  %v2725_v31 = vsub.f32 %v2640_v21, %v2713_v29 }
 0xe16   :  { %9050 = vpow2.f32 %v2731_v0  ;;  %v2733_v24 = vmul.f32 1.442695, %v2725_v31 }
 0xe18   :  { %9052 = vpow2.f32 %v2733_v24 }
 0xe1d   :  { %v2716_v16 = vpop.xlane.xlu1 %2715 }
 0xe1e   :  { %v9049_v6 = vpop.eup %9048  ;;  %v2726_v8 = vsub.f32 %v2692_v61, %v2716_v16 }
 0xe1f   :  { %v2719_v22 = vpop.xlane.xlu0 %2718  ;;  %v2741_v14 = vsel %vm634_vm4, %v9049_v6, 0.0 }
 0xe20   :  { %v9051_v23 = vpop.eup %9050  ;;  %v2735_v26 = vmul.f32 1.442695, %v2726_v8  ;;  %v2727_v28 = vsub.f32 %v2695_v15, %v2719_v22  ;;  %2742 = vadd.xlane.f32.xlu0 %v2741_v14  ;;  %v7136_v22 = vld [vmem:[%s11351_s12] ss:$0 sm:$0xff] }
 0xe21   :  { %v2722_v30 = vpop.xlane.xlu1 %2721  ;;  %v2744_v32 = vsel %vm634_vm4, %v9051_v23, 0.0 }
 0xe22   :  { %v9053_v37 = vpop.eup %9052  ;;  %9054 = vpow2.f32 %v2735_v26  ;;  %v2737_v33 = vmul.f32 1.442695, %v2727_v28  ;;  %v2728_v35 = vsub.f32 %v2700_v49, %v2722_v30  ;;  %2745 = vadd.xlane.f32.xlu1 %v2744_v32 }
 0xe23   :  { %v2747_v36 = vsel %vm634_vm4, %v9053_v37, 0.0 }
 0xe24   :  { %9056 = vpow2.f32 %v2737_v33  ;;  %v2739_v39 = vmul.f32 1.442695, %v2728_v35  ;;  %2748 = vadd.xlane.f32.xlu0 %v2747_v36 }
 0xe26   :  { %9058 = vpow2.f32 %v2739_v39 }
 0xe2c   :  { %v9055_v40 = vpop.eup %9054 }
 0xe2d   :  { %v2750_v34 = vsel %vm634_vm4, %v9055_v40, 0.0 }
 0xe2e   :  { %v9057_v38 = vpop.eup %9056  ;;  %2751 = vadd.xlane.f32.xlu1 %v2750_v34 }
 0xe2f   :  { %v2753_v41 = vsel %vm634_vm4, %v9057_v38, 0.0 }
 0xe30   :  { %v9059_v9 = vpop.eup %9058  ;;  %2754 = vadd.xlane.f32.xlu0 %v2753_v41 }
 0xe31   :  { %v2756_v7 = vsel %vm634_vm4, %v9059_v9, 0.0 }
 0xe32   :  { %2757 = vadd.xlane.f32.xlu1 %v2756_v7 }
 0xead   :  { %v2743_v43 = vpop.xlane.xlu0 %2742 }
 0xeae   :  { %9060 = vrcp.f32 %v2743_v43  ;;  %v9213_v43 = vld [vmem:[%s11373_s26 + $0x10] sm:$0xff] }
 0xeaf   :  { %v2746_v63 = vpop.xlane.xlu1 %2745 }
 0xeb0   :  { %9062 = vrcp.f32 %v2746_v63 }
 0xeb1   :  { %v2749_v51 = vpop.xlane.xlu0 %2748 }
 0xeb2   :  { %9064 = vrcp.f32 %v2749_v51 }
 0xeb8   :  { %v9061_v20 = vpop.eup %9060 }
 0xeb9   :  { %v2765_v44 = vmul.f32 %v9061_v20, %v9049_v6 }
 0xeba   :  { %v9063_v59 = vpop.eup %9062 }
 0xebb   :  { %v2752_v42 = vpop.xlane.xlu1 %2751  ;;  %v2766_v62 = vmul.f32 %v9063_v59, %v9051_v23  ;;  %v9211_v23 = vld [vmem:[%s11373_s26] sm:$0xff] }
 0xebc   :  { %v9065_v19 = vpop.eup %9064  ;;  %9066 = vrcp.f32 %v2752_v42  ;;  %v9214_v42 = vld [vmem:[%s11373_s26 + $0x18] sm:$0xff] }
 0xebd   :  { %v2767_v45 = vmul.f32 %v9065_v19, %v9053_v37  ;;  %v2755_v21 = vpop.xlane.xlu0 %2754  ;;  %v2771_v48 = vpack.c.bf16 %v2766_v62, %v2765_v44 }
 0xebe   :  { %9068 = vrcp.f32 %v2755_v21 }
 0xebf   :  { %v2758_v52 = vpop.xlane.xlu1 %2757  ;;  %8303 = vmatprep.mubr.msk.bf16.mxu0 %vm634_vm4, %v2771_v48  ;;  %v2772_v10 = vpack.c.bf16 %v2767_v45, %v2767_v45 }
 0xec0   :  { %9070 = vrcp.f32 %v2758_v52 }
 0xec1   :  { %8304 = vmatmul.mubr.msk.bf16.vlgmr.msra.gmra.mrb[120].mxu0 %vm634_vm4, %v2772_v10 }
 0xec2   :  { %8308 = vmatpush3.bf16.msra.mxu0 %v10101_v46  ;;  %v8855_v46 = vld [vmem:[%s11350_s11 + $0x18] sm:$0xff]  }
 0xec3   :  { %8776 = vmatprep.subr.msk.bf16.mxu0 %vm715_vm3, %v2778_v56  ;;  %8316 = vmatpush3.bf16.msra.mxu1 %v8855_v46  ;;  %v9215_v56 = vld [vmem:[%s11373_s26 + $0x20] sm:$0xff] }
 0xec6   :  { %v9067_v60 = vpop.eup %9066  ;;  %8310 = vmatpush3.bf16.msra.mxu0 %v2843_v57 }
 0xec7   :  { %v2768_v4 = vmul.f32 %v9067_v60, %v9055_v40 }
 0xec8   :  { %v9069_v61 = vpop.eup %9068 }
 0xec9   :  { %v2769_v3 = vmul.f32 %v9069_v61, %v9057_v38 }
 0xeca   :  { %v9071_v49 = vpop.eup %9070 }
 0xecb   :  { %v2770_v15 = vmul.f32 %v9071_v49, %v9059_v9  ;;  %v2773_v54 = vpack.c.bf16 %v2769_v3, %v2768_v4  ;;  %v9216_v3 = vld [vmem:[%s11373_s26 + $0x28] sm:$0xff] }
 0xecd   :  { %8311 = vmatprep.mubr.msk.bf16.mxu0 %vm634_vm4, %v2773_v54  ;;  %v2774_v17 = vpack.c.bf16 %v2770_v15, %v2770_v15 }
 0xecf   :  { %8312 = vmatmul.mubr.msk.bf16.vlgmr.msra.gmra.mrb[124].mxu0 %vm634_vm4, %v2774_v17 }
 0xf94   :  { %v8305_v47 = vpop.f32.mrb[120].mxu0 }
 0xf95   :  { %v2822_v1 = vpop.f32.mrb[121].mxu0 }
 0xf96   :  { %v8306_v55 = vpop.f32.mrb[122].mxu0 }
 0xf97   :  { %v2825_v11 = vpop.f32.mrb[123].mxu0 }
 0xf98   :  { %v2893_v12 = vpack.c.bf16 %v2825_v11, %v2822_v1  ;;  %v8858_v11 = vld [vmem:[%s11352_s15 + $0x4] ss:$8 sps:$4 sm:$0xff]  }
 0xf99   :  { %3184 = vmatprep.subr.bf16.mxu0 %v8858_v11 }
 0xf9a   :  { %8318 = vmatmul.mubr.msk.bf16.vlgmr.msra.gmra.mrb[116].mxu1 %vm513_vm2, %v2893_v12  ;;  %v8856_v12 = vld [vmem:[%s11352_s15] ss:$8 sps:$4 sm:$0xff]  }
 0xf9b   :  { %8321 = vmatprep.mubr.msk.bf16.mxu1 %vm9227_vm1, %v9226_v25  ;;  %3185 = vmatpush1.bf16.msra.mxu0 %v8856_v12 }
 0xfa2   :  { %v8313_v13 = vpop.f32.mrb[124].mxu0 }
 0xfa3   :  { %v2879_v18 = vpop.f32.mrb[125].mxu0 }
 0xfa4   :  { %v2894_v29 = vpack.c.bf16 %v2879_v18, %v8305_v47  ;;  %v8314_v0 = vpop.f32.mrb[126].mxu0  ;;  %v8859_v18 = vld [vmem:[%s11352_s15 + $0x10] ss:$8 sps:$4 sm:$0xff]  }
 0xfa5   :  { %v2882_v31 = vpop.f32.mrb[127].mxu0  ;;  %v8862_v0 = vld [vmem:[%s11352_s15 + $0x20] ss:$8 sps:$4 sm:$0xff]  }
 0xfa6   :  { %v2895_v24 = vpack.c.bf16 %v8313_v13, %v2882_v31  ;;  %8322 = vmatmul.mubr.msk.bf16.gmra.mrb[120].mxu1 %vm513_vm2, %v2894_v29  ;;  %v8861_v13 = vld [vmem:[%s11352_s15 + $0x14] ss:$8 sps:$4 sm:$0xff]   ;;  %v8864_v29 = vld [vmem:[%s11352_s15 + $0x24] ss:$8 sps:$4 sm:$0xff]  }
 0xfa7   :  { %8325 = vmatprep.mubr.msk.bf16.mxu1 %vm9227_vm1, %v9226_v25  ;;  %3186 = vmatprep.subr.bf16.mxu0 %v8861_v13  ;;  %v8867_v31 = vld [vmem:[%s11352_s15 + $0x34] ss:$8 sps:$4 sm:$0xff]  }
 0xfa8   :  { %3187 = vmatpush1.bf16.msra.mxu0 %v8859_v18 }
 0xfa9   :  { %3188 = vmatprep.subr.bf16.mxu0 %v8864_v29 }
 0xfac   :  { %3189 = vmatpush1.bf16.msra.mxu0 %v8862_v0 }
 0xfad   :  { %3190 = vmatprep.subr.bf16.mxu0 %v8867_v31  ;;  %v7138_v31 = vld [vmem:[%s11355_s14] ss:$0 sm:$0xff] }
 0xfae   :  { %8326 = vmatmul.mubr.msk.bf16.gmra.mrb[124].mxu1 %vm513_vm2, %v2895_v24  ;;  %v8865_v24 = vld [vmem:[%s11352_s15 + $0x30] ss:$8 sps:$4 sm:$0xff]  }
 0xfb0   :  { %3191 = vmatpush1.bf16.msra.mxu0 %v8865_v24 }
 0xfb1   :  { %8329 = vmatprep.subr.bf16.mxu0 %v9226_v25 }
0x106d   :  { %v2948_v16 = vpop.f32.mrb[116].mxu1 }
0x106e   :  { %v2971_v6 = vadd.f32 %v2948_v16, %v10107_v27  ;;  %v8319_v8 = vpop.f32.mrb[117].mxu1  ;;  %v9212_v27 = vld [vmem:[%s11373_s26 + $0x8] sm:$0xff]  ;;  %v9228_v16 = vmov 0  }
0x106f   :  { %v2951_v14 = vpop.f32.mrb[118].mxu1  ;;  %3216 = vmatprep.mubr.bf16.mxu0 %v9228_v16  ;;  %v8869_v8 = vld [vmem:[%s11353_s17] sm:$0xff]  }
0x1070   :  { %v2977_v26 = vadd.f32 %v9211_v23, %v2971_v6  ;;  %v2972_v28 = vadd.f32 %v2951_v14, %v10110_v58  ;;  %v8320_v30 = vpop.f32.mrb[119].mxu1  ;;  %v8868_v6 = vld [vmem:[%s11353_s17 + $0x40] sm:$0xff]   ;;  %v8871_v14 = vld [vmem:[%s11353_s17 + $0x8] sm:$0xff]   ;;  %v8872_v23 = vld [vmem:[%s11353_s17 + $0x50] sm:$0xff]  }
0x1071   :  { %7673 = vmatprep.subr.bf16.mxu1 %v8868_v6  ;;  %v8875_v30 = vld [vmem:[%s11353_s17 + $0x18] sm:$0xff]  }
0x1072   :  { %v10195_v32 = vadd.f32 %v7136_v22, %v2977_v26  ;;  %v2978_v37 = vadd.f32 %v9212_v27, %v2972_v28  ;;  %7674 = vmatpush3.bf16.msra.mxu1 %v8869_v8  ;;  %v8873_v26 = vld [vmem:[%s11353_s17 + $0x10] sm:$0xff]   ;;  %v8874_v28 = vld [vmem:[%s11353_s17 + $0x58] sm:$0xff]   ;;  %v8876_v27 = vld [vmem:[%s11353_s17 + $0x60] sm:$0xff]  }
0x1074   :  { %v10200_v33 = vadd.f32 %v7136_v22, %v2978_v37  ;;  %v2998_v35 = vsel %vm83_vm0, %v10195_v32, 0.0  ;;  %v3022_v36 = vmul.f32 %v10195_v32, %v10195_v32  ;;  %v8877_v37 = vld [vmem:[%s11353_s17 + $0x20] sm:$0xff]  }
0x1075   :  { %2999 = vadd.xlane.f32.xlu0 %v2998_v35  ;;  %v8878_v35 = vld [vmem:[%s11353_s17 + $0x68] sm:$0xff]  }
0x1076   :  { %v3001_v58 = vsel %vm83_vm0, %v10200_v33, 0.0  ;;  %v3023_v39 = vmul.f32 %v10200_v33, %v10200_v33  ;;  %v3028_v40 = vsel %vm83_vm0, %v3022_v36, 0.0 }
0x1077   :  { %3002 = vadd.xlane.f32.xlu1 %v3001_v58 }
0x1078   :  { %v3031_v9 = vsel %vm83_vm0, %v3023_v39, 0.0 }
0x1079   :  { %3029 = vadd.xlane.f32.xlu0 %v3028_v40  ;;  %v2956_v34 = vpop.f32.mrb[120].mxu1 }
0x107a   :  { %v2973_v38 = vadd.f32 %v2956_v34, %v10113_v2  ;;  %v8323_v41 = vpop.f32.mrb[121].mxu1 }
0x107b   :  { %3032 = vadd.xlane.f32.xlu1 %v3031_v9  ;;  %v2959_v7 = vpop.f32.mrb[122].mxu1 }
0x107c   :  { %v2979_v63 = vadd.f32 %v9213_v43, %v2973_v38  ;;  %v2974_v51 = vadd.f32 %v2959_v7, %v10116_v50  ;;  %v8324_v20 = vpop.f32.mrb[123].mxu1 }
0x107e   :  { %v10217_v59 = vadd.f32 %v7136_v22, %v2979_v63  ;;  %v2980_v2 = vadd.f32 %v9214_v42, %v2974_v51 }
0x1080   :  { %v10222_v44 = vadd.f32 %v7136_v22, %v2980_v2  ;;  %v3004_v62 = vsel %vm83_vm0, %v10217_v59, 0.0  ;;  %v3024_v19 = vmul.f32 %v10217_v59, %v10217_v59 }
0x1081   :  { %3005 = vadd.xlane.f32.xlu0 %v3004_v62  ;;  %v2964_v45 = vpop.f32.mrb[124].mxu1 }
0x1082   :  { %v2975_v50 = vadd.f32 %v2964_v45, %v10119_v5  ;;  %v8327_v21 = vpop.f32.mrb[125].mxu1  ;;  %v3007_v48 = vsel %vm83_vm0, %v10222_v44, 0.0  ;;  %v3025_v52 = vmul.f32 %v10222_v44, %v10222_v44  ;;  %v3034_v4 = vsel %vm83_vm0, %v3024_v19, 0.0 }
0x1083   :  { %3008 = vadd.xlane.f32.xlu1 %v3007_v48  ;;  %v2967_v10 = vpop.f32.mrb[126].mxu1 }
0x1084   :  { %v2981_v57 = vadd.f32 %v9215_v56, %v2975_v50  ;;  %v2976_v60 = vadd.f32 %v2967_v10, %v10122_v53  ;;  %v8328_v61 = vpop.f32.mrb[127].mxu1  ;;  %v3037_v15 = vsel %vm83_vm0, %v3025_v52, 0.0 }
0x1085   :  { %3035 = vadd.xlane.f32.xlu0 %v3034_v4 }
0x1086   :  { %v10238_v5 = vadd.f32 %v7136_v22, %v2981_v57  ;;  %v2982_v49 = vadd.f32 %v9216_v3, %v2976_v60 }
0x1087   :  { %3038 = vadd.xlane.f32.xlu1 %v3037_v15 }
0x1088   :  { %v10244_v54 = vadd.f32 %v7136_v22, %v2982_v49  ;;  %v3010_v17 = vsel %vm83_vm0, %v10238_v5, 0.0  ;;  %v3026_v53 = vmul.f32 %v10238_v5, %v10238_v5  ;;  %v8870_v22 = vld [vmem:[%s11353_s17 + $0x48] sm:$0xff]  }
0x1089   :  { %3011 = vadd.xlane.f32.xlu0 %v3010_v17  ;;  %7675 = vmatprep.subr.bf16.mxu1 %v8870_v22  ;;  %v7137_v17 = vld [vmem:[%s11354_s13] ss:$0 sm:$0xff] }
0x108a   :  { %v3013_v46 = vsel %vm83_vm0, %v10244_v54, 0.0  ;;  %v3027_v47 = vmul.f32 %v10244_v54, %v10244_v54  ;;  %v3040_v1 = vsel %vm83_vm0, %v3026_v53, 0.0  ;;  %7676 = vmatpush3.bf16.msra.mxu1 %v8871_v14 }
0x108b   :  { %3014 = vadd.xlane.f32.xlu1 %v3013_v46  ;;  %7677 = vmatprep.subr.bf16.mxu1 %v8872_v23 }
0x108c   :  { %v3043_v55 = vsel %vm83_vm0, %v3027_v47, 0.0 }
0x108d   :  { %3041 = vadd.xlane.f32.xlu0 %v3040_v1 }
0x108e   :  { %7678 = vmatpush3.bf16.msra.mxu1 %v8873_v26 }
0x108f   :  { %3044 = vadd.xlane.f32.xlu1 %v3043_v55  ;;  %7679 = vmatprep.subr.bf16.mxu1 %v8874_v28 }
0x1092   :  { %7680 = vmatpush3.bf16.msra.mxu1 %v8875_v30 }
0x1093   :  { %7681 = vmatprep.subr.bf16.mxu1 %v8876_v27 }
0x1096   :  { %7682 = vmatpush3.bf16.msra.mxu1 %v8877_v37 }
0x1097   :  { %7683 = vmatprep.subr.bf16.mxu1 %v8878_v35 }
0x1102   :  { %v3000_v36 = vpop.xlane.xlu0 %2999 }
0x1103   :  { %v3016_v58 = vmul.f32 0.015625, %v3000_v36 }
0x1104   :  { %v3003_v39 = vpop.xlane.xlu1 %3002 }
0x1105   :  { %v3017_v40 = vmul.f32 0.015625, %v3003_v39  ;;  %v3052_v38 = vmul.f32 %v3016_v58, %v3016_v58  ;;  %v3064_v60 = vsub.f32 %v10195_v32, %v3016_v58 }
0x1106   :  { %v3030_v34 = vpop.xlane.xlu0 %3029 }
0x1107   :  { %v3046_v41 = vmul.f32 0.015625, %v3030_v34  ;;  %v3053_v7 = vmul.f32 %v3017_v40, %v3017_v40  ;;  %v3065_v53 = vsub.f32 %v10200_v33, %v3017_v40 }
0x1108   :  { %v3033_v9 = vpop.xlane.xlu1 %3032 }
0x1109   :  { %v3058_v43 = vsub.f32 %v3046_v41, %v3052_v38  ;;  %v3047_v63 = vmul.f32 0.015625, %v3033_v9 }
0x110b   :  { %v3070_v51 = vadd.f32 1e-05, %v3058_v43  ;;  %v3059_v20 = vsub.f32 %v3047_v63, %v3053_v7 }
0x110d   :  { %9072 = vrsqrt.f32 %v3070_v51  ;;  %v3071_v42 = vadd.f32 1e-05, %v3059_v20 }
0x110e   :  { %v3006_v2 = vpop.xlane.xlu0 %3005 }
0x110f   :  { %9074 = vrsqrt.f32 %v3071_v42  ;;  %v3018_v62 = vmul.f32 0.015625, %v3006_v2 }
0x1110   :  { %v3009_v19 = vpop.xlane.xlu1 %3008 }
0x1111   :  { %v3019_v45 = vmul.f32 0.015625, %v3009_v19  ;;  %v3054_v21 = vmul.f32 %v3018_v62, %v3018_v62  ;;  %v3066_v35 = vsub.f32 %v10217_v59, %v3018_v62 }
0x1112   :  { %v3036_v50 = vpop.xlane.xlu0 %3035 }
0x1113   :  { %v3048_v48 = vmul.f32 0.015625, %v3036_v50  ;;  %v3055_v10 = vmul.f32 %v3019_v45, %v3019_v45  ;;  %v3067_v58 = vsub.f32 %v10222_v44, %v3019_v45 }
0x1114   :  { %v3039_v52 = vpop.xlane.xlu1 %3038 }
0x1115   :  { %v3060_v56 = vsub.f32 %v3048_v48, %v3054_v21  ;;  %v3049_v57 = vmul.f32 0.015625, %v3039_v52  ;;  %v8879_v52 = vld [vmem:[%s11353_s17 + $0x28] sm:$0xff]  }
0x1116   :  { %v3012_v61 = vpop.xlane.xlu0 %3011  ;;  %7684 = vmatpush3.bf16.msra.mxu1 %v8879_v52 }
0x1117   :  { %v9073_v4 = vpop.eup %9072  ;;  %v3072_v3 = vadd.f32 1e-05, %v3060_v56  ;;  %v3061_v49 = vsub.f32 %v3049_v57, %v3055_v10  ;;  %v3020_v15 = vmul.f32 0.015625, %v3012_v61  ;;  %v8880_v10 = vld [vmem:[%s11353_s17 + $0x70] sm:$0xff]   ;;  %v8882_v57 = vld [vmem:[%s11353_s17 + $0x78] sm:$0xff]   ;;  %v3125_v61 = vlaneseq }
0x1118   :  { %v3082_v46 = vmul.f32 %v9073_v4, %v3064_v60  ;;  %v3015_v47 = vpop.xlane.xlu1 %3014  ;;  %v8881_v56 = vld [vmem:[%s11353_s17 + $0x30] sm:$0xff]   ;;  %7685 = vmatprep.subr.bf16.mxu1 %v8880_v10  ;;  %v8883_v60 = vld [vmem:[%s11353_s17 + $0x38] sm:$0xff]  }
0x1119   :  { %v9075_v1 = vpop.eup %9074  ;;  %9076 = vrsqrt.f32 %v3072_v3  ;;  %v3073_v55 = vadd.f32 1e-05, %v3061_v49  ;;  %v3021_v12 = vmul.f32 0.015625, %v3015_v47  ;;  %v3056_v29 = vmul.f32 %v3020_v15, %v3020_v15  ;;  %v3123_v49 = vld [vmem:[%s11356_s16] sm:$0x3] }
0x111a   :  { %v3083_v11 = vmul.f32 %v9075_v1, %v3065_v53  ;;  %v3042_v13 = vpop.xlane.xlu0 %3041  ;;  %v3094_v18 = vmul.f32 %v7137_v17, %v3082_v46  ;;  %v3068_v9 = vsub.f32 %v10238_v5, %v3020_v15  ;;  %7686 = vmatpush3.bf16.msra.mxu1 %v8881_v56  ;;  %v10350_v4 = vshrl.u32 %v3125_v61, 7 }
0x111b   :  { %9078 = vrsqrt.f32 %v3073_v55  ;;  %v3050_v0 = vmul.f32 0.015625, %v3042_v13  ;;  %v3057_v8 = vmul.f32 %v3021_v12, %v3021_v12  ;;  %v3069_v51 = vsub.f32 %v10244_v54, %v3021_v12  ;;  %7687 = vmatprep.subr.bf16.mxu1 %v8882_v57 }
0x111c   :  { %v3045_v24 = vpop.xlane.xlu1 %3044  ;;  %v3095_v6 = vmul.f32 %v7137_v17, %v3083_v11  ;;  %v3106_v23 = vadd.f32 %v7138_v31, %v3094_v18  ;;  %v3127_v3 = vsub.s32 0, %v10350_v4  ;;  %v3131_v15 = vsub.s32 1, %v10350_v4 }
0x111d   :  { %v3062_v22 = vsub.f32 %v3050_v0, %v3056_v29  ;;  %v3051_v14 = vmul.f32 0.015625, %v3045_v24 }
0x111e   :  { %v3107_v26 = vadd.f32 %v7138_v31, %v3095_v6  ;;  %7688 = vmatpush3.bf16.msra.mxu1 %v8883_v60  ;;  %v3132_v53 = vrot.slane %v3123_v49, %v3131_v15 }
0x111f   :  { %v3074_v28 = vadd.f32 1e-05, %v3062_v22  ;;  %v3063_v30 = vsub.f32 %v3051_v14, %v3057_v8  ;;  %8349 = vmatprep.subr.bf16.mxu1 %v9226_v25 }
0x1120   :  { %v3112_v27 = vpack.c.bf16 %v3107_v26, %v3106_v23 }
0x1121   :  { %9080 = vrsqrt.f32 %v3074_v28  ;;  %v3075_v37 = vadd.f32 1e-05, %v3063_v30 }
0x1122   :  { %7147 = vmatmul.mubr.msk.bf16.vlgmr.msra.gmra.mrb[128].mxu0 %vm83_vm0, %v3112_v27 }
0x1123   :  { %v9077_v36 = vpop.eup %9076  ;;  %9082 = vrsqrt.f32 %v3075_v37  ;;  %3226 = vmatprep.mubr.bf16.mxu0 %v9228_v16 }
0x1124   :  { %v3084_v39 = vmul.f32 %v9077_v36, %v3066_v35 }
0x1125   :  { %v9079_v40 = vpop.eup %9078 }
0x1126   :  { %v3085_v34 = vmul.f32 %v9079_v40, %v3067_v58  ;;  %v3096_v38 = vmul.f32 %v7137_v17, %v3084_v39 }
0x1128   :  { %v3097_v41 = vmul.f32 %v7137_v17, %v3085_v34  ;;  %v3108_v7 = vadd.f32 %v7138_v31, %v3096_v38 }
0x112a   :  { %v3109_v43 = vadd.f32 %v7138_v31, %v3097_v41 }
0x112b   :  { %v9081_v63 = vpop.eup %9080 }
0x112c   :  { %v3113_v20 = vpack.c.bf16 %v3109_v43, %v3108_v7  ;;  %v3086_v42 = vmul.f32 %v9081_v63, %v3068_v9 }
0x112d   :  { %v9083_v2 = vpop.eup %9082 }
0x112e   :  { %7148 = vmatmul.mubr.msk.bf16.gmra.mrb[132].mxu0 %vm83_vm0, %v3113_v20  ;;  %v3087_v62 = vmul.f32 %v9083_v2, %v3069_v51  ;;  %v3098_v19 = vmul.f32 %v7137_v17, %v3086_v42 }
0x112f   :  { %3236 = vmatprep.mubr.bf16.mxu0 %v9228_v16 }
0x1130   :  { %v3099_v45 = vmul.f32 %v7137_v17, %v3087_v62  ;;  %v3110_v50 = vadd.f32 %v7138_v31, %v3098_v19  ;;  %v3128_v17 = vrot.slane %v3123_v49, %v3127_v3 }
0x1132   :  { %v3111_v21 = vadd.f32 %v7138_v31, %v3099_v45 }
0x1134   :  { %v3114_v48 = vpack.c.bf16 %v3111_v21, %v3110_v50 }
0x1136   :  { %7149 = vmatmul.mubr.msk.bf16.gmra.mrb[136].mxu0 %vm83_vm0, %v3114_v48  ;;  %v7150_v48 = vld [vmem:[%s11357_s18] ss:$0 sm:$0xff] }
0x1137   :  { %8337 = vmatprep.mubr.msk.bf16.mxu0 %vm9227_vm1, %v9226_v25 }
0x11f5   :  { %v3218_v46 = vpop.f32.mrb[128].mxu0 }
0x11f6   :  { %v3219_v47 = vadd.f32 %v3218_v46, %v3128_v17  ;;  %v3220_v1 = vpop.f32.mrb[129].mxu0 }
0x11f7   :  { %v3221_v55 = vadd.f32 %v3220_v1, %v3132_v53  ;;  %v3222_v11 = vpop.f32.mrb[130].mxu0 }
0x11f8   :  { %v3223_v12 = vadd.f32 %v3222_v11, %v3128_v17  ;;  %v3224_v13 = vpop.f32.mrb[131].mxu0  ;;  %v3247_v29 = vmax.f32 %v3219_v47, 0.0 }
0x11f9   :  { %v3225_v18 = vadd.f32 %v3224_v13, %v3132_v53  ;;  %v3248_v31 = vmax.f32 %v3221_v55, 0.0 }
0x11fa   :  { %v3249_v0 = vmax.f32 %v3223_v12, 0.0 }
0x11fb   :  { %v3250_v24 = vmax.f32 %v3225_v18, 0.0 }
0x11fc   :  { %v3259_v6 = vpack.c.bf16 %v3249_v0, %v3247_v29 }
0x11fd   :  { %v3260_v8 = vpack.c.bf16 %v3250_v24, %v3248_v31 }
0x11ff   :  { %3432 = vmatprep.mubr.bf16.mxu1 %v3260_v8 }
0x1200   :  { %3433 = vmatmul.mubr.bf16.vlgmr.msra.gmra.mrb[128].mxu1 %v3259_v6 }
0x1201   :  { %v3228_v22 = vpop.f32.mrb[132].mxu0 }
0x1202   :  { %v3229_v14 = vadd.f32 %v3228_v22, %v3128_v17  ;;  %v3230_v23 = vpop.f32.mrb[133].mxu0 }
0x1203   :  { %v3231_v26 = vadd.f32 %v3230_v23, %v3132_v53  ;;  %v3232_v28 = vpop.f32.mrb[134].mxu0 }
0x1204   :  { %v3233_v30 = vadd.f32 %v3232_v28, %v3128_v17  ;;  %v3234_v27 = vpop.f32.mrb[135].mxu0  ;;  %v3251_v35 = vmax.f32 %v3229_v14, 0.0 }
0x1205   :  { %v3235_v37 = vadd.f32 %v3234_v27, %v3132_v53  ;;  %v3252_v58 = vmax.f32 %v3231_v26, 0.0 }
0x1206   :  { %v3253_v36 = vmax.f32 %v3233_v30, 0.0 }
0x1207   :  { %v3254_v39 = vmax.f32 %v3235_v37, 0.0 }
0x1208   :  { %v3261_v40 = vpack.c.bf16 %v3253_v36, %v3251_v35 }
0x1209   :  { %v3262_v34 = vpack.c.bf16 %v3254_v39, %v3252_v58  ;;  %v3238_v38 = vpop.f32.mrb[136].mxu0 }
0x120a   :  { %v3239_v41 = vadd.f32 %v3238_v38, %v3128_v17  ;;  %v3240_v9 = vpop.f32.mrb[137].mxu0 }
0x120b   :  { %v3241_v7 = vadd.f32 %v3240_v9, %v3132_v53  ;;  %v3242_v43 = vpop.f32.mrb[138].mxu0  ;;  %3440 = vmatprep.mubr.bf16.mxu1 %v3262_v34 }
0x120c   :  { %v3243_v63 = vadd.f32 %v3242_v43, %v3128_v17  ;;  %v3244_v51 = vpop.f32.mrb[139].mxu0  ;;  %3441 = vmatmul.mubr.bf16.gmra.mrb[132].mxu1 %v3261_v40  ;;  %v3255_v42 = vmax.f32 %v3239_v41, 0.0  ;;  %v8884_v43 = vld [vmem:[%s11374_s7 + $0x80] sm:$0xff]  }
0x120d   :  { %v3245_v20 = vadd.f32 %v3244_v51, %v3132_v53  ;;  %v3256_v62 = vmax.f32 %v3241_v7, 0.0  ;;  %8330 = vmatpush3.bf16.msra.mxu0 %v8884_v43  ;;  %v8886_v51 = vld [vmem:[%s11374_s7 + $0x88] sm:$0xff]  }
0x120e   :  { %v3257_v2 = vmax.f32 %v3243_v63, 0.0  ;;  %v8885_v63 = vld [vmem:[%s11375_s9 + $0x80] sm:$0xff]   ;;  %8331 = vmatprep.subr.bf16.mxu0 %v9226_v25 }
0x120f   :  { %v3258_v19 = vmax.f32 %v3245_v20, 0.0  ;;  %8350 = vmatpush3.bf16.msra.mxu1 %v8885_v63  ;;  %v8887_v20 = vld [vmem:[%s11375_s9 + $0x88] sm:$0xff]  }
0x1210   :  { %v3263_v45 = vpack.c.bf16 %v3257_v2, %v3255_v42  ;;  %8351 = vmatprep.subr.bf16.mxu1 %v9226_v25  ;;  %v8888_v42 = vld [vmem:[%s11374_s7 + $0x90] sm:$0xff]  }
0x1211   :  { %v3264_v50 = vpack.c.bf16 %v3258_v19, %v3256_v62  ;;  %8332 = vmatpush3.bf16.msra.mxu0 %v8886_v51  ;;  %v8889_v2 = vld [vmem:[%s11375_s9 + $0x90] sm:$0xff]   ;;  %v8890_v62 = vld [vmem:[%s11374_s7 + $0x98] sm:$0xff]  }
0x1212   :  { %8333 = vmatprep.subr.bf16.mxu0 %v9226_v25  ;;  %v8891_v19 = vld [vmem:[%s11375_s9 + $0x98] sm:$0xff]  }
0x1213   :  { %3448 = vmatprep.mubr.bf16.mxu1 %v3264_v50  ;;  %8352 = vmatpush3.bf16.msra.mxu1 %v8887_v20 }
0x1214   :  { %3449 = vmatmul.mubr.bf16.gmra.mrb[136].mxu1 %v3263_v45  ;;  %8353 = vmatprep.subr.bf16.mxu1 %v9226_v25 }
0x1215   :  { %8357 = vmatprep.mubr.msk.bf16.mxu1 %vm9227_vm1, %v9226_v25  ;;  %8334 = vmatpush3.bf16.msra.mxu0 %v8888_v42 }
0x1216   :  { %8335 = vmatprep.subr.bf16.mxu0 %v9226_v25 }
0x1217   :  { %8354 = vmatpush3.bf16.msra.mxu1 %v8889_v2 }
0x1218   :  { %8355 = vmatprep.subr.bf16.mxu1 %v9226_v25 }
0x1219   :  { %8336 = vmatpush3.bf16.msra.mxu0 %v8890_v62 }
0x121a   :  { %8369 = vmatprep.subr.bf16.mxu0 %v9226_v25 }
0x121b   :  { %8356 = vmatpush3.bf16.msra.mxu1 %v8891_v19 }
0x12d3   :  { %v7689_v21 = vpop.f32.mrb[128].mxu1 }
0x12d4   :  { %v7690_v52 = vpop.f32.mrb[129].mxu1 }
0x12d5   :  { %v7691_v10 = vadd.f32 %v7690_v52, %v7689_v21  ;;  %v7692_v56 = vpop.f32.mrb[130].mxu1 }
0x12d6   :  { %v7693_v57 = vpop.f32.mrb[131].mxu1 }
0x12d7   :  { %v3435_v60 = vadd.f32 %v7691_v10, %v7150_v48  ;;  %v7694_v61 = vadd.f32 %v7693_v57, %v7692_v56 }
0x12d9   :  { %v10367_v49 = vadd.f32 %v3435_v60, %v10195_v32  ;;  %v3438_v17 = vadd.f32 %v7694_v61, %v7150_v48 }
0x12db   :  { %v10370_v53 = vadd.f32 %v3438_v17, %v10200_v33  ;;  %v3467_v46 = vsel %vm83_vm0, %v10367_v49, 0.0  ;;  %v3491_v47 = vmul.f32 %v10367_v49, %v10367_v49 }
0x12dc   :  { %3468 = vadd.xlane.f32.xlu0 %v3467_v46 }
0x12dd   :  { %v3470_v1 = vsel %vm83_vm0, %v10370_v53, 0.0  ;;  %v3492_v55 = vmul.f32 %v10370_v53, %v10370_v53  ;;  %v3497_v11 = vsel %vm83_vm0, %v3491_v47, 0.0 }
0x12de   :  { %3471 = vadd.xlane.f32.xlu1 %v3470_v1 }
0x12df   :  { %v7695_v32 = vpop.f32.mrb[132].mxu1  ;;  %v3500_v18 = vsel %vm83_vm0, %v3492_v55, 0.0 }
0x12e0   :  { %3498 = vadd.xlane.f32.xlu0 %v3497_v11  ;;  %v7696_v33 = vpop.f32.mrb[133].mxu1 }
0x12e1   :  { %v7697_v12 = vadd.f32 %v7696_v33, %v7695_v32  ;;  %v7698_v13 = vpop.f32.mrb[134].mxu1 }
0x12e2   :  { %3501 = vadd.xlane.f32.xlu1 %v3500_v18  ;;  %v7699_v29 = vpop.f32.mrb[135].mxu1 }
0x12e3   :  { %v3443_v0 = vadd.f32 %v7697_v12, %v7150_v48  ;;  %v7700_v31 = vadd.f32 %v7699_v29, %v7698_v13 }
0x12e5   :  { %v10383_v24 = vadd.f32 %v3443_v0, %v10217_v59  ;;  %v3446_v6 = vadd.f32 %v7700_v31, %v7150_v48 }
0x12e7   :  { %v10386_v8 = vadd.f32 %v3446_v6, %v10222_v44  ;;  %v7701_v22 = vpop.f32.mrb[136].mxu1  ;;  %v3473_v14 = vsel %vm83_vm0, %v10383_v24, 0.0  ;;  %v3493_v23 = vmul.f32 %v10383_v24, %v10383_v24 }
0x12e8   :  { %3474 = vadd.xlane.f32.xlu0 %v3473_v14  ;;  %v7702_v26 = vpop.f32.mrb[137].mxu1 }
0x12e9   :  { %v7703_v28 = vadd.f32 %v7702_v26, %v7701_v22  ;;  %v7704_v30 = vpop.f32.mrb[138].mxu1  ;;  %v3476_v27 = vsel %vm83_vm0, %v10386_v8, 0.0  ;;  %v3494_v59 = vmul.f32 %v10386_v8, %v10386_v8  ;;  %v3503_v36 = vsel %vm83_vm0, %v3493_v23, 0.0  ;;  %v10449_v26 = vld [vmem:[%s11376_s0 + $0x1] ss:$0 sm:$0xff] }
0x12ea   :  { %3477 = vadd.xlane.f32.xlu1 %v3476_v27  ;;  %v7705_v44 = vpop.f32.mrb[139].mxu1 }
0x12eb   :  { %v3451_v37 = vadd.f32 %v7703_v28, %v7150_v48  ;;  %v7706_v35 = vadd.f32 %v7705_v44, %v7704_v30  ;;  %v3506_v40 = vsel %vm83_vm0, %v3494_v59, 0.0 }
0x12ec   :  { %3504 = vadd.xlane.f32.xlu0 %v3503_v36  ;;  %v10455_v36 = vld [vmem:[%s11377_s4 + $0x1] ss:$0 sm:$0xff] }
0x12ed   :  { %v10398_v58 = vadd.f32 %v3451_v37, %v10238_v5  ;;  %v3454_v39 = vadd.f32 %v7706_v35, %v7150_v48 }
0x12ee   :  { %3507 = vadd.xlane.f32.xlu1 %v3506_v40 }
0x12ef   :  { %v10402_v34 = vadd.f32 %v3454_v39, %v10244_v54  ;;  %v3479_v38 = vsel %vm83_vm0, %v10398_v58, 0.0  ;;  %v3495_v41 = vmul.f32 %v10398_v58, %v10398_v58 }
0x12f0   :  { %3480 = vadd.xlane.f32.xlu0 %v3479_v38 }
0x12f1   :  { %v3482_v9 = vsel %vm83_vm0, %v10402_v34, 0.0  ;;  %v3496_v5 = vmul.f32 %v10402_v34, %v10402_v34  ;;  %v3509_v7 = vsel %vm83_vm0, %v3495_v41, 0.0 }
0x12f2   :  { %3483 = vadd.xlane.f32.xlu1 %v3482_v9 }
0x12f3   :  { %v3512_v54 = vsel %vm83_vm0, %v3496_v5, 0.0 }
0x12f4   :  { %3510 = vadd.xlane.f32.xlu0 %v3509_v7 }
0x12f6   :  { %3513 = vadd.xlane.f32.xlu1 %v3512_v54 }
0x1369   :  { %v3469_v45 = vpop.xlane.xlu0 %3468 }
0x136a   :  { %v3485_v50 = vmul.f32 0.015625, %v3469_v45  ;;  %v9217_v45 = vld [vmem:[%s11345_s1] sm:$0xff] }
0x136b   :  { %v3472_v21 = vpop.xlane.xlu1 %3471 }
0x136c   :  { %v3486_v48 = vmul.f32 0.015625, %v3472_v21  ;;  %v3521_v10 = vmul.f32 %v3485_v50, %v3485_v50  ;;  %v3533_v22 = vsub.f32 %v10367_v49, %v3485_v50  ;;  %v9218_v21 = vld [vmem:[%s11345_s1 + $0x8] sm:$0xff] }
0x136d   :  { %v3499_v52 = vpop.xlane.xlu0 %3498 }
0x136e   :  { %v3515_v56 = vmul.f32 0.015625, %v3499_v52  ;;  %v3522_v60 = vmul.f32 %v3486_v48, %v3486_v48  ;;  %v3534_v59 = vsub.f32 %v10370_v53, %v3486_v48 }
0x136f   :  { %v3502_v57 = vpop.xlane.xlu1 %3501 }
0x1370   :  { %v3527_v61 = vsub.f32 %v3515_v56, %v3521_v10  ;;  %v3516_v17 = vmul.f32 0.015625, %v3502_v57  ;;  %v8892_v57 = vld [vmem:[%s11378_s28 + $0x80] sm:$0xff]  }
0x1372   :  { %v3539_v46 = vadd.f32 1e-05, %v3527_v61  ;;  %v3528_v47 = vsub.f32 %v3516_v17, %v3522_v60 }
0x1374   :  { %9084 = vrsqrt.f32 %v3539_v46  ;;  %v3540_v1 = vadd.f32 1e-05, %v3528_v47 }
0x1375   :  { %v3475_v55 = vpop.xlane.xlu0 %3474 }
0x1376   :  { %9086 = vrsqrt.f32 %v3540_v1  ;;  %v3487_v32 = vmul.f32 0.015625, %v3475_v55  ;;  %v8893_v55 = vld [vmem:[%s11378_s28 + $0x88] sm:$0xff]  }
0x1377   :  { %v3478_v11 = vpop.xlane.xlu1 %3477 }
0x1378   :  { %v3488_v33 = vmul.f32 0.015625, %v3478_v11  ;;  %v3523_v13 = vmul.f32 %v3487_v32, %v3487_v32  ;;  %v3535_v56 = vsub.f32 %v10383_v24, %v3487_v32 }
0x1379   :  { %v3505_v12 = vpop.xlane.xlu0 %3504 }
0x137a   :  { %v3517_v18 = vmul.f32 0.015625, %v3505_v12  ;;  %v3524_v0 = vmul.f32 %v3488_v33, %v3488_v33  ;;  %v3536_v61 = vsub.f32 %v10386_v8, %v3488_v33 }
0x137b   :  { %v3508_v29 = vpop.xlane.xlu1 %3507 }
0x137c   :  { %v3529_v31 = vsub.f32 %v3517_v18, %v3523_v13  ;;  %v3518_v6 = vmul.f32 0.015625, %v3508_v29  ;;  %v8894_v13 = vld [vmem:[%s11378_s28 + $0x90] sm:$0xff]  }
0x137d   :  { %v3481_v14 = vpop.xlane.xlu0 %3480  ;;  %v9219_v29 = vld [vmem:[%s11345_s1 + $0x10] sm:$0xff] }
0x137e   :  { %v9085_v23 = vpop.eup %9084  ;;  %v3541_v28 = vadd.f32 1e-05, %v3529_v31  ;;  %v3530_v30 = vsub.f32 %v3518_v6, %v3524_v0  ;;  %v3489_v27 = vmul.f32 0.015625, %v3481_v14 }
0x137f   :  { %v3551_v44 = vmul.f32 %v9085_v23, %v3533_v22  ;;  %v3484_v37 = vpop.xlane.xlu1 %3483 }
0x1380   :  { %v9087_v35 = vpop.eup %9086  ;;  %9088 = vrsqrt.f32 %v3541_v28  ;;  %v3542_v39 = vadd.f32 1e-05, %v3530_v30  ;;  %v3490_v41 = vmul.f32 0.015625, %v3484_v37  ;;  %v3525_v5 = vmul.f32 %v3489_v27, %v3489_v27 }
0x1381   :  { %v3563_v40 = vmul.f32 %v10449_v26, %v3551_v44  ;;  %v3552_v38 = vmul.f32 %v9087_v35, %v3534_v59  ;;  %v3511_v9 = vpop.xlane.xlu0 %3510  ;;  %v3537_v12 = vsub.f32 %v10398_v58, %v3489_v27  ;;  %v8895_v27 = vld [vmem:[%s11378_s28 + $0x98] sm:$0xff]  }
0x1382   :  { %9090 = vrsqrt.f32 %v3542_v39  ;;  %v3519_v7 = vmul.f32 0.015625, %v3511_v9  ;;  %v3526_v51 = vmul.f32 %v3490_v41, %v3490_v41  ;;  %v3538_v6 = vsub.f32 %v10402_v34, %v3490_v41 }
0x1383   :  { %v3575_v54 = vadd.f32 %v10455_v36, %v3563_v40  ;;  %v3564_v43 = vmul.f32 %v10449_v26, %v3552_v38  ;;  %v3514_v63 = vpop.xlane.xlu1 %3513  ;;  %v7197_v38 = vld [vmem:[%s11347_s8 + $0x4] ss:$0 sm:$0xff] }
0x1384   :  { %v3531_v20 = vsub.f32 %v3519_v7, %v3525_v5  ;;  %v3520_v42 = vmul.f32 0.015625, %v3514_v63 }
0x1385   :  { %v3576_v2 = vadd.f32 %v10455_v36, %v3564_v43  ;;  %v3581_v50 = vadd.f32 %v9217_v45, %v3575_v54 }
0x1386   :  { %v3543_v62 = vadd.f32 1e-05, %v3531_v20  ;;  %v3532_v19 = vsub.f32 %v3520_v42, %v3526_v51 }
0x1387   :  { %v3582_v48 = vadd.f32 %v9218_v21, %v3576_v2 }
0x1388   :  { %9092 = vrsqrt.f32 %v3543_v62  ;;  %v3544_v52 = vadd.f32 1e-05, %v3532_v19 }
0x1389   :  { %v10467_v10 = vpack.c.bf16 %v3582_v48, %v3581_v50 }
0x138a   :  { %v9089_v60 = vpop.eup %9088  ;;  %9094 = vrsqrt.f32 %v3544_v52 }
0x138b   :  { %v3553_v17 = vmul.f32 %v9089_v60, %v3535_v56  ;;  %8338 = vmatmul.mubr.msk.bf16.vlgmr.msra.gmra.mrb[140].mxu0 %vm83_vm0, %v10467_v10  ;;  %8358 = vmatmul.mubr.msk.bf16.vlgmr.msra.gmra.mrb[140].mxu1 %vm83_vm0, %v10467_v10 }
0x138c   :  { %v9091_v46 = vpop.eup %9090  ;;  %8341 = vmatprep.mubr.msk.bf16.mxu0 %vm9227_vm1, %v9226_v25  ;;  %8361 = vmatprep.mubr.msk.bf16.mxu1 %vm9227_vm1, %v9226_v25 }
0x138d   :  { %v3565_v47 = vmul.f32 %v10449_v26, %v3553_v17  ;;  %v3554_v1 = vmul.f32 %v9091_v46, %v3536_v61  ;;  %8370 = vmatpush3.bf16.msra.mxu0 %v8892_v57 }
0x138e   :  { %8371 = vmatprep.subr.bf16.mxu0 %v9226_v25 }
0x138f   :  { %v3577_v32 = vadd.f32 %v10455_v36, %v3565_v47  ;;  %v3566_v11 = vmul.f32 %v10449_v26, %v3554_v1 }
0x1391   :  { %v3578_v33 = vadd.f32 %v10455_v36, %v3566_v11  ;;  %8372 = vmatpush3.bf16.msra.mxu0 %v8893_v55  ;;  %v3583_v0 = vadd.f32 %v9219_v29, %v3577_v32 }
0x1392   :  { %v9093_v18 = vpop.eup %9092  ;;  %8373 = vmatprep.subr.bf16.mxu0 %v9226_v25 }
0x1393   :  { %v3584_v31 = vadd.f32 %v9217_v45, %v3578_v33  ;;  %v3555_v22 = vmul.f32 %v9093_v18, %v3537_v12 }
0x1394   :  { %v9095_v14 = vpop.eup %9094 }
0x1395   :  { %v10499_v23 = vpack.c.bf16 %v3584_v31, %v3583_v0  ;;  %v3567_v28 = vmul.f32 %v10449_v26, %v3555_v22  ;;  %v3556_v30 = vmul.f32 %v9095_v14, %v3538_v6  ;;  %8374 = vmatpush3.bf16.msra.mxu0 %v8894_v13 }
0x1396   :  { %8375 = vmatprep.subr.bf16.mxu0 %v9226_v25 }
0x1397   :  { %v3579_v59 = vadd.f32 %v10455_v36, %v3567_v28  ;;  %v3568_v44 = vmul.f32 %v10449_v26, %v3556_v30  ;;  %8342 = vmatmul.mubr.msk.bf16.gmra.mrb[144].mxu0 %vm83_vm0, %v10499_v23  ;;  %8362 = vmatmul.mubr.msk.bf16.gmra.mrb[144].mxu1 %vm83_vm0, %v10499_v23  ;;  %v10538_v26 = vld [vmem:[%s11346_s6 + $0x4] ss:$0 sm:$0xff] }
0x1398   :  { %8345 = vmatprep.mubr.msk.bf16.mxu0 %vm9227_vm1, %v9226_v25  ;;  %8365 = vmatprep.mubr.msk.bf16.mxu1 %vm9227_vm1, %v9226_v25 }
0x1399   :  { %v3580_v37 = vadd.f32 %v10455_v36, %v3568_v44  ;;  %8376 = vmatpush3.bf16.msra.mxu0 %v8895_v27  ;;  %v3585_v35 = vadd.f32 %v9218_v21, %v3579_v59 }
0x139b   :  { %v3586_v39 = vadd.f32 %v9219_v29, %v3580_v37  ;;  %v7214_v37 = vld [vmem:[%s11348_s10 + $0x4] ss:$0 sm:$0xff] }
0x139d   :  { %v10517_v40 = vpack.c.bf16 %v3586_v39, %v3585_v35 }
0x139f   :  { %8346 = vmatmul.mubr.msk.bf16.gmra.mrb[148].mxu0 %vm83_vm0, %v10517_v40  ;;  %8366 = vmatmul.mubr.msk.bf16.gmra.mrb[148].mxu1 %vm83_vm0, %v10517_v40 }
0x13a0   :  { %8377 = vmatprep.mubr.msk.bf16.mxu0 %vm9227_vm1, %v9226_v25 }
0x13a7   :  { %8378 = vmatmul.mubr.msk.bf16.vlgmr.msra.gmra.mrb[152].mxu0 %vm83_vm0, %v10467_v10 }
0x13a8   :  { %8381 = vmatprep.mubr.msk.bf16.mxu0 %vm9227_vm1, %v9226_v25 }
0x13af   :  { %8382 = vmatmul.mubr.msk.bf16.gmra.mrb[156].mxu0 %vm83_vm0, %v10499_v23 }
0x13b0   :  { %8385 = vmatprep.mubr.msk.bf16.mxu0 %vm9227_vm1, %v9226_v25 }
0x13b7   :  { %8386 = vmatmul.mubr.msk.bf16.gmra.mrb[160].mxu0 %vm83_vm0, %v10517_v40 }
0x145e   :  { %v3674_v36 = vpop.f32.mrb[140].mxu0  ;;  %v3772_v41 = vpop.f32.mrb[140].mxu1 }
0x145f   :  { %v8339_v9 = vpop.f32.mrb[141].mxu0  ;;  %v8359_v5 = vpop.f32.mrb[141].mxu1  ;;  %v3675_v43 = vadd.f32 %v10538_v26, %v3674_v36  ;;  %v3773_v63 = vadd.f32 %v7197_v38, %v3772_v41 }
0x1460   :  { %v3677_v7 = vpop.f32.mrb[142].mxu0  ;;  %v3775_v54 = vpop.f32.mrb[142].mxu1 }
0x1461   :  { %v3678_v51 = vadd.f32 %v10538_v26, %v3677_v7  ;;  %v3776_v20 = vadd.f32 %v7197_v38, %v3775_v54  ;;  %v8340_v42 = vpop.f32.mrb[143].mxu0  ;;  %v8360_v2 = vpop.f32.mrb[143].mxu1 }
0x1463   :  { %v3893_v62 = vpack.c.bf16 %v3678_v51, %v3675_v43  ;;  %v3897_v19 = vpack.c.bf16 %v3776_v20, %v3773_v63 }
0x1465   :  { %8777 = vmatprep.subr.msk.bf16.mxu1 %vm513_vm2, %v3897_v19  ;;  %8393 = vmatprep.mubr.msk.bf16.mxu1 %vm513_vm2, %v3893_v62  ;;  %v3908_v45 = vsel %vm513_vm2, %v3897_v19, 0 }
0x1466   :  { %8390 = vmatpush3.bf16.xpose.msra.mxu1 %v3908_v45 }
0x146a   :  { %v3682_v50 = vpop.f32.mrb[144].mxu0  ;;  %v3780_v21 = vpop.f32.mrb[144].mxu1 }
0x146b   :  { %v3781_v48 = vadd.f32 %v7197_v38, %v3780_v21  ;;  %v8343_v52 = vpop.f32.mrb[145].mxu0  ;;  %v8363_v56 = vpop.f32.mrb[145].mxu1  ;;  %v3683_v1 = vadd.f32 %v10538_v26, %v3682_v50 }
0x146c   :  { %v3685_v57 = vpop.f32.mrb[146].mxu0  ;;  %v3783_v60 = vpop.f32.mrb[146].mxu1 }
0x146d   :  { %v3898_v61 = vpack.c.bf16 %v3781_v48, %v3781_v48  ;;  %v8344_v17 = vpop.f32.mrb[147].mxu0  ;;  %v8364_v46 = vpop.f32.mrb[147].mxu1  ;;  %v3686_v11 = vadd.f32 %v10538_v26, %v3685_v57  ;;  %v3784_v33 = vadd.f32 %v7197_v38, %v3783_v60  ;;  %v3894_v6 = vpack.c.bf16 %v3683_v1, %v3683_v1 }
0x146f   :  { %v3911_v47 = vsel %vm513_vm2, %v3898_v61, 0  ;;  %8778 = vmatprep.subr.msk.bf16.mxu1 %vm513_vm2, %v3898_v61 }
0x1470   :  { %8392 = vmatpush3.bf16.xpose.msra.mxu1 %v3911_v47 }
0x1472   :  { %v3690_v55 = vpop.f32.mrb[148].mxu0  ;;  %v3788_v32 = vpop.f32.mrb[148].mxu1 }
0x1473   :  { %v3691_v12 = vadd.f32 %v10538_v26, %v3690_v55  ;;  %v3789_v13 = vadd.f32 %v7197_v38, %v3788_v32  ;;  %v8347_v18 = vpop.f32.mrb[149].mxu0  ;;  %v8367_v29 = vpop.f32.mrb[149].mxu1 }
0x1474   :  { %v3693_v0 = vpop.f32.mrb[150].mxu0  ;;  %v3791_v31 = vpop.f32.mrb[150].mxu1  ;;  %v10579_v18 = vld [vmem:[%s11349_s2 + $0x10] sm:$0xff] }
0x1475   :  { %v3895_v22 = vpack.c.bf16 %v3691_v12, %v3686_v11  ;;  %v3899_v14 = vpack.c.bf16 %v3789_v13, %v3784_v33  ;;  %v3792_v28 = vadd.f32 %v7197_v38, %v3791_v31  ;;  %v8348_v30 = vpop.f32.mrb[151].mxu0  ;;  %v8368_v27 = vpop.f32.mrb[151].mxu1  ;;  %v3694_v54 = vadd.f32 %v10538_v26, %v3693_v0  ;;  %v10573_v11 = vld [vmem:[%s11349_s2] sm:$0xff]  ;;  %v10585_v0 = vld [vmem:[%s11349_s2 + $0x8] sm:$0xff] }
0x1477   :  { %v3900_v59 = vpack.c.bf16 %v3792_v28, %v3792_v28  ;;  %8394 = vmatmul.mubr.msk.bf16.vlgmr.msra.gmra.mrb[152].mxu1 %vm513_vm2, %v3894_v6  ;;  %8779 = vmatprep.subr.msk.bf16.mxu0 %vm513_vm2, %v3899_v14  ;;  %v3968_v44 = vsel %vm513_vm2, %v3899_v14, 0  ;;  %v3896_v42 = vpack.c.bf16 %v3694_v54, %v3694_v54 }
0x1478   :  { %8401 = vmatprep.mubr.msk.bf16.mxu0 %vm513_vm2, %v3895_v22  ;;  %8398 = vmatpush3.bf16.xpose.msra.mxu0 %v3968_v44 }
0x1479   :  { %8780 = vmatprep.subr.msk.bf16.mxu0 %vm513_vm2, %v3900_v59  ;;  %v3971_v5 = vsel %vm513_vm2, %v3900_v59, 0 }
0x147a   :  { %v3870_v35 = vpop.f32.mrb[152].mxu0 }
0x147b   :  { %v8379_v39 = vpop.f32.mrb[153].mxu0  ;;  %v3871_v38 = vadd.f32 %v7214_v37, %v3870_v35 }
0x147c   :  { %v3873_v36 = vpop.f32.mrb[154].mxu0 }
0x147d   :  { %v3874_v41 = vadd.f32 %v7214_v37, %v3873_v36  ;;  %v8380_v9 = vpop.f32.mrb[155].mxu0 }
0x147f   :  { %v4091_v7 = vpack.c.bf16 %v3874_v41, %v3871_v38 }
0x1480   :  { %8400 = vmatpush3.bf16.xpose.msra.mxu0 %v3971_v5 }
0x1481   :  { %8405 = vmatprep.subr.bf16.mxu1 %v4091_v7 }
0x1482   :  { %v3878_v43 = vpop.f32.mrb[156].mxu0  ;;  %8406 = vmatpush3.bf16.msra.mxu1 %v4091_v7 }
0x1483   :  { %v3879_v63 = vadd.f32 %v7214_v37, %v3878_v43  ;;  %v8383_v51 = vpop.f32.mrb[157].mxu0 }
0x1484   :  { %v3881_v20 = vpop.f32.mrb[158].mxu0 }
0x1485   :  { %v4092_v2 = vpack.c.bf16 %v3879_v63, %v3879_v63  ;;  %v8384_v62 = vpop.f32.mrb[159].mxu0  ;;  %v3882_v26 = vadd.f32 %v7214_v37, %v3881_v20 }
0x1487   :  { %v4102_v19 = vsel %vm715_vm3, %v4092_v2, 0  ;;  %8402 = vmatmul.mubr.msk.bf16.vlgmr.msra.gmra.mrb[164].mxu0 %vm513_vm2, %v3896_v42  ;;  %8781 = vmatprep.subr.msk.bf16.mxu1 %vm715_vm3, %v4092_v2 }
0x1488   :  { %8408 = vmatpush3.bf16.msra.mxu1 %v4102_v19 }
0x1489   :  { %8421 = vmatprep.subr.bf16.mxu1 %v9226_v25 }
0x148a   :  { %v3886_v45 = vpop.f32.mrb[160].mxu0 }
0x148b   :  { %v3887_v50 = vadd.f32 %v7214_v37, %v3886_v45  ;;  %v8387_v21 = vpop.f32.mrb[161].mxu0 }
0x148c   :  { %v3889_v48 = vpop.f32.mrb[162].mxu0 }
0x148d   :  { %v4093_v52 = vpack.c.bf16 %v3887_v50, %v3882_v26  ;;  %v3890_v56 = vadd.f32 %v7214_v37, %v3889_v48  ;;  %v8388_v57 = vpop.f32.mrb[163].mxu0 }
0x148f   :  { %v4094_v60 = vpack.c.bf16 %v3890_v56, %v3890_v56  ;;  %8413 = vmatprep.subr.bf16.mxu0 %v4093_v52 }
0x1490   :  { %8414 = vmatpush3.bf16.msra.mxu0 %v4093_v52 }
0x1491   :  { %8782 = vmatprep.subr.msk.bf16.mxu0 %vm715_vm3, %v4094_v60  ;;  %v4159_v61 = vsel %vm715_vm3, %v4094_v60, 0 }
0x1494   :  { %8416 = vmatpush3.bf16.msra.mxu0 %v4159_v61 }
0x1495   :  { %8441 = vmatprep.subr.bf16.mxu0 %v9226_v25 }
0x154a   :  { %v8395_v17 = vpop.f32.mrb[152].mxu1 }
0x154b   :  { %v3947_v46 = vpop.f32.mrb[153].mxu1  ;;  %v3956_v27 = vadd.f32 %v10579_v18, %v8395_v17 }
0x154c   :  { %v8396_v47 = vpop.f32.mrb[154].mxu1  ;;  %v3948_v22 = vadd.f32 %v10573_v11, %v3947_v46 }
0x154d   :  { %v3950_v1 = vpop.f32.mrb[155].mxu1  ;;  %v4027_v37 = vsel %vm634_vm4, %v3956_v27, -inf }
0x154e   :  { %v3951_v28 = vadd.f32 %v10585_v0, %v3950_v1  ;;  %v4021_v59 = vsel %vm634_vm4, %v3948_v22, -inf }
0x1550   :  { %v4024_v44 = vsel %vm634_vm4, %v3951_v28, -inf }
0x155a   :  { %v8403_v55 = vpop.f32.mrb[164].mxu0 }
0x155b   :  { %v4007_v32 = vpop.f32.mrb[165].mxu0  ;;  %v4016_v29 = vadd.f32 %v10579_v18, %v8403_v55 }
0x155c   :  { %v4008_v33 = vadd.f32 %v10573_v11, %v4007_v32  ;;  %v8404_v12 = vpop.f32.mrb[166].mxu0 }
0x155d   :  { %v4010_v13 = vpop.f32.mrb[167].mxu0  ;;  %v4036_v30 = vsel %vm634_vm4, %v4016_v29, -inf }
0x155e   :  { %v4011_v31 = vadd.f32 %v10585_v0, %v4010_v13  ;;  %v4030_v6 = vsel %vm634_vm4, %v4008_v33, -inf }
0x155f   :  { %4031 = vmax.xlane.f32.xlu0 %v4030_v6 }
0x1560   :  { %v4033_v14 = vsel %vm634_vm4, %v4011_v31, -inf }
0x1561   :  { %4034 = vmax.xlane.f32.xlu1 %v4033_v14 }
0x1563   :  { %4037 = vmax.xlane.f32.xlu0 %v4036_v30 }
0x1565   :  { %4022 = vmax.xlane.f32.xlu1 %v4021_v59  ;;  %v8896_v59 = vld [vmem:[%s11375_s9 + $0xa0] sm:$0xff]  }
0x1567   :  { %4025 = vmax.xlane.f32.xlu0 %v4024_v44 }
0x1569   :  { %4028 = vmax.xlane.f32.xlu1 %v4027_v37 }
0x15ec   :  { %v4032_v35 = vpop.xlane.xlu0 %4031 }
0x15ed   :  { %v4042_v39 = vsub.f32 %v4008_v33, %v4032_v35 }
0x15ee   :  { %v4035_v36 = vpop.xlane.xlu1 %4034 }
0x15ef   :  { %v4051_v38 = vmul.f32 1.442695, %v4042_v39  ;;  %v4043_v41 = vsub.f32 %v4011_v31, %v4035_v36 }
0x15f0   :  { %v4038_v9 = vpop.xlane.xlu0 %4037 }
0x15f1   :  { %9096 = vpow2.f32 %v4051_v38  ;;  %v4053_v5 = vmul.f32 1.442695, %v4043_v41  ;;  %v4044_v7 = vsub.f32 %v4016_v29, %v4038_v9  ;;  %v8897_v38 = vld [vmem:[%s11375_s9 + $0xa8] sm:$0xff]  }
0x15f2   :  { %v4023_v54 = vpop.xlane.xlu1 %4022 }
0x15f3   :  { %9098 = vpow2.f32 %v4053_v5  ;;  %v4055_v43 = vmul.f32 1.442695, %v4044_v7  ;;  %v4039_v63 = vsub.f32 %v3948_v22, %v4023_v54  ;;  %v8898_v5 = vld [vmem:[%s11374_s7 + $0xa0] sm:$0xff]   ;;  %v8899_v54 = vld [vmem:[%s11375_s9 + $0xb0] sm:$0xff]  }
0x15f4   :  { %v4026_v51 = vpop.xlane.xlu0 %4025 }
0x15f5   :  { %9100 = vpow2.f32 %v4055_v43  ;;  %v4045_v20 = vmul.f32 1.442695, %v4039_v63  ;;  %v4040_v42 = vsub.f32 %v3951_v28, %v4026_v51  ;;  %v8900_v43 = vld [vmem:[%s11374_s7 + $0xa8] sm:$0xff]   ;;  %v8901_v63 = vld [vmem:[%s11375_s9 + $0xb8] sm:$0xff]   ;;  %v8902_v51 = vld [vmem:[%s11374_s7 + $0xb0] sm:$0xff]  }
0x15f6   :  { %v4029_v2 = vpop.xlane.xlu1 %4028 }
0x15f7   :  { %9102 = vpow2.f32 %v4045_v20  ;;  %v4047_v62 = vmul.f32 1.442695, %v4040_v42  ;;  %v4041_v19 = vsub.f32 %v3956_v27, %v4029_v2  ;;  %v8903_v20 = vld [vmem:[%s11374_s7 + $0xb8] sm:$0xff]   ;;  %v8904_v42 = vld [vmem:[%s11378_s28 + $0xa0] sm:$0xff]   ;;  %v8905_v2 = vld [vmem:[%s11378_s28 + $0xa8] sm:$0xff]  }
0x15f9   :  { %9104 = vpow2.f32 %v4047_v62  ;;  %v4049_v45 = vmul.f32 1.442695, %v4041_v19  ;;  %v8906_v62 = vld [vmem:[%s11378_s28 + $0xb0] sm:$0xff]   ;;  %v8907_v19 = vld [vmem:[%s11378_s28 + $0xb8] sm:$0xff]  }
0x15fb   :  { %v9097_v26 = vpop.eup %9096  ;;  %9106 = vpow2.f32 %v4049_v45 }
0x15fc   :  { %v4066_v50 = vsel %vm634_vm4, %v9097_v26, 0.0 }
0x15fd   :  { %v9099_v21 = vpop.eup %9098  ;;  %4067 = vadd.xlane.f32.xlu0 %v4066_v50 }
0x15fe   :  { %v4069_v48 = vsel %vm634_vm4, %v9099_v21, 0.0 }
0x15ff   :  { %v9101_v52 = vpop.eup %9100  ;;  %4070 = vadd.xlane.f32.xlu1 %v4069_v48 }
0x1600   :  { %v4072_v56 = vsel %vm634_vm4, %v9101_v52, 0.0 }
0x1601   :  { %v9103_v57 = vpop.eup %9102  ;;  %4073 = vadd.xlane.f32.xlu0 %v4072_v56 }
0x1602   :  { %v4057_v60 = vsel %vm634_vm4, %v9103_v57, 0.0 }
0x1603   :  { %v9105_v61 = vpop.eup %9104  ;;  %4058 = vadd.xlane.f32.xlu1 %v4057_v60 }
0x1604   :  { %v4060_v17 = vsel %vm634_vm4, %v9105_v61, 0.0 }
0x1605   :  { %v9107_v46 = vpop.eup %9106  ;;  %4061 = vadd.xlane.f32.xlu0 %v4060_v17 }
0x1606   :  { %v4063_v47 = vsel %vm634_vm4, %v9107_v46, 0.0 }
0x1607   :  { %4064 = vadd.xlane.f32.xlu1 %v4063_v47 }
0x168a   :  { %v4068_v1 = vpop.xlane.xlu0 %4067 }
0x168b   :  { %9108 = vrcp.f32 %v4068_v1 }
0x168c   :  { %v4071_v55 = vpop.xlane.xlu1 %4070 }
0x168d   :  { %9110 = vrcp.f32 %v4071_v55 }
0x168e   :  { %v4074_v32 = vpop.xlane.xlu0 %4073 }
0x168f   :  { %9112 = vrcp.f32 %v4074_v32 }
0x1690   :  { %v4059_v33 = vpop.xlane.xlu1 %4058 }
0x1691   :  { %9114 = vrcp.f32 %v4059_v33 }
0x1692   :  { %v4062_v12 = vpop.xlane.xlu0 %4061 }
0x1693   :  { %9116 = vrcp.f32 %v4062_v12 }
0x1694   :  { %v4065_v13 = vpop.xlane.xlu1 %4064 }
0x1695   :  { %v9109_v29 = vpop.eup %9108  ;;  %9118 = vrcp.f32 %v4065_v13 }
0x1696   :  { %v4084_v6 = vmul.f32 %v9109_v29, %v9097_v26  ;;  %v7241_v29 = vld [vmem:[%s11346_s6 + $0x5] ss:$0 sm:$0xff] }
0x1697   :  { %v9111_v31 = vpop.eup %9110 }
0x1698   :  { %v4085_v22 = vmul.f32 %v9111_v31, %v9099_v21 }
0x1699   :  { %v9113_v14 = vpop.eup %9112 }
0x169a   :  { %v4086_v28 = vmul.f32 %v9113_v14, %v9101_v52  ;;  %v4089_v30 = vpack.c.bf16 %v4085_v22, %v4084_v6 }
0x169b   :  { %v9115_v27 = vpop.eup %9114 }
0x169c   :  { %8417 = vmatprep.mubr.msk.bf16.mxu0 %vm634_vm4, %v4089_v30  ;;  %v4090_v44 = vpack.c.bf16 %v4086_v28, %v4086_v28  ;;  %v4081_v35 = vmul.f32 %v9115_v27, %v9103_v57 }
0x169d   :  { %v9117_v37 = vpop.eup %9116 }
0x169e   :  { %8418 = vmatmul.mubr.msk.bf16.vlgmr.msra.gmra.mrb[168].mxu0 %vm634_vm4, %v4090_v44  ;;  %v4082_v39 = vmul.f32 %v9117_v37, %v9105_v61 }
0x169f   :  { %v9119_v36 = vpop.eup %9118  ;;  %8442 = vmatpush3.bf16.msra.mxu0 %v8896_v59  ;;  %8449 = vmatprep.mubr.msk.bf16.mxu0 %vm9227_vm1, %v9226_v25 }
0x16a0   :  { %v4083_v41 = vmul.f32 %v9119_v36, %v9107_v46  ;;  %8443 = vmatprep.subr.bf16.mxu0 %v9226_v25  ;;  %v4087_v9 = vpack.c.bf16 %v4082_v39, %v4081_v35  ;;  %v7258_v46 = vld [vmem:[%s11347_s8 + $0x5] ss:$0 sm:$0xff] }
0x16a2   :  { %8409 = vmatprep.mubr.msk.bf16.mxu1 %vm634_vm4, %v4087_v9  ;;  %v4088_v7 = vpack.c.bf16 %v4083_v41, %v4083_v41 }
0x16a3   :  { %8444 = vmatpush3.bf16.msra.mxu0 %v8897_v38 }
0x16a4   :  { %8410 = vmatmul.mubr.msk.bf16.vlgmr.msra.gmra.mrb[156].mxu1 %vm634_vm4, %v4088_v7  ;;  %8445 = vmatprep.subr.bf16.mxu0 %v9226_v25 }
0x16a5   :  { %8422 = vmatpush3.bf16.msra.mxu1 %v8898_v5  ;;  %8429 = vmatprep.mubr.msk.bf16.mxu1 %vm9227_vm1, %v9226_v25 }
0x16a6   :  { %8423 = vmatprep.subr.bf16.mxu1 %v9226_v25 }
0x16a7   :  { %8446 = vmatpush3.bf16.msra.mxu0 %v8899_v54 }
0x16a8   :  { %8447 = vmatprep.subr.bf16.mxu0 %v9226_v25 }
0x16a9   :  { %8424 = vmatpush3.bf16.msra.mxu1 %v8900_v43 }
0x16aa   :  { %8425 = vmatprep.subr.bf16.mxu1 %v9226_v25 }
0x16ab   :  { %8448 = vmatpush3.bf16.msra.mxu0 %v8901_v63 }
0x16ad   :  { %8426 = vmatpush3.bf16.msra.mxu1 %v8902_v51 }
0x16ae   :  { %8450 = vmatmul.mubr.msk.bf16.vlgmr.msra.gmra.mrb[172].mxu0 %vm83_vm0, %v10467_v10  ;;  %8427 = vmatprep.subr.bf16.mxu1 %v9226_v25 }
0x16af   :  { %8453 = vmatprep.mubr.msk.bf16.mxu0 %vm9227_vm1, %v9226_v25 }
0x16b1   :  { %8428 = vmatpush3.bf16.msra.mxu1 %v8903_v20 }
0x16b2   :  { %8461 = vmatprep.subr.bf16.mxu1 %v9226_v25 }
0x16b4   :  { %8430 = vmatmul.mubr.msk.bf16.vlgmr.msra.gmra.mrb[160].mxu1 %vm83_vm0, %v10467_v10 }
0x16b5   :  { %8433 = vmatprep.mubr.msk.bf16.mxu1 %vm9227_vm1, %v9226_v25  ;;  %8462 = vmatpush3.bf16.msra.mxu1 %v8904_v42 }
0x16b6   :  { %8454 = vmatmul.mubr.msk.bf16.gmra.mrb[176].mxu0 %vm83_vm0, %v10499_v23  ;;  %8463 = vmatprep.subr.bf16.mxu1 %v9226_v25 }
0x16b7   :  { %8457 = vmatprep.mubr.msk.bf16.mxu0 %vm9227_vm1, %v9226_v25 }
0x16b9   :  { %8464 = vmatpush3.bf16.msra.mxu1 %v8905_v2 }
0x16ba   :  { %8465 = vmatprep.subr.bf16.mxu1 %v9226_v25 }
0x16bc   :  { %8434 = vmatmul.mubr.msk.bf16.gmra.mrb[164].mxu1 %vm83_vm0, %v10499_v23 }
0x16bd   :  { %8437 = vmatprep.mubr.msk.bf16.mxu1 %vm9227_vm1, %v9226_v25  ;;  %8466 = vmatpush3.bf16.msra.mxu1 %v8906_v62 }
0x16be   :  { %8458 = vmatmul.mubr.msk.bf16.gmra.mrb[180].mxu0 %vm83_vm0, %v10517_v40  ;;  %8467 = vmatprep.subr.bf16.mxu1 %v9226_v25 }
0x16c1   :  { %8468 = vmatpush3.bf16.msra.mxu1 %v8907_v19 }
0x16c4   :  { %8438 = vmatmul.mubr.msk.bf16.gmra.mrb[168].mxu1 %vm83_vm0, %v10517_v40 }
0x16c5   :  { %8469 = vmatprep.mubr.msk.bf16.mxu1 %vm9227_vm1, %v9226_v25 }
0x16cc   :  { %8470 = vmatmul.mubr.msk.bf16.vlgmr.msra.gmra.mrb[172].mxu1 %vm83_vm0, %v10467_v10 }
0x16cd   :  { %8473 = vmatprep.mubr.msk.bf16.mxu1 %vm9227_vm1, %v9226_v25 }
0x16d4   :  { %8474 = vmatmul.mubr.msk.bf16.gmra.mrb[176].mxu1 %vm83_vm0, %v10499_v23 }
0x16d5   :  { %8477 = vmatprep.mubr.msk.bf16.mxu1 %vm9227_vm1, %v9226_v25 }
0x16dc   :  { %8478 = vmatmul.mubr.msk.bf16.gmra.mrb[180].mxu1 %vm83_vm0, %v10517_v40 }
0x1771   :  { %v10689_v45 = vpop.f32.mrb[168].mxu0 }
0x1772   :  { %v10691_v26 = vpop.f32.mrb[169].mxu0 }
0x1773   :  { %v8420_v50 = vpop.f32.mrb[170].mxu0 }
0x1774   :  { %v10693_v21 = vpop.f32.mrb[171].mxu0 }
0x1775   :  { %v4211_v48 = vpack.c.bf16 %v10689_v45, %v10693_v21  ;;  %v8913_v45 = vld [vmem:[%s11350_s11 + $0x28] sm:$0xff]  }
0x1777   :  { %v10697_v52 = vpop.f32.mrb[156].mxu1 }
0x1778   :  { %v4210_v56 = vpack.c.bf16 %v10691_v26, %v10697_v52  ;;  %v10701_v57 = vpop.f32.mrb[157].mxu1 }
0x1779   :  { %v8412_v60 = vpop.f32.mrb[158].mxu1 }
0x177a   :  { %v10703_v61 = vpop.f32.mrb[159].mxu1 }
0x177b   :  { %v4209_v17 = vpack.c.bf16 %v10703_v61, %v10701_v57  ;;  %v8912_v57 = vld [vmem:[%s11375_s9 + $0xd8] sm:$0xff]  }
0x1781   :  { %v4388_v47 = vpop.f32.mrb[172].mxu0 }
0x1782   :  { %v8451_v1 = vpop.f32.mrb[173].mxu0  ;;  %v4389_v32 = vadd.f32 %v7258_v46, %v4388_v47 }
0x1783   :  { %v4391_v55 = vpop.f32.mrb[174].mxu0 }
0x1784   :  { %v4392_v33 = vadd.f32 %v7258_v46, %v4391_v55  ;;  %v8452_v12 = vpop.f32.mrb[175].mxu0 }
0x1786   :  { %v4513_v13 = vpack.c.bf16 %v4392_v33, %v4389_v32 }
0x1787   :  { %v4290_v31 = vpop.f32.mrb[160].mxu1 }
0x1788   :  { %v8431_v6 = vpop.f32.mrb[161].mxu1  ;;  %8783 = vmatprep.subr.msk.bf16.mxu0 %vm513_vm2, %v4513_v13  ;;  %v4524_v22 = vsel %vm513_vm2, %v4513_v13, 0  ;;  %v4291_v30 = vadd.f32 %v7241_v29, %v4290_v31 }
0x1789   :  { %v4293_v14 = vpop.f32.mrb[162].mxu1  ;;  %v4396_v28 = vpop.f32.mrb[176].mxu0  ;;  %8482 = vmatpush3.bf16.xpose.msra.mxu0 %v4524_v22 }
0x178a   :  { %v4294_v27 = vadd.f32 %v7241_v29, %v4293_v14  ;;  %v4397_v59 = vadd.f32 %v7258_v46, %v4396_v28  ;;  %v8432_v44 = vpop.f32.mrb[163].mxu1  ;;  %v8455_v37 = vpop.f32.mrb[177].mxu0 }
0x178b   :  { %v4399_v35 = vpop.f32.mrb[178].mxu0 }
0x178c   :  { %v4509_v39 = vpack.c.bf16 %v4294_v27, %v4291_v30  ;;  %v4514_v36 = vpack.c.bf16 %v4397_v59, %v4397_v59  ;;  %v8456_v38 = vpop.f32.mrb[179].mxu0  ;;  %v4400_v43 = vadd.f32 %v7258_v46, %v4399_v35 }
0x178e   :  { %8784 = vmatprep.subr.msk.bf16.mxu0 %vm513_vm2, %v4514_v36  ;;  %8485 = vmatprep.mubr.msk.bf16.mxu0 %vm513_vm2, %v4509_v39  ;;  %v4527_v9 = vsel %vm513_vm2, %v4514_v36, 0 }
0x178f   :  { %v4298_v41 = vpop.f32.mrb[164].mxu1 }
0x1790   :  { %v8435_v5 = vpop.f32.mrb[165].mxu1  ;;  %v4299_v63 = vadd.f32 %v7241_v29, %v4298_v41 }
0x1791   :  { %v4301_v7 = vpop.f32.mrb[166].mxu1  ;;  %v4404_v54 = vpop.f32.mrb[180].mxu0  ;;  %8484 = vmatpush3.bf16.xpose.msra.mxu0 %v4527_v9 }
0x1792   :  { %v4405_v51 = vadd.f32 %v7258_v46, %v4404_v54  ;;  %v8436_v20 = vpop.f32.mrb[167].mxu1  ;;  %v8459_v42 = vpop.f32.mrb[181].mxu0  ;;  %v4510_v60 = vpack.c.bf16 %v4299_v63, %v4299_v63  ;;  %v4302_v1 = vadd.f32 %v7241_v29, %v4301_v7 }
0x1793   :  { %v4407_v2 = vpop.f32.mrb[182].mxu0 }
0x1794   :  { %v4515_v62 = vpack.c.bf16 %v4405_v51, %v4400_v43  ;;  %v4408_v19 = vadd.f32 %v7258_v46, %v4407_v2  ;;  %v8460_v50 = vpop.f32.mrb[183].mxu0  ;;  %v7275_v46 = vld [vmem:[%s11348_s10 + $0x5] ss:$0 sm:$0xff] }
0x1796   :  { %8785 = vmatprep.subr.msk.bf16.mxu0 %vm513_vm2, %v4515_v62  ;;  %v4516_v55 = vpack.c.bf16 %v4408_v19, %v4408_v19  ;;  %v4584_v12 = vsel %vm513_vm2, %v4515_v62, 0 }
0x1797   :  { %v4306_v47 = vpop.f32.mrb[168].mxu1 }
0x1798   :  { %v4307_v32 = vadd.f32 %v7241_v29, %v4306_v47  ;;  %v8439_v33 = vpop.f32.mrb[169].mxu1  ;;  %8486 = vmatmul.mubr.msk.bf16.vlgmr.msra.gmra.mrb[184].mxu0 %vm513_vm2, %v4510_v60  ;;  %v4587_v14 = vsel %vm513_vm2, %v4516_v55, 0 }
0x1799   :  { %v4309_v13 = vpop.f32.mrb[170].mxu1  ;;  %8490 = vmatpush3.bf16.xpose.msra.mxu0 %v4584_v12 }
0x179a   :  { %v4511_v31 = vpack.c.bf16 %v4307_v32, %v4302_v1  ;;  %v8440_v6 = vpop.f32.mrb[171].mxu1  ;;  %8786 = vmatprep.subr.msk.bf16.mxu0 %vm513_vm2, %v4516_v55  ;;  %v4310_v27 = vadd.f32 %v7241_v29, %v4309_v13 }
0x179c   :  { %8493 = vmatprep.mubr.msk.bf16.mxu0 %vm513_vm2, %v4511_v31  ;;  %v4512_v39 = vpack.c.bf16 %v4310_v27, %v4310_v27 }
0x179f   :  { %v4486_v22 = vpop.f32.mrb[172].mxu1 }
0x17a0   :  { %v8471_v28 = vpop.f32.mrb[173].mxu1  ;;  %v4487_v59 = vadd.f32 %v7275_v46, %v4486_v22 }
0x17a1   :  { %v4489_v30 = vpop.f32.mrb[174].mxu1  ;;  %8492 = vmatpush3.bf16.xpose.msra.mxu0 %v4587_v14 }
0x17a2   :  { %v4490_v44 = vadd.f32 %v7275_v46, %v4489_v30  ;;  %v8472_v37 = vpop.f32.mrb[175].mxu1 }
0x17a4   :  { %v4707_v35 = vpack.c.bf16 %v4490_v44, %v4487_v59 }
0x17a6   :  { %8497 = vmatprep.subr.bf16.mxu1 %v4707_v35 }
0x17a7   :  { %v4494_v36 = vpop.f32.mrb[176].mxu1  ;;  %8498 = vmatpush3.bf16.msra.mxu1 %v4707_v35 }
0x17a8   :  { %v4495_v38 = vadd.f32 %v7275_v46, %v4494_v36  ;;  %v8475_v41 = vpop.f32.mrb[177].mxu1  ;;  %8494 = vmatmul.mubr.msk.bf16.vlgmr.msra.gmra.mrb[188].mxu0 %vm513_vm2, %v4512_v39 }
0x17a9   :  { %v4497_v9 = vpop.f32.mrb[178].mxu1 }
0x17aa   :  { %v4708_v5 = vpack.c.bf16 %v4495_v38, %v4495_v38  ;;  %v8476_v7 = vpop.f32.mrb[179].mxu1  ;;  %v4498_v43 = vadd.f32 %v7275_v46, %v4497_v9 }
0x17ac   :  { %v4718_v54 = vsel %vm715_vm3, %v4708_v5, 0  ;;  %8787 = vmatprep.subr.msk.bf16.mxu1 %vm715_vm3, %v4708_v5 }
0x17ad   :  { %8500 = vmatpush3.bf16.msra.mxu1 %v4718_v54 }
0x17ae   :  { %8513 = vmatprep.subr.bf16.mxu1 %v9226_v25 }
0x17af   :  { %v4502_v29 = vpop.f32.mrb[180].mxu1 }
0x17b0   :  { %v4503_v63 = vadd.f32 %v7275_v46, %v4502_v29  ;;  %v8479_v51 = vpop.f32.mrb[181].mxu1 }
0x17b1   :  { %v4505_v20 = vpop.f32.mrb[182].mxu1 }
0x17b2   :  { %v4709_v42 = vpack.c.bf16 %v4503_v63, %v4498_v43  ;;  %v4506_v2 = vadd.f32 %v7275_v46, %v4505_v20  ;;  %v8480_v62 = vpop.f32.mrb[183].mxu1 }
0x17b4   :  { %v4710_v19 = vpack.c.bf16 %v4506_v2, %v4506_v2  ;;  %8505 = vmatprep.subr.bf16.mxu0 %v4709_v42 }
0x17b5   :  { %8506 = vmatpush3.bf16.msra.mxu0 %v4709_v42 }
0x17b6   :  { %8788 = vmatprep.subr.msk.bf16.mxu0 %vm715_vm3, %v4710_v19  ;;  %v4775_v50 = vsel %vm715_vm3, %v4710_v19, 0 }
0x17b9   :  { %8508 = vmatpush3.bf16.msra.mxu0 %v4775_v50 }
0x17ba   :  { %8527 = vmatprep.subr.bf16.mxu0 %v9226_v25 }
0x186b   :  { %v8487_v60 = vpop.f32.mrb[184].mxu0 }
0x186c   :  { %v4563_v47 = vpop.f32.mrb[185].mxu0  ;;  %v4572_v33 = vadd.f32 %v10579_v18, %v8487_v60 }
0x186d   :  { %v4564_v1 = vadd.f32 %v10573_v11, %v4563_v47  ;;  %v8488_v55 = vpop.f32.mrb[186].mxu0 }
0x186e   :  { %v4566_v32 = vpop.f32.mrb[187].mxu0  ;;  %v4643_v6 = vsel %vm634_vm4, %v4572_v33, -inf }
0x186f   :  { %v4567_v12 = vadd.f32 %v10585_v0, %v4566_v32  ;;  %v4637_v13 = vsel %vm634_vm4, %v4564_v1, -inf }
0x1870   :  { %4638 = vmax.xlane.f32.xlu0 %v4637_v13 }
0x1871   :  { %v4640_v31 = vsel %vm634_vm4, %v4567_v12, -inf }
0x1872   :  { %4641 = vmax.xlane.f32.xlu1 %v4640_v31 }
0x1874   :  { %4644 = vmax.xlane.f32.xlu0 %v4643_v6 }
0x187b   :  { %v8495_v46 = vpop.f32.mrb[188].mxu0 }
0x187c   :  { %v4623_v22 = vpop.f32.mrb[189].mxu0  ;;  %v4632_v27 = vadd.f32 %v10579_v18, %v8495_v46 }
0x187d   :  { %v4624_v14 = vadd.f32 %v10573_v11, %v4623_v22  ;;  %v8496_v28 = vpop.f32.mrb[190].mxu0 }
0x187e   :  { %v4626_v30 = vpop.f32.mrb[191].mxu0  ;;  %v4652_v35 = vsel %vm634_vm4, %v4632_v27, -inf }
0x187f   :  { %v4627_v59 = vadd.f32 %v10585_v0, %v4626_v30  ;;  %v4646_v44 = vsel %vm634_vm4, %v4624_v14, -inf }
0x1880   :  { %4647 = vmax.xlane.f32.xlu1 %v4646_v44 }
0x1881   :  { %v4649_v37 = vsel %vm634_vm4, %v4627_v59, -inf }
0x1882   :  { %4650 = vmax.xlane.f32.xlu0 %v4649_v37 }
0x1884   :  { %4653 = vmax.xlane.f32.xlu1 %v4652_v35 }
0x18fd   :  { %v4639_v39 = vpop.xlane.xlu0 %4638 }
0x18fe   :  { %v4655_v36 = vsub.f32 %v4564_v1, %v4639_v39 }
0x18ff   :  { %v4642_v38 = vpop.xlane.xlu1 %4641 }
0x1900   :  { %v4661_v41 = vmul.f32 1.442695, %v4655_v36  ;;  %v4656_v11 = vsub.f32 %v4567_v12, %v4642_v38 }
0x1901   :  { %v4645_v9 = vpop.xlane.xlu0 %4644 }
0x1902   :  { %9120 = vpow2.f32 %v4661_v41  ;;  %v4663_v5 = vmul.f32 1.442695, %v4656_v11  ;;  %v4657_v18 = vsub.f32 %v4572_v33, %v4645_v9 }
0x1904   :  { %9122 = vpow2.f32 %v4663_v5  ;;  %v4665_v0 = vmul.f32 1.442695, %v4657_v18 }
0x1906   :  { %9124 = vpow2.f32 %v4665_v0 }
0x190c   :  { %v9121_v7 = vpop.eup %9120 }
0x190d   :  { %v4648_v54 = vpop.xlane.xlu1 %4647  ;;  %v4673_v29 = vsel %vm634_vm4, %v9121_v7, 0.0 }
0x190e   :  { %v9123_v43 = vpop.eup %9122  ;;  %v4658_v63 = vsub.f32 %v4624_v14, %v4648_v54  ;;  %4674 = vadd.xlane.f32.xlu0 %v4673_v29  ;;  %v8908_v54 = vld [vmem:[%s11350_s11 + $0x20] sm:$0xff]  }
0x190f   :  { %v4651_v51 = vpop.xlane.xlu0 %4650  ;;  %v4676_v20 = vsel %vm634_vm4, %v9123_v43, 0.0 }
0x1910   :  { %v9125_v42 = vpop.eup %9124  ;;  %v4667_v2 = vmul.f32 1.442695, %v4658_v63  ;;  %v4659_v62 = vsub.f32 %v4627_v59, %v4651_v51  ;;  %4677 = vadd.xlane.f32.xlu1 %v4676_v20  ;;  %v8910_v63 = vld [vmem:[%s11375_s9 + $0xc8] sm:$0xff]   ;;  %v8911_v51 = vld [vmem:[%s11375_s9 + $0xd0] sm:$0xff]  }
0x1911   :  { %v4654_v19 = vpop.xlane.xlu1 %4653  ;;  %v4679_v50 = vsel %vm634_vm4, %v9125_v42, 0.0  ;;  %v8916_v20 = vld [vmem:[%s11374_s7 + $0xd0] sm:$0xff]  }
0x1912   :  { %9126 = vpow2.f32 %v4667_v2  ;;  %v4669_v60 = vmul.f32 1.442695, %v4659_v62  ;;  %v4660_v47 = vsub.f32 %v4632_v27, %v4654_v19  ;;  %4680 = vadd.xlane.f32.xlu0 %v4679_v50 }
0x1914   :  { %9128 = vpow2.f32 %v4669_v60  ;;  %v4671_v1 = vmul.f32 1.442695, %v4660_v47 }
0x1916   :  { %9130 = vpow2.f32 %v4671_v1 }
0x191c   :  { %v9127_v55 = vpop.eup %9126 }
0x191d   :  { %v4682_v32 = vsel %vm634_vm4, %v9127_v55, 0.0 }
0x191e   :  { %v9129_v33 = vpop.eup %9128  ;;  %4683 = vadd.xlane.f32.xlu1 %v4682_v32 }
0x191f   :  { %v4685_v12 = vsel %vm634_vm4, %v9129_v33, 0.0 }
0x1920   :  { %v9131_v13 = vpop.eup %9130  ;;  %4686 = vadd.xlane.f32.xlu0 %v4685_v12 }
0x1921   :  { %v4688_v31 = vsel %vm634_vm4, %v9131_v13, 0.0 }
0x1922   :  { %4689 = vadd.xlane.f32.xlu1 %v4688_v31  ;;  %v8918_v31 = vld [vmem:[%s11378_s28 + $0xc0] sm:$0xff]  }
0x199b   :  { %v4675_v6 = vpop.xlane.xlu0 %4674 }
0x199c   :  { %9132 = vrcp.f32 %v4675_v6 }
0x199d   :  { %v4678_v46 = vpop.xlane.xlu1 %4677 }
0x199e   :  { %9134 = vrcp.f32 %v4678_v46 }
0x199f   :  { %v4681_v22 = vpop.xlane.xlu0 %4680 }
0x19a0   :  { %9136 = vrcp.f32 %v4681_v22  ;;  %v8919_v22 = vld [vmem:[%s11378_s28 + $0xc8] sm:$0xff]  }
0x19a6   :  { %v9133_v14 = vpop.eup %9132 }
0x19a7   :  { %v4697_v30 = vmul.f32 %v9133_v14, %v9121_v7 }
0x19a8   :  { %v9135_v28 = vpop.eup %9134 }
0x19a9   :  { %v4698_v27 = vmul.f32 %v9135_v28, %v9123_v43  ;;  %v8909_v43 = vld [vmem:[%s11375_s9 + $0xc0] sm:$0xff]  }
0x19aa   :  { %v9137_v59 = vpop.eup %9136 }
0x19ab   :  { %v4699_v44 = vmul.f32 %v9137_v59, %v9125_v42  ;;  %v4684_v37 = vpop.xlane.xlu1 %4683  ;;  %v4703_v35 = vpack.c.bf16 %v4698_v27, %v4697_v30  ;;  %v8917_v42 = vld [vmem:[%s11374_s7 + $0xd8] sm:$0xff]   ;;  %v8920_v30 = vld [vmem:[%s11378_s28 + $0xd0] sm:$0xff]  }
0x19ac   :  { %9138 = vrcp.f32 %v4684_v37  ;;  %v7327_v37 = vld [vmem:[%s11347_s8 + $0x6] ss:$0 sm:$0xff] }
0x19ad   :  { %v4704_v39 = vpack.c.bf16 %v4699_v44, %v4699_v44  ;;  %v4687_v36 = vpop.xlane.xlu0 %4686  ;;  %8501 = vmatprep.mubr.msk.bf16.mxu1 %vm634_vm4, %v4703_v35  ;;  %v8921_v44 = vld [vmem:[%s11378_s28 + $0xd8] sm:$0xff]  }
0x19ae   :  { %9140 = vrcp.f32 %v4687_v36 }
0x19af   :  { %v4690_v38 = vpop.xlane.xlu1 %4689  ;;  %8502 = vmatmul.mubr.msk.bf16.vlgmr.msra.gmra.mrb[184].mxu1 %vm634_vm4, %v4704_v39 }
0x19b0   :  { %9142 = vrcp.f32 %v4690_v38  ;;  %8515 = vmatprep.mubr.msk.bf16.mxu1 %vm9227_vm1, %v9226_v25  ;;  %8514 = vmatpush3.bf16.msra.mxu1 %v8913_v45 }
0x19b1   :  { %8541 = vmatprep.subr.bf16.mxu1 %v9226_v25 }
0x19b6   :  { %v9139_v41 = vpop.eup %9138 }
0x19b7   :  { %v4700_v9 = vmul.f32 %v9139_v41, %v9127_v55 }
0x19b8   :  { %v9141_v11 = vpop.eup %9140 }
0x19b9   :  { %v4701_v5 = vmul.f32 %v9141_v11, %v9129_v33 }
0x19ba   :  { %v9143_v18 = vpop.eup %9142 }
0x19bb   :  { %v4702_v0 = vmul.f32 %v9143_v18, %v9131_v13  ;;  %v4705_v7 = vpack.c.bf16 %v4701_v5, %v4700_v9 }
0x19bd   :  { %8509 = vmatprep.mubr.msk.bf16.mxu0 %vm634_vm4, %v4705_v7  ;;  %v4706_v29 = vpack.c.bf16 %v4702_v0, %v4702_v0 }
0x19bf   :  { %8510 = vmatmul.mubr.msk.bf16.vlgmr.msra.gmra.mrb[192].mxu0 %vm634_vm4, %v4706_v29 }
0x19c0   :  { %8528 = vmatpush3.bf16.msra.mxu0 %v8908_v54  ;;  %8529 = vmatprep.mubr.msk.bf16.mxu0 %vm9227_vm1, %v9226_v25 }
0x19c1   :  { %8561 = vmatprep.subr.bf16.mxu0 %v9226_v25 }
0x19c7   :  { %8530 = vmatmul.mubr.msk.bf16.vlgmr.msra.gmra.mrb[196].mxu0 %vm513_vm2, %v4209_v17  ;;  %v8915_v17 = vld [vmem:[%s11374_s7 + $0xc8] sm:$0xff]  }
0x19c8   :  { %8533 = vmatprep.mubr.msk.bf16.mxu0 %vm9227_vm1, %v9226_v25  ;;  %8562 = vmatpush3.bf16.msra.mxu0 %v8909_v43 }
0x19c9   :  { %8563 = vmatprep.subr.bf16.mxu0 %v9226_v25 }
0x19cc   :  { %8564 = vmatpush3.bf16.msra.mxu0 %v8910_v63 }
0x19cd   :  { %8565 = vmatprep.subr.bf16.mxu0 %v9226_v25 }
0x19cf   :  { %8534 = vmatmul.mubr.msk.bf16.gmra.mrb[200].mxu0 %vm513_vm2, %v4210_v56  ;;  %v8914_v56 = vld [vmem:[%s11374_s7 + $0xc0] sm:$0xff]  }
0x19d0   :  { %8537 = vmatprep.mubr.msk.bf16.mxu0 %vm9227_vm1, %v9226_v25  ;;  %8566 = vmatpush3.bf16.msra.mxu0 %v8911_v51 }
0x19d1   :  { %8567 = vmatprep.subr.bf16.mxu0 %v9226_v25 }
0x19d4   :  { %8568 = vmatpush3.bf16.msra.mxu0 %v8912_v57 }
0x19d7   :  { %8538 = vmatmul.mubr.msk.bf16.gmra.mrb[204].mxu0 %vm513_vm2, %v4211_v48 }
0x19d8   :  { %8569 = vmatprep.mubr.msk.bf16.mxu0 %vm9227_vm1, %v9226_v25 }
0x19df   :  { %8570 = vmatmul.mubr.msk.bf16.vlgmr.msra.gmra.mrb[208].mxu0 %vm83_vm0, %v10467_v10 }
0x19e0   :  { %8573 = vmatprep.mubr.msk.bf16.mxu0 %vm9227_vm1, %v9226_v25 }
0x19e7   :  { %8574 = vmatmul.mubr.msk.bf16.gmra.mrb[212].mxu0 %vm83_vm0, %v10499_v23 }
0x19e8   :  { %8577 = vmatprep.mubr.msk.bf16.mxu0 %vm9227_vm1, %v9226_v25 }
0x19ef   :  { %8578 = vmatmul.mubr.msk.bf16.gmra.mrb[216].mxu0 %vm83_vm0, %v10517_v40 }
0x1a82   :  { %v8503_v26 = vpop.f32.mrb[184].mxu1 }
0x1a83   :  { %v4754_v21 = vpop.f32.mrb[185].mxu1 }
0x1a84   :  { %v8504_v48 = vpop.f32.mrb[186].mxu1 }
0x1a85   :  { %v4757_v52 = vpop.f32.mrb[187].mxu1 }
0x1a86   :  { %v4825_v61 = vpack.c.bf16 %v4757_v52, %v4754_v21 }
0x1a88   :  { %8516 = vmatmul.mubr.msk.bf16.vlgmr.msra.gmra.mrb[188].mxu1 %vm513_vm2, %v4825_v61 }
0x1a89   :  { %8519 = vmatprep.mubr.msk.bf16.mxu1 %vm9227_vm1, %v9226_v25  ;;  %8542 = vmatpush3.bf16.msra.mxu1 %v8914_v56 }
0x1a8a   :  { %8543 = vmatprep.subr.bf16.mxu1 %v9226_v25 }
0x1a8d   :  { %8544 = vmatpush3.bf16.msra.mxu1 %v8915_v17 }
0x1a8e   :  { %8545 = vmatprep.subr.bf16.mxu1 %v9226_v25 }
0x1a91   :  { %8546 = vmatpush3.bf16.msra.mxu1 %v8916_v20 }
0x1a92   :  { %v8511_v2 = vpop.f32.mrb[192].mxu0  ;;  %8547 = vmatprep.subr.bf16.mxu1 %v9226_v25 }
0x1a93   :  { %v4811_v62 = vpop.f32.mrb[193].mxu0 }
0x1a94   :  { %v4826_v19 = vpack.c.bf16 %v4811_v62, %v8503_v26  ;;  %v8512_v50 = vpop.f32.mrb[194].mxu0 }
0x1a95   :  { %v4814_v60 = vpop.f32.mrb[195].mxu0  ;;  %8548 = vmatpush3.bf16.msra.mxu1 %v8917_v42 }
0x1a96   :  { %v4827_v47 = vpack.c.bf16 %v8511_v2, %v4814_v60  ;;  %8520 = vmatmul.mubr.msk.bf16.gmra.mrb[192].mxu1 %vm513_vm2, %v4826_v19  ;;  %8581 = vmatprep.subr.bf16.mxu1 %v9226_v25 }
0x1a97   :  { %8523 = vmatprep.mubr.msk.bf16.mxu1 %vm9227_vm1, %v9226_v25 }
0x1a9a   :  { %v10833_v1 = vpop.f32.mrb[196].mxu0 }
0x1a9b   :  { %v8531_v55 = vpop.f32.mrb[197].mxu0 }
0x1a9c   :  { %v10835_v32 = vpop.f32.mrb[198].mxu0 }
0x1a9d   :  { %v8532_v33 = vpop.f32.mrb[199].mxu0 }
0x1a9e   :  { %8524 = vmatmul.mubr.msk.bf16.gmra.mrb[196].mxu1 %vm513_vm2, %v4827_v47 }
0x1a9f   :  { %8549 = vmatprep.mubr.msk.bf16.mxu1 %vm9227_vm1, %v9226_v25 }
0x1aa2   :  { %v10840_v12 = vpop.f32.mrb[200].mxu0 }
0x1aa3   :  { %v8535_v13 = vpop.f32.mrb[201].mxu0 }
0x1aa4   :  { %v10845_v6 = vpop.f32.mrb[202].mxu0 }
0x1aa5   :  { %v8536_v46 = vpop.f32.mrb[203].mxu0 }
0x1aa6   :  { %8550 = vmatmul.mubr.msk.bf16.vlgmr.msra.gmra.mrb[200].mxu1 %vm83_vm0, %v10467_v10 }
0x1aa7   :  { %8553 = vmatprep.mubr.msk.bf16.mxu1 %vm9227_vm1, %v9226_v25  ;;  %8582 = vmatpush3.bf16.msra.mxu1 %v8918_v31 }
0x1aa8   :  { %8583 = vmatprep.subr.bf16.mxu1 %v9226_v25 }
0x1aaa   :  { %v4968_v14 = vpop.f32.mrb[204].mxu0 }
0x1aab   :  { %v8539_v28 = vpop.f32.mrb[205].mxu0  ;;  %8584 = vmatpush3.bf16.msra.mxu1 %v8919_v22 }
0x1aac   :  { %v4971_v27 = vpop.f32.mrb[206].mxu0  ;;  %8585 = vmatprep.subr.bf16.mxu1 %v9226_v25  ;;  %v7310_v28 = vld [vmem:[%s11346_s6 + $0x6] ss:$0 sm:$0xff] }
0x1aad   :  { %v8540_v59 = vpop.f32.mrb[207].mxu0 }
0x1aae   :  { %8554 = vmatmul.mubr.msk.bf16.gmra.mrb[204].mxu1 %vm83_vm0, %v10499_v23 }
0x1aaf   :  { %8557 = vmatprep.mubr.msk.bf16.mxu1 %vm9227_vm1, %v9226_v25  ;;  %8586 = vmatpush3.bf16.msra.mxu1 %v8920_v30 }
0x1ab0   :  { %8587 = vmatprep.subr.bf16.mxu1 %v9226_v25 }
0x1ab2   :  { %v5148_v35 = vpop.f32.mrb[208].mxu0 }
0x1ab3   :  { %v8571_v39 = vpop.f32.mrb[209].mxu0  ;;  %8588 = vmatpush3.bf16.msra.mxu1 %v8921_v44  ;;  %v5149_v38 = vadd.f32 %v7327_v37, %v5148_v35 }
0x1ab4   :  { %v5151_v36 = vpop.f32.mrb[210].mxu0 }
0x1ab5   :  { %v5152_v41 = vadd.f32 %v7327_v37, %v5151_v36  ;;  %v8572_v11 = vpop.f32.mrb[211].mxu0 }
0x1ab6   :  { %8558 = vmatmul.mubr.msk.bf16.gmra.mrb[208].mxu1 %vm83_vm0, %v10517_v40 }
0x1ab7   :  { %v5273_v9 = vpack.c.bf16 %v5152_v41, %v5149_v38  ;;  %8589 = vmatprep.mubr.msk.bf16.mxu1 %vm9227_vm1, %v9226_v25 }
0x1ab9   :  { %8789 = vmatprep.subr.msk.bf16.mxu0 %vm513_vm2, %v5273_v9  ;;  %v5284_v5 = vsel %vm513_vm2, %v5273_v9, 0 }
0x1aba   :  { %v5156_v18 = vpop.f32.mrb[212].mxu0  ;;  %8602 = vmatpush3.bf16.xpose.msra.mxu0 %v5284_v5 }
0x1abb   :  { %v5157_v0 = vadd.f32 %v7327_v37, %v5156_v18  ;;  %v8575_v7 = vpop.f32.mrb[213].mxu0 }
0x1abc   :  { %v5159_v54 = vpop.f32.mrb[214].mxu0 }
0x1abd   :  { %v5274_v29 = vpack.c.bf16 %v5157_v0, %v5157_v0  ;;  %v8576_v43 = vpop.f32.mrb[215].mxu0  ;;  %v5160_v57 = vadd.f32 %v7327_v37, %v5159_v54 }
0x1abe   :  { %8590 = vmatmul.mubr.msk.bf16.vlgmr.msra.gmra.mrb[212].mxu1 %vm83_vm0, %v10467_v10 }
0x1abf   :  { %8790 = vmatprep.subr.msk.bf16.mxu0 %vm513_vm2, %v5274_v29  ;;  %8593 = vmatprep.mubr.msk.bf16.mxu1 %vm9227_vm1, %v9226_v25  ;;  %v5287_v63 = vsel %vm513_vm2, %v5274_v29, 0 }
0x1ac2   :  { %v5164_v51 = vpop.f32.mrb[216].mxu0  ;;  %8604 = vmatpush3.bf16.xpose.msra.mxu0 %v5287_v63 }
0x1ac3   :  { %v5165_v45 = vadd.f32 %v7327_v37, %v5164_v51  ;;  %v8579_v26 = vpop.f32.mrb[217].mxu0 }
0x1ac4   :  { %v5167_v21 = vpop.f32.mrb[218].mxu0 }
0x1ac5   :  { %v5275_v48 = vpack.c.bf16 %v5165_v45, %v5160_v57  ;;  %v5168_v52 = vadd.f32 %v7327_v37, %v5167_v21  ;;  %v8580_v56 = vpop.f32.mrb[219].mxu0  ;;  %v7344_v57 = vld [vmem:[%s11348_s10 + $0x6] ss:$0 sm:$0xff] }
0x1ac6   :  { %8594 = vmatmul.mubr.msk.bf16.gmra.mrb[216].mxu1 %vm83_vm0, %v10499_v23 }
0x1ac7   :  { %8791 = vmatprep.subr.msk.bf16.mxu0 %vm513_vm2, %v5275_v48  ;;  %8597 = vmatprep.mubr.msk.bf16.mxu1 %vm9227_vm1, %v9226_v25  ;;  %v5276_v11 = vpack.c.bf16 %v5168_v52, %v5168_v52  ;;  %v5344_v9 = vsel %vm513_vm2, %v5275_v48, 0 }
0x1ac9   :  { %v5347_v63 = vsel %vm513_vm2, %v5276_v11, 0 }
0x1ace   :  { %8598 = vmatmul.mubr.msk.bf16.gmra.mrb[220].mxu1 %vm83_vm0, %v10517_v40 }
0x1b5b   :  { %v4880_v61 = vpop.f32.mrb[188].mxu1 }
0x1b5c   :  { %v10890_v17 = vadd.f32 %v10833_v1, %v4880_v61  ;;  %v8517_v20 = vpop.f32.mrb[189].mxu1 }
0x1b5d   :  { %v4883_v42 = vpop.f32.mrb[190].mxu1 }
0x1b5e   :  { %v10893_v2 = vadd.f32 %v10835_v32, %v4883_v42  ;;  %v8518_v62 = vpop.f32.mrb[191].mxu1 }
0x1b69   :  { %v4888_v19 = vpop.f32.mrb[192].mxu1 }
0x1b6a   :  { %v10896_v50 = vadd.f32 %v10840_v12, %v4888_v19  ;;  %v8521_v60 = vpop.f32.mrb[193].mxu1 }
0x1b6b   :  { %v4891_v47 = vpop.f32.mrb[194].mxu1 }
0x1b6c   :  { %v10899_v55 = vadd.f32 %v10845_v6, %v4891_v47  ;;  %v8522_v33 = vpop.f32.mrb[195].mxu1 }
0x1b71   :  { %v4896_v13 = vpop.f32.mrb[196].mxu1 }
0x1b72   :  { %v10901_v31 = vadd.f32 %v4968_v14, %v4896_v13  ;;  %v8525_v1 = vpop.f32.mrb[197].mxu1 }
0x1b73   :  { %v4899_v46 = vpop.f32.mrb[198].mxu1 }
0x1b74   :  { %v10903_v22 = vadd.f32 %v4971_v27, %v4899_v46  ;;  %v8526_v32 = vpop.f32.mrb[199].mxu1 }
0x1b79   :  { %v5050_v12 = vpop.f32.mrb[200].mxu1 }
0x1b7a   :  { %v8551_v30 = vpop.f32.mrb[201].mxu1  ;;  %v5051_v44 = vadd.f32 %v7310_v28, %v5050_v12 }
0x1b7b   :  { %v5053_v59 = vpop.f32.mrb[202].mxu1 }
0x1b7c   :  { %v5054_v37 = vadd.f32 %v7310_v28, %v5053_v59  ;;  %v8552_v6 = vpop.f32.mrb[203].mxu1 }
0x1b7e   :  { %v5269_v35 = vpack.c.bf16 %v5054_v37, %v5051_v44 }
0x1b80   :  { %8605 = vmatprep.mubr.msk.bf16.mxu0 %vm513_vm2, %v5269_v35 }
0x1b81   :  { %v5058_v14 = vpop.f32.mrb[204].mxu1 }
0x1b82   :  { %v5059_v39 = vadd.f32 %v7310_v28, %v5058_v14  ;;  %v8555_v36 = vpop.f32.mrb[205].mxu1 }
0x1b83   :  { %v5061_v38 = vpop.f32.mrb[206].mxu1 }
0x1b84   :  { %v5270_v27 = vpack.c.bf16 %v5059_v39, %v5059_v39  ;;  %v8556_v41 = vpop.f32.mrb[207].mxu1  ;;  %v5062_v18 = vadd.f32 %v7310_v28, %v5061_v38  ;;  %v10927_v39 = vld [vmem:[%s11349_s2] sm:$0xff] }
0x1b85   :  { %v10933_v41 = vld [vmem:[%s11349_s2 + $0x10] sm:$0xff] }
0x1b86   :  { %8606 = vmatmul.mubr.msk.bf16.vlgmr.msra.gmra.mrb[220].mxu0 %vm513_vm2, %v5270_v27 }
0x1b87   :  { %8610 = vmatpush3.bf16.xpose.msra.mxu0 %v5344_v9  ;;  %v10939_v9 = vld [vmem:[%s11349_s2 + $0x8] sm:$0xff] }
0x1b88   :  { %8792 = vmatprep.subr.msk.bf16.mxu0 %vm513_vm2, %v5276_v11 }
0x1b89   :  { %v5066_v5 = vpop.f32.mrb[208].mxu1 }
0x1b8a   :  { %v5067_v0 = vadd.f32 %v7310_v28, %v5066_v5  ;;  %v8559_v7 = vpop.f32.mrb[209].mxu1 }
0x1b8b   :  { %v5069_v54 = vpop.f32.mrb[210].mxu1 }
0x1b8c   :  { %v5271_v29 = vpack.c.bf16 %v5067_v0, %v5062_v18  ;;  %v8560_v43 = vpop.f32.mrb[211].mxu1  ;;  %v5070_v51 = vadd.f32 %v7310_v28, %v5069_v54 }
0x1b8e   :  { %8613 = vmatprep.mubr.msk.bf16.mxu0 %vm513_vm2, %v5271_v29  ;;  %v5272_v48 = vpack.c.bf16 %v5070_v51, %v5070_v51 }
0x1b8f   :  { %8612 = vmatpush3.bf16.xpose.msra.mxu0 %v5347_v63 }
0x1b91   :  { %v5246_v45 = vpop.f32.mrb[212].mxu1 }
0x1b92   :  { %v8591_v26 = vpop.f32.mrb[213].mxu1  ;;  %v5247_v52 = vadd.f32 %v7344_v57, %v5246_v45 }
0x1b93   :  { %v5249_v21 = vpop.f32.mrb[214].mxu1 }
0x1b94   :  { %v5250_v56 = vadd.f32 %v7344_v57, %v5249_v21  ;;  %v8592_v61 = vpop.f32.mrb[215].mxu1 }
0x1b96   :  { %v5467_v20 = vpack.c.bf16 %v5250_v56, %v5247_v52  ;;  %8614 = vmatmul.mubr.msk.bf16.vlgmr.msra.gmra.mrb[224].mxu0 %vm513_vm2, %v5272_v48 }
0x1b98   :  { %8617 = vmatprep.subr.bf16.mxu1 %v5467_v20 }
0x1b99   :  { %v5254_v42 = vpop.f32.mrb[216].mxu1  ;;  %8618 = vmatpush3.bf16.msra.mxu1 %v5467_v20 }
0x1b9a   :  { %v5255_v62 = vadd.f32 %v7344_v57, %v5254_v42  ;;  %v8595_v19 = vpop.f32.mrb[217].mxu1 }
0x1b9b   :  { %v5257_v60 = vpop.f32.mrb[218].mxu1 }
0x1b9c   :  { %v5468_v47 = vpack.c.bf16 %v5255_v62, %v5255_v62  ;;  %v8596_v33 = vpop.f32.mrb[219].mxu1  ;;  %v5258_v46 = vadd.f32 %v7344_v57, %v5257_v60 }
0x1b9e   :  { %v5478_v13 = vsel %vm715_vm3, %v5468_v47, 0  ;;  %8793 = vmatprep.subr.msk.bf16.mxu1 %vm715_vm3, %v5468_v47 }
0x1b9f   :  { %8620 = vmatpush3.bf16.msra.mxu1 %v5478_v13 }
0x1ba0   :  { %8633 = vmatprep.subr.bf16.mxu1 %v9226_v25 }
0x1ba1   :  { %v5262_v1 = vpop.f32.mrb[220].mxu1 }
0x1ba2   :  { %v5263_v32 = vadd.f32 %v7344_v57, %v5262_v1  ;;  %v8599_v28 = vpop.f32.mrb[221].mxu1 }
0x1ba3   :  { %v5265_v12 = vpop.f32.mrb[222].mxu1 }
0x1ba4   :  { %v5469_v30 = vpack.c.bf16 %v5263_v32, %v5258_v46  ;;  %v5266_v59 = vadd.f32 %v7344_v57, %v5265_v12  ;;  %v8600_v44 = vpop.f32.mrb[223].mxu1 }
0x1ba6   :  { %v5470_v37 = vpack.c.bf16 %v5266_v59, %v5266_v59  ;;  %8625 = vmatprep.subr.bf16.mxu0 %v5469_v30 }
0x1ba7   :  { %8626 = vmatpush3.bf16.msra.mxu0 %v5469_v30 }
0x1ba8   :  { %8794 = vmatprep.subr.msk.bf16.mxu0 %vm715_vm3, %v5470_v37  ;;  %v5535_v6 = vsel %vm715_vm3, %v5470_v37, 0 }
0x1bab   :  { %8628 = vmatpush3.bf16.msra.mxu0 %v5535_v6 }
0x1bac   :  { %8647 = vmatprep.subr.bf16.mxu0 %v9226_v25 }
0x1c59   :  { %v8607_v35 = vpop.f32.mrb[220].mxu0 }
0x1c5a   :  { %v5323_v14 = vpop.f32.mrb[221].mxu0  ;;  %v5332_v11 = vadd.f32 %v10933_v41, %v8607_v35 }
0x1c5b   :  { %v5324_v36 = vadd.f32 %v10927_v39, %v5323_v14  ;;  %v8608_v38 = vpop.f32.mrb[222].mxu0 }
0x1c5c   :  { %v5326_v27 = vpop.f32.mrb[223].mxu0  ;;  %v5403_v7 = vsel %vm634_vm4, %v5332_v11, -inf }
0x1c5d   :  { %v5327_v5 = vadd.f32 %v10939_v9, %v5326_v27  ;;  %v5397_v18 = vsel %vm634_vm4, %v5324_v36, -inf }
0x1c5e   :  { %5398 = vmax.xlane.f32.xlu0 %v5397_v18 }
0x1c5f   :  { %v5400_v0 = vsel %vm634_vm4, %v5327_v5, -inf }
0x1c60   :  { %5401 = vmax.xlane.f32.xlu1 %v5400_v0 }
0x1c62   :  { %5404 = vmax.xlane.f32.xlu0 %v5403_v7 }
0x1c69   :  { %v8615_v54 = vpop.f32.mrb[224].mxu0 }
0x1c6a   :  { %v5383_v29 = vpop.f32.mrb[225].mxu0  ;;  %v5392_v57 = vadd.f32 %v10933_v41, %v8615_v54 }
0x1c6b   :  { %v5384_v43 = vadd.f32 %v10927_v39, %v5383_v29  ;;  %v8616_v63 = vpop.f32.mrb[226].mxu0 }
0x1c6c   :  { %v5386_v51 = vpop.f32.mrb[227].mxu0  ;;  %v5412_v48 = vsel %vm634_vm4, %v5392_v57, -inf }
0x1c6d   :  { %v5387_v45 = vadd.f32 %v10939_v9, %v5386_v51  ;;  %v5406_v26 = vsel %vm634_vm4, %v5384_v43, -inf }
0x1c6e   :  { %5407 = vmax.xlane.f32.xlu1 %v5406_v26 }
0x1c6f   :  { %v5409_v21 = vsel %vm634_vm4, %v5387_v45, -inf }
0x1c70   :  { %5410 = vmax.xlane.f32.xlu0 %v5409_v21 }
0x1c72   :  { %5413 = vmax.xlane.f32.xlu1 %v5412_v48 }
0x1ceb   :  { %v5399_v52 = vpop.xlane.xlu0 %5398 }
0x1cec   :  { %v5415_v56 = vsub.f32 %v5324_v36, %v5399_v52 }
0x1ced   :  { %v5402_v61 = vpop.xlane.xlu1 %5401 }
0x1cee   :  { %v5421_v20 = vmul.f32 1.442695, %v5415_v56  ;;  %v5416_v42 = vsub.f32 %v5327_v5, %v5402_v61 }
0x1cef   :  { %v5405_v62 = vpop.xlane.xlu0 %5404 }
0x1cf0   :  { %9144 = vpow2.f32 %v5421_v20  ;;  %v5423_v19 = vmul.f32 1.442695, %v5416_v42  ;;  %v5417_v60 = vsub.f32 %v5332_v11, %v5405_v62 }
0x1cf2   :  { %9146 = vpow2.f32 %v5423_v19  ;;  %v5425_v47 = vmul.f32 1.442695, %v5417_v60 }
0x1cf4   :  { %9148 = vpow2.f32 %v5425_v47 }
0x1cfa   :  { %v9145_v33 = vpop.eup %9144 }
0x1cfb   :  { %v5408_v13 = vpop.xlane.xlu1 %5407  ;;  %v5433_v1 = vsel %vm634_vm4, %v9145_v33, 0.0 }
0x1cfc   :  { %v9147_v46 = vpop.eup %9146  ;;  %v5418_v32 = vsub.f32 %v5384_v43, %v5408_v13  ;;  %5434 = vadd.xlane.f32.xlu0 %v5433_v1  ;;  %v8922_v13 = vld [vmem:[%s11374_s7 + $0xe0] sm:$0xff]  }
0x1cfd   :  { %v5411_v28 = vpop.xlane.xlu0 %5410  ;;  %v5436_v12 = vsel %vm634_vm4, %v9147_v46, 0.0 }
0x1cfe   :  { %v9149_v30 = vpop.eup %9148  ;;  %v5427_v59 = vmul.f32 1.442695, %v5418_v32  ;;  %v5419_v44 = vsub.f32 %v5387_v45, %v5411_v28  ;;  %5437 = vadd.xlane.f32.xlu1 %v5436_v12  ;;  %v8924_v32 = vld [vmem:[%s11374_s7 + $0xf0] sm:$0xff]   ;;  %v8925_v28 = vld [vmem:[%s11374_s7 + $0xf8] sm:$0xff]   ;;  %v8926_v12 = vld [vmem:[%s11378_s28 + $0xe0] sm:$0xff]  }
0x1cff   :  { %v5414_v37 = vpop.xlane.xlu1 %5413  ;;  %v5439_v6 = vsel %vm634_vm4, %v9149_v30, 0.0 }
0x1d00   :  { %9150 = vpow2.f32 %v5427_v59  ;;  %v5429_v35 = vmul.f32 1.442695, %v5419_v44  ;;  %v5420_v14 = vsub.f32 %v5392_v57, %v5414_v37  ;;  %5440 = vadd.xlane.f32.xlu0 %v5439_v6  ;;  %v8928_v59 = vld [vmem:[%s11378_s28 + $0xf0] sm:$0xff]   ;;  %v8929_v44 = vld [vmem:[%s11378_s28 + $0xf8] sm:$0xff]  }
0x1d01   :  { %v8930_v37 = vld [vmem:[%s11350_s11 + $0x30] sm:$0xff]  }
0x1d02   :  { %9152 = vpow2.f32 %v5429_v35  ;;  %v5431_v36 = vmul.f32 1.442695, %v5420_v14 }
0x1d04   :  { %9154 = vpow2.f32 %v5431_v36 }
0x1d0a   :  { %v9151_v38 = vpop.eup %9150 }
0x1d0b   :  { %v5442_v27 = vsel %vm634_vm4, %v9151_v38, 0.0 }
0x1d0c   :  { %v9153_v11 = vpop.eup %9152  ;;  %5443 = vadd.xlane.f32.xlu1 %v5442_v27 }
0x1d0d   :  { %v5445_v5 = vsel %vm634_vm4, %v9153_v11, 0.0 }
0x1d0e   :  { %v9155_v18 = vpop.eup %9154  ;;  %5446 = vadd.xlane.f32.xlu0 %v5445_v5  ;;  %v8933_v5 = vld [vmem:[%s11375_s9 + $0xf0] sm:$0xff]  }
0x1d0f   :  { %v5448_v0 = vsel %vm634_vm4, %v9155_v18, 0.0 }
0x1d10   :  { %5449 = vadd.xlane.f32.xlu1 %v5448_v0 }
0x1d89   :  { %v5435_v7 = vpop.xlane.xlu0 %5434 }
0x1d8a   :  { %9156 = vrcp.f32 %v5435_v7 }
0x1d8b   :  { %v5438_v54 = vpop.xlane.xlu1 %5437 }
0x1d8c   :  { %9158 = vrcp.f32 %v5438_v54 }
0x1d8d   :  { %v5441_v29 = vpop.xlane.xlu0 %5440 }
0x1d8e   :  { %9160 = vrcp.f32 %v5441_v29 }
0x1d94   :  { %v9157_v43 = vpop.eup %9156 }
0x1d95   :  { %v5457_v51 = vmul.f32 %v9157_v43, %v9145_v33 }
0x1d96   :  { %v9159_v63 = vpop.eup %9158 }
0x1d97   :  { %v5458_v57 = vmul.f32 %v9159_v63, %v9147_v46  ;;  %v8923_v46 = vld [vmem:[%s11374_s7 + $0xe8] sm:$0xff]  }
0x1d98   :  { %v9161_v45 = vpop.eup %9160 }
0x1d99   :  { %v5459_v26 = vmul.f32 %v9161_v45, %v9149_v30  ;;  %v5444_v21 = vpop.xlane.xlu1 %5443  ;;  %v5463_v48 = vpack.c.bf16 %v5458_v57, %v5457_v51  ;;  %v8927_v30 = vld [vmem:[%s11378_s28 + $0xe8] sm:$0xff]   ;;  %v7375_v51 = vld [vmem:[%s11346_s6 + $0x7] ss:$0 sm:$0xff] }
0x1d9a   :  { %9162 = vrcp.f32 %v5444_v21 }
0x1d9b   :  { %v5464_v52 = vpack.c.bf16 %v5459_v26, %v5459_v26  ;;  %v5447_v56 = vpop.xlane.xlu0 %5446  ;;  %8621 = vmatprep.mubr.msk.bf16.mxu1 %vm634_vm4, %v5463_v48 }
0x1d9c   :  { %9164 = vrcp.f32 %v5447_v56 }
0x1d9d   :  { %v5450_v61 = vpop.xlane.xlu1 %5449  ;;  %8622 = vmatmul.mubr.msk.bf16.vlgmr.msra.gmra.mrb[224].mxu1 %vm634_vm4, %v5464_v52 }
0x1d9e   :  { %9166 = vrcp.f32 %v5450_v61  ;;  %8635 = vmatprep.mubr.msk.bf16.mxu1 %vm9227_vm1, %v9226_v25  ;;  %8634 = vmatpush3.bf16.msra.mxu1 %v8930_v37 }
0x1d9f   :  { %8667 = vmatprep.subr.bf16.mxu1 %v9226_v25 }
0x1da4   :  { %v9163_v20 = vpop.eup %9162 }
0x1da5   :  { %v5460_v62 = vmul.f32 %v9163_v20, %v9151_v38  ;;  %v8931_v38 = vld [vmem:[%s11375_s9 + $0xe0] sm:$0xff]  }
0x1da6   :  { %v9165_v42 = vpop.eup %9164 }
0x1da7   :  { %v5461_v19 = vmul.f32 %v9165_v42, %v9153_v11  ;;  %v8932_v11 = vld [vmem:[%s11375_s9 + $0xe8] sm:$0xff]  }
0x1da8   :  { %v9167_v60 = vpop.eup %9166 }
0x1da9   :  { %v5462_v47 = vmul.f32 %v9167_v60, %v9155_v18  ;;  %v5465_v33 = vpack.c.bf16 %v5461_v19, %v5460_v62  ;;  %v8934_v18 = vld [vmem:[%s11375_s9 + $0xf8] sm:$0xff]  }
0x1dab   :  { %8629 = vmatprep.mubr.msk.bf16.mxu0 %vm634_vm4, %v5465_v33  ;;  %v5466_v1 = vpack.c.bf16 %v5462_v47, %v5462_v47 }
0x1dad   :  { %8630 = vmatmul.mubr.msk.bf16.vlgmr.msra.gmra.mrb[228].mxu0 %vm634_vm4, %v5466_v1 }
0x1dae   :  { %8648 = vmatpush3.bf16.msra.mxu0 %v8922_v13  ;;  %8655 = vmatprep.mubr.msk.bf16.mxu0 %vm9227_vm1, %v9226_v25 }
0x1daf   :  { %8649 = vmatprep.subr.bf16.mxu0 %v9226_v25 }
0x1db2   :  { %8650 = vmatpush3.bf16.msra.mxu0 %v8923_v46 }
0x1db3   :  { %8651 = vmatprep.subr.bf16.mxu0 %v9226_v25 }
0x1db6   :  { %8652 = vmatpush3.bf16.msra.mxu0 %v8924_v32 }
0x1db7   :  { %8653 = vmatprep.subr.bf16.mxu0 %v9226_v25 }
0x1dba   :  { %8654 = vmatpush3.bf16.msra.mxu0 %v8925_v28 }
0x1dbb   :  { %8687 = vmatprep.subr.bf16.mxu0 %v9226_v25 }
0x1dbd   :  { %8656 = vmatmul.mubr.msk.bf16.vlgmr.msra.gmra.mrb[232].mxu0 %vm83_vm0, %v10467_v10 }
0x1dbe   :  { %8659 = vmatprep.mubr.msk.bf16.mxu0 %vm9227_vm1, %v9226_v25  ;;  %8688 = vmatpush3.bf16.msra.mxu0 %v8926_v12 }
0x1dbf   :  { %8689 = vmatprep.subr.bf16.mxu0 %v9226_v25 }
0x1dc2   :  { %8690 = vmatpush3.bf16.msra.mxu0 %v8927_v30 }
0x1dc3   :  { %8691 = vmatprep.subr.bf16.mxu0 %v9226_v25 }
0x1dc5   :  { %8660 = vmatmul.mubr.msk.bf16.gmra.mrb[236].mxu0 %vm83_vm0, %v10499_v23 }
0x1dc6   :  { %8663 = vmatprep.mubr.msk.bf16.mxu0 %vm9227_vm1, %v9226_v25  ;;  %8692 = vmatpush3.bf16.msra.mxu0 %v8928_v59 }
0x1dc7   :  { %8693 = vmatprep.subr.bf16.mxu0 %v9226_v25 }
0x1dca   :  { %8694 = vmatpush3.bf16.msra.mxu0 %v8929_v44 }
0x1dcd   :  { %8664 = vmatmul.mubr.msk.bf16.gmra.mrb[240].mxu0 %vm83_vm0, %v10517_v40 }
0x1dce   :  { %8695 = vmatprep.mubr.msk.bf16.mxu0 %vm9227_vm1, %v9226_v25 }
0x1dd5   :  { %8696 = vmatmul.mubr.msk.bf16.vlgmr.msra.gmra.mrb[244].mxu0 %vm83_vm0, %v10467_v10 }
0x1dd6   :  { %8699 = vmatprep.mubr.msk.bf16.mxu0 %vm9227_vm1, %v9226_v25 }
0x1ddd   :  { %8700 = vmatmul.mubr.msk.bf16.gmra.mrb[248].mxu0 %vm83_vm0, %v10499_v23 }
0x1dde   :  { %8703 = vmatprep.mubr.msk.bf16.mxu0 %vm9227_vm1, %v9226_v25 }
0x1de5   :  { %8704 = vmatmul.mubr.msk.bf16.gmra.mrb[252].mxu0 %vm83_vm0, %v10517_v40 }
0x1e70   :  { %v8623_v6 = vpop.f32.mrb[224].mxu1 }
0x1e71   :  { %v5514_v35 = vpop.f32.mrb[225].mxu1 }
0x1e72   :  { %v8624_v14 = vpop.f32.mrb[226].mxu1 }
0x1e73   :  { %v5517_v36 = vpop.f32.mrb[227].mxu1 }
0x1e74   :  { %v5585_v27 = vpack.c.bf16 %v5517_v36, %v5514_v35 }
0x1e76   :  { %8636 = vmatmul.mubr.msk.bf16.vlgmr.msra.gmra.mrb[228].mxu1 %vm513_vm2, %v5585_v27 }
0x1e77   :  { %8639 = vmatprep.mubr.msk.bf16.mxu1 %vm9227_vm1, %v9226_v25  ;;  %8668 = vmatpush3.bf16.msra.mxu1 %v8931_v38 }
0x1e78   :  { %8669 = vmatprep.subr.bf16.mxu1 %v9226_v25 }
0x1e7b   :  { %8670 = vmatpush3.bf16.msra.mxu1 %v8932_v11 }
0x1e7c   :  { %8671 = vmatprep.subr.bf16.mxu1 %v9226_v25 }
0x1e7f   :  { %8672 = vmatpush3.bf16.msra.mxu1 %v8933_v5 }
0x1e80   :  { %v8631_v0 = vpop.f32.mrb[228].mxu0  ;;  %8673 = vmatprep.subr.bf16.mxu1 %v9226_v25 }
0x1e81   :  { %v5571_v7 = vpop.f32.mrb[229].mxu0 }
0x1e82   :  { %v5586_v54 = vpack.c.bf16 %v5571_v7, %v8623_v6  ;;  %v8632_v29 = vpop.f32.mrb[230].mxu0 }
0x1e83   :  { %v5574_v43 = vpop.f32.mrb[231].mxu0  ;;  %8674 = vmatpush3.bf16.msra.mxu1 %v8934_v18 }
0x1e84   :  { %v5587_v63 = vpack.c.bf16 %v8631_v0, %v5574_v43  ;;  %8640 = vmatmul.mubr.msk.bf16.gmra.mrb[232].mxu1 %vm513_vm2, %v5586_v54 }
0x1e85   :  { %8643 = vmatprep.mubr.msk.bf16.mxu1 %vm9227_vm1, %v9226_v25 }
0x1e8c   :  { %8644 = vmatmul.mubr.msk.bf16.gmra.mrb[236].mxu1 %vm513_vm2, %v5587_v63 }
0x1e8d   :  { %8675 = vmatprep.mubr.msk.bf16.mxu1 %vm9227_vm1, %v9226_v25 }
0x1e90   :  { %v5744_v57 = vpop.f32.mrb[232].mxu0 }
0x1e91   :  { %v8657_v45 = vpop.f32.mrb[233].mxu0  ;;  %v5745_v21 = vadd.f32 %v7375_v51, %v5744_v57 }
0x1e92   :  { %v5747_v26 = vpop.f32.mrb[234].mxu0 }
0x1e93   :  { %v5748_v48 = vadd.f32 %v7375_v51, %v5747_v26  ;;  %v8658_v52 = vpop.f32.mrb[235].mxu0 }
0x1e94   :  { %8676 = vmatmul.mubr.msk.bf16.vlgmr.msra.gmra.mrb[240].mxu1 %vm83_vm0, %v10467_v10 }
0x1e95   :  { %v5963_v56 = vpack.c.bf16 %v5748_v48, %v5745_v21  ;;  %8679 = vmatprep.mubr.msk.bf16.mxu1 %vm9227_vm1, %v9226_v25 }
0x1e98   :  { %v5752_v61 = vpop.f32.mrb[236].mxu0 }
0x1e99   :  { %v11053_v20 = vadd.f32 %v7375_v51, %v5752_v61  ;;  %v8661_v42 = vpop.f32.mrb[237].mxu0 }
0x1e9a   :  { %v5755_v62 = vpop.f32.mrb[238].mxu0 }
0x1e9b   :  { %v8662_v19 = vpop.f32.mrb[239].mxu0  ;;  %v5756_v47 = vadd.f32 %v7375_v51, %v5755_v62 }
0x1e9c   :  { %8680 = vmatmul.mubr.msk.bf16.gmra.mrb[244].mxu1 %vm83_vm0, %v10499_v23  ;;  %v11068_v23 = vld [vmem:[%s11348_s10 + $0x7] ss:$0 sm:$0xff] }
0x1e9d   :  { %8683 = vmatprep.mubr.msk.bf16.mxu1 %vm9227_vm1, %v9226_v25 }
0x1ea0   :  { %v5760_v60 = vpop.f32.mrb[240].mxu0 }
0x1ea1   :  { %v5761_v33 = vadd.f32 %v7375_v51, %v5760_v60  ;;  %v8665_v10 = vpop.f32.mrb[241].mxu0 }
0x1ea2   :  { %v5763_v13 = vpop.f32.mrb[242].mxu0 }
0x1ea3   :  { %v5965_v1 = vpack.c.bf16 %v5761_v33, %v5756_v47  ;;  %v11059_v46 = vadd.f32 %v7375_v51, %v5763_v13  ;;  %v8666_v32 = vpop.f32.mrb[243].mxu0 }
0x1ea4   :  { %8684 = vmatmul.mubr.msk.bf16.gmra.mrb[248].mxu1 %vm83_vm0, %v10517_v40 }
0x1ea5   :  { %8719 = vmatprep.mubr.msk.bf16.mxu0 %vm513_vm2, %v5965_v1  ;;  %8711 = vmatprep.mubr.msk.bf16.mxu1 %vm513_vm2, %v5963_v56 }
0x1ea8   :  { %v5940_v28 = vpop.f32.mrb[244].mxu0 }
0x1ea9   :  { %v8697_v12 = vpop.f32.mrb[245].mxu0  ;;  %v5941_v59 = vadd.f32 %v11068_v23, %v5940_v28 }
0x1eaa   :  { %v5943_v30 = vpop.f32.mrb[246].mxu0 }
0x1eab   :  { %v5944_v44 = vadd.f32 %v11068_v23, %v5943_v30  ;;  %v8698_v37 = vpop.f32.mrb[247].mxu0 }
0x1ead   :  { %v11072_v6 = vpack.c.bf16 %v5944_v44, %v5941_v59 }
0x1eb0   :  { %v5948_v40 = vpop.f32.mrb[248].mxu0 }
0x1eb1   :  { %v8701_v35 = vpop.f32.mrb[249].mxu0 }
0x1eb2   :  { %v5951_v14 = vpop.f32.mrb[250].mxu0 }
0x1eb3   :  { %v8702_v36 = vpop.f32.mrb[251].mxu0  ;;  %v5952_v27 = vadd.f32 %v11068_v23, %v5951_v14 }
0x1eb8   :  { %v5956_v38 = vpop.f32.mrb[252].mxu0 }
0x1eb9   :  { %v5957_v11 = vadd.f32 %v11068_v23, %v5956_v38  ;;  %v8705_v5 = vpop.f32.mrb[253].mxu0 }
0x1eba   :  { %v5959_v18 = vpop.f32.mrb[254].mxu0 }
0x1ebb   :  { %v11076_v0 = vpack.c.bf16 %v5957_v11, %v5952_v27  ;;  %v11079_v7 = vadd.f32 %v11068_v23, %v5959_v18  ;;  %v8706_v54 = vpop.f32.mrb[255].mxu0  ;;  %v5949_v11 = vadd.f32 %v11068_v23, %v5948_v40  ;;  %v5966_v40 = vpack.c.bf16 %v11059_v46, %v11059_v46 }
0x1f49   :  { %v5640_v29 = vpop.f32.mrb[228].mxu1 }
0x1f4a   :  { %v11082_v43 = vadd.f32 %v5640_v29, %v10890_v17  ;;  %v8637_v63 = vpop.f32.mrb[229].mxu1  ;;  %v5964_v29 = vpack.c.bf16 %v11053_v20, %v11053_v20 }
0x1f4b   :  { %v5643_v51 = vpop.f32.mrb[230].mxu1 }
0x1f4c   :  { %v11085_v57 = vadd.f32 %v5643_v51, %v10893_v2  ;;  %v8638_v45 = vpop.f32.mrb[231].mxu1 }
0x1f4d   :  { %v6162_v45 = vpack.c.bf16 %v5949_v11, %v5949_v11 }
0x1f4f   :  { %v6172_v23 = vsel %vm715_vm3, %v6162_v45, 0 }
0x1f57   :  { %v5648_v26 = vpop.f32.mrb[232].mxu1 }
0x1f58   :  { %v11088_v21 = vadd.f32 %v5648_v26, %v10896_v50  ;;  %v8641_v48 = vpop.f32.mrb[233].mxu1  ;;  %v7392_v50 = vld [vmem:[%s11347_s8 + $0x7] ss:$0 sm:$0xff] }
0x1f59   :  { %v5651_v52 = vpop.f32.mrb[234].mxu1 }
0x1f5a   :  { %v11091_v56 = vadd.f32 %v5651_v52, %v10899_v55  ;;  %v8642_v61 = vpop.f32.mrb[235].mxu1 }
0x1f5f   :  { %v5656_v42 = vpop.f32.mrb[236].mxu1 }
0x1f60   :  { %v11094_v17 = vadd.f32 %v5656_v42, %v10901_v31  ;;  %v8645_v62 = vpop.f32.mrb[237].mxu1 }
0x1f61   :  { %v5659_v19 = vpop.f32.mrb[238].mxu1 }
0x1f62   :  { %v11097_v2 = vadd.f32 %v5659_v19, %v10903_v22  ;;  %v8646_v60 = vpop.f32.mrb[239].mxu1 }
0x1f67   :  { %v5842_v47 = vpop.f32.mrb[240].mxu1 }
0x1f68   :  { %v8677_v33 = vpop.f32.mrb[241].mxu1  ;;  %v5843_v55 = vadd.f32 %v7392_v50, %v5842_v47 }
0x1f69   :  { %v5845_v10 = vpop.f32.mrb[242].mxu1 }
0x1f6a   :  { %v5846_v13 = vadd.f32 %v7392_v50, %v5845_v10  ;;  %v8678_v1 = vpop.f32.mrb[243].mxu1 }
0x1f6c   :  { %v5967_v32 = vpack.c.bf16 %v5846_v13, %v5843_v55 }
0x1f6e   :  { %8795 = vmatprep.subr.msk.bf16.mxu1 %vm513_vm2, %v5967_v32  ;;  %v5978_v31 = vsel %vm513_vm2, %v5967_v32, 0 }
0x1f6f   :  { %v5850_v28 = vpop.f32.mrb[244].mxu1  ;;  %8708 = vmatpush3.bf16.xpose.msra.mxu1 %v5978_v31 }
0x1f70   :  { %v5851_v22 = vadd.f32 %v7392_v50, %v5850_v28  ;;  %v8681_v12 = vpop.f32.mrb[245].mxu1 }
0x1f71   :  { %v5853_v30 = vpop.f32.mrb[246].mxu1 }
0x1f72   :  { %v5968_v59 = vpack.c.bf16 %v5851_v22, %v5851_v22  ;;  %v8682_v44 = vpop.f32.mrb[247].mxu1  ;;  %v5854_v14 = vadd.f32 %v7392_v50, %v5853_v30 }
0x1f74   :  { %8796 = vmatprep.subr.msk.bf16.mxu1 %vm513_vm2, %v5968_v59  ;;  %v5981_v37 = vsel %vm513_vm2, %v5968_v59, 0 }
0x1f77   :  { %v5858_v35 = vpop.f32.mrb[248].mxu1  ;;  %8710 = vmatpush3.bf16.xpose.msra.mxu1 %v5981_v37 }
0x1f78   :  { %v5859_v36 = vadd.f32 %v7392_v50, %v5858_v35  ;;  %v8685_v38 = vpop.f32.mrb[249].mxu1  ;;  %8723 = vmatprep.subr.bf16.mxu1 %v11072_v6 }
0x1f79   :  { %v5861_v27 = vpop.f32.mrb[250].mxu1 }
0x1f7a   :  { %v5969_v5 = vpack.c.bf16 %v5859_v36, %v5854_v14  ;;  %v5862_v18 = vadd.f32 %v7392_v50, %v5861_v27  ;;  %v8686_v54 = vpop.f32.mrb[251].mxu1 }
0x1f7c   :  { %v5970_v63 = vpack.c.bf16 %v5862_v18, %v5862_v18  ;;  %8797 = vmatprep.subr.msk.bf16.mxu0 %vm513_vm2, %v5969_v5  ;;  %v6038_v51 = vsel %vm513_vm2, %v5969_v5, 0 }
0x1f7d   :  { %8716 = vmatpush3.bf16.xpose.msra.mxu0 %v6038_v51 }
0x1f7e   :  { %8712 = vmatmul.mubr.msk.bf16.vlgmr.msra.gmra.mrb[252].mxu1 %vm513_vm2, %v5964_v29  ;;  %8798 = vmatprep.subr.msk.bf16.mxu0 %vm513_vm2, %v5970_v63  ;;  %v6041_v20 = vsel %vm513_vm2, %v5970_v63, 0 }
0x1f7f   :  { %8724 = vmatpush3.bf16.msra.mxu1 %v11072_v6 }
0x1f80   :  { %8799 = vmatprep.subr.msk.bf16.mxu1 %vm715_vm3, %v6162_v45 }
0x1f83   :  { %8726 = vmatpush3.bf16.msra.mxu1 %v6172_v23 }
0x1f84   :  { %8731 = vmatprep.subr.bf16.mxu1 %v11076_v0 }
0x1f85   :  { %8718 = vmatpush3.bf16.xpose.msra.mxu0 %v6041_v20 }
0x1f86   :  { %8739 = vmatprep.subr.bf16.mxu0 %v9226_v25 }
0x1f8c   :  { %8720 = vmatmul.mubr.msk.bf16.vlgmr.msra.gmra.mrb[0].mxu0 %vm513_vm2, %v5966_v40 }
0x1f8d   :  { %8741 = vmatprep.mubr.msk.bf16.mxu0 %vm9227_vm1, %v9226_v25 }
0x2051   :  { %v8713_v6 = vpop.f32.mrb[252].mxu1 }
0x2052   :  { %v6017_v26 = vpop.f32.mrb[253].mxu1  ;;  %v6026_v42 = vadd.f32 %v10933_v41, %v8713_v6 }
0x2053   :  { %v6018_v48 = vadd.f32 %v10927_v39, %v6017_v26  ;;  %v8714_v52 = vpop.f32.mrb[254].mxu1 }
0x2054   :  { %v6020_v61 = vpop.f32.mrb[255].mxu1  ;;  %v6097_v60 = vsel %vm634_vm4, %v6026_v42, -inf }
0x2055   :  { %v6021_v62 = vadd.f32 %v10939_v9, %v6020_v61  ;;  %v6091_v19 = vsel %vm634_vm4, %v6018_v48, -inf }
0x2056   :  { %6092 = vmax.xlane.f32.xlu0 %v6091_v19 }
0x2057   :  { %v6094_v46 = vsel %vm634_vm4, %v6021_v62, -inf }
0x2058   :  { %6095 = vmax.xlane.f32.xlu1 %v6094_v46 }
0x205a   :  { %6098 = vmax.xlane.f32.xlu0 %v6097_v60 }
0x205f   :  { %v8721_v50 = vpop.f32.mrb[0].mxu0 }
0x2060   :  { %v6077_v47 = vpop.f32.mrb[1].mxu0  ;;  %v6086_v13 = vadd.f32 %v10933_v41, %v8721_v50 }
0x2061   :  { %v6078_v33 = vadd.f32 %v10927_v39, %v6077_v47  ;;  %v8722_v10 = vpop.f32.mrb[2].mxu0 }
0x2062   :  { %v6080_v55 = vpop.f32.mrb[3].mxu0  ;;  %v6106_v28 = vsel %vm634_vm4, %v6086_v13, -inf }
0x2063   :  { %v6081_v1 = vadd.f32 %v10939_v9, %v6080_v55  ;;  %v6100_v32 = vsel %vm634_vm4, %v6078_v33, -inf }
0x2064   :  { %6101 = vmax.xlane.f32.xlu1 %v6100_v32 }
0x2065   :  { %v6103_v31 = vsel %vm634_vm4, %v6081_v1, -inf }
0x2066   :  { %6104 = vmax.xlane.f32.xlu0 %v6103_v31 }
0x2068   :  { %6107 = vmax.xlane.f32.xlu1 %v6106_v28  ;;  %v6164_v28 = vpack.c.bf16 %v11079_v7, %v11079_v7 }
0x20e3   :  { %v6093_v22 = vpop.xlane.xlu0 %6092 }
0x20e4   :  { %v6109_v12 = vsub.f32 %v6018_v48, %v6093_v22  ;;  %v6229_v22 = vsel %vm715_vm3, %v6164_v28, 0 }
0x20e5   :  { %v6096_v30 = vpop.xlane.xlu1 %6095 }
0x20e6   :  { %v6115_v59 = vmul.f32 1.442695, %v6109_v12  ;;  %v6110_v39 = vsub.f32 %v6021_v62, %v6096_v30 }
0x20e7   :  { %v6099_v44 = vpop.xlane.xlu0 %6098 }
0x20e8   :  { %9168 = vpow2.f32 %v6115_v59  ;;  %v6117_v37 = vmul.f32 1.442695, %v6110_v39  ;;  %v6111_v41 = vsub.f32 %v6026_v42, %v6099_v44 }
0x20ea   :  { %9170 = vpow2.f32 %v6117_v37  ;;  %v6119_v9 = vmul.f32 1.442695, %v6111_v41 }
0x20ec   :  { %9172 = vpow2.f32 %v6119_v9 }
0x20f1   :  { %v6102_v35 = vpop.xlane.xlu1 %6101 }
0x20f2   :  { %v9169_v14 = vpop.eup %9168  ;;  %v6112_v36 = vsub.f32 %v6078_v33, %v6102_v35 }
0x20f3   :  { %v6105_v38 = vpop.xlane.xlu0 %6104  ;;  %v6127_v27 = vsel %vm634_vm4, %v9169_v14, 0.0 }
0x20f4   :  { %v9171_v11 = vpop.eup %9170  ;;  %v6121_v5 = vmul.f32 1.442695, %v6112_v36  ;;  %v6113_v18 = vsub.f32 %v6081_v1, %v6105_v38  ;;  %6128 = vadd.xlane.f32.xlu0 %v6127_v27 }
0x20f5   :  { %v6108_v54 = vpop.xlane.xlu1 %6107  ;;  %v6130_v29 = vsel %vm634_vm4, %v9171_v11, 0.0 }
0x20f6   :  { %v9173_v63 = vpop.eup %9172  ;;  %9174 = vpow2.f32 %v6121_v5  ;;  %v6123_v51 = vmul.f32 1.442695, %v6113_v18  ;;  %v6114_v45 = vsub.f32 %v6086_v13, %v6108_v54  ;;  %6131 = vadd.xlane.f32.xlu1 %v6130_v29 }
0x20f7   :  { %v6133_v23 = vsel %vm634_vm4, %v9173_v63, 0.0 }
0x20f8   :  { %9176 = vpow2.f32 %v6123_v51  ;;  %v6125_v20 = vmul.f32 1.442695, %v6114_v45  ;;  %6134 = vadd.xlane.f32.xlu0 %v6133_v23  ;;  %v7432_v23 = vld [vmem:[%s11351_s12 + $0x1] ss:$0 sm:$0xff] }
0x20fa   :  { %9178 = vpow2.f32 %v6125_v20 }
0x2100   :  { %v9175_v40 = vpop.eup %9174 }
0x2101   :  { %v6136_v6 = vsel %vm634_vm4, %v9175_v40, 0.0 }
0x2102   :  { %v9177_v26 = vpop.eup %9176  ;;  %6137 = vadd.xlane.f32.xlu1 %v6136_v6 }
0x2103   :  { %v6139_v48 = vsel %vm634_vm4, %v9177_v26, 0.0 }
0x2104   :  { %v9179_v52 = vpop.eup %9178  ;;  %6140 = vadd.xlane.f32.xlu0 %v6139_v48 }
0x2105   :  { %v6142_v61 = vsel %vm634_vm4, %v9179_v52, 0.0 }
0x2106   :  { %6143 = vadd.xlane.f32.xlu1 %v6142_v61 }
0x2181   :  { %v6129_v42 = vpop.xlane.xlu0 %6128 }
0x2182   :  { %9180 = vrcp.f32 %v6129_v42 }
0x2183   :  { %v6132_v62 = vpop.xlane.xlu1 %6131 }
0x2184   :  { %9182 = vrcp.f32 %v6132_v62 }
0x2185   :  { %v6135_v19 = vpop.xlane.xlu0 %6134 }
0x2186   :  { %9184 = vrcp.f32 %v6135_v19 }
0x218c   :  { %v9181_v46 = vpop.eup %9180 }
0x218d   :  { %v6151_v47 = vmul.f32 %v9181_v46, %v9169_v14 }
0x218e   :  { %v9183_v60 = vpop.eup %9182 }
0x218f   :  { %v6138_v50 = vpop.xlane.xlu1 %6137  ;;  %v6152_v33 = vmul.f32 %v9183_v60, %v9171_v11 }
0x2190   :  { %v9185_v10 = vpop.eup %9184  ;;  %9186 = vrcp.f32 %v6138_v50 }
0x2191   :  { %v6153_v55 = vmul.f32 %v9185_v10, %v9173_v63  ;;  %v6141_v13 = vpop.xlane.xlu0 %6140  ;;  %v6157_v1 = vpack.c.bf16 %v6152_v33, %v6151_v47 }
0x2192   :  { %9188 = vrcp.f32 %v6141_v13 }
0x2193   :  { %v6158_v32 = vpack.c.bf16 %v6153_v55, %v6153_v55  ;;  %v6144_v31 = vpop.xlane.xlu1 %6143  ;;  %8727 = vmatprep.mubr.msk.bf16.mxu1 %vm634_vm4, %v6157_v1 }
0x2194   :  { %9190 = vrcp.f32 %v6144_v31 }
0x2195   :  { %8728 = vmatmul.mubr.msk.bf16.vlgmr.msra.gmra.mrb[0].mxu1 %vm634_vm4, %v6158_v32 }
0x2196   :  { %8732 = vmatpush3.bf16.msra.mxu1 %v11076_v0  ;;  %v8935_v0 = vld [vmem:[%s11350_s11 + $0x38] sm:$0xff]  }
0x2197   :  { %8800 = vmatprep.subr.msk.bf16.mxu1 %vm715_vm3, %v6164_v28  ;;  %8740 = vmatpush3.bf16.msra.mxu0 %v8935_v0 }
0x219a   :  { %v9187_v12 = vpop.eup %9186  ;;  %8734 = vmatpush3.bf16.msra.mxu1 %v6229_v22 }
0x219b   :  { %v6154_v59 = vmul.f32 %v9187_v12, %v9175_v40 }
0x219c   :  { %v9189_v30 = vpop.eup %9188 }
0x219d   :  { %v6155_v39 = vmul.f32 %v9189_v30, %v9177_v26 }
0x219e   :  { %v9191_v44 = vpop.eup %9190 }
0x219f   :  { %v6156_v37 = vmul.f32 %v9191_v44, %v9179_v52  ;;  %v6159_v41 = vpack.c.bf16 %v6155_v39, %v6154_v59 }
0x21a1   :  { %v6160_v9 = vpack.c.bf16 %v6156_v37, %v6156_v37  ;;  %8735 = vmatprep.mubr.msk.bf16.mxu1 %vm634_vm4, %v6159_v41 }
0x21a3   :  { %8736 = vmatmul.mubr.msk.bf16.vlgmr.msra.gmra.mrb[4].mxu1 %vm634_vm4, %v6160_v9 }
0x21a4   :  { %6607 = vmatprep.mubr.bf16.mxu1 %v9228_v16 }
0x2268   :  { %v8729_v7 = vpop.f32.mrb[0].mxu1 }
0x2269   :  { %v6208_v35 = vpop.f32.mrb[1].mxu1 }
0x226a   :  { %v8730_v14 = vpop.f32.mrb[2].mxu1 }
0x226b   :  { %v6211_v36 = vpop.f32.mrb[3].mxu1  ;;  %v8941_v14 = vld [vmem:[%s11352_s15 + $0x54] ss:$8 sps:$4 sm:$0xff]  }
0x226c   :  { %v6279_v38 = vpack.c.bf16 %v6211_v36, %v6208_v35  ;;  %v8936_v35 = vld [vmem:[%s11352_s15 + $0x40] ss:$8 sps:$4 sm:$0xff]   ;;  %v8939_v36 = vld [vmem:[%s11352_s15 + $0x50] ss:$8 sps:$4 sm:$0xff]  }
0x226e   :  { %8742 = vmatmul.mubr.msk.bf16.vlgmr.msra.gmra.mrb[4].mxu0 %vm513_vm2, %v6279_v38  ;;  %v8944_v38 = vld [vmem:[%s11352_s15 + $0x64] ss:$8 sps:$4 sm:$0xff]  }
0x226f   :  { %8745 = vmatprep.mubr.msk.bf16.mxu0 %vm9227_vm1, %v9226_v25 }
0x2276   :  { %v8737_v27 = vpop.f32.mrb[4].mxu1 }
0x2277   :  { %v6265_v11 = vpop.f32.mrb[5].mxu1 }
0x2278   :  { %v6280_v5 = vpack.c.bf16 %v6265_v11, %v8729_v7  ;;  %v8738_v18 = vpop.f32.mrb[6].mxu1  ;;  %v8938_v7 = vld [vmem:[%s11352_s15 + $0x44] ss:$8 sps:$4 sm:$0xff]   ;;  %v8947_v11 = vld [vmem:[%s11352_s15 + $0x74] ss:$8 sps:$4 sm:$0xff]  }
0x2279   :  { %v6268_v54 = vpop.f32.mrb[7].mxu1  ;;  %6575 = vmatprep.subr.bf16.mxu1 %v8938_v7  ;;  %v8948_v18 = vld [vmem:[%s11353_s17 + $0xc0] sm:$0xff]  }
0x227a   :  { %v6281_v29 = vpack.c.bf16 %v8737_v27, %v6268_v54  ;;  %8746 = vmatmul.mubr.msk.bf16.gmra.mrb[8].mxu0 %vm513_vm2, %v6280_v5  ;;  %6576 = vmatpush1.bf16.msra.mxu1 %v8936_v35  ;;  %v8942_v27 = vld [vmem:[%s11352_s15 + $0x60] ss:$8 sps:$4 sm:$0xff]   ;;  %v8945_v5 = vld [vmem:[%s11352_s15 + $0x70] ss:$8 sps:$4 sm:$0xff]  }
0x227b   :  { %8749 = vmatprep.mubr.msk.bf16.mxu0 %vm9227_vm1, %v9226_v25  ;;  %6577 = vmatprep.subr.bf16.mxu1 %v8941_v14  ;;  %v8949_v54 = vld [vmem:[%s11353_s17 + $0x80] sm:$0xff]  }
0x227c   :  { %7871 = vmatprep.subr.bf16.mxu0 %v8948_v18 }
0x227d   :  { %7872 = vmatpush3.bf16.msra.mxu0 %v8949_v54 }
0x227e   :  { %6578 = vmatpush1.bf16.msra.mxu1 %v8939_v36 }
0x227f   :  { %6579 = vmatprep.subr.bf16.mxu1 %v8944_v38 }
0x2282   :  { %8750 = vmatmul.mubr.msk.bf16.gmra.mrb[12].mxu0 %vm513_vm2, %v6281_v29  ;;  %6580 = vmatpush1.bf16.msra.mxu1 %v8942_v27  ;;  %v8950_v29 = vld [vmem:[%s11353_s17 + $0xc8] sm:$0xff]  }
0x2283   :  { %6581 = vmatprep.subr.bf16.mxu1 %v8947_v11  ;;  %7873 = vmatprep.subr.bf16.mxu0 %v8950_v29  ;;  %v7436_v11 = vld [vmem:[%s11355_s14 + $0x1] ss:$0 sm:$0xff] }
0x2286   :  { %6582 = vmatpush1.bf16.msra.mxu1 %v8945_v5 }
0x2341   :  { %v6334_v63 = vpop.f32.mrb[4].mxu0 }
0x2342   :  { %v6357_v51 = vadd.f32 %v6334_v63, %v11082_v43  ;;  %v8743_v45 = vpop.f32.mrb[5].mxu0  ;;  %v8951_v63 = vld [vmem:[%s11353_s17 + $0x88] sm:$0xff]  }
0x2343   :  { %v6337_v20 = vpop.f32.mrb[6].mxu0  ;;  %7874 = vmatpush3.bf16.msra.mxu0 %v8951_v63  ;;  %v8953_v45 = vld [vmem:[%s11353_s17 + $0x90] sm:$0xff]  }
0x2344   :  { %v6363_v40 = vadd.f32 %v6357_v51, %v10367_v49  ;;  %v6358_v6 = vadd.f32 %v6337_v20, %v11085_v57  ;;  %v8744_v26 = vpop.f32.mrb[7].mxu0  ;;  %v8952_v51 = vld [vmem:[%s11353_s17 + $0xd0] sm:$0xff]   ;;  %v8955_v20 = vld [vmem:[%s11353_s17 + $0x98] sm:$0xff]  }
0x2345   :  { %7875 = vmatprep.subr.bf16.mxu0 %v8952_v51  ;;  %v8958_v26 = vld [vmem:[%s11353_s17 + $0xe8] sm:$0xff]  }
0x2346   :  { %v11169_v48 = vadd.f32 %v7432_v23, %v6363_v40  ;;  %v6364_v25 = vadd.f32 %v6358_v6, %v10370_v53  ;;  %v8956_v40 = vld [vmem:[%s11353_s17 + $0xe0] sm:$0xff]  }
0x2347   :  { %7876 = vmatpush3.bf16.msra.mxu0 %v8953_v45  ;;  %v8957_v6 = vld [vmem:[%s11353_s17 + $0xa0] sm:$0xff]  }
0x2348   :  { %v11172_v52 = vadd.f32 %v7432_v23, %v6364_v25  ;;  %v6387_v43 = vsel %vm83_vm0, %v11169_v48, 0.0  ;;  %v6411_v61 = vmul.f32 %v11169_v48, %v11169_v48 }
0x2349   :  { %6388 = vadd.xlane.f32.xlu0 %v6387_v43 }
0x234a   :  { %v6390_v42 = vsel %vm83_vm0, %v11172_v52, 0.0  ;;  %v6412_v49 = vmul.f32 %v11172_v52, %v11172_v52  ;;  %v6417_v57 = vsel %vm83_vm0, %v6411_v61, 0.0 }
0x234b   :  { %6391 = vadd.xlane.f32.xlu1 %v6390_v42 }
0x234c   :  { %v6420_v46 = vsel %vm83_vm0, %v6412_v49, 0.0 }
0x234d   :  { %6418 = vadd.xlane.f32.xlu0 %v6417_v57  ;;  %v6342_v53 = vpop.f32.mrb[8].mxu0 }
0x234e   :  { %v6359_v62 = vadd.f32 %v6342_v53, %v11088_v21  ;;  %v8747_v19 = vpop.f32.mrb[9].mxu0 }
0x234f   :  { %6421 = vadd.xlane.f32.xlu1 %v6420_v46  ;;  %v6345_v60 = vpop.f32.mrb[10].mxu0 }
0x2350   :  { %v6365_v50 = vadd.f32 %v6359_v62, %v10383_v24  ;;  %v6360_v47 = vadd.f32 %v6345_v60, %v11091_v56  ;;  %v8748_v33 = vpop.f32.mrb[11].mxu0 }
0x2352   :  { %v11187_v10 = vadd.f32 %v7432_v23, %v6365_v50  ;;  %v6366_v55 = vadd.f32 %v6360_v47, %v10386_v8 }
0x2354   :  { %v11190_v13 = vadd.f32 %v7432_v23, %v6366_v55  ;;  %v6393_v1 = vsel %vm83_vm0, %v11187_v10, 0.0  ;;  %v6413_v21 = vmul.f32 %v11187_v10, %v11187_v10 }
0x2355   :  { %6394 = vadd.xlane.f32.xlu0 %v6393_v1  ;;  %v6350_v32 = vpop.f32.mrb[12].mxu0 }
0x2356   :  { %v6361_v31 = vadd.f32 %v6350_v32, %v11094_v17  ;;  %v8751_v24 = vpop.f32.mrb[13].mxu0  ;;  %v6396_v56 = vsel %vm83_vm0, %v11190_v13, 0.0  ;;  %v6414_v28 = vmul.f32 %v11190_v13, %v11190_v13  ;;  %v6423_v59 = vsel %vm83_vm0, %v6413_v21, 0.0 }
0x2357   :  { %6397 = vadd.xlane.f32.xlu1 %v6396_v56  ;;  %v6353_v8 = vpop.f32.mrb[14].mxu0 }
0x2358   :  { %v6367_v22 = vadd.f32 %v6361_v31, %v10398_v58  ;;  %v6362_v12 = vadd.f32 %v6353_v8, %v11097_v2  ;;  %v8752_v30 = vpop.f32.mrb[15].mxu0  ;;  %v6426_v44 = vsel %vm83_vm0, %v6414_v28, 0.0 }
0x2359   :  { %6424 = vadd.xlane.f32.xlu0 %v6423_v59 }
0x235a   :  { %v11204_v39 = vadd.f32 %v7432_v23, %v6367_v22  ;;  %v6368_v17 = vadd.f32 %v6362_v12, %v10402_v34 }
0x235b   :  { %6427 = vadd.xlane.f32.xlu1 %v6426_v44  ;;  %v7435_v44 = vld [vmem:[%s11354_s13 + $0x1] ss:$0 sm:$0xff] }
0x235c   :  { %v11208_v37 = vadd.f32 %v7432_v23, %v6368_v17  ;;  %v6399_v41 = vsel %vm83_vm0, %v11204_v39, 0.0  ;;  %v6415_v58 = vmul.f32 %v11204_v39, %v11204_v39  ;;  %v8954_v23 = vld [vmem:[%s11353_s17 + $0xd8] sm:$0xff]  }
0x235d   :  { %6400 = vadd.xlane.f32.xlu0 %v6399_v41  ;;  %7877 = vmatprep.subr.bf16.mxu0 %v8954_v23 }
0x235e   :  { %v6402_v2 = vsel %vm83_vm0, %v11208_v37, 0.0  ;;  %v6416_v9 = vmul.f32 %v11208_v37, %v11208_v37  ;;  %v6429_v34 = vsel %vm83_vm0, %v6415_v58, 0.0  ;;  %7878 = vmatpush3.bf16.msra.mxu0 %v8955_v20 }
0x235f   :  { %6403 = vadd.xlane.f32.xlu1 %v6402_v2  ;;  %7879 = vmatprep.subr.bf16.mxu0 %v8956_v40 }
0x2360   :  { %v6432_v0 = vsel %vm83_vm0, %v6416_v9, 0.0 }
0x2361   :  { %6430 = vadd.xlane.f32.xlu0 %v6429_v34 }
0x2362   :  { %7880 = vmatpush3.bf16.msra.mxu0 %v8957_v6 }
0x2363   :  { %6433 = vadd.xlane.f32.xlu1 %v6432_v0  ;;  %7881 = vmatprep.subr.bf16.mxu0 %v8958_v26 }
0x23d6   :  { %v6389_v25 = vpop.xlane.xlu0 %6388 }
0x23d7   :  { %v6405_v43 = vmul.f32 0.015625, %v6389_v25 }
0x23d8   :  { %v6392_v61 = vpop.xlane.xlu1 %6391 }
0x23d9   :  { %v6406_v42 = vmul.f32 0.015625, %v6392_v61  ;;  %v6441_v57 = vmul.f32 %v6405_v43, %v6405_v43  ;;  %v6453_v30 = vsub.f32 %v11169_v48, %v6405_v43 }
0x23da   :  { %v6419_v49 = vpop.xlane.xlu0 %6418 }
0x23db   :  { %v6435_v53 = vmul.f32 0.015625, %v6419_v49  ;;  %v6442_v19 = vmul.f32 %v6406_v42, %v6406_v42  ;;  %v6454_v9 = vsub.f32 %v11172_v52, %v6406_v42 }
0x23dc   :  { %v6422_v62 = vpop.xlane.xlu1 %6421 }
0x23dd   :  { %v6447_v46 = vsub.f32 %v6435_v53, %v6441_v57  ;;  %v6436_v60 = vmul.f32 0.015625, %v6422_v62 }
0x23df   :  { %v6459_v50 = vadd.f32 1e-05, %v6447_v46  ;;  %v6448_v47 = vsub.f32 %v6436_v60, %v6442_v19 }
0x23e1   :  { %9192 = vrsqrt.f32 %v6459_v50  ;;  %v6460_v33 = vadd.f32 1e-05, %v6448_v47 }
0x23e2   :  { %v6395_v55 = vpop.xlane.xlu0 %6394 }
0x23e3   :  { %9194 = vrsqrt.f32 %v6460_v33  ;;  %v6407_v1 = vmul.f32 0.015625, %v6395_v55 }
0x23e4   :  { %v6398_v21 = vpop.xlane.xlu1 %6397 }
0x23e5   :  { %v6408_v32 = vmul.f32 0.015625, %v6398_v21  ;;  %v6443_v24 = vmul.f32 %v6407_v1, %v6407_v1  ;;  %v6455_v25 = vsub.f32 %v11187_v10, %v6407_v1 }
0x23e6   :  { %v6425_v31 = vpop.xlane.xlu0 %6424 }
0x23e7   :  { %v6437_v56 = vmul.f32 0.015625, %v6425_v31  ;;  %v6444_v8 = vmul.f32 %v6408_v32, %v6408_v32  ;;  %v6456_v61 = vsub.f32 %v11190_v13, %v6408_v32 }
0x23e8   :  { %v6428_v28 = vpop.xlane.xlu1 %6427 }
0x23e9   :  { %v6449_v22 = vsub.f32 %v6437_v56, %v6443_v24  ;;  %v6438_v12 = vmul.f32 0.015625, %v6428_v28  ;;  %v8961_v28 = vld [vmem:[%s11353_s17 + $0xb0] sm:$0xff]  }
0x23ea   :  { %v6401_v59 = vpop.xlane.xlu0 %6400 }
0x23eb   :  { %v9193_v17 = vpop.eup %9192  ;;  %v6461_v41 = vadd.f32 1e-05, %v6449_v22  ;;  %v6450_v58 = vsub.f32 %v6438_v12, %v6444_v8  ;;  %v6409_v2 = vmul.f32 0.015625, %v6401_v59  ;;  %v8963_v8 = vld [vmem:[%s11353_s17 + $0xb8] sm:$0xff]   ;;  %v7445_v22 = vld [vmem:[%s11356_s16 + $0x2] sm:$0x3] }
0x23ec   :  { %v6471_v34 = vmul.f32 %v9193_v17, %v6453_v30  ;;  %v6404_v0 = vpop.xlane.xlu1 %6403  ;;  %v6519_v12 = vrot.slane %v7445_v22, %v3127_v3  ;;  %v6523_v30 = vrot.slane %v7445_v22, %v3131_v15 }
0x23ed   :  { %v9195_v7 = vpop.eup %9194  ;;  %9196 = vrsqrt.f32 %v6461_v41  ;;  %v6462_v35 = vadd.f32 1e-05, %v6450_v58  ;;  %v6410_v38 = vmul.f32 0.015625, %v6404_v0  ;;  %v6445_v5 = vmul.f32 %v6409_v2, %v6409_v2 }
0x23ee   :  { %v6483_v14 = vmul.f32 %v7435_v44, %v6471_v34  ;;  %v6472_v36 = vmul.f32 %v9195_v7, %v6454_v9  ;;  %v6431_v27 = vpop.xlane.xlu0 %6430  ;;  %v6457_v60 = vsub.f32 %v11204_v39, %v6409_v2  ;;  %v8959_v39 = vld [vmem:[%s11353_s17 + $0xa8] sm:$0xff]  }
0x23ef   :  { %9198 = vrsqrt.f32 %v6462_v35  ;;  %v6439_v18 = vmul.f32 0.015625, %v6431_v27  ;;  %v6446_v63 = vmul.f32 %v6410_v38, %v6410_v38  ;;  %v6458_v10 = vsub.f32 %v11208_v37, %v6410_v38  ;;  %7882 = vmatpush3.bf16.msra.mxu0 %v8959_v39  ;;  %v8960_v37 = vld [vmem:[%s11353_s17 + $0xf0] sm:$0xff]  }
0x23f0   :  { %v6484_v54 = vmul.f32 %v7435_v44, %v6472_v36  ;;  %v6434_v29 = vpop.xlane.xlu1 %6433  ;;  %v6495_v45 = vadd.f32 %v7436_v11, %v6483_v14  ;;  %7883 = vmatprep.subr.bf16.mxu0 %v8960_v37 }
0x23f1   :  { %v6451_v52 = vsub.f32 %v6439_v18, %v6445_v5  ;;  %v6440_v51 = vmul.f32 0.015625, %v6434_v29 }
0x23f2   :  { %v6496_v23 = vadd.f32 %v7436_v11, %v6484_v54 }
0x23f3   :  { %v6463_v20 = vadd.f32 1e-05, %v6451_v52  ;;  %v6452_v40 = vsub.f32 %v6440_v51, %v6446_v63  ;;  %7884 = vmatpush3.bf16.msra.mxu0 %v8961_v28 }
0x23f4   :  { %v6501_v6 = vpack.c.bf16 %v6496_v23, %v6495_v45 }
0x23f5   :  { %9200 = vrsqrt.f32 %v6463_v20  ;;  %v6464_v26 = vadd.f32 1e-05, %v6452_v40 }
0x23f6   :  { %7454 = vmatmul.mubr.msk.bf16.vlgmr.msra.gmra.mrb[8].mxu1 %vm83_vm0, %v6501_v6 }
0x23f7   :  { %v9197_v43 = vpop.eup %9196  ;;  %9202 = vrsqrt.f32 %v6464_v26  ;;  %6617 = vmatprep.mubr.bf16.mxu1 %v9228_v16 }
0x23f8   :  { %v6473_v42 = vmul.f32 %v9197_v43, %v6455_v25 }
0x23f9   :  { %v9199_v49 = vpop.eup %9198 }
0x23fa   :  { %v6485_v57 = vmul.f32 %v7435_v44, %v6473_v42  ;;  %v6474_v53 = vmul.f32 %v9199_v49, %v6456_v61 }
0x23fc   :  { %v6486_v62 = vmul.f32 %v7435_v44, %v6474_v53  ;;  %v6497_v19 = vadd.f32 %v7436_v11, %v6485_v57 }
0x23fe   :  { %v6498_v46 = vadd.f32 %v7436_v11, %v6486_v62 }
0x23ff   :  { %v9201_v50 = vpop.eup %9200 }
0x2400   :  { %v6502_v47 = vpack.c.bf16 %v6498_v46, %v6497_v19  ;;  %v6475_v33 = vmul.f32 %v9201_v50, %v6457_v60  ;;  %v7490_v50 = vld [vmem:[%s11357_s18 + $0x1] ss:$0 sm:$0xff] }
0x2401   :  { %v9203_v55 = vpop.eup %9202 }
0x2402   :  { %v6487_v1 = vmul.f32 %v7435_v44, %v6475_v33  ;;  %v6476_v21 = vmul.f32 %v9203_v55, %v6458_v10  ;;  %7455 = vmatmul.mubr.msk.bf16.gmra.mrb[12].mxu1 %vm83_vm0, %v6502_v47 }
0x2403   :  { %6627 = vmatprep.mubr.bf16.mxu1 %v9228_v16  ;;  %v8962_v16 = vld [vmem:[%s11353_s17 + $0xf8] sm:$0xff]  }
0x2404   :  { %v6488_v32 = vmul.f32 %v7435_v44, %v6476_v21  ;;  %v6499_v31 = vadd.f32 %v7436_v11, %v6487_v1  ;;  %7885 = vmatprep.subr.bf16.mxu0 %v8962_v16 }
0x2405   :  { %7886 = vmatpush3.bf16.msra.mxu0 %v8963_v8 }
0x2406   :  { %v6500_v24 = vadd.f32 %v7436_v11, %v6488_v32 }
0x2408   :  { %v6503_v56 = vpack.c.bf16 %v6500_v24, %v6499_v31 }
0x240a   :  { %7456 = vmatmul.mubr.msk.bf16.gmra.mrb[16].mxu1 %vm83_vm0, %v6503_v56 }
0x24c9   :  { %v6609_v59 = vpop.f32.mrb[8].mxu1 }
0x24ca   :  { %v6610_v17 = vadd.f32 %v6609_v59, %v6519_v12  ;;  %v6611_v44 = vpop.f32.mrb[9].mxu1 }
0x24cb   :  { %v6612_v41 = vadd.f32 %v6611_v44, %v6523_v30  ;;  %v6613_v58 = vpop.f32.mrb[10].mxu1 }
0x24cc   :  { %v6614_v2 = vadd.f32 %v6613_v58, %v6519_v12  ;;  %v6615_v9 = vpop.f32.mrb[11].mxu1  ;;  %v6638_v0 = vmax.f32 %v6610_v17, 0.0 }
0x24cd   :  { %v6616_v34 = vadd.f32 %v6615_v9, %v6523_v30  ;;  %v6639_v35 = vmax.f32 %v6612_v41, 0.0 }
0x24ce   :  { %v6640_v7 = vmax.f32 %v6614_v2, 0.0 }
0x24cf   :  { %v6641_v14 = vmax.f32 %v6616_v34, 0.0 }
0x24d0   :  { %v6650_v36 = vpack.c.bf16 %v6640_v7, %v6638_v0 }
0x24d1   :  { %v6651_v38 = vpack.c.bf16 %v6641_v14, %v6639_v35 }
0x24d3   :  { %6825 = vmatprep.mubr.bf16.mxu0 %v6651_v38 }
0x24d4   :  { %6826 = vmatmul.mubr.bf16.vlgmr.msra.gmra.mrb[16].mxu0 %v6650_v36 }
0x24d5   :  { %v6619_v3 = vpop.f32.mrb[12].mxu1 }
0x24d6   :  { %v6620_v27 = vadd.f32 %v6619_v3, %v6519_v12  ;;  %v6621_v4 = vpop.f32.mrb[13].mxu1 }
0x24d7   :  { %v6622_v15 = vadd.f32 %v6621_v4, %v6523_v30  ;;  %v6623_v11 = vpop.f32.mrb[14].mxu1 }
0x24d8   :  { %v6624_v5 = vadd.f32 %v6623_v11, %v6519_v12  ;;  %v6625_v18 = vpop.f32.mrb[15].mxu1  ;;  %v6642_v29 = vmax.f32 %v6620_v27, 0.0 }
0x24d9   :  { %v6626_v54 = vadd.f32 %v6625_v18, %v6523_v30  ;;  %v6643_v52 = vmax.f32 %v6622_v15, 0.0  ;;  %v7507_v15 = vld [vmem:[%s11358_s19] ss:$0 sm:$0xff] }
0x24da   :  { %v6644_v63 = vmax.f32 %v6624_v5, 0.0  ;;  %v7508_v18 = vld [vmem:[%s11359_s20] ss:$0 sm:$0xff] }
0x24db   :  { %v6645_v51 = vmax.f32 %v6626_v54, 0.0 }
0x24dc   :  { %v6652_v45 = vpack.c.bf16 %v6644_v63, %v6642_v29 }
0x24dd   :  { %v6653_v23 = vpack.c.bf16 %v6645_v51, %v6643_v52  ;;  %v6629_v20 = vpop.f32.mrb[16].mxu1 }
0x24de   :  { %v6630_v40 = vadd.f32 %v6629_v20, %v6519_v12  ;;  %v6631_v6 = vpop.f32.mrb[17].mxu1 }
0x24df   :  { %v6632_v26 = vadd.f32 %v6631_v6, %v6523_v30  ;;  %v6633_v25 = vpop.f32.mrb[18].mxu1  ;;  %6832 = vmatprep.mubr.bf16.mxu0 %v6653_v23 }
0x24e0   :  { %v6634_v43 = vadd.f32 %v6633_v25, %v6519_v12  ;;  %v6635_v61 = vpop.f32.mrb[19].mxu1  ;;  %6833 = vmatmul.mubr.bf16.gmra.mrb[20].mxu0 %v6652_v45  ;;  %v6646_v49 = vmax.f32 %v6630_v40, 0.0 }
0x24e1   :  { %v6636_v42 = vadd.f32 %v6635_v61, %v6523_v30  ;;  %v6647_v53 = vmax.f32 %v6632_v26, 0.0 }
0x24e2   :  { %v6648_v57 = vmax.f32 %v6634_v43, 0.0 }
0x24e3   :  { %v6649_v62 = vmax.f32 %v6636_v42, 0.0 }
0x24e4   :  { %v6654_v19 = vpack.c.bf16 %v6648_v57, %v6646_v49 }
0x24e5   :  { %v6655_v46 = vpack.c.bf16 %v6649_v62, %v6647_v53 }
0x24e7   :  { %6839 = vmatprep.mubr.bf16.mxu0 %v6655_v46 }
0x24e8   :  { %6840 = vmatmul.mubr.bf16.gmra.mrb[24].mxu0 %v6654_v19 }
0x25a7   :  { %v7887_v60 = vpop.f32.mrb[16].mxu0 }
0x25a8   :  { %v7888_v47 = vpop.f32.mrb[17].mxu0 }
0x25a9   :  { %v7889_v10 = vadd.f32 %v7888_v47, %v7887_v60  ;;  %v7890_v33 = vpop.f32.mrb[18].mxu0 }
0x25aa   :  { %v7891_v55 = vpop.f32.mrb[19].mxu0 }
0x25ab   :  { %v6828_v1 = vadd.f32 %v7889_v10, %v7490_v50 }
0x25ad   :  { %v6846_v21 = vadd.f32 %v6828_v1, %v11169_v48 }
0x25af   :  { %v6851_v32 = vsel %vm6850_vm5, %v6846_v21, 0.0  ;;  %v6859_v31 = vmul.f32 %v6846_v21, %v6846_v21 }
0x25b0   :  { %6852 = vadd.xlane.f32.xlu0 %v6851_v32 }
0x25b1   :  { %v6861_v56 = vsel %vm6850_vm5, %v6859_v31, 0.0 }
0x25b3   :  { %v7893_v24 = vpop.f32.mrb[20].mxu0 }
0x25b4   :  { %6862 = vadd.xlane.f32.xlu0 %v6861_v56  ;;  %v7894_v39 = vpop.f32.mrb[21].mxu0 }
0x25b5   :  { %v7896_v37 = vpop.f32.mrb[22].mxu0 }
0x25b6   :  { %v7897_v28 = vpop.f32.mrb[23].mxu0 }
0x25b7   :  { %v7898_v16 = vadd.f32 %v7897_v28, %v7896_v37 }
0x25b9   :  { %v6837_v8 = vadd.f32 %v7898_v16, %v7490_v50 }
0x25bb   :  { %v6847_v22 = vadd.f32 %v6837_v8, %v11190_v13  ;;  %v7899_v12 = vpop.f32.mrb[24].mxu0 }
0x25bc   :  { %v7900_v30 = vpop.f32.mrb[25].mxu0 }
0x25bd   :  { %v7902_v59 = vpop.f32.mrb[26].mxu0  ;;  %v6854_v48 = vsel %vm6850_vm5, %v6847_v22, 0.0  ;;  %v6860_v17 = vmul.f32 %v6847_v22, %v6847_v22 }
0x25be   :  { %6855 = vadd.xlane.f32.xlu1 %v6854_v48  ;;  %v7903_v44 = vpop.f32.mrb[27].mxu0 }
0x25bf   :  { %v6864_v41 = vsel %vm6850_vm5, %v6860_v17, 0.0 }
0x25c2   :  { %6865 = vadd.xlane.f32.xlu1 %v6864_v41 }
0x263d   :  { %v6853_v58 = vpop.xlane.xlu0 %6852 }
0x263e   :  { %v6857_v2 = vmul.f32 0.015625, %v6853_v58 }
0x2640   :  { %v6869_v34 = vmul.f32 %v6857_v2, %v6857_v2  ;;  %v6873_v27 = vsub.f32 %v6846_v21, %v6857_v2 }
0x2641   :  { %v6863_v9 = vpop.xlane.xlu0 %6862 }
0x2642   :  { %v6867_v0 = vmul.f32 0.015625, %v6863_v9 }
0x2644   :  { %v6871_v7 = vsub.f32 %v6867_v0, %v6869_v34 }
0x2646   :  { %v6875_v35 = vadd.f32 1e-05, %v6871_v7 }
0x2648   :  { %9204 = vrsqrt.f32 %v6875_v35 }
0x264b   :  { %v6856_v13 = vpop.xlane.xlu1 %6855 }
0x264c   :  { %v6858_v14 = vmul.f32 0.015625, %v6856_v13 }
0x264e   :  { %v6870_v38 = vmul.f32 %v6858_v14, %v6858_v14  ;;  %v6874_v52 = vsub.f32 %v6847_v22, %v6858_v14 }
0x264f   :  { %v6866_v36 = vpop.xlane.xlu1 %6865 }
0x2650   :  { %v6868_v3 = vmul.f32 0.015625, %v6866_v36 }
0x2652   :  { %v9205_v4 = vpop.eup %9204  ;;  %v6872_v11 = vsub.f32 %v6868_v3, %v6870_v38 }
0x2653   :  { %v6879_v5 = vmul.f32 %v9205_v4, %v6873_v27 }
0x2654   :  { %v6876_v54 = vadd.f32 1e-05, %v6872_v11 }
0x2655   :  { %v6887_v29 = vmul.f32 %v7507_v15, %v6879_v5 }
0x2656   :  { %9206 = vrsqrt.f32 %v6876_v54 }
0x2657   :  { %v6895_v63 = vadd.f32 %v7508_v18, %v6887_v29 }
0x2659   :  { %6897 = vst.msk [vmem:[%s11360_s21] sm:$0x7] %vm6850_vm5, %v6895_v63 }
0x2660   :  { %v9207_v51 = vpop.eup %9206 }
0x2661   :  { %v6880_v45 = vmul.f32 %v9207_v51, %v6874_v52 }
0x2663   :  { %v6888_v23 = vmul.f32 %v7507_v15, %v6880_v45 }
0x2665   :  { %v6896_v20 = vadd.f32 %v7508_v18, %v6888_v23 }
0x2667   :  { %6898 = vst.msk [vmem:[%s11360_s21 + $0x4] sm:$0x7] %vm6850_vm5, %v6896_v20 }

</bundles_post_ra>
